<compile_context>
chip_gen: v5e
topology: v5e:2x2
jax: 0.10.0
libtpu: 0.0.40
codegen_flags: <defaults>
</compile_context>

<pallas_src>
import functools
import math

import numpy as np
import jax
import jax.numpy as jnp
from jax import lax
from jax.experimental import pallas as pl
from jax.experimental.pallas import tpu as pltpu

NEG_SLOPE = 0.2
ACT_SCALE = math.sqrt(2.0)

# Normalized (1,3,3,1) resample kernel (outer product, sum = 1); entries are
# {1,3,9}/64 and therefore exact in bf16.
_FIR1D = np.array([1.0, 3.0, 3.0, 1.0], dtype=np.float64)
FIR = np.outer(_FIR1D, _FIR1D)
FIR = (FIR / FIR.sum()).astype(np.float32)

# (name, Cin, Cout, downsample, activate)
LAYERS = [
    ("conv1", 3, 64, False, True),
    ("conv2", 64, 128, True, True),
    ("conv3", 128, 128, False, True),
    ("conv4", 128, 256, True, True),
    ("conv5", 256, 256, False, True),
    ("final_conv", 256, 1, False, False),
]


# ----------------------------------------------------------------------------
# Static geometry
# ----------------------------------------------------------------------------
def _plan(H, W):
    H2, W2 = H // 2, W // 2
    H4, W4 = H // 4, W // 4
    Wp1, Wp3, Wp5 = W + 2, W2 + 2, W4 + 2
    return dict(
        H=H, W=W, H2=H2, W2=W2, H4=H4, W4=W4,
        Wp1=Wp1, Wp3=Wp3, Wp5=Wp5,
        L1=H * Wp1,            # rows of conv1's strided output / conv1 anchors
        P1=(H + 3) * Wp1,      # rows of the flat padded input buffer
        L3=H2 * Wp3,           # rows of conv2 output / conv3 anchors
        P3=(H2 + 3) * Wp3,     # rows of conv3's flat padded buffer
        L5=H4 * Wp5,           # rows of conv4 output / conv5+final anchors
        P5=(H4 + 3) * Wp5,     # rows of conv5/final flat padded buffers
    )


@functools.lru_cache(maxsize=None)
def _gather_np(Hi, Wi, Wp_in, Ho, Wo, Wp_out):
    """Weighted gather for blur(pad=2, FIR 4x4) + 3x3 stride-2 conv.

    Rows enumerate (tap, oy, ox) with ox running over the *next* layer's row
    stride Wp_out (rows with ox >= Wo stay zero).  Columns index the previous
    layer's strided flat activation (row stride Wp_in); only valid columns
    (ix < Wi) are referenced.  FIR weights are baked in (each entry is a
    single bf16-exact FIR value; no sums)."""
    mat = np.zeros((9 * Ho * Wp_out, Hi * Wp_in), np.float32)
    for dy in range(3):
        for dx in range(3):
            t = dy * 3 + dx
            for oy in range(Ho):
                for ox in range(Wo):
                    r = t * Ho * Wp_out + oy * Wp_out + ox
                    for fy in range(4):
                        for fx in range(4):
                            iy = 2 * oy + dy + fy - 2
                            ix = 2 * ox + dx + fx - 2
                            if 0 <= iy < Hi and 0 <= ix < Wi:
                                mat[r, iy * Wp_in + ix] += FIR[fy, fx]
    return mat


@functools.lru_cache(maxsize=None)
def _mask_np(Ho, Wo, Wp_out):
    """(Ho*Wp_out, 1) mask: 1 at valid output columns, 0 at the junk columns."""
    m = np.zeros((Ho * Wp_out, 1), np.float32)
    for oy in range(Ho):
        m[oy * Wp_out:oy * Wp_out + Wo, 0] = 1.0
    return m


# ----------------------------------------------------------------------------
# Fused kernel (one grid step = one batch element, fully resident in VMEM)
# ----------------------------------------------------------------------------
def _make_kernel(p, return_feats):
    Wp1, Wp3, Wp5 = p["Wp1"], p["Wp3"], p["Wp5"]
    L1, L3, L5 = p["L1"], p["L3"], p["L5"]
    P3, P5 = p["P3"], p["P5"]

    def lrelu(v):                                   # FusedLeakyReLU
        return jnp.where(v >= 0.0, v, NEG_SLOPE * v) * ACT_SCALE

    def im2col(xflat, Wp, L):
        # 9 contiguous shifted slices of the flat padded buffer, cast to bf16
        # per tap and concatenated along lanes -> (L, 9*C).
        pieces = []
        for dy in range(3):
            for dx in range(3):
                d = dy * Wp + dx
                pieces.append(xflat[d:d + L, :].astype(jnp.bfloat16))
        return jnp.concatenate(pieces, axis=-1)

    def split_taps(gwin, M):
        # (9*M, C) gather output -> (M, 9*C) im2col (tap blocks are
        # sublane-aligned slices; cast per block, concat along lanes).
        pieces = [gwin[t * M:(t + 1) * M, :].astype(jnp.bfloat16)
                  for t in range(9)]
        return jnp.concatenate(pieces, axis=-1)

    def stage(s_ref, act, Wp, L, P):
        # One interior store (activation already carries the padded row
        # stride, with junk columns masked to zero) + two tiny halo zeros.
        head = Wp + 1
        c = s_ref.shape[1]
        s_ref[0:head, :] = jnp.zeros((head, c), s_ref.dtype)
        s_ref[head + L:P, :] = jnp.zeros((P - head - L, c), s_ref.dtype)
        s_ref[head:head + L, :] = act

    def kernel(x_ref, w1, b1, g2, w2, b2, m2, w3, b3, g4, w4, b4, m45,
               w5, b5, wf, bfin, *rest):
        if return_feats:
            out_ref, f3_ref, f5_ref, s3, s5, s6 = rest
        else:
            out_ref, s3, s5, s6 = rest
            f3_ref = f5_ref = None

        # ---- conv1: 3x3 stride-1, shifted-slice im2col, one MXU matmul ----
        xin = x_ref[0]                                          # (P1, 8) f32
        c1 = im2col(xin, Wp1, L1)                               # (L1, 72) bf16
        a1 = lrelu(jnp.dot(c1, w1[...],
                           preferred_element_type=jnp.float32) + b1[...])
        a1q = a1.astype(jnp.bfloat16)                           # (L1, 64)

        # ---- conv2: FIR blur + stride-2 conv via weighted gather ----
        gw = jnp.dot(g2[...], a1q, preferred_element_type=jnp.float32)
        c2 = split_taps(gw, L3)                                 # (L3, 576)
        a2 = lrelu(jnp.dot(c2, w2[...],
                           preferred_element_type=jnp.float32) + b2[...])
        stage(s3, a2 * m2[...], Wp3, L3, P3)

        # ---- conv3: 3x3 stride-1 ----
        c3 = im2col(s3[...], Wp3, L3)                           # (L3, 1152)
        a3 = lrelu(jnp.dot(c3, w3[...],
                           preferred_element_type=jnp.float32) + b3[...])
        if return_feats:
            f3_ref[0] = a3                                      # (L3, 128) f32
        a3q = a3.astype(jnp.bfloat16)

        # ---- conv4: FIR blur + stride-2 conv via weighted gather ----
        gw = jnp.dot(g4[...], a3q, preferred_element_type=jnp.float32)
        c4 = split_taps(gw, L5)                                 # (L5, 1152)
        a4 = lrelu(jnp.dot(c4, w4[...],
                           preferred_element_type=jnp.float32) + b4[...])
        stage(s5, a4 * m45[...], Wp5, L5, P5)

        # ---- conv5: 3x3 stride-1 ----
        c5 = im2col(s5[...], Wp5, L5)                           # (L5, 2304)
        a5 = lrelu(jnp.dot(c5, w5[...],
                           preferred_element_type=jnp.float32) + b5[...])
        if return_feats:
            f5_ref[0] = a5                                      # (L5, 256) f32
        stage(s6, a5 * m45[...], Wp5, L5, P5)

        # ---- final_conv: Cout=1 -> VPU multiply + lane reduction (no MXU) ----
        s6v = s6[...]                                           # (P5, 256) f32
        acc = jnp.zeros((L5, 1), jnp.float32)
        for dy in range(3):
            for dx in range(3):
                t = dy * 3 + dx
                d = dy * Wp5 + dx
                tap = s6v[d:d + L5, :].astype(jnp.bfloat16).astype(jnp.float32)
                acc = acc + jnp.sum(tap * wf[:, t * 256:(t + 1) * 256],
                                    axis=-1, keepdims=True)
        out_ref[0] = acc + bfin[...]

    return kernel


def _const_spec(arr):
    nd = arr.ndim
    return pl.BlockSpec(arr.shape, lambda n, _nd=nd: (0,) * _nd)


# ----------------------------------------------------------------------------
# Public wrapper (NCHW in / NCHW out), matches FacialComponentDiscriminator
# ----------------------------------------------------------------------------
@functools.partial(jax.jit, static_argnames=("return_feats",))
def facial_component_discriminator(x_nchw, params, return_feats=False):
    N, C, H, W = x_nchw.shape
    assert C == 3 and H % 4 == 0 and W % 4 == 0, (C, H, W)
    p = _plan(H, W)

    # NCHW -> NHWC, halo pad (1 extra bottom row so every tap slice stays
    # in-bounds), channels 3 -> 8 for a lane-friendly im2col, then flatten.
    x = jnp.transpose(x_nchw, (0, 2, 3, 1)).astype(jnp.float32)
    x = jnp.pad(x, ((0, 0), (1, 2), (1, 1), (0, 5)))
    x_flat = x.reshape(N, p["P1"], 8)

    def eq_weight(name, cin, cout, cin_pad=None):
        # EqualConv2d scale folded in; rows ordered (ky, kx, cin).
        w = params[name]["w"].astype(jnp.float32) * (1.0 / math.sqrt(cin * 9))
        ck = cin if cin_pad is None else cin_pad
        if ck != cin:
            w = jnp.pad(w, ((0, 0), (0, 0), (0, ck - cin), (0, 0)))
        return w.reshape(9 * ck, cout).astype(jnp.bfloat16)

    def bias(name, cout):
        return params[name]["b"].astype(jnp.float32).reshape(1, cout)

    g2 = jnp.asarray(_gather_np(H, W, p["Wp1"], p["H2"], p["W2"], p["Wp3"]),
                     dtype=jnp.bfloat16)
    g4 = jnp.asarray(_gather_np(p["H2"], p["W2"], p["Wp3"],
                                p["H4"], p["W4"], p["Wp5"]),
                     dtype=jnp.bfloat16)
    m2 = jnp.asarray(_mask_np(p["H2"], p["W2"], p["Wp3"]))
    m45 = jnp.asarray(_mask_np(p["H4"], p["W4"], p["Wp5"]))

    wf = (params["final_conv"]["w"].astype(jnp.float32)
          * (1.0 / math.sqrt(256 * 9))).reshape(1, 9 * 256)
    wf = wf.astype(jnp.bfloat16).astype(jnp.float32)   # bf16-rounded, f32 held
    bfin = params["final_conv"]["b"].astype(jnp.float32).reshape(1, 1)

    consts = [
        eq_weight("conv1", 3, 64, cin_pad=8), bias("conv1", 64),
        g2, eq_weight("conv2", 64, 128), bias("conv2", 128), m2,
        eq_weight("conv3", 128, 128), bias("conv3", 128),
        g4, eq_weight("conv4", 128, 256), bias("conv4", 256), m45,
        eq_weight("conv5", 256, 256), bias("conv5", 256),
        wf, bfin,
    ]

    in_specs = [pl.BlockSpec((1, p["P1"], 8), lambda n: (n, 0, 0))]
    in_specs += [_const_spec(c) for c in consts]

    out_shapes = [jax.ShapeDtypeStruct((N, p["L5"], 1), jnp.float32)]
    out_specs = [pl.BlockSpec((1, p["L5"], 1), lambda n: (n, 0, 0))]
    if return_feats:
        out_shapes += [jax.ShapeDtypeStruct((N, p["L3"], 128), jnp.float32),
                       jax.ShapeDtypeStruct((N, p["L5"], 256), jnp.float32)]
        out_specs += [pl.BlockSpec((1, p["L3"], 128), lambda n: (n, 0, 0)),
                      pl.BlockSpec((1, p["L5"], 256), lambda n: (n, 0, 0))]

    scratch_shapes = [pltpu.VMEM((p["P3"], 128), jnp.float32),
                      pltpu.VMEM((p["P5"], 256), jnp.float32),
                      pltpu.VMEM((p["P5"], 256), jnp.float32)]

    outs = pl.pallas_call(
        _make_kernel(p, return_feats),
        out_shape=out_shapes,
        grid=(N,),
        in_specs=in_specs,
        out_specs=out_specs,
        scratch_shapes=scratch_shapes,
        compiler_params=pltpu.CompilerParams(
            dimension_semantics=("parallel",),       # batch -> 2 TCs on v7x
            vmem_limit_bytes=32 * 1024 * 1024),
    )(x_flat, *consts)

    out = outs[0].reshape(N, p["H4"], p["Wp5"])[:, :, :p["W4"]]
    out = out[:, None, :, :]                               # (N, 1, H/4, W/4)
    if not return_feats:
        return out, None
    f3 = outs[1].reshape(N, p["H2"], p["Wp3"], 128)[:, :, :p["W2"], :]
    f5 = outs[2].reshape(N, p["H4"], p["Wp5"], 256)[:, :, :p["W4"], :]
    feats = [jnp.transpose(f3, (0, 3, 1, 2)),              # after conv3
             jnp.transpose(f5, (0, 3, 1, 2))]              # after conv5
    return out, feats


# ----------------------------------------------------------------------------
# Deterministic parameter init (shapes from the module's __init__)
# ----------------------------------------------------------------------------
def init_params(key):
    params = {}
    for name, cin, cout, _down, _act in LAYERS:
        key, wk, bk = jax.random.split(key, 3)
        w = jax.random.normal(wk, (3, 3, cin, cout), dtype=jnp.float32)
        # PyTorch zero-inits these biases; use small random values so the
        # bias path is actually exercised by the test.
        b = 0.1 * jax.random.normal(bk, (cout,), dtype=jnp.float32)
        params[name] = dict(w=w, b=b)
    return params


# ----------------------------------------------------------------------------
# Pure-JAX reference (same bf16-input / f32-accumulation math, XLA convs)
# ----------------------------------------------------------------------------
def _ref_conv_layer(x, w, b, downsample, activate):
    cin = x.shape[-1]
    scale = 1.0 / math.sqrt(cin * 9)
    wq = (w * scale).astype(jnp.bfloat16)
    xq = x.astype(jnp.bfloat16)
    if downsample:
        xp = jnp.pad(xq, ((0, 0), (2, 2), (2, 2), (0, 0)))
        fir = jnp.asarray(FIR, jnp.bfloat16)
        fir_w = jnp.broadcast_to(fir[:, :, None, None], (4, 4, 1, cin))
        blur = lax.conv_general_dilated(
            xp, fir_w, (1, 1), "VALID",
            dimension_numbers=("NHWC", "HWIO", "NHWC"),
            feature_group_count=cin,
            preferred_element_type=jnp.float32)
        xq = blur.astype(jnp.bfloat16)
        stride, padding = (2, 2), "VALID"
    else:
        stride, padding = (1, 1), "SAME"
    y = lax.conv_general_dilated(
        xq, wq, stride, padding,
        dimension_numbers=("NHWC", "HWIO", "NHWC"),
        preferred_element_type=jnp.float32) + b.reshape(1, 1, 1, -1)
    if activate:
        y = jnp.where(y >= 0.0, y, NEG_SLOPE * y) * ACT_SCALE
    return y


def _reference_forward(x_nchw, params):
    feat = jnp.transpose(x_nchw, (0, 2, 3, 1)).astype(jnp.float32)
    feats = []
    for name, _cin, _cout, down, act in LAYERS:
        p = params[name]
        feat = _ref_conv_layer(feat, p["w"], p["b"], down, act)
        if name in ("conv3", "conv5"):
            feats.append(jnp.transpose(feat, (0, 3, 1, 2)))
    return jnp.transpose(feat, (0, 3, 1, 2)), feats


# ----------------------------------------------------------------------------
if __name__ == "__main__":
    key = jax.random.PRNGKey(0)
    key, xk = jax.random.split(key)
    # Input images, PyTorch NCHW: batch=2, 3 channels, 16x16 spatial.
    x = jax.random.normal(xk, (2, 3, 16, 16), dtype=jnp.float32)
    params = init_params(key)

    out, none_feats = facial_component_discriminator(x, params, return_feats=False)
    out = jax.block_until_ready(out)
    assert out.shape == (2, 1, 4, 4), out.shape
    assert none_feats is None

    ref_out, ref_feats = _reference_forward(x, params)
    ref_out = jax.block_until_ready(ref_out)
    np.testing.assert_allclose(np.asarray(out), np.asarray(ref_out),
                               rtol=2e-2, atol=2e-2)

    out2, feats = facial_component_discriminator(x, params, return_feats=True)
    out2 = jax.block_until_ready(out2)
    assert len(feats) == 2
    assert feats[0].shape == (2, 128, 8, 8), feats[0].shape
    assert feats[1].shape == (2, 256, 4, 4), feats[1].shape
    np.testing.assert_allclose(np.asarray(out2), np.asarray(out),
                               rtol=1e-5, atol=1e-5)
    for f, rf in zip(feats, ref_feats):
        np.testing.assert_allclose(np.asarray(f), np.asarray(rf),
                                   rtol=2e-2, atol=2e-2)

    print("KERNEL_OK")
</pallas_src>

<mosaic_0001>
module attributes {stable_mosaic.version = 11 : i64} {
  func.func @kernel(%arg0: i32, %arg1: memref<1x342x8xf32, #tpu.memory_space<vmem>>, %arg2: memref<72x64xbf16, #tpu.memory_space<vmem>>, %arg3: memref<1x64xf32, #tpu.memory_space<vmem>>, %arg4: memref<720x288xbf16, #tpu.memory_space<vmem>>, %arg5: memref<576x128xbf16, #tpu.memory_space<vmem>>, %arg6: memref<1x128xf32, #tpu.memory_space<vmem>>, %arg7: memref<80x1xf32, #tpu.memory_space<vmem>>, %arg8: memref<1152x128xbf16, #tpu.memory_space<vmem>>, %arg9: memref<1x128xf32, #tpu.memory_space<vmem>>, %arg10: memref<216x80xbf16, #tpu.memory_space<vmem>>, %arg11: memref<1152x256xbf16, #tpu.memory_space<vmem>>, %arg12: memref<1x256xf32, #tpu.memory_space<vmem>>, %arg13: memref<24x1xf32, #tpu.memory_space<vmem>>, %arg14: memref<2304x256xbf16, #tpu.memory_space<vmem>>, %arg15: memref<1x256xf32, #tpu.memory_space<vmem>>, %arg16: memref<1x2304xf32, #tpu.memory_space<vmem>>, %arg17: memref<1x1xf32, #tpu.memory_space<vmem>>, %arg18: memref<1x24x1xf32, #tpu.memory_space<vmem>>, %arg19: memref<110x128xf32, #tpu.memory_space<vmem>>, %arg20: memref<42x256xf32, #tpu.memory_space<vmem>>, %arg21: memref<42x256xf32, #tpu.memory_space<vmem>>) attributes {dimension_semantics = [#tpu.dimension_semantics<parallel>], iteration_bounds = array<i64: 2>, scalar_prefetch = 0 : i64, scratch_operands = 3 : i64, tpu.core_type = #tpu.core_type<tc>, window_params = [{transform_indices = @transform_0, window_bounds = array<i64: 1, 342, 8>}, {pipeline_mode = #tpu.pipeline_mode<synchronous>, transform_indices = @transform_1, window_bounds = array<i64: 72, 64>}, {pipeline_mode = #tpu.pipeline_mode<synchronous>, transform_indices = @transform_2, window_bounds = array<i64: 1, 64>}, {pipeline_mode = #tpu.pipeline_mode<synchronous>, transform_indices = @transform_3, window_bounds = array<i64: 720, 288>}, {pipeline_mode = #tpu.pipeline_mode<synchronous>, transform_indices = @transform_4, window_bounds = array<i64: 576, 128>}, {pipeline_mode = #tpu.pipeline_mode<synchronous>, transform_indices = @transform_5, window_bounds = array<i64: 1, 128>}, {pipeline_mode = #tpu.pipeline_mode<synchronous>, transform_indices = @transform_6, window_bounds = array<i64: 80, 1>}, {pipeline_mode = #tpu.pipeline_mode<synchronous>, transform_indices = @transform_7, window_bounds = array<i64: 1152, 128>}, {pipeline_mode = #tpu.pipeline_mode<synchronous>, transform_indices = @transform_8, window_bounds = array<i64: 1, 128>}, {pipeline_mode = #tpu.pipeline_mode<synchronous>, transform_indices = @transform_9, window_bounds = array<i64: 216, 80>}, {pipeline_mode = #tpu.pipeline_mode<synchronous>, transform_indices = @transform_10, window_bounds = array<i64: 1152, 256>}, {pipeline_mode = #tpu.pipeline_mode<synchronous>, transform_indices = @transform_11, window_bounds = array<i64: 1, 256>}, {pipeline_mode = #tpu.pipeline_mode<synchronous>, transform_indices = @transform_12, window_bounds = array<i64: 24, 1>}, {pipeline_mode = #tpu.pipeline_mode<synchronous>, transform_indices = @transform_13, window_bounds = array<i64: 2304, 256>}, {pipeline_mode = #tpu.pipeline_mode<synchronous>, transform_indices = @transform_14, window_bounds = array<i64: 1, 256>}, {pipeline_mode = #tpu.pipeline_mode<synchronous>, transform_indices = @transform_15, window_bounds = array<i64: 1, 2304>}, {pipeline_mode = #tpu.pipeline_mode<synchronous>, transform_indices = @transform_16, window_bounds = array<i64: 1, 1>}, {transform_indices = @transform_17, window_bounds = array<i64: 1, 24, 1>}]} {
    %c0 = arith.constant 0 : index
    %c0_0 = arith.constant 0 : index
    %c0_1 = arith.constant 0 : index
    %0 = vector.load %arg1[%c0, %c0_0, %c0_1] : memref<1x342x8xf32, #tpu.memory_space<vmem>>, vector<1x342x8xf32>
    %1 = vector.shape_cast %0 : vector<1x342x8xf32> to vector<342x8xf32>
    %2 = vector.extract_strided_slice %1 {offsets = [0, 0], sizes = [288, 8], strides = [1, 1]} : vector<342x8xf32> to vector<288x8xf32>
    %3 = arith.truncf %2 : vector<288x8xf32> to vector<288x8xbf16>
    %4 = vector.extract_strided_slice %1 {offsets = [1, 0], sizes = [288, 8], strides = [1, 1]} : vector<342x8xf32> to vector<288x8xf32>
    %5 = arith.truncf %4 : vector<288x8xf32> to vector<288x8xbf16>
    %6 = vector.extract_strided_slice %1 {offsets = [2, 0], sizes = [288, 8], strides = [1, 1]} : vector<342x8xf32> to vector<288x8xf32>
    %7 = arith.truncf %6 : vector<288x8xf32> to vector<288x8xbf16>
    %8 = vector.extract_strided_slice %1 {offsets = [18, 0], sizes = [288, 8], strides = [1, 1]} : vector<342x8xf32> to vector<288x8xf32>
    %9 = arith.truncf %8 : vector<288x8xf32> to vector<288x8xbf16>
    %10 = vector.extract_strided_slice %1 {offsets = [19, 0], sizes = [288, 8], strides = [1, 1]} : vector<342x8xf32> to vector<288x8xf32>
    %11 = arith.truncf %10 : vector<288x8xf32> to vector<288x8xbf16>
    %12 = vector.extract_strided_slice %1 {offsets = [20, 0], sizes = [288, 8], strides = [1, 1]} : vector<342x8xf32> to vector<288x8xf32>
    %13 = arith.truncf %12 : vector<288x8xf32> to vector<288x8xbf16>
    %14 = vector.extract_strided_slice %1 {offsets = [36, 0], sizes = [288, 8], strides = [1, 1]} : vector<342x8xf32> to vector<288x8xf32>
    %15 = arith.truncf %14 : vector<288x8xf32> to vector<288x8xbf16>
    %16 = vector.extract_strided_slice %1 {offsets = [37, 0], sizes = [288, 8], strides = [1, 1]} : vector<342x8xf32> to vector<288x8xf32>
    %17 = arith.truncf %16 : vector<288x8xf32> to vector<288x8xbf16>
    %18 = vector.extract_strided_slice %1 {offsets = [38, 0], sizes = [288, 8], strides = [1, 1]} : vector<342x8xf32> to vector<288x8xf32>
    %19 = arith.truncf %18 : vector<288x8xf32> to vector<288x8xbf16>
    %20 = tpu.concatenate %3, %5, %7, %9, %11, %13, %15, %17, %19 in 1 : vector<288x8xbf16>, vector<288x8xbf16>, vector<288x8xbf16>, vector<288x8xbf16>, vector<288x8xbf16>, vector<288x8xbf16>, vector<288x8xbf16>, vector<288x8xbf16>, vector<288x8xbf16> -> vector<288x72xbf16>
    %c0_2 = arith.constant 0 : index
    %c0_3 = arith.constant 0 : index
    %21 = vector.load %arg2[%c0_2, %c0_3] : memref<72x64xbf16, #tpu.memory_space<vmem>>, vector<72x64xbf16>
    %cst = arith.constant dense<0.000000e+00> : vector<288x64xf32>
    %22 = tpu.matmul %20, %21, %cst {dimension_numbers = #tpu.dot_dimension_numbers<[1], [0], [0], [1], [0, 0, 1, 1], [], []>} : vector<288x72xbf16>, vector<72x64xbf16>, vector<288x64xf32> -> vector<288x64xf32>
    %c0_4 = arith.constant 0 : index
    %c0_5 = arith.constant 0 : index
    %23 = vector.load %arg3[%c0_4, %c0_5] : memref<1x64xf32, #tpu.memory_space<vmem>>, vector<1x64xf32>
    %24 = vector.broadcast %23 : vector<1x64xf32> to vector<288x64xf32>
    %25 = arith.addf %22, %24 : vector<288x64xf32>
    %cst_6 = arith.constant 0.000000e+00 : f32
    %26 = vector.broadcast %cst_6 : f32 to vector<288x64xf32>
    %27 = arith.cmpf oge, %25, %26 : vector<288x64xf32>
    %cst_7 = arith.constant 2.000000e-01 : f32
    %28 = vector.broadcast %cst_7 : f32 to vector<288x64xf32>
    %29 = arith.mulf %28, %25 : vector<288x64xf32>
    %30 = arith.select %27, %25, %29 : vector<288x64xi1>, vector<288x64xf32>
    %cst_8 = arith.constant 1.41421354 : f32
    %31 = vector.broadcast %cst_8 : f32 to vector<288x64xf32>
    %32 = arith.mulf %30, %31 : vector<288x64xf32>
    %33 = arith.truncf %32 : vector<288x64xf32> to vector<288x64xbf16>
    %c0_9 = arith.constant 0 : index
    %c0_10 = arith.constant 0 : index
    %34 = vector.load %arg4[%c0_9, %c0_10] : memref<720x288xbf16, #tpu.memory_space<vmem>>, vector<720x288xbf16>
    %cst_11 = arith.constant dense<0.000000e+00> : vector<720x64xf32>
    %35 = tpu.matmul %34, %33, %cst_11 {dimension_numbers = #tpu.dot_dimension_numbers<[1], [0], [0], [1], [0, 0, 1, 1], [], []>} : vector<720x288xbf16>, vector<288x64xbf16>, vector<720x64xf32> -> vector<720x64xf32>
    %36 = vector.extract_strided_slice %35 {offsets = [0, 0], sizes = [80, 64], strides = [1, 1]} : vector<720x64xf32> to vector<80x64xf32>
    %37 = arith.truncf %36 : vector<80x64xf32> to vector<80x64xbf16>
    %38 = vector.extract_strided_slice %35 {offsets = [80, 0], sizes = [80, 64], strides = [1, 1]} : vector<720x64xf32> to vector<80x64xf32>
    %39 = arith.truncf %38 : vector<80x64xf32> to vector<80x64xbf16>
    %40 = vector.extract_strided_slice %35 {offsets = [160, 0], sizes = [80, 64], strides = [1, 1]} : vector<720x64xf32> to vector<80x64xf32>
    %41 = arith.truncf %40 : vector<80x64xf32> to vector<80x64xbf16>
    %42 = vector.extract_strided_slice %35 {offsets = [240, 0], sizes = [80, 64], strides = [1, 1]} : vector<720x64xf32> to vector<80x64xf32>
    %43 = arith.truncf %42 : vector<80x64xf32> to vector<80x64xbf16>
    %44 = vector.extract_strided_slice %35 {offsets = [320, 0], sizes = [80, 64], strides = [1, 1]} : vector<720x64xf32> to vector<80x64xf32>
    %45 = arith.truncf %44 : vector<80x64xf32> to vector<80x64xbf16>
    %46 = vector.extract_strided_slice %35 {offsets = [400, 0], sizes = [80, 64], strides = [1, 1]} : vector<720x64xf32> to vector<80x64xf32>
    %47 = arith.truncf %46 : vector<80x64xf32> to vector<80x64xbf16>
    %48 = vector.extract_strided_slice %35 {offsets = [480, 0], sizes = [80, 64], strides = [1, 1]} : vector<720x64xf32> to vector<80x64xf32>
    %49 = arith.truncf %48 : vector<80x64xf32> to vector<80x64xbf16>
    %50 = vector.extract_strided_slice %35 {offsets = [560, 0], sizes = [80, 64], strides = [1, 1]} : vector<720x64xf32> to vector<80x64xf32>
    %51 = arith.truncf %50 : vector<80x64xf32> to vector<80x64xbf16>
    %52 = vector.extract_strided_slice %35 {offsets = [640, 0], sizes = [80, 64], strides = [1, 1]} : vector<720x64xf32> to vector<80x64xf32>
    %53 = arith.truncf %52 : vector<80x64xf32> to vector<80x64xbf16>
    %54 = tpu.concatenate %37, %39, %41, %43, %45, %47, %49, %51, %53 in 1 : vector<80x64xbf16>, vector<80x64xbf16>, vector<80x64xbf16>, vector<80x64xbf16>, vector<80x64xbf16>, vector<80x64xbf16>, vector<80x64xbf16>, vector<80x64xbf16>, vector<80x64xbf16> -> vector<80x576xbf16>
    %c0_12 = arith.constant 0 : index
    %c0_13 = arith.constant 0 : index
    %55 = vector.load %arg5[%c0_12, %c0_13] : memref<576x128xbf16, #tpu.memory_space<vmem>>, vector<576x128xbf16>
    %cst_14 = arith.constant dense<0.000000e+00> : vector<80x128xf32>
    %56 = tpu.matmul %54, %55, %cst_14 {dimension_numbers = #tpu.dot_dimension_numbers<[1], [0], [0], [1], [0, 0, 1, 1], [], []>} : vector<80x576xbf16>, vector<576x128xbf16>, vector<80x128xf32> -> vector<80x128xf32>
    %c0_15 = arith.constant 0 : index
    %c0_16 = arith.constant 0 : index
    %57 = vector.load %arg6[%c0_15, %c0_16] : memref<1x128xf32, #tpu.memory_space<vmem>>, vector<1x128xf32>
    %58 = vector.broadcast %57 : vector<1x128xf32> to vector<80x128xf32>
    %59 = arith.addf %56, %58 : vector<80x128xf32>
    %cst_17 = arith.constant 0.000000e+00 : f32
    %60 = vector.broadcast %cst_17 : f32 to vector<80x128xf32>
    %61 = arith.cmpf oge, %59, %60 : vector<80x128xf32>
    %cst_18 = arith.constant 2.000000e-01 : f32
    %62 = vector.broadcast %cst_18 : f32 to vector<80x128xf32>
    %63 = arith.mulf %62, %59 : vector<80x128xf32>
    %64 = arith.select %61, %59, %63 : vector<80x128xi1>, vector<80x128xf32>
    %cst_19 = arith.constant 1.41421354 : f32
    %65 = vector.broadcast %cst_19 : f32 to vector<80x128xf32>
    %66 = arith.mulf %64, %65 : vector<80x128xf32>
    %c0_20 = arith.constant 0 : index
    %c0_21 = arith.constant 0 : index
    %67 = vector.load %arg7[%c0_20, %c0_21] : memref<80x1xf32, #tpu.memory_space<vmem>>, vector<80x1xf32>
    %68 = vector.broadcast %67 : vector<80x1xf32> to vector<80x128xf32>
    %69 = arith.mulf %66, %68 : vector<80x128xf32>
    %cst_22 = arith.constant 0.000000e+00 : f32
    %70 = vector.broadcast %cst_22 : f32 to vector<11x128xf32>
    %c0_23 = arith.constant 0 : index
    %c0_24 = arith.constant 0 : index
    %71 = vector.load %arg19[%c0_23, %c0_24] : memref<110x128xf32, #tpu.memory_space<vmem>>, vector<11x128xf32>
    tpu.vector_store %arg19[%c0_23, %c0_24], %70 {strides = array<i32>} : memref<110x128xf32, #tpu.memory_space<vmem>>, vector<11x128xf32>,
    %cst_25 = arith.constant 0.000000e+00 : f32
    %72 = vector.broadcast %cst_25 : f32 to vector<19x128xf32>
    %c91 = arith.constant 91 : index
    %c0_26 = arith.constant 0 : index
    %73 = vector.load %arg19[%c91, %c0_26] : memref<110x128xf32, #tpu.memory_space<vmem>>, vector<19x128xf32>
    tpu.vector_store %arg19[%c91, %c0_26], %72 {strides = array<i32>} : memref<110x128xf32, #tpu.memory_space<vmem>>, vector<19x128xf32>,
    %c11 = arith.constant 11 : index
    %c0_27 = arith.constant 0 : index
    %74 = vector.load %arg19[%c11, %c0_27] : memref<110x128xf32, #tpu.memory_space<vmem>>, vector<80x128xf32>
    tpu.vector_store %arg19[%c11, %c0_27], %69 {strides = array<i32>} : memref<110x128xf32, #tpu.memory_space<vmem>>, vector<80x128xf32>,
    %c0_28 = arith.constant 0 : index
    %c0_29 = arith.constant 0 : index
    %75 = vector.load %arg19[%c0_28, %c0_29] : memref<110x128xf32, #tpu.memory_space<vmem>>, vector<110x128xf32>
    %76 = vector.extract_strided_slice %75 {offsets = [0, 0], sizes = [80, 128], strides = [1, 1]} : vector<110x128xf32> to vector<80x128xf32>
    %77 = arith.truncf %76 : vector<80x128xf32> to vector<80x128xbf16>
    %78 = vector.extract_strided_slice %75 {offsets = [1, 0], sizes = [80, 128], strides = [1, 1]} : vector<110x128xf32> to vector<80x128xf32>
    %79 = arith.truncf %78 : vector<80x128xf32> to vector<80x128xbf16>
    %80 = vector.extract_strided_slice %75 {offsets = [2, 0], sizes = [80, 128], strides = [1, 1]} : vector<110x128xf32> to vector<80x128xf32>
    %81 = arith.truncf %80 : vector<80x128xf32> to vector<80x128xbf16>
    %82 = vector.extract_strided_slice %75 {offsets = [10, 0], sizes = [80, 128], strides = [1, 1]} : vector<110x128xf32> to vector<80x128xf32>
    %83 = arith.truncf %82 : vector<80x128xf32> to vector<80x128xbf16>
    %84 = vector.extract_strided_slice %75 {offsets = [11, 0], sizes = [80, 128], strides = [1, 1]} : vector<110x128xf32> to vector<80x128xf32>
    %85 = arith.truncf %84 : vector<80x128xf32> to vector<80x128xbf16>
    %86 = vector.extract_strided_slice %75 {offsets = [12, 0], sizes = [80, 128], strides = [1, 1]} : vector<110x128xf32> to vector<80x128xf32>
    %87 = arith.truncf %86 : vector<80x128xf32> to vector<80x128xbf16>
    %88 = vector.extract_strided_slice %75 {offsets = [20, 0], sizes = [80, 128], strides = [1, 1]} : vector<110x128xf32> to vector<80x128xf32>
    %89 = arith.truncf %88 : vector<80x128xf32> to vector<80x128xbf16>
    %90 = vector.extract_strided_slice %75 {offsets = [21, 0], sizes = [80, 128], strides = [1, 1]} : vector<110x128xf32> to vector<80x128xf32>
    %91 = arith.truncf %90 : vector<80x128xf32> to vector<80x128xbf16>
    %92 = vector.extract_strided_slice %75 {offsets = [22, 0], sizes = [80, 128], strides = [1, 1]} : vector<110x128xf32> to vector<80x128xf32>
    %93 = arith.truncf %92 : vector<80x128xf32> to vector<80x128xbf16>
    %94 = tpu.concatenate %77, %79, %81, %83, %85, %87, %89, %91, %93 in 1 : vector<80x128xbf16>, vector<80x128xbf16>, vector<80x128xbf16>, vector<80x128xbf16>, vector<80x128xbf16>, vector<80x128xbf16>, vector<80x128xbf16>, vector<80x128xbf16>, vector<80x128xbf16> -> vector<80x1152xbf16>
    %c0_30 = arith.constant 0 : index
    %c0_31 = arith.constant 0 : index
    %95 = vector.load %arg8[%c0_30, %c0_31] : memref<1152x128xbf16, #tpu.memory_space<vmem>>, vector<1152x128xbf16>
    %cst_32 = arith.constant dense<0.000000e+00> : vector<80x128xf32>
    %96 = tpu.matmul %94, %95, %cst_32 {dimension_numbers = #tpu.dot_dimension_numbers<[1], [0], [0], [1], [0, 0, 1, 1], [], []>} : vector<80x1152xbf16>, vector<1152x128xbf16>, vector<80x128xf32> -> vector<80x128xf32>
    %c0_33 = arith.constant 0 : index
    %c0_34 = arith.constant 0 : index
    %97 = vector.load %arg9[%c0_33, %c0_34] : memref<1x128xf32, #tpu.memory_space<vmem>>, vector<1x128xf32>
    %98 = vector.broadcast %97 : vector<1x128xf32> to vector<80x128xf32>
    %99 = arith.addf %96, %98 : vector<80x128xf32>
    %cst_35 = arith.constant 0.000000e+00 : f32
    %100 = vector.broadcast %cst_35 : f32 to vector<80x128xf32>
    %101 = arith.cmpf oge, %99, %100 : vector<80x128xf32>
    %cst_36 = arith.constant 2.000000e-01 : f32
    %102 = vector.broadcast %cst_36 : f32 to vector<80x128xf32>
    %103 = arith.mulf %102, %99 : vector<80x128xf32>
    %104 = arith.select %101, %99, %103 : vector<80x128xi1>, vector<80x128xf32>
    %cst_37 = arith.constant 1.41421354 : f32
    %105 = vector.broadcast %cst_37 : f32 to vector<80x128xf32>
    %106 = arith.mulf %104, %105 : vector<80x128xf32>
    %107 = arith.truncf %106 : vector<80x128xf32> to vector<80x128xbf16>
    %c0_38 = arith.constant 0 : index
    %c0_39 = arith.constant 0 : index
    %108 = vector.load %arg10[%c0_38, %c0_39] : memref<216x80xbf16, #tpu.memory_space<vmem>>, vector<216x80xbf16>
    %cst_40 = arith.constant dense<0.000000e+00> : vector<216x128xf32>
    %109 = tpu.matmul %108, %107, %cst_40 {dimension_numbers = #tpu.dot_dimension_numbers<[1], [0], [0], [1], [0, 0, 1, 1], [], []>} : vector<216x80xbf16>, vector<80x128xbf16>, vector<216x128xf32> -> vector<216x128xf32>
    %110 = vector.extract_strided_slice %109 {offsets = [0, 0], sizes = [24, 128], strides = [1, 1]} : vector<216x128xf32> to vector<24x128xf32>
    %111 = arith.truncf %110 : vector<24x128xf32> to vector<24x128xbf16>
    %112 = vector.extract_strided_slice %109 {offsets = [24, 0], sizes = [24, 128], strides = [1, 1]} : vector<216x128xf32> to vector<24x128xf32>
    %113 = arith.truncf %112 : vector<24x128xf32> to vector<24x128xbf16>
    %114 = vector.extract_strided_slice %109 {offsets = [48, 0], sizes = [24, 128], strides = [1, 1]} : vector<216x128xf32> to vector<24x128xf32>
    %115 = arith.truncf %114 : vector<24x128xf32> to vector<24x128xbf16>
    %116 = vector.extract_strided_slice %109 {offsets = [72, 0], sizes = [24, 128], strides = [1, 1]} : vector<216x128xf32> to vector<24x128xf32>
    %117 = arith.truncf %116 : vector<24x128xf32> to vector<24x128xbf16>
    %118 = vector.extract_strided_slice %109 {offsets = [96, 0], sizes = [24, 128], strides = [1, 1]} : vector<216x128xf32> to vector<24x128xf32>
    %119 = arith.truncf %118 : vector<24x128xf32> to vector<24x128xbf16>
    %120 = vector.extract_strided_slice %109 {offsets = [120, 0], sizes = [24, 128], strides = [1, 1]} : vector<216x128xf32> to vector<24x128xf32>
    %121 = arith.truncf %120 : vector<24x128xf32> to vector<24x128xbf16>
    %122 = vector.extract_strided_slice %109 {offsets = [144, 0], sizes = [24, 128], strides = [1, 1]} : vector<216x128xf32> to vector<24x128xf32>
    %123 = arith.truncf %122 : vector<24x128xf32> to vector<24x128xbf16>
    %124 = vector.extract_strided_slice %109 {offsets = [168, 0], sizes = [24, 128], strides = [1, 1]} : vector<216x128xf32> to vector<24x128xf32>
    %125 = arith.truncf %124 : vector<24x128xf32> to vector<24x128xbf16>
    %126 = vector.extract_strided_slice %109 {offsets = [192, 0], sizes = [24, 128], strides = [1, 1]} : vector<216x128xf32> to vector<24x128xf32>
    %127 = arith.truncf %126 : vector<24x128xf32> to vector<24x128xbf16>
    %128 = tpu.concatenate %111, %113, %115, %117, %119, %121, %123, %125, %127 in 1 : vector<24x128xbf16>, vector<24x128xbf16>, vector<24x128xbf16>, vector<24x128xbf16>, vector<24x128xbf16>, vector<24x128xbf16>, vector<24x128xbf16>, vector<24x128xbf16>, vector<24x128xbf16> -> vector<24x1152xbf16>
    %c0_41 = arith.constant 0 : index
    %c0_42 = arith.constant 0 : index
    %129 = vector.load %arg11[%c0_41, %c0_42] : memref<1152x256xbf16, #tpu.memory_space<vmem>>, vector<1152x256xbf16>
    %cst_43 = arith.constant dense<0.000000e+00> : vector<24x256xf32>
    %130 = tpu.matmul %128, %129, %cst_43 {dimension_numbers = #tpu.dot_dimension_numbers<[1], [0], [0], [1], [0, 0, 1, 1], [], []>} : vector<24x1152xbf16>, vector<1152x256xbf16>, vector<24x256xf32> -> vector<24x256xf32>
    %c0_44 = arith.constant 0 : index
    %c0_45 = arith.constant 0 : index
    %131 = vector.load %arg12[%c0_44, %c0_45] : memref<1x256xf32, #tpu.memory_space<vmem>>, vector<1x256xf32>
    %132 = vector.broadcast %131 : vector<1x256xf32> to vector<24x256xf32>
    %133 = arith.addf %130, %132 : vector<24x256xf32>
    %cst_46 = arith.constant 0.000000e+00 : f32
    %134 = vector.broadcast %cst_46 : f32 to vector<24x256xf32>
    %135 = arith.cmpf oge, %133, %134 : vector<24x256xf32>
    %cst_47 = arith.constant 2.000000e-01 : f32
    %136 = vector.broadcast %cst_47 : f32 to vector<24x256xf32>
    %137 = arith.mulf %136, %133 : vector<24x256xf32>
    %138 = arith.select %135, %133, %137 : vector<24x256xi1>, vector<24x256xf32>
    %cst_48 = arith.constant 1.41421354 : f32
    %139 = vector.broadcast %cst_48 : f32 to vector<24x256xf32>
    %140 = arith.mulf %138, %139 : vector<24x256xf32>
    %c0_49 = arith.constant 0 : index
    %c0_50 = arith.constant 0 : index
    %141 = vector.load %arg13[%c0_49, %c0_50] : memref<24x1xf32, #tpu.memory_space<vmem>>, vector<24x1xf32>
    %142 = vector.broadcast %141 : vector<24x1xf32> to vector<24x256xf32>
    %143 = arith.mulf %140, %142 : vector<24x256xf32>
    %cst_51 = arith.constant 0.000000e+00 : f32
    %144 = vector.broadcast %cst_51 : f32 to vector<7x256xf32>
    %c0_52 = arith.constant 0 : index
    %c0_53 = arith.constant 0 : index
    %145 = vector.load %arg20[%c0_52, %c0_53] : memref<42x256xf32, #tpu.memory_space<vmem>>, vector<7x256xf32>
    tpu.vector_store %arg20[%c0_52, %c0_53], %144 {strides = array<i32>} : memref<42x256xf32, #tpu.memory_space<vmem>>, vector<7x256xf32>,
    %cst_54 = arith.constant 0.000000e+00 : f32
    %146 = vector.broadcast %cst_54 : f32 to vector<11x256xf32>
    %c31 = arith.constant 31 : index
    %c0_55 = arith.constant 0 : index
    %147 = vector.load %arg20[%c31, %c0_55] : memref<42x256xf32, #tpu.memory_space<vmem>>, vector<11x256xf32>
    tpu.vector_store %arg20[%c31, %c0_55], %146 {strides = array<i32>} : memref<42x256xf32, #tpu.memory_space<vmem>>, vector<11x256xf32>,
    %c7 = arith.constant 7 : index
    %c0_56 = arith.constant 0 : index
    %148 = vector.load %arg20[%c7, %c0_56] : memref<42x256xf32, #tpu.memory_space<vmem>>, vector<24x256xf32>
    tpu.vector_store %arg20[%c7, %c0_56], %143 {strides = array<i32>} : memref<42x256xf32, #tpu.memory_space<vmem>>, vector<24x256xf32>,
    %c0_57 = arith.constant 0 : index
    %c0_58 = arith.constant 0 : index
    %149 = vector.load %arg20[%c0_57, %c0_58] : memref<42x256xf32, #tpu.memory_space<vmem>>, vector<42x256xf32>
    %150 = vector.extract_strided_slice %149 {offsets = [0, 0], sizes = [24, 256], strides = [1, 1]} : vector<42x256xf32> to vector<24x256xf32>
    %151 = arith.truncf %150 : vector<24x256xf32> to vector<24x256xbf16>
    %152 = vector.extract_strided_slice %149 {offsets = [1, 0], sizes = [24, 256], strides = [1, 1]} : vector<42x256xf32> to vector<24x256xf32>
    %153 = arith.truncf %152 : vector<24x256xf32> to vector<24x256xbf16>
    %154 = vector.extract_strided_slice %149 {offsets = [2, 0], sizes = [24, 256], strides = [1, 1]} : vector<42x256xf32> to vector<24x256xf32>
    %155 = arith.truncf %154 : vector<24x256xf32> to vector<24x256xbf16>
    %156 = vector.extract_strided_slice %149 {offsets = [6, 0], sizes = [24, 256], strides = [1, 1]} : vector<42x256xf32> to vector<24x256xf32>
    %157 = arith.truncf %156 : vector<24x256xf32> to vector<24x256xbf16>
    %158 = vector.extract_strided_slice %149 {offsets = [7, 0], sizes = [24, 256], strides = [1, 1]} : vector<42x256xf32> to vector<24x256xf32>
    %159 = arith.truncf %158 : vector<24x256xf32> to vector<24x256xbf16>
    %160 = vector.extract_strided_slice %149 {offsets = [8, 0], sizes = [24, 256], strides = [1, 1]} : vector<42x256xf32> to vector<24x256xf32>
    %161 = arith.truncf %160 : vector<24x256xf32> to vector<24x256xbf16>
    %162 = vector.extract_strided_slice %149 {offsets = [12, 0], sizes = [24, 256], strides = [1, 1]} : vector<42x256xf32> to vector<24x256xf32>
    %163 = arith.truncf %162 : vector<24x256xf32> to vector<24x256xbf16>
    %164 = vector.extract_strided_slice %149 {offsets = [13, 0], sizes = [24, 256], strides = [1, 1]} : vector<42x256xf32> to vector<24x256xf32>
    %165 = arith.truncf %164 : vector<24x256xf32> to vector<24x256xbf16>
    %166 = vector.extract_strided_slice %149 {offsets = [14, 0], sizes = [24, 256], strides = [1, 1]} : vector<42x256xf32> to vector<24x256xf32>
    %167 = arith.truncf %166 : vector<24x256xf32> to vector<24x256xbf16>
    %168 = tpu.concatenate %151, %153, %155, %157, %159, %161, %163, %165, %167 in 1 : vector<24x256xbf16>, vector<24x256xbf16>, vector<24x256xbf16>, vector<24x256xbf16>, vector<24x256xbf16>, vector<24x256xbf16>, vector<24x256xbf16>, vector<24x256xbf16>, vector<24x256xbf16> -> vector<24x2304xbf16>
    %c0_59 = arith.constant 0 : index
    %c0_60 = arith.constant 0 : index
    %169 = vector.load %arg14[%c0_59, %c0_60] : memref<2304x256xbf16, #tpu.memory_space<vmem>>, vector<2304x256xbf16>
    %cst_61 = arith.constant dense<0.000000e+00> : vector<24x256xf32>
    %170 = tpu.matmul %168, %169, %cst_61 {dimension_numbers = #tpu.dot_dimension_numbers<[1], [0], [0], [1], [0, 0, 1, 1], [], []>} : vector<24x2304xbf16>, vector<2304x256xbf16>, vector<24x256xf32> -> vector<24x256xf32>
    %c0_62 = arith.constant 0 : index
    %c0_63 = arith.constant 0 : index
    %171 = vector.load %arg15[%c0_62, %c0_63] : memref<1x256xf32, #tpu.memory_space<vmem>>, vector<1x256xf32>
    %172 = vector.broadcast %171 : vector<1x256xf32> to vector<24x256xf32>
    %173 = arith.addf %170, %172 : vector<24x256xf32>
    %cst_64 = arith.constant 0.000000e+00 : f32
    %174 = vector.broadcast %cst_64 : f32 to vector<24x256xf32>
    %175 = arith.cmpf oge, %173, %174 : vector<24x256xf32>
    %cst_65 = arith.constant 2.000000e-01 : f32
    %176 = vector.broadcast %cst_65 : f32 to vector<24x256xf32>
    %177 = arith.mulf %176, %173 : vector<24x256xf32>
    %178 = arith.select %175, %173, %177 : vector<24x256xi1>, vector<24x256xf32>
    %cst_66 = arith.constant 1.41421354 : f32
    %179 = vector.broadcast %cst_66 : f32 to vector<24x256xf32>
    %180 = arith.mulf %178, %179 : vector<24x256xf32>
    %c0_67 = arith.constant 0 : index
    %c0_68 = arith.constant 0 : index
    %181 = vector.load %arg13[%c0_67, %c0_68] : memref<24x1xf32, #tpu.memory_space<vmem>>, vector<24x1xf32>
    %182 = vector.broadcast %181 : vector<24x1xf32> to vector<24x256xf32>
    %183 = arith.mulf %180, %182 : vector<24x256xf32>
    %cst_69 = arith.constant 0.000000e+00 : f32
    %184 = vector.broadcast %cst_69 : f32 to vector<7x256xf32>
    %c0_70 = arith.constant 0 : index
    %c0_71 = arith.constant 0 : index
    %185 = vector.load %arg21[%c0_70, %c0_71] : memref<42x256xf32, #tpu.memory_space<vmem>>, vector<7x256xf32>
    tpu.vector_store %arg21[%c0_70, %c0_71], %184 {strides = array<i32>} : memref<42x256xf32, #tpu.memory_space<vmem>>, vector<7x256xf32>,
    %cst_72 = arith.constant 0.000000e+00 : f32
    %186 = vector.broadcast %cst_72 : f32 to vector<11x256xf32>
    %c31_73 = arith.constant 31 : index
    %c0_74 = arith.constant 0 : index
    %187 = vector.load %arg21[%c31_73, %c0_74] : memref<42x256xf32, #tpu.memory_space<vmem>>, vector<11x256xf32>
    tpu.vector_store %arg21[%c31_73, %c0_74], %186 {strides = array<i32>} : memref<42x256xf32, #tpu.memory_space<vmem>>, vector<11x256xf32>,
    %c7_75 = arith.constant 7 : index
    %c0_76 = arith.constant 0 : index
    %188 = vector.load %arg21[%c7_75, %c0_76] : memref<42x256xf32, #tpu.memory_space<vmem>>, vector<24x256xf32>
    tpu.vector_store %arg21[%c7_75, %c0_76], %183 {strides = array<i32>} : memref<42x256xf32, #tpu.memory_space<vmem>>, vector<24x256xf32>,
    %c0_77 = arith.constant 0 : index
    %c0_78 = arith.constant 0 : index
    %189 = vector.load %arg21[%c0_77, %c0_78] : memref<42x256xf32, #tpu.memory_space<vmem>>, vector<42x256xf32>
    %cst_79 = arith.constant 0.000000e+00 : f32
    %190 = vector.broadcast %cst_79 : f32 to vector<24x1xf32>
    %191 = vector.extract_strided_slice %189 {offsets = [0, 0], sizes = [24, 256], strides = [1, 1]} : vector<42x256xf32> to vector<24x256xf32>
    %192 = arith.truncf %191 : vector<24x256xf32> to vector<24x256xbf16>
    %193 = arith.extf %192 : vector<24x256xbf16> to vector<24x256xf32>
    %c0_80 = arith.constant 0 : index
    %c0_81 = arith.constant 0 : index
    %194 = vector.load %arg16[%c0_80, %c0_81] : memref<1x2304xf32, #tpu.memory_space<vmem>>, vector<1x256xf32>
    %195 = vector.broadcast %194 : vector<1x256xf32> to vector<24x256xf32>
    %196 = arith.mulf %193, %195 : vector<24x256xf32>
    %cst_82 = arith.constant dense<0.000000e+00> : vector<24xf32>
    %197 = vector.multi_reduction <add>, %196, %cst_82 [1] : vector<24x256xf32> to vector<24xf32>
    %198 = vector.shape_cast %197 : vector<24xf32> to vector<24x1xf32>
    %199 = arith.addf %190, %198 : vector<24x1xf32>
    %200 = vector.extract_strided_slice %189 {offsets = [1, 0], sizes = [24, 256], strides = [1, 1]} : vector<42x256xf32> to vector<24x256xf32>
    %201 = arith.truncf %200 : vector<24x256xf32> to vector<24x256xbf16>
    %202 = arith.extf %201 : vector<24x256xbf16> to vector<24x256xf32>
    %c0_83 = arith.constant 0 : index
    %c256 = arith.constant 256 : index
    %203 = vector.load %arg16[%c0_83, %c256] : memref<1x2304xf32, #tpu.memory_space<vmem>>, vector<1x256xf32>
    %204 = vector.broadcast %203 : vector<1x256xf32> to vector<24x256xf32>
    %205 = arith.mulf %202, %204 : vector<24x256xf32>
    %cst_84 = arith.constant dense<0.000000e+00> : vector<24xf32>
    %206 = vector.multi_reduction <add>, %205, %cst_84 [1] : vector<24x256xf32> to vector<24xf32>
    %207 = vector.shape_cast %206 : vector<24xf32> to vector<24x1xf32>
    %208 = arith.addf %199, %207 : vector<24x1xf32>
    %209 = vector.extract_strided_slice %189 {offsets = [2, 0], sizes = [24, 256], strides = [1, 1]} : vector<42x256xf32> to vector<24x256xf32>
    %210 = arith.truncf %209 : vector<24x256xf32> to vector<24x256xbf16>
    %211 = arith.extf %210 : vector<24x256xbf16> to vector<24x256xf32>
    %c0_85 = arith.constant 0 : index
    %c512 = arith.constant 512 : index
    %212 = vector.load %arg16[%c0_85, %c512] : memref<1x2304xf32, #tpu.memory_space<vmem>>, vector<1x256xf32>
    %213 = vector.broadcast %212 : vector<1x256xf32> to vector<24x256xf32>
    %214 = arith.mulf %211, %213 : vector<24x256xf32>
    %cst_86 = arith.constant dense<0.000000e+00> : vector<24xf32>
    %215 = vector.multi_reduction <add>, %214, %cst_86 [1] : vector<24x256xf32> to vector<24xf32>
    %216 = vector.shape_cast %215 : vector<24xf32> to vector<24x1xf32>
    %217 = arith.addf %208, %216 : vector<24x1xf32>
    %218 = vector.extract_strided_slice %189 {offsets = [6, 0], sizes = [24, 256], strides = [1, 1]} : vector<42x256xf32> to vector<24x256xf32>
    %219 = arith.truncf %218 : vector<24x256xf32> to vector<24x256xbf16>
    %220 = arith.extf %219 : vector<24x256xbf16> to vector<24x256xf32>
    %c0_87 = arith.constant 0 : index
    %c768 = arith.constant 768 : index
    %221 = vector.load %arg16[%c0_87, %c768] : memref<1x2304xf32, #tpu.memory_space<vmem>>, vector<1x256xf32>
    %222 = vector.broadcast %221 : vector<1x256xf32> to vector<24x256xf32>
    %223 = arith.mulf %220, %222 : vector<24x256xf32>
    %cst_88 = arith.constant dense<0.000000e+00> : vector<24xf32>
    %224 = vector.multi_reduction <add>, %223, %cst_88 [1] : vector<24x256xf32> to vector<24xf32>
    %225 = vector.shape_cast %224 : vector<24xf32> to vector<24x1xf32>
    %226 = arith.addf %217, %225 : vector<24x1xf32>
    %227 = vector.extract_strided_slice %189 {offsets = [7, 0], sizes = [24, 256], strides = [1, 1]} : vector<42x256xf32> to vector<24x256xf32>
    %228 = arith.truncf %227 : vector<24x256xf32> to vector<24x256xbf16>
    %229 = arith.extf %228 : vector<24x256xbf16> to vector<24x256xf32>
    %c0_89 = arith.constant 0 : index
    %c1024 = arith.constant 1024 : index
    %230 = vector.load %arg16[%c0_89, %c1024] : memref<1x2304xf32, #tpu.memory_space<vmem>>, vector<1x256xf32>
    %231 = vector.broadcast %230 : vector<1x256xf32> to vector<24x256xf32>
    %232 = arith.mulf %229, %231 : vector<24x256xf32>
    %cst_90 = arith.constant dense<0.000000e+00> : vector<24xf32>
    %233 = vector.multi_reduction <add>, %232, %cst_90 [1] : vector<24x256xf32> to vector<24xf32>
    %234 = vector.shape_cast %233 : vector<24xf32> to vector<24x1xf32>
    %235 = arith.addf %226, %234 : vector<24x1xf32>
    %236 = vector.extract_strided_slice %189 {offsets = [8, 0], sizes = [24, 256], strides = [1, 1]} : vector<42x256xf32> to vector<24x256xf32>
    %237 = arith.truncf %236 : vector<24x256xf32> to vector<24x256xbf16>
    %238 = arith.extf %237 : vector<24x256xbf16> to vector<24x256xf32>
    %c0_91 = arith.constant 0 : index
    %c1280 = arith.constant 1280 : index
    %239 = vector.load %arg16[%c0_91, %c1280] : memref<1x2304xf32, #tpu.memory_space<vmem>>, vector<1x256xf32>
    %240 = vector.broadcast %239 : vector<1x256xf32> to vector<24x256xf32>
    %241 = arith.mulf %238, %240 : vector<24x256xf32>
    %cst_92 = arith.constant dense<0.000000e+00> : vector<24xf32>
    %242 = vector.multi_reduction <add>, %241, %cst_92 [1] : vector<24x256xf32> to vector<24xf32>
    %243 = vector.shape_cast %242 : vector<24xf32> to vector<24x1xf32>
    %244 = arith.addf %235, %243 : vector<24x1xf32>
    %245 = vector.extract_strided_slice %189 {offsets = [12, 0], sizes = [24, 256], strides = [1, 1]} : vector<42x256xf32> to vector<24x256xf32>
    %246 = arith.truncf %245 : vector<24x256xf32> to vector<24x256xbf16>
    %247 = arith.extf %246 : vector<24x256xbf16> to vector<24x256xf32>
    %c0_93 = arith.constant 0 : index
    %c1536 = arith.constant 1536 : index
    %248 = vector.load %arg16[%c0_93, %c1536] : memref<1x2304xf32, #tpu.memory_space<vmem>>, vector<1x256xf32>
    %249 = vector.broadcast %248 : vector<1x256xf32> to vector<24x256xf32>
    %250 = arith.mulf %247, %249 : vector<24x256xf32>
    %cst_94 = arith.constant dense<0.000000e+00> : vector<24xf32>
    %251 = vector.multi_reduction <add>, %250, %cst_94 [1] : vector<24x256xf32> to vector<24xf32>
    %252 = vector.shape_cast %251 : vector<24xf32> to vector<24x1xf32>
    %253 = arith.addf %244, %252 : vector<24x1xf32>
    %254 = vector.extract_strided_slice %189 {offsets = [13, 0], sizes = [24, 256], strides = [1, 1]} : vector<42x256xf32> to vector<24x256xf32>
    %255 = arith.truncf %254 : vector<24x256xf32> to vector<24x256xbf16>
    %256 = arith.extf %255 : vector<24x256xbf16> to vector<24x256xf32>
    %c0_95 = arith.constant 0 : index
    %c1792 = arith.constant 1792 : index
    %257 = vector.load %arg16[%c0_95, %c1792] : memref<1x2304xf32, #tpu.memory_space<vmem>>, vector<1x256xf32>
    %258 = vector.broadcast %257 : vector<1x256xf32> to vector<24x256xf32>
    %259 = arith.mulf %256, %258 : vector<24x256xf32>
    %cst_96 = arith.constant dense<0.000000e+00> : vector<24xf32>
    %260 = vector.multi_reduction <add>, %259, %cst_96 [1] : vector<24x256xf32> to vector<24xf32>
    %261 = vector.shape_cast %260 : vector<24xf32> to vector<24x1xf32>
    %262 = arith.addf %253, %261 : vector<24x1xf32>
    %263 = vector.extract_strided_slice %189 {offsets = [14, 0], sizes = [24, 256], strides = [1, 1]} : vector<42x256xf32> to vector<24x256xf32>
    %264 = arith.truncf %263 : vector<24x256xf32> to vector<24x256xbf16>
    %265 = arith.extf %264 : vector<24x256xbf16> to vector<24x256xf32>
    %c0_97 = arith.constant 0 : index
    %c2048 = arith.constant 2048 : index
    %266 = vector.load %arg16[%c0_97, %c2048] : memref<1x2304xf32, #tpu.memory_space<vmem>>, vector<1x256xf32>
    %267 = vector.broadcast %266 : vector<1x256xf32> to vector<24x256xf32>
    %268 = arith.mulf %265, %267 : vector<24x256xf32>
    %cst_98 = arith.constant dense<0.000000e+00> : vector<24xf32>
    %269 = vector.multi_reduction <add>, %268, %cst_98 [1] : vector<24x256xf32> to vector<24xf32>
    %270 = vector.shape_cast %269 : vector<24xf32> to vector<24x1xf32>
    %271 = arith.addf %262, %270 : vector<24x1xf32>
    %c0_99 = arith.constant 0 : index
    %c0_100 = arith.constant 0 : index
    %272 = vector.load %arg17[%c0_99, %c0_100] : memref<1x1xf32, #tpu.memory_space<vmem>>, vector<1x1xf32>
    %273 = vector.broadcast %272 : vector<1x1xf32> to vector<24x1xf32>
    %274 = arith.addf %271, %273 : vector<24x1xf32>
    %c0_101 = arith.constant 0 : index
    %c0_102 = arith.constant 0 : index
    %c0_103 = arith.constant 0 : index
    %275 = vector.load %arg18[%c0_101, %c0_102, %c0_103] : memref<1x24x1xf32, #tpu.memory_space<vmem>>, vector<1x24x1xf32>
    %276 = vector.shape_cast %275 : vector<1x24x1xf32> to vector<24x1xf32>
    %277 = vector.shape_cast %274 : vector<24x1xf32> to vector<1x24x1xf32>
    tpu.vector_store %arg18[%c0_101, %c0_102, %c0_103], %277 {strides = array<i32>} : memref<1x24x1xf32, #tpu.memory_space<vmem>>, vector<1x24x1xf32>,
    return
  }
  func.func @transform_0(%arg0: i32) -> (i32, i32, i32) {
    %c0_i32 = arith.constant 0 : i32
    %c0_i32_0 = arith.constant 0 : i32
    %c0_i32_1 = arith.constant 0 : i32
    return %arg0, %c0_i32, %c0_i32_0 : i32, i32, i32
  }
  func.func @transform_1(%arg0: i32) -> (i32, i32) {
    %c0_i32 = arith.constant 0 : i32
    %c0_i32_0 = arith.constant 0 : i32
    %c0_i32_1 = arith.constant 0 : i32
    return %c0_i32, %c0_i32_0 : i32, i32
  }
  func.func @transform_2(%arg0: i32) -> (i32, i32) {
    %c0_i32 = arith.constant 0 : i32
    %c0_i32_0 = arith.constant 0 : i32
    %c0_i32_1 = arith.constant 0 : i32
    return %c0_i32, %c0_i32_0 : i32, i32
  }
  func.func @transform_3(%arg0: i32) -> (i32, i32) {
    %c0_i32 = arith.constant 0 : i32
    %c0_i32_0 = arith.constant 0 : i32
    %c0_i32_1 = arith.constant 0 : i32
    return %c0_i32, %c0_i32_0 : i32, i32
  }
  func.func @transform_4(%arg0: i32) -> (i32, i32) {
    %c0_i32 = arith.constant 0 : i32
    %c0_i32_0 = arith.constant 0 : i32
    %c0_i32_1 = arith.constant 0 : i32
    return %c0_i32, %c0_i32_0 : i32, i32
  }
  func.func @transform_5(%arg0: i32) -> (i32, i32) {
    %c0_i32 = arith.constant 0 : i32
    %c0_i32_0 = arith.constant 0 : i32
    %c0_i32_1 = arith.constant 0 : i32
    return %c0_i32, %c0_i32_0 : i32, i32
  }
  func.func @transform_6(%arg0: i32) -> (i32, i32) {
    %c0_i32 = arith.constant 0 : i32
    %c0_i32_0 = arith.constant 0 : i32
    %c0_i32_1 = arith.constant 0 : i32
    return %c0_i32, %c0_i32_0 : i32, i32
  }
  func.func @transform_7(%arg0: i32) -> (i32, i32) {
    %c0_i32 = arith.constant 0 : i32
    %c0_i32_0 = arith.constant 0 : i32
    %c0_i32_1 = arith.constant 0 : i32
    return %c0_i32, %c0_i32_0 : i32, i32
  }
  func.func @transform_8(%arg0: i32) -> (i32, i32) {
    %c0_i32 = arith.constant 0 : i32
    %c0_i32_0 = arith.constant 0 : i32
    %c0_i32_1 = arith.constant 0 : i32
    return %c0_i32, %c0_i32_0 : i32, i32
  }
  func.func @transform_9(%arg0: i32) -> (i32, i32) {
    %c0_i32 = arith.constant 0 : i32
    %c0_i32_0 = arith.constant 0 : i32
    %c0_i32_1 = arith.constant 0 : i32
    return %c0_i32, %c0_i32_0 : i32, i32
  }
  func.func @transform_10(%arg0: i32) -> (i32, i32) {
    %c0_i32 = arith.constant 0 : i32
    %c0_i32_0 = arith.constant 0 : i32
    %c0_i32_1 = arith.constant 0 : i32
    return %c0_i32, %c0_i32_0 : i32, i32
  }
  func.func @transform_11(%arg0: i32) -> (i32, i32) {
    %c0_i32 = arith.constant 0 : i32
    %c0_i32_0 = arith.constant 0 : i32
    %c0_i32_1 = arith.constant 0 : i32
    return %c0_i32, %c0_i32_0 : i32, i32
  }
  func.func @transform_12(%arg0: i32) -> (i32, i32) {
    %c0_i32 = arith.constant 0 : i32
    %c0_i32_0 = arith.constant 0 : i32
    %c0_i32_1 = arith.constant 0 : i32
    return %c0_i32, %c0_i32_0 : i32, i32
  }
  func.func @transform_13(%arg0: i32) -> (i32, i32) {
    %c0_i32 = arith.constant 0 : i32
    %c0_i32_0 = arith.constant 0 : i32
    %c0_i32_1 = arith.constant 0 : i32
    return %c0_i32, %c0_i32_0 : i32, i32
  }
  func.func @transform_14(%arg0: i32) -> (i32, i32) {
    %c0_i32 = arith.constant 0 : i32
    %c0_i32_0 = arith.constant 0 : i32
    %c0_i32_1 = arith.constant 0 : i32
    return %c0_i32, %c0_i32_0 : i32, i32
  }
  func.func @transform_15(%arg0: i32) -> (i32, i32) {
    %c0_i32 = arith.constant 0 : i32
    %c0_i32_0 = arith.constant 0 : i32
    %c0_i32_1 = arith.constant 0 : i32
    return %c0_i32, %c0_i32_0 : i32, i32
  }
  func.func @transform_16(%arg0: i32) -> (i32, i32) {
    %c0_i32 = arith.constant 0 : i32
    %c0_i32_0 = arith.constant 0 : i32
    %c0_i32_1 = arith.constant 0 : i32
    return %c0_i32, %c0_i32_0 : i32, i32
  }
  func.func @transform_17(%arg0: i32) -> (i32, i32, i32) {
    %c0_i32 = arith.constant 0 : i32
    %c0_i32_0 = arith.constant 0 : i32
    %c0_i32_1 = arith.constant 0 : i32
    return %arg0, %c0_i32, %c0_i32_0 : i32, i32, i32
  }
}

</mosaic_0001>

<bundles_post_ra>
// kernel: facial_component_discriminator.1
= control target key start
LH: loop header
LB: loop body
LE: loop exit
PB: predicated region body
PF: predicated region fallthrough
CT: control target
= control target key end

     0   :  { %s14512_s26 = smov 0   ;;  %s21282_s0 = inlined_call_operand.vmem [shape: f32[2,342,8], index: 0, kind: input, shape index: {}]   ;;  %s21283_s1 = inlined_call_operand.vmem [shape: bf16[72,64], index: 1, kind: input, shape index: {}]   ;;  %s21284_s2 = inlined_call_operand.vmem [shape: f32[1,64], index: 2, kind: input, shape index: {}]   ;;  %s21285_s3 = inlined_call_operand.vmem [shape: bf16[720,288], index: 3, kind: input, shape index: {}]   ;;  %s21286_s4 = inlined_call_operand.vmem [shape: bf16[576,128], index: 4, kind: input, shape index: {}]   ;;  %s21287_s5 = inlined_call_operand.vmem [shape: f32[1,128], index: 5, kind: input, shape index: {}]   ;;  %s21288_s6 = inlined_call_operand.vmem [shape: f32[80,1], index: 6, kind: input, shape index: {}]   ;;  %s21289_s7 = inlined_call_operand.vmem [shape: bf16[1152,128], index: 7, kind: input, shape index: {}]   ;;  %s21290_s8 = inlined_call_operand.vmem [shape: f32[1,128], index: 8, kind: input, shape index: {}]   ;;  %s21291_s9 = inlined_call_operand.vmem [shape: bf16[216,80], index: 9, kind: input, shape index: {}]   ;;  %s21292_s10 = inlined_call_operand.vmem [shape: bf16[1152,256], index: 10, kind: input, shape index: {}]   ;;  %s21293_s11 = inlined_call_operand.vmem [shape: f32[1,256], index: 11, kind: input, shape index: {}]   ;;  %s21294_s12 = inlined_call_operand.vmem [shape: f32[24,1], index: 12, kind: input, shape index: {}]   ;;  %s21295_s13 = inlined_call_operand.vmem [shape: bf16[2304,256], index: 13, kind: input, shape index: {}]   ;;  %s21296_s14 = inlined_call_operand.vmem [shape: f32[1,256], index: 14, kind: input, shape index: {}]   ;;  %s21297_s15 = inlined_call_operand.vmem [shape: f32[1,2304], index: 15, kind: input, shape index: {}]   ;;  %s21298_s16 = inlined_call_operand.<no memory space> [shape: f32[1,1], index: 16, kind: input, shape index: {}]   ;;  %s21299_s17 = inlined_call_operand.vmem [shape: f32[2,24,1], index: 17, kind: output, shape index: {}]  }
   0x1   :  { %21306 = sst [smem:[#allocation6_spill]] %s21282_s0  ;;  %v22_v0 = vstv %s21298_s16 }
   0x2   :  { %21307 = sst [smem:[#allocation7_spill]] %s21283_s1  ;;  %23 = vst [vmem:[#allocation5] sm:$0x1] %v22_v0 }
   0x3 LB: > { %s10810_s27 = sadd.s32 4294967295, %s14406_s26   ;;  %p10814_p0 = scmp.ge.s32.totalorder %s14406_s26, 1  ;;  %s14406_s26 = sphi %s14512_s26, %s29_s26  }
   0x4   : > { %p489_p1 = scmp.lt.s32.totalorder %s14406_s26, 3 }
   0x6   : > { %p490_p2 = pnand %p10814_p0, %p489_p1 }
   0x7   : > { %p541_p3 = scmp.lt.s32.totalorder (!%p490_p2), %s10810_s27, 1  ;;  %s21308_s0 = sld [smem:[#allocation6_spill]] (!%p490_p2) }
   0x8   : > { %493 = sbr.rel (%p490_p2) target bundleno = 3350 (0xd16), region = 88  ;;  %s14408_s18 = smov (!%p490_p2), 24  }
   0x9   : > { %s14409_s19 = smov (!%p490_p2), 16   ;;  %s14410_s1 = smov (!%p490_p2), 40  }
   0xa   : > { %s14411_s20 = smov (!%p490_p2), 64   ;;  %s14412_s21 = smov (!%p490_p2), 8  }
   0xb   : > { %s14413_s22 = smov (!%p490_p2), 48   ;;  %s14414_s23 = smov (!%p490_p2), 32  }
   0xc   : > { %s14415_s24 = smov (!%p490_p2), 56   ;;  %s21309_s28 = sld [smem:[#allocation7_spill]] (!%p490_p2) }
   0xd   : > { %s21357_s27 = smov (!%p541_p3, %s10810_s27), 1  ;;  %vm912_vm0 = vcmask 1046528   ;;  %vm21304_vm1 = vcmask 1044480   ;;  %vm727_vm2 = vsmask.f32 7424  ;;  %vm21305_vm3 = vcmask 1045504  }
   0xe   : > { %s14369_s16 = smul.u32 344, %s21357_s27  ;;  %vm21302_vm4 = vsmask.f32 6400  ;;  %vm21303_vm5 = vsmask.f32 5376  ;;  %vm21301_vm6 = vcmask 1043456  }
   0xf   : > { %vm1470_vm7 = vcmask 64512   ;;  %vm1507_vm8 = vcmask 130048   ;;  %vm1544_vm9 = vcmask 195584   ;;  %vm1581_vm10 = vcmask 261120  }
  0x10   : > { %s14526_s30 = scalar_lea.vmem %s21308_s0, %s14369_s16  ;;  %vm1618_vm11 = vcmask 326656   ;;  %vm1655_vm12 = vcmask 392192   ;;  %vm1692_vm13 = vcmask 457728   ;;  %vm1729_vm14 = vcmask 523264  }
  0x11   : > { %v554_v1 = vld [vmem:[%s14526_s30 + $0x10] sm:$0xff]  ;;  %v555_v2 = vld [vmem:[%s14526_s30 + $0x18] sm:$0xff]  ;;  %v556_v3 = vld [vmem:[%s14526_s30 + $0x20] sm:$0xff]  ;;  %vm1806_vm15 = vcmask 588800  }
  0x12   : > { %v557_v4 = vld [vmem:[%s14526_s30 + $0x28] sm:$0xff]  ;;  %v595_v5 = vpack.c.bf16 %v554_v1, %v554_v1  ;;  %v596_v6 = vpack.c.bf16 %v555_v2, %v555_v2  ;;  %v597_v7 = vpack.c.bf16 %v556_v3, %v556_v3  ;;  %v552_v8 = vld [vmem:[%s14526_s30] sm:$0xff]  ;;  %v558_v13 = vld [vmem:[%s14526_s30 + $0x30] sm:$0xff] }
  0x13   : > { %v553_v9 = vld [vmem:[%s14526_s30 + $0x8] sm:$0xff]  ;;  %v598_v10 = vpack.c.bf16 %v557_v4, %v557_v4  ;;  %v593_v11 = vpack.c.bf16 %v552_v8, %v552_v8  ;;  %v559_v14 = vld [vmem:[%s14526_s30 + $0x38] sm:$0xff]  ;;  %v599_v18 = vpack.c.bf16 %v558_v13, %v558_v13  ;;  %v560_v1 = vld [vmem:[%s14526_s30 + $0x40] sm:$0xff] }
  0x14   : > { %v594_v12 = vpack.c.bf16 %v553_v9, %v553_v9  ;;  %v672_v15 = vunpack.c.l.b16 %v595_v5  ;;  %v673_v16 = vunpack.c.l.b16 %v596_v6  ;;  %v674_v17 = vunpack.c.l.b16 %v597_v7  ;;  %v561_v2 = vld [vmem:[%s14526_s30 + $0x48] sm:$0xff] }
  0x15   : > { %v675_v19 = vunpack.c.l.b16 %v598_v10  ;;  %v670_v20 = vunpack.c.l.b16 %v593_v11  ;;  %v600_v22 = vpack.c.bf16 %v559_v14, %v559_v14  ;;  %v676_v24 = vunpack.c.l.b16 %v599_v18 }
  0x16   : > { %v671_v21 = vunpack.c.l.b16 %v594_v12  ;;  %v14536_v23 = vpack.c.b16 %v673_v16, %v672_v15  ;;  %v601_v5 = vpack.c.bf16 %v560_v1, %v560_v1  ;;  %v602_v6 = vpack.c.bf16 %v561_v2, %v561_v2 }
  0x17   : > { %v14538_v25 = vpack.c.b16 %v675_v19, %v674_v17  ;;  %v677_v27 = vunpack.c.l.b16 %v600_v22  ;;  %v562_v22 = vld [vmem:[%s14526_s30 + $0x50] sm:$0xff] }
  0x18   : > { %v14540_v26 = vpack.c.b16 %v671_v21, %v670_v20  ;;  %v914_v28 = vrot.slane %v14536_v23, 1  ;;  %v736_v32 = vshll.u32 %v14536_v23, 16  ;;  %v740_v37 = vshrl.u32 %v14536_v23, 16 }
  0x19   : > { %v916_v29 = vrot.slane %v14538_v25, 1  ;;  %v14545_v31 = vpack.c.b16 %v677_v27, %v676_v24  ;;  %v14558_v38 = vshll.u32 %v14538_v25, 16  ;;  %v1397_v39 = vrot.slane %v14538_v25, 3  ;;  %v563_v24 = vld [vmem:[%s14526_s30 + $0x58] sm:$0xff] }
  0x1a   : > { %v913_v30 = vrot.slane %v14540_v26, 1  ;;  %v729_v33 = vshrl.u32 %v14540_v26, 16  ;;  %v731_v34 = vshll.u32 %v14540_v26, 16  ;;  %v14566_v42 = vshrl.u32 %v14538_v25, 16 }
  0x1b   : > { %v14553_v35 = vsel %vm912_vm0, %v914_v28, %v916_v29  ;;  %v1398_v40 = vrot.slane %v14545_v31, 3  ;;  %v738_v43 = vrot.slane %v736_v32, 1  ;;  %v14569_v44 = vshll.u32 %v14545_v31, 16 }
  0x1c   : > { %v915_v36 = vsel %vm912_vm0, %v913_v30, %v914_v28  ;;  %996 = vrot.lane.b32.xlu1 %v14553_v35, %s14408_s18  ;;  %v733_v41 = vrot.slane %v731_v34, 1  ;;  %v14572_v45 = vshrl.u32 %v14545_v31, 16  ;;  %v1155_v47 = vrot.slane %v14536_v23, 2 }
  0x1d   : > { %950 = vrot.lane.b32.xlu0 %v915_v36, %s14409_s19  ;;  %v1033_v48 = vrot.slane %v740_v37, 1  ;;  %v1034_v49 = vrot.slane %v736_v32, 2  ;;  %v1037_v50 = vrot.slane %v14558_v38, 2  ;;  %v1399_v51 = vsel %vm21304_vm1, %v1397_v39, %v1398_v40 }
  0x1e   : > { %v734_v46 = vor.u32 %v733_v41, %v729_v33  ;;  %v1036_v52 = vrot.slane %v14566_v42, 1  ;;  %v1275_v53 = vrot.slane %v14566_v42, 2  ;;  %v1156_v54 = vrot.slane %v14538_v25, 2 }
  0x1f   : > { %v1276_v56 = vrot.slane %v14558_v38, 3  ;;  %v1278_v57 = vrot.slane %v14572_v45, 2  ;;  %v1279_v58 = vrot.slane %v14569_v44, 3  ;;  %v1035_v60 = vor.u32 %v1034_v49, %v1033_v48 }
  0x20   : > { %v739_v55 = vsel %vm727_vm2, %v734_v46, %v738_v43  ;;  %v1157_v59 = vsel %vm21305_vm3, %v1155_v47, %v1156_v54  ;;  %v1038_v61 = vor.u32 %v1037_v50, %v1036_v52  ;;  %v1158_v0 = vrot.slane %v14545_v31, 2 }
  0x21   : > { %1192 = vrot.lane.b32.xlu2 %v1157_v59, %s14410_s1  ;;  %v1277_v62 = vor.u32 %v1276_v56, %v1275_v53  ;;  %v1280_v63 = vor.u32 %v1279_v58, %v1278_v57  ;;  %v742_v8 = vor.u32 %v740_v37, %v738_v43  ;;  %v918_v9 = vrot.slane %v14545_v31, 1  ;;  %v564_v57 = vld [vmem:[%s14526_s30 + $0x60] sm:$0xff]  ;;  %v565_v58 = vld [vmem:[%s14526_s30 + $0x68] sm:$0xff] }
  0x22   : > { %v1039_v3 = vsel %vm21302_vm4, %v1035_v60, %v1038_v61  ;;  %v1159_v7 = vsel %vm21305_vm3, %v1156_v54, %v1158_v0  ;;  %v678_v10 = vunpack.c.l.b16 %v601_v5  ;;  %v679_v11 = vunpack.c.l.b16 %v602_v6 }
  0x23   : > { %v1281_v4 = vsel %vm21303_vm5, %v1277_v62, %v1280_v63  ;;  %v746_v12 = vrot.slane %v14558_v38, 1  ;;  %v1040_v14 = vrot.slane %v14572_v45, 1  ;;  %v1041_v15 = vrot.slane %v14569_v44, 2 }
  0x24   : > { %1434 = vrot.lane.b32.xlu1 %v1399_v51, %s14411_s20  ;;  %v919_v16 = vsel %vm912_vm0, %v916_v29, %v918_v9  ;;  %v14607_v17 = vpack.c.b16 %v679_v11, %v678_v10  ;;  %v603_v32 = vpack.c.bf16 %v562_v22, %v562_v22  ;;  %v604_v33 = vpack.c.bf16 %v563_v24, %v563_v24  ;;  %v567_v22 = vld [vmem:[%s14526_s30 + $0x78] sm:$0xff] }
  0x25   : > { %876 = vrot.lane.b32.xlu0 %v739_v55, %s14412_s21  ;;  %v747_v13 = vsel %vm727_vm2, %v742_v8, %v746_v12  ;;  %v1042_v18 = vor.u32 %v1041_v15, %v1040_v14  ;;  %v750_v34 = vor.u32 %v14566_v42, %v746_v12  ;;  %v606_v62 = vpack.c.bf16 %v565_v58, %v565_v58 }
  0x26   : > { %v1160_v19 = vrot.slane %v14607_v17, 2  ;;  %v14615_v20 = vshll.u32 %v14607_v17, 16  ;;  %v14618_v21 = vshrl.u32 %v14607_v17, 16  ;;  %v1400_v37 = vrot.slane %v14607_v17, 3 }
  0x27   : > { %v1043_v27 = vsel %vm21302_vm4, %v1038_v61, %v1042_v18  ;;  %v680_v38 = vunpack.c.l.b16 %v603_v32  ;;  %v681_v39 = vunpack.c.l.b16 %v604_v33  ;;  %v605_v61 = vpack.c.bf16 %v564_v57, %v564_v57  ;;  %v1774_v32 = vld [vmem:[%s21309_s28 + $0x20] sm:$0xf] }
  0x28   : > { %v1282_v28 = vrot.slane %v14618_v21, 2  ;;  %v1283_v29 = vrot.slane %v14615_v20, 3  ;;  %v1161_v30 = vsel %vm21305_vm3, %v1158_v0, %v1160_v19  ;;  %v1401_v46 = vsel %vm21304_vm1, %v1398_v40, %v1400_v37 }
  0x29   : > { %1238 = vrot.lane.b32.xlu2 %v1159_v7, %s14413_s22  ;;  %v1044_v47 = vrot.slane %v14618_v21, 1  ;;  %v1045_v48 = vrot.slane %v14615_v20, 2  ;;  %v14639_v42 = vpack.c.b16 %v681_v39, %v680_v38  ;;  %v762_v1 = vrot.slane %v14615_v20, 1  ;;  %v566_v20 = vld [vmem:[%s14526_s30 + $0x70] sm:$0xff] }
  0x2a   : > { %v1284_v36 = vor.u32 %v1283_v29, %v1282_v28  ;;  %v682_v2 = vunpack.c.l.b16 %v605_v61  ;;  %v607_v28 = vpack.c.bf16 %v566_v20, %v566_v20  ;;  %v608_v29 = vpack.c.bf16 %v567_v22, %v567_v22 }
  0x2b   : > { %v1046_v49 = vor.u32 %v1045_v48, %v1044_v47  ;;  %v14646_v50 = vshll.u32 %v14639_v42, 16  ;;  %v14649_v40 = vshrl.u32 %v14639_v42, 16  ;;  %v1162_v55 = vrot.slane %v14639_v42, 2 }
  0x2c   : > { %1118 = vrot.lane.b32.xlu1 %v1039_v3, %s14414_s23  ;;  %v1285_v43 = vsel %vm21303_vm5, %v1280_v63, %v1284_v36  ;;  %v1402_v63 = vrot.slane %v14639_v42, 3  ;;  %v683_v3 = vunpack.c.l.b16 %v606_v62  ;;  %v922_v11 = vrot.slane %v14639_v42, 1  ;;  %v13670_v62 = vld [vmem:[%s21309_s28 + $0x8] sm:$0xff] }
  0x2d   : > { %1360 = vrot.lane.b32.xlu0 %v1281_v4, %s14415_s24  ;;  %v1047_v52 = vsel %vm21302_vm4, %v1042_v18, %v1046_v49  ;;  %v1286_v53 = vrot.slane %v14649_v40, 2  ;;  %v1287_v54 = vrot.slane %v14646_v50, 3  ;;  %v1163_v59 = vsel %vm21305_vm3, %v1160_v19, %v1162_v55 }
  0x2e   : > { %v1403_v4 = vsel %vm21304_vm1, %v1400_v37, %v1402_v63  ;;  %v1048_v6 = vrot.slane %v14649_v40, 1  ;;  %v14673_v8 = vpack.c.b16 %v683_v3, %v682_v2  ;;  %v766_v33 = vor.u32 %v14618_v21, %v762_v1 }
  0x2f   : > { %v1288_v56 = vor.u32 %v1287_v54, %v1286_v53  ;;  %v685_v37 = vunpack.c.l.b16 %v608_v29  ;;  %v770_v38 = vrot.slane %v14646_v50, 1  ;;  %v568_v53 = vld [vmem:[%s14526_s30 + $0x80] sm:$0xff]  ;;  %v569_v54 = vld [vmem:[%s14526_s30 + $0x88] sm:$0xff] }
  0x30   : > { %v14682_v10 = vshrl.u32 %v14673_v8, 16  ;;  %v1404_v18 = vrot.slane %v14673_v8, 3  ;;  %v1164_v19 = vrot.slane %v14673_v8, 2  ;;  %v610_v61 = vpack.c.bf16 %v569_v54, %v569_v54 }
  0x31   : > { %878 = vrot.lane.b32.xlu2 %v747_v13, %s14412_s21  ;;  %v1289_v60 = vsel %vm21303_vm5, %v1284_v36, %v1288_v56  ;;  %v684_v36 = vunpack.c.l.b16 %v607_v28 }
  0x32   : > { %v1290_v13 = vrot.slane %v14682_v10, 2 }
  0x33   : > { %v14716_v48 = vpack.c.b16 %v685_v37, %v684_v36 }
  0x34   : > { %998 = vrot.lane.b32.xlu1 %v919_v16, %s14408_s18 }
  0x35   : > { %952 = vrot.lane.b32.xlu0 %v14553_v35, %s14409_s19  ;;  %v754_v35 = vrot.slane %v14569_v44, 1  ;;  %v920_v44 = vrot.slane %v14607_v17, 1 }
  0x37   : > { %v755_v41 = vsel %vm727_vm2, %v750_v34, %v754_v35  ;;  %v921_v51 = vsel %vm912_vm0, %v918_v9, %v920_v44  ;;  %v758_v0 = vor.u32 %v14572_v45, %v754_v35  ;;  %v14679_v9 = vshll.u32 %v14673_v8, 16 }
  0x38   : > { %v923_v15 = vsel %vm912_vm0, %v920_v44, %v922_v11  ;;  %v1796_v34 = vunpack.c.l.b16 %v1774_v32  ;;  %v924_v35 = vrot.slane %v14673_v8, 1  ;;  %v13672_v44 = vld [vmem:[%s21309_s28 + $0x18] sm:$0xff] }
  0x39   : > { %1120 = vrot.lane.b32.xlu2 %v1043_v27, %s14414_s23  ;;  %v763_v5 = vsel %vm727_vm2, %v758_v0, %v762_v1  ;;  %v1291_v14 = vrot.slane %v14679_v9, 3  ;;  %v1405_v27 = vsel %vm21304_vm1, %v1402_v63, %v1404_v18  ;;  %v1406_v63 = vrot.slane %v14716_v48, 3 }
  0x3a   : > { %v1801_v39 = vpack.c.b16 %v1796_v34, %v1796_v34  ;;  %v925_v21 = vsel %vm912_vm0, %v922_v11, %v924_v35  ;;  %v774_v1 = vor.u32 %v14649_v40, %v770_v38  ;;  %v778_v2 = vrot.slane %v14679_v9, 1  ;;  %v571_v34 = vld [vmem:[%s14526_s30 + $0x98] sm:$0xff] }
  0x3c   : > { %1240 = vrot.lane.b32.xlu1 %v1161_v30, %s14413_s22  ;;  %v1845_v47 = vsel %vm21301_vm6, %v1801_v39, 0  ;;  %v779_v11 = vsel %vm727_vm2, %v774_v1, %v778_v2 }
  0x3d   : > { %1194 = vrot.lane.b32.xlu0 %v1159_v7, %s14410_s1  ;;  %v1049_v7 = vrot.slane %v14646_v50, 2  ;;  %1850 = vmatpush.bf16.msra.mxu0 %v1845_v47  ;;  %v1166_v50 = vrot.slane %v14716_v48, 2 }
  0x3f   : > { %v1050_v45 = vor.u32 %v1049_v7, %v1048_v6  ;;  %v13669_v6 = vld [vmem:[%s21309_s28] sm:$0xff]  ;;  %v1407_v7 = vsel %vm21304_vm1, %v1404_v18, %v1406_v63 }
  0x41   : > { %1362 = vrot.lane.b32.xlu2 %v1285_v43, %s14415_s24  ;;  %v1051_v12 = vsel %vm21302_vm4, %v1046_v49, %v1050_v45  ;;  %v1052_v43 = vrot.slane %v14682_v10, 1  ;;  %1851 = vmatpush.bf16.msra.mxu0 %v13672_v44 }
  0x44   : > { %880 = vrot.lane.b32.xlu1 %v755_v41, %s14412_s21  ;;  %v771_v41 = vsel %vm727_vm2, %v766_v33, %v770_v38  ;;  %v570_v33 = vld [vmem:[%s14526_s30 + $0x90] sm:$0xff]  ;;  %v612_v38 = vpack.c.bf16 %v571_v34, %v571_v34 }
  0x45   : > { %1436 = vrot.lane.b32.xlu0 %v1401_v46, %s14411_s20  ;;  %v1053_v46 = vrot.slane %v14679_v9, 2  ;;  %v611_v37 = vpack.c.bf16 %v570_v33, %v570_v33 }
  0x47   : > { %v1054_v49 = vor.u32 %v1053_v46, %v1052_v43  ;;  %v688_v47 = vunpack.c.l.b16 %v611_v37 }
  0x49   : > { %954 = vrot.lane.b32.xlu2 %v919_v16, %s14409_s19  ;;  %v14692_v16 = vor.u32 %v1291_v14, %v1290_v13  ;;  %v926_v13 = vrot.slane %v14716_v48, 1 }
  0x4b   : > { %v1293_v24 = vsel %vm21303_vm5, %v1288_v56, %v14692_v16  ;;  %v1055_v56 = vsel %vm21302_vm4, %v1050_v45, %v1054_v49 }
  0x4c   : > { %1122 = vrot.lane.b32.xlu1 %v1047_v52, %s14414_s23  ;;  %v14729_v52 = vshrl.u32 %v14716_v48, 16 }
  0x4d   : > { %1000 = vrot.lane.b32.xlu0 %v921_v51, %s14408_s18 }
  0x4e   : > { %v1294_v57 = vrot.slane %v14729_v52, 2  ;;  %v1056_v40 = vrot.slane %v14729_v52, 1 }
  0x51   : > { %1196 = vrot.lane.b32.xlu2 %v1161_v30, %s14410_s1  ;;  %v1165_v30 = vsel %vm21305_vm3, %v1162_v55, %v1164_v19  ;;  %v13671_v55 = vld [vmem:[%s21309_s28 + $0x10] sm:$0xff] }
  0x52   : > { %1852 = vmatpush.bf16.msra.mxu0 %v13671_v55 }
  0x54   : > { %1364 = vrot.lane.b32.xlu1 %v1289_v60, %s14415_s24  ;;  %v609_v60 = vpack.c.bf16 %v568_v53, %v568_v53 }
  0x55   : > { %1242 = vrot.lane.b32.xlu0 %v1163_v59, %s14413_s22 }
  0x56   : > { %1853 = vmatpush.bf16.msra.mxu0 %v13670_v62 }
  0x59   : > { %1438 = vrot.lane.b32.xlu2 %v1403_v4, %s14411_s20  ;;  %v686_v4 = vunpack.c.l.b16 %v609_v60 }
  0x5a   : > { %1854 = vmatpush.bf16.msra.mxu0 %v13669_v6 }
  0x5c   : > { %956 = vrot.lane.b32.xlu1 %v921_v51, %s14409_s19  ;;  %v14726_v51 = vshll.u32 %v14716_v48, 16 }
  0x5d   : > { %882 = vrot.lane.b32.xlu0 %v763_v5, %s14412_s21  ;;  %v687_v5 = vunpack.c.l.b16 %v610_v61 }
  0x5e   : > { %v1295_v58 = vrot.slane %v14726_v51, 3  ;;  %v1057_v9 = vrot.slane %v14726_v51, 2  ;;  %v786_v43 = vrot.slane %v14726_v51, 1 }
  0x60   : > { %v1296_v0 = vor.u32 %v1295_v58, %v1294_v57  ;;  %v1058_v14 = vor.u32 %v1057_v9, %v1056_v40 }
  0x61   : > { %1002 = vrot.lane.b32.xlu2 %v923_v15, %s14408_s18 }
  0x62   : > { %v1297_v45 = vsel %vm21303_vm5, %v14692_v16, %v1296_v0  ;;  %v1059_v20 = vsel %vm21302_vm4, %v1054_v49, %v1058_v14 }
  0x64   : > { %1198 = vrot.lane.b32.xlu1 %v1163_v59, %s14410_s1  ;;  %v1167_v59 = vsel %vm21305_vm3, %v1164_v19, %v1166_v50  ;;  %v927_v19 = vsel %vm912_vm0, %v924_v35, %v926_v13 }
  0x65   : > { %1124 = vrot.lane.b32.xlu0 %v1051_v12, %s14414_s23  ;;  %v14760_v12 = vpack.c.b16 %v687_v5, %v686_v4 }
  0x67   : > { %v14770_v16 = vshrl.u32 %v14760_v12, 16  ;;  %v1408_v39 = vrot.slane %v14760_v12, 3 }
  0x69   : > { %1244 = vrot.lane.b32.xlu2 %v1165_v30, %s14413_s22  ;;  %v1298_v22 = vrot.slane %v14770_v16, 2  ;;  %v1060_v53 = vrot.slane %v14770_v16, 1  ;;  %v1409_v55 = vsel %vm21304_vm1, %v1406_v63, %v1408_v39 }
  0x6c   : > { %1440 = vrot.lane.b32.xlu1 %v1405_v27, %s14411_s20  ;;  %v1168_v27 = vrot.slane %v14760_v12, 2 }
  0x6d   : > { %1366 = vrot.lane.b32.xlu0 %v1293_v24, %s14415_s24 }
  0x6e   : > { %v1169_v35 = vsel %vm21305_vm3, %v1166_v50, %v1168_v27 }
  0x71   : > { %884 = vrot.lane.b32.xlu2 %v771_v41, %s14412_s21  ;;  %v782_v41 = vor.u32 %v14682_v10, %v778_v2 }
  0x73   : > { %v787_v10 = vsel %vm727_vm2, %v782_v41, %v786_v43 }
  0x74   : > { %1004 = vrot.lane.b32.xlu1 %v925_v21, %s14408_s18 }
  0x75   : > { %958 = vrot.lane.b32.xlu0 %v923_v15, %s14409_s19  ;;  %v14767_v15 = vshll.u32 %v14760_v12, 16 }
  0x77   : > { %v1299_v24 = vrot.slane %v14767_v15, 3  ;;  %v1061_v54 = vrot.slane %v14767_v15, 2 }
  0x79   : > { %1126 = vrot.lane.b32.xlu2 %v1055_v56, %s14414_s23  ;;  %v14782_v28 = vor.u32 %v1299_v24, %v1298_v22  ;;  %v573_v22 = vld [vmem:[%s14526_s30 + $0xa8] sm:$0xff] }
  0x7b   : > { %v14749_v3 = vpop.permute.xlu2 %1192  ;;  %v1301_v36 = vsel %vm21303_vm5, %v1296_v0, %v14782_v28  ;;  %v928_v0 = vrot.slane %v14760_v12, 1 }
  0x7c   : > { %1246 = vrot.lane.b32.xlu1 %v1167_v59, %s14413_s22 }
  0x7d   : > { %1200 = vrot.lane.b32.xlu0 %v1165_v30, %s14410_s1 }
  0x81   : > { %1368 = vrot.lane.b32.xlu2 %v1297_v45, %s14415_s24 }
  0x83   : > { %v1239_v18 = vpop.permute.xlu2 %1238 }
  0x84   : > { %886 = vrot.lane.b32.xlu1 %v779_v11, %s14412_s21  ;;  %v929_v11 = vsel %vm912_vm0, %v926_v13, %v928_v0 }
  0x85   : > { %1442 = vrot.lane.b32.xlu0 %v1407_v7, %s14411_s20 }
  0x89   : > { %960 = vrot.lane.b32.xlu2 %v925_v21, %s14409_s19  ;;  %v689_v21 = vunpack.c.l.b16 %v612_v38 }
  0x8b   : > { %v14784_v29 = vpop.permute.xlu2 %878  ;;  %v14809_v56 = vpack.c.b16 %v689_v21, %v688_v47  ;;  %v794_v47 = vrot.slane %v14767_v15, 1 }
  0x8c   : > { %1128 = vrot.lane.b32.xlu1 %v1059_v20, %s14414_s23  ;;  %v572_v20 = vld [vmem:[%s14526_s30 + $0xa0] sm:$0xff]  ;;  %v1474_v24 = vsel %vm1470_vm7, %v14536_v23, %v14784_v29 }
  0x8d   : > { %1006 = vrot.lane.b32.xlu0 %v927_v19, %s14408_s18  ;;  %v14818_v58 = vshll.u32 %v14809_v56, 16  ;;  %v1170_v13 = vrot.slane %v14809_v56, 2 }
  0x8e   : > { %v997_v30 = vpop.permute.xlu1 %996 }
  0x8f   : > { %v951_v32 = vpop.permute.xlu0 %950  ;;  %v1303_v7 = vrot.slane %v14818_v58, 3  ;;  %v1171_v34 = vsel %vm21305_vm3, %v1168_v27, %v1170_v13  ;;  %v930_v27 = vrot.slane %v14809_v56, 1 }
  0x91   : > { %1202 = vrot.lane.b32.xlu2 %v1167_v59, %s14410_s1  ;;  %v14821_v59 = vshrl.u32 %v14809_v56, 16 }
  0x93   : > { %v14799_v46 = vpop.permute.xlu2 %1120  ;;  %v1302_v6 = vrot.slane %v14821_v59, 2 }
  0x94   : > { %1370 = vrot.lane.b32.xlu1 %v1301_v36, %s14415_s24  ;;  %v614_v36 = vpack.c.bf16 %v573_v22, %v573_v22 }
  0x95   : > { %1248 = vrot.lane.b32.xlu0 %v1169_v35, %s14413_s22  ;;  %v14844_v40 = vor.u32 %v1303_v7, %v1302_v6 }
  0x96   : > { %v1435_v44 = vpop.permute.xlu1 %1434  ;;  %v691_v41 = vunpack.c.l.b16 %v614_v36 }
  0x97   : > { %v877_v49 = vpop.permute.xlu0 %876 }
  0x98   : > { %v1472_v50 = vsel %vm1470_vm7, %v14540_v26, %v877_v49  ;;  %v14815_v26 = vor.u32 %v1061_v54, %v1060_v53  ;;  %v14885_v49 = vsel %vm912_vm0, %v928_v0, %v930_v27  ;;  %v574_v0 = vld [vmem:[%s14526_s30 + $0xb0] sm:$0xff] }
  0x99   : > { %v1509_v57 = vsel %vm1507_vm8, %v1472_v50, %v951_v32  ;;  %1444 = vrot.lane.b32.xlu2 %v1409_v55, %s14411_s20  ;;  %v1305_v32 = vsel %vm21303_vm5, %v14782_v28, %v14844_v40  ;;  %v790_v28 = vor.u32 %v14729_v52, %v786_v43  ;;  %v1064_v52 = vrot.slane %v14821_v59, 1 }
  0x9a   : > { %v1546_v62 = vsel %vm1544_vm9, %v1509_v57, %v997_v30  ;;  %v1063_v4 = vsel %vm21302_vm4, %v1058_v14, %v14815_v26  ;;  %v1065_v43 = vrot.slane %v14818_v58, 2  ;;  %v615_v6 = vpack.c.bf16 %v574_v0, %v574_v0 }
  0x9b   : > { %v14823_v60 = vpop.permute.xlu2 %1362  ;;  %v795_v51 = vsel %vm727_vm2, %v790_v28, %v794_v47 }
  0x9c   : > { %962 = vrot.lane.b32.xlu1 %v927_v19, %s14409_s19  ;;  %v1410_v19 = vrot.slane %v14809_v56, 3  ;;  %v692_v22 = vunpack.c.l.b16 %v615_v6 }
  0x9d   : > { %888 = vrot.lane.b32.xlu0 %v787_v10, %s14412_s21 }
  0x9e   : > { %v1119_v61 = vpop.permute.xlu1 %1118  ;;  %v1411_v33 = vsel %vm21304_vm1, %v1408_v39, %v1410_v19 }
  0x9f   : > { %v1361_v63 = vpop.permute.xlu0 %1360  ;;  %v1583_v1 = vsel %vm1581_vm10, %v1546_v62, %v1119_v61 }
  0xa0   : > { %v1620_v2 = vsel %vm1618_vm11, %v1583_v1, %v14749_v3  ;;  %v575_v1 = vld [vmem:[%s14526_s30 + $0xb8] sm:$0xff] }
  0xa1   : > { %v1657_v5 = vsel %vm1655_vm12, %v1620_v2, %v1239_v18  ;;  %1008 = vrot.lane.b32.xlu2 %v929_v11, %s14408_s18  ;;  %v616_v7 = vpack.c.bf16 %v575_v1, %v575_v1 }
  0xa2   : > { %v1694_v45 = vsel %vm1692_vm13, %v1657_v5, %v1361_v63 }
  0xa3   : > { %v1731_v3 = vsel %vm1729_vm14, %v1694_v45, %v1435_v44  ;;  %v14846_v9 = vpop.permute.xlu2 %954 }
  0xa4   : > { %10833 = vmatmul.msk.bf16.vlgmr.msra.gmra.mxu0 %vm1806_vm15, %v1731_v3  ;;  %1204 = vrot.lane.b32.xlu1 %v1169_v35, %s14410_s1  ;;  %v613_v35 = vpack.c.bf16 %v572_v20, %v572_v20  ;;  %v802_v20 = vrot.slane %v14818_v58, 1 }
  0xa5   : > { %1130 = vrot.lane.b32.xlu0 %v1063_v4, %s14414_s23 }
  0xa6   : > { %v999_v18 = vpop.permute.xlu1 %998  ;;  %v690_v39 = vunpack.c.l.b16 %v613_v35 }
  0xa7   : > { %v953_v14 = vpop.permute.xlu0 %952 }
  0xa8   : > { %v1511_v30 = vsel %vm1507_vm8, %v1474_v24, %v953_v14  ;;  %v14887_v50 = vpack.c.b16 %v691_v41, %v690_v39  ;;  %v693_v24 = vunpack.c.l.b16 %v616_v7 }
  0xa9   : > { %1250 = vrot.lane.b32.xlu2 %v1171_v34, %s14413_s22  ;;  %v1548_v23 = vsel %vm1544_vm9, %v1511_v30, %v999_v18 }
  0xaa   : > { %v1585_v21 = vsel %vm1581_vm10, %v1548_v23, %v14799_v46  ;;  %v1066_v46 = vor.u32 %v1065_v43, %v1064_v52  ;;  %v1172_v57 = vrot.slane %v14887_v50, 2  ;;  %v14898_v61 = vshll.u32 %v14887_v50, 16 }
  0xab   : > { %v14872_v29 = vpop.permute.xlu2 %1196  ;;  %v14901_v62 = vshrl.u32 %v14887_v50, 16  ;;  %v14937_v35 = vpack.c.b16 %v693_v24, %v692_v22 }
  0xac   : > { %1446 = vrot.lane.b32.xlu1 %v1411_v33, %s14411_s20  ;;  %v1067_v2 = vsel %vm21302_vm4, %v14815_v26, %v1066_v46  ;;  %v1307_v4 = vrot.slane %v14898_v61, 3  ;;  %v1173_v5 = vsel %vm21305_vm3, %v1170_v13, %v1172_v57  ;;  %v1412_v26 = vrot.slane %v14887_v50, 3 }
  0xad   : > { %1372 = vrot.lane.b32.xlu0 %v1305_v32, %s14415_s24  ;;  %v798_v13 = vor.u32 %v14770_v16, %v794_v47  ;;  %v1068_v58 = vrot.slane %v14901_v62, 1  ;;  %v14950_v39 = vshrl.u32 %v14937_v35, 16  ;;  %v1174_v43 = vrot.slane %v14937_v35, 2 }
  0xae   : > { %v1241_v38 = vpop.permute.xlu1 %1240  ;;  %v1413_v33 = vsel %vm21304_vm1, %v1410_v19, %v1412_v26 }
  0xaf   : > { %v1195_v37 = vpop.permute.xlu0 %1194  ;;  %v803_v16 = vsel %vm727_vm2, %v798_v13, %v802_v20 }
  0xb0   : > { %v1622_v44 = vsel %vm1618_vm11, %v1585_v21, %v1195_v37 }
  0xb1   : > { %v1659_v15 = vsel %vm1655_vm12, %v1622_v44, %v1241_v38  ;;  %890 = vrot.lane.b32.xlu2 %v795_v51, %s14412_s21  ;;  %v14947_v38 = vshll.u32 %v14937_v35, 16  ;;  %v1310_v51 = vrot.slane %v14950_v39, 2 }
  0xb2   : > { %v1696_v54 = vsel %vm1692_vm13, %v1659_v15, %v14823_v60  ;;  %v1306_v60 = vrot.slane %v14901_v62, 2 }
  0xb3   : > { %v1439_v53 = vpop.permute.xlu2 %1438  ;;  %v1311_v52 = vrot.slane %v14947_v38, 3 }
  0xb4   : > { %1010 = vrot.lane.b32.xlu1 %v14885_v49, %s14408_s18 }
  0xb5   : > { %964 = vrot.lane.b32.xlu0 %v929_v11, %s14409_s19  ;;  %v1308_v11 = vor.u32 %v1307_v4, %v1306_v60  ;;  %v1414_v60 = vrot.slane %v14937_v35, 3  ;;  %v810_v4 = vrot.slane %v14898_v61, 1 }
  0xb6   : > { %v881_v10 = vpop.permute.xlu1 %880 }
  0xb7   : > { %v1437_v55 = vpop.permute.xlu0 %1436  ;;  %v1476_v45 = vsel %vm1470_vm7, %v14538_v25, %v881_v10  ;;  %v1309_v32 = vsel %vm21303_vm5, %v14844_v40, %v1308_v11  ;;  %v932_v40 = vrot.slane %v14887_v50, 1  ;;  %v577_v10 = vld [vmem:[%s14526_s30 + $0xc8] sm:$0xff] }
  0xb8   : > { %v1733_v63 = vsel %vm1729_vm14, %v1696_v54, %v1437_v55  ;;  %v1513_v25 = vsel %vm1507_vm8, %v1476_v45, %v14846_v9  ;;  %v1312_v54 = vor.u32 %v1311_v52, %v1310_v51  ;;  %v576_v55 = vld [vmem:[%s14526_s30 + $0xc0] sm:$0xff]  ;;  %v618_v0 = vpack.c.bf16 %v577_v10, %v577_v10  ;;  %v579_v51 = vld [vmem:[%s14526_s30 + $0xd8] sm:$0xff] }
  0xb9   : > { %10834 = vmatmul.msk.bf16.gmra.mxu0 %vm1806_vm15, %v1733_v63  ;;  %1132 = vrot.lane.b32.xlu2 %v1067_v2, %s14414_s23  ;;  %v617_v63 = vpack.c.bf16 %v576_v55, %v576_v55 }
  0xba   : > { %v1313_v1 = vsel %vm21303_vm5, %v1308_v11, %v1312_v54  ;;  %v695_v7 = vunpack.c.l.b16 %v618_v0 }
  0xbb   : > { %v14920_v3 = vpop.permute.xlu2 %1002 }
  0xbc   : > { %1252 = vrot.lane.b32.xlu1 %v1173_v5, %s14413_s22 }
  0xbd   : > { %1206 = vrot.lane.b32.xlu0 %v1171_v34, %s14410_s1  ;;  %v1069_v34 = vrot.slane %v14898_v61, 2  ;;  %v1073_v61 = vrot.slane %v14947_v38, 2 }
  0xbe   : > { %v1123_v18 = vpop.permute.xlu1 %1122 }
  0xbf   : > { %v1001_v14 = vpop.permute.xlu0 %1000  ;;  %v1070_v37 = vor.u32 %v1069_v34, %v1068_v58 }
  0xc0   : > { %v1550_v30 = vsel %vm1544_vm9, %v1513_v25, %v1001_v14 }
  0xc1   : > { %v1587_v9 = vsel %vm1581_vm10, %v1550_v30, %v1123_v18  ;;  %1374 = vrot.lane.b32.xlu2 %v1309_v32, %s14415_s24  ;;  %v1071_v44 = vsel %vm21302_vm4, %v1066_v46, %v1070_v37  ;;  %v1415_v18 = vsel %vm21304_vm1, %v1412_v26, %v1414_v60 }
  0xc2   : > { %v1624_v19 = vsel %vm1618_vm11, %v1587_v9, %v14872_v29  ;;  %v933_v29 = vsel %vm912_vm0, %v930_v27, %v932_v40 }
  0xc3   : > { %v1245_v36 = vpop.permute.xlu2 %1244 }
  0xc4   : > { %892 = vrot.lane.b32.xlu1 %v803_v16, %s14412_s21  ;;  %v934_v16 = vrot.slane %v14937_v35, 1 }
  0xc5   : > { %1448 = vrot.lane.b32.xlu0 %v1413_v33, %s14411_s20 }
  0xc6   : > { %v1365_v28 = vpop.permute.xlu1 %1364 }
  0xc7   : > { %v1243_v23 = vpop.permute.xlu0 %1242 }
  0xc8   : > { %v1661_v41 = vsel %vm1655_vm12, %v1624_v19, %v1243_v23 }
  0xc9   : > { %v1698_v47 = vsel %vm1692_vm13, %v1661_v41, %v1365_v28  ;;  %966 = vrot.lane.b32.xlu2 %v14885_v49, %s14409_s19  ;;  %v1175_v49 = vsel %vm21305_vm3, %v1172_v57, %v1174_v43  ;;  %v694_v57 = vunpack.c.l.b16 %v617_v63 }
  0xca   : > { %v1735_v21 = vsel %vm1729_vm14, %v1698_v47, %v1439_v53 }
  0xcb   : > { %10835 = vmatmul.msk.bf16.gmra.mxu0 %vm1806_vm15, %v1735_v21  ;;  %v885_v15 = vpop.permute.xlu2 %884 }
  0xcc   : > { %1134 = vrot.lane.b32.xlu1 %v1071_v44, %s14414_s23  ;;  %v578_v44 = vld [vmem:[%s14526_s30 + $0xd0] sm:$0xff] }
  0xcd   : > { %1012 = vrot.lane.b32.xlu0 %v933_v29, %s14408_s18  ;;  %v619_v10 = vpack.c.bf16 %v578_v44, %v578_v44 }
  0xce   : > { %v957_v27 = vpop.permute.xlu1 %956 }
  0xcf   : > { %v883_v53 = vpop.permute.xlu0 %882 }
  0xd0   : > { %v1478_v46 = vsel %vm1470_vm7, %v14545_v31, %v883_v53  ;;  %v806_v31 = vor.u32 %v14821_v59, %v802_v20  ;;  %v1072_v59 = vrot.slane %v14950_v39, 1  ;;  %v14995_v20 = vpack.c.b16 %v695_v7, %v694_v57 }
  0xd1   : > { %1208 = vrot.lane.b32.xlu2 %v1173_v5, %s14410_s1  ;;  %v1515_v2 = vsel %vm1507_vm8, %v1478_v46, %v957_v27  ;;  %v620_v46 = vpack.c.bf16 %v579_v51, %v579_v51 }
  0xd2   : > { %v1552_v5 = vsel %vm1544_vm9, %v1515_v2, %v14920_v3  ;;  %v811_v13 = vsel %vm727_vm2, %v806_v31, %v810_v4  ;;  %v15001_v3 = vor.u32 %v1073_v61, %v1072_v59  ;;  %v15004_v26 = vshll.u32 %v14995_v20, 16 }
  0xd3   : > { %v1127_v6 = vpop.permute.xlu2 %1126  ;;  %v15007_v24 = vshrl.u32 %v14995_v20, 16  ;;  %v1416_v21 = vrot.slane %v14995_v20, 3  ;;  %v936_v0 = vrot.slane %v14995_v20, 1  ;;  %v818_v2 = vrot.slane %v14947_v38, 1 }
  0xd4   : > { %1376 = vrot.lane.b32.xlu1 %v1313_v1, %s14415_s24  ;;  %v1075_v9 = vsel %vm21302_vm4, %v1070_v37, %v15001_v3  ;;  %v1315_v23 = vrot.slane %v15004_v26, 3  ;;  %v696_v1 = vunpack.c.l.b16 %v619_v10 }
  0xd5   : > { %1254 = vrot.lane.b32.xlu0 %v1175_v49, %s14413_s22  ;;  %v1314_v19 = vrot.slane %v15007_v24, 2  ;;  %v1417_v27 = vsel %vm21304_vm1, %v1414_v60, %v1416_v21  ;;  %v15060_v7 = vsel %vm912_vm0, %v934_v16, %v936_v0  ;;  %v822_v44 = vor.u32 %v14950_v39, %v818_v2 }
  0xd6   : > { %v1199_v14 = vpop.permute.xlu1 %1198 }
  0xd7   : > { %v1125_v45 = vpop.permute.xlu0 %1124  ;;  %v15024_v28 = vor.u32 %v1315_v23, %v1314_v19 }
  0xd8   : > { %v1589_v11 = vsel %vm1581_vm10, %v1552_v5, %v1125_v45 }
  0xd9   : > { %v1626_v22 = vsel %vm1618_vm11, %v1589_v11, %v1199_v14  ;;  %1450 = vrot.lane.b32.xlu2 %v1415_v18, %s14411_s20  ;;  %v1317_v53 = vsel %vm21303_vm5, %v1312_v54, %v15024_v28 }
  0xda   : > { %v1663_v30 = vsel %vm1655_vm12, %v1626_v22, %v1245_v36  ;;  %v935_v36 = vsel %vm912_vm0, %v932_v40, %v934_v16  ;;  %v1480_v40 = vsel %vm1470_vm7, %v14607_v17, %v885_v15  ;;  %v814_v17 = vor.u32 %v14901_v62, %v810_v4 }
  0xdb   : > { %v1369_v25 = vpop.permute.xlu2 %1368  ;;  %v1076_v62 = vrot.slane %v15007_v24, 1  ;;  %v1077_v4 = vrot.slane %v15004_v26, 2 }
  0xdc   : > { %968 = vrot.lane.b32.xlu1 %v933_v29, %s14409_s19  ;;  %v1176_v29 = vrot.slane %v14995_v20, 2  ;;  %v819_v57 = vsel %vm727_vm2, %v814_v17, %v818_v2 }
  0xdd   : > { %894 = vrot.lane.b32.xlu0 %v811_v13, %s14412_s21 }
  0xde   : > { %v1441_v33 = vpop.permute.xlu1 %1440  ;;  %v1177_v55 = vsel %vm21305_vm3, %v1174_v43, %v1176_v29  ;;  %v697_v43 = vunpack.c.l.b16 %v620_v46 }
  0xdf   : > { %v1367_v32 = vpop.permute.xlu0 %1366 }
  0xe0   : > { %v1700_v58 = vsel %vm1692_vm13, %v1663_v30, %v1367_v32  ;;  %v15062_v45 = vpack.c.b16 %v697_v43, %v696_v1  ;;  %v580_v30 = vld [vmem:[%s14526_s30 + $0xe0] sm:$0xff]  ;;  %v581_v32 = vld [vmem:[%s14526_s30 + $0xe8] sm:$0xff] }
  0xe1   : > { %v1737_v34 = vsel %vm1729_vm14, %v1700_v58, %v1441_v33  ;;  %1014 = vrot.lane.b32.xlu2 %v935_v36, %s14408_s18 }
  0xe2   : > { %10836 = vmatmul.msk.bf16.gmra.mxu0 %vm1806_vm15, %v1737_v34  ;;  %v1178_v13 = vrot.slane %v15062_v45, 2  ;;  %v15072_v59 = vshll.u32 %v15062_v45, 16  ;;  %v15075_v61 = vshrl.u32 %v15062_v45, 16  ;;  %v621_v34 = vpack.c.bf16 %v580_v30, %v580_v30 }
  0xe3   : > { %v15026_v41 = vpop.permute.xlu2 %960 }
  0xe4   : > { %1210 = vrot.lane.b32.xlu1 %v1175_v49, %s14410_s1  ;;  %v1319_v16 = vrot.slane %v15072_v59, 3  ;;  %v1179_v58 = vsel %vm21305_vm3, %v1176_v29, %v1178_v13  ;;  %v826_v29 = vrot.slane %v15004_v26, 1  ;;  %v698_v51 = vunpack.c.l.b16 %v621_v34 }
  0xe5   : > { %1136 = vrot.lane.b32.xlu0 %v1075_v9, %s14414_s23  ;;  %v622_v9 = vpack.c.bf16 %v581_v32, %v581_v32  ;;  %v1080_v26 = vrot.slane %v15075_v61, 1 }
  0xe6   : > { %v1005_v37 = vpop.permute.xlu1 %1004  ;;  %v827_v39 = vsel %vm727_vm2, %v822_v44, %v826_v29 }
  0xe7   : > { %v959_v47 = vpop.permute.xlu0 %958 }
  0xe8   : > { %v1517_v52 = vsel %vm1507_vm8, %v1480_v40, %v959_v47  ;;  %v699_v40 = vunpack.c.l.b16 %v622_v9 }
  0xe9   : > { %1256 = vrot.lane.b32.xlu2 %v1177_v55, %s14413_s22  ;;  %v1554_v49 = vsel %vm1544_vm9, %v1517_v52, %v1005_v37 }
  0xea   : > { %v1591_v60 = vsel %vm1581_vm10, %v1554_v49, %v1127_v6  ;;  %v1078_v6 = vor.u32 %v1077_v4, %v1076_v62  ;;  %v15109_v10 = vpack.c.b16 %v699_v40, %v698_v51 }
  0xeb   : > { %v15048_v15 = vpop.permute.xlu2 %1202 }
  0xec   : > { %1452 = vrot.lane.b32.xlu1 %v1417_v27, %s14411_s20  ;;  %v1079_v33 = vsel %vm21302_vm4, %v15001_v3, %v1078_v6  ;;  %v1418_v3 = vrot.slane %v15062_v45, 3  ;;  %v15122_v1 = vshrl.u32 %v15109_v10, 16  ;;  %v1180_v4 = vrot.slane %v15109_v10, 2 }
  0xed   : > { %1378 = vrot.lane.b32.xlu0 %v1317_v53, %s14415_s24 }
  0xee   : > { %v1247_v63 = vpop.permute.xlu1 %1246  ;;  %v1419_v27 = vsel %vm21304_vm1, %v1416_v21, %v1418_v3  ;;  %v1084_v51 = vrot.slane %v15122_v1, 1 }
  0xef   : > { %v1201_v54 = vpop.permute.xlu0 %1200 }
  0xf0   : > { %v1628_v31 = vsel %vm1618_vm11, %v1591_v60, %v1201_v54 }
  0xf1   : > { %v1665_v38 = vsel %vm1655_vm12, %v1628_v31, %v1247_v63  ;;  %896 = vrot.lane.b32.xlu2 %v819_v57, %s14412_s21  ;;  %v15119_v63 = vshll.u32 %v15109_v10, 16  ;;  %v1322_v57 = vrot.slane %v15122_v1, 2 }
  0xf2   : > { %v1702_v5 = vsel %vm1692_vm13, %v1665_v38, %v1369_v25  ;;  %v1318_v25 = vrot.slane %v15075_v61, 2 }
  0xf3   : > { %v1445_v14 = vpop.permute.xlu2 %1444  ;;  %v1323_v62 = vrot.slane %v15119_v63, 3 }
  0xf4   : > { %1016 = vrot.lane.b32.xlu1 %v15060_v7, %s14408_s18  ;;  %v1320_v23 = vor.u32 %v1319_v16, %v1318_v25  ;;  %v1420_v25 = vrot.slane %v15109_v10, 3  ;;  %v834_v16 = vrot.slane %v15072_v59, 1 }
  0xf5   : > { %970 = vrot.lane.b32.xlu0 %v935_v36, %s14409_s19 }
  0xf6   : > { %v887_v18 = vpop.permute.xlu1 %886  ;;  %v1321_v53 = vsel %vm21303_vm5, %v15024_v28, %v1320_v23  ;;  %v938_v28 = vrot.slane %v15062_v45, 1 }
  0xf7   : > { %v1443_v11 = vpop.permute.xlu0 %1442  ;;  %v1482_v19 = vsel %vm1470_vm7, %v14639_v42, %v887_v18  ;;  %v583_v18 = vld [vmem:[%s14526_s30 + $0xf8] sm:$0xff] }
  0xf8   : > { %v1739_v22 = vsel %vm1729_vm14, %v1702_v5, %v1443_v11  ;;  %v1519_v52 = vsel %vm1507_vm8, %v1482_v19, %v15026_v41  ;;  %v1324_v5 = vor.u32 %v1323_v62, %v1322_v57  ;;  %v582_v11 = vld [vmem:[%s14526_s30 + $0xf0] sm:$0xff]  ;;  %v624_v30 = vpack.c.bf16 %v583_v18, %v583_v18  ;;  %v585_v57 = vld [vmem:[%s14526_s30 + $0x108] sm:$0xff] }
  0xf9   : > { %10837 = vmatmul.msk.bf16.gmra.mxu0 %vm1806_vm15, %v1739_v22  ;;  %1138 = vrot.lane.b32.xlu2 %v1079_v33, %s14414_s23  ;;  %v623_v22 = vpack.c.bf16 %v582_v11, %v582_v11 }
  0xfa   : > { %v1325_v32 = vsel %vm21303_vm5, %v1320_v23, %v1324_v5  ;;  %v701_v9 = vunpack.c.l.b16 %v624_v30 }
  0xfb   : > { %v1009_v36 = vpop.permute.xlu2 %1008 }
  0xfc   : > { %1258 = vrot.lane.b32.xlu1 %v1179_v58, %s14413_s22 }
  0xfd   : > { %1212 = vrot.lane.b32.xlu0 %v1177_v55, %s14410_s1  ;;  %v1081_v55 = vrot.slane %v15072_v59, 2 }
  0xfe   : > { %v1129_v37 = vpop.permute.xlu1 %1128 }
  0xff   : > { %v1007_v47 = vpop.permute.xlu0 %1006  ;;  %v1082_v54 = vor.u32 %v1081_v55, %v1080_v26 }
 0x100   : > { %v1556_v42 = vsel %vm1544_vm9, %v1519_v52, %v1007_v47 }
 0x101   : > { %v1593_v41 = vsel %vm1581_vm10, %v1556_v42, %v1129_v37  ;;  %1380 = vrot.lane.b32.xlu2 %v1321_v53, %s14415_s24  ;;  %v1083_v31 = vsel %vm21302_vm4, %v1078_v6, %v1082_v54  ;;  %v1421_v37 = vsel %vm21304_vm1, %v1418_v3, %v1420_v25 }
 0x102   : > { %v1630_v21 = vsel %vm1618_vm11, %v1593_v41, %v15048_v15  ;;  %v939_v15 = vsel %vm912_vm0, %v936_v0, %v938_v28 }
 0x103   : > { %v1251_v46 = vpop.permute.xlu2 %1250 }
 0x104   : > { %898 = vrot.lane.b32.xlu1 %v827_v39, %s14412_s21 }
 0x105   : > { %1454 = vrot.lane.b32.xlu0 %v1419_v27, %s14411_s20  ;;  %v940_v27 = vrot.slane %v15109_v10, 1 }
 0x106   : > { %v1371_v17 = vpop.permute.xlu1 %1370 }
 0x107   : > { %v1249_v49 = vpop.permute.xlu0 %1248 }
 0x108   : > { %v1667_v43 = vsel %vm1655_vm12, %v1630_v21, %v1249_v49 }
 0x109   : > { %v1704_v2 = vsel %vm1692_vm13, %v1667_v43, %v1371_v17  ;;  %972 = vrot.lane.b32.xlu2 %v15060_v7, %s14409_s19  ;;  %v1181_v7 = vsel %vm21305_vm3, %v1178_v13, %v1180_v4  ;;  %v700_v13 = vunpack.c.l.b16 %v623_v22 }
 0x10a   : > { %v1741_v60 = vsel %vm1729_vm14, %v1704_v2, %v1445_v14 }
 0x10b   : > { %10838 = vmatmul.msk.bf16.gmra.mxu0 %vm1806_vm15, %v1741_v60  ;;  %v891_v38 = vpop.permute.xlu2 %890  ;;  %v15166_v59 = vpack.c.b16 %v701_v9, %v700_v13 }
 0x10c   : > { %1140 = vrot.lane.b32.xlu1 %v1083_v31, %s14414_s23  ;;  %v584_v31 = vld [vmem:[%s14526_s30 + $0x100] sm:$0xff] }
 0x10d   : > { %1018 = vrot.lane.b32.xlu0 %v939_v15, %s14408_s18  ;;  %v15175_v3 = vshll.u32 %v15166_v59, 16  ;;  %v15178_v40 = vshrl.u32 %v15166_v59, 16  ;;  %v1182_v60 = vrot.slane %v15166_v59, 2  ;;  %v625_v18 = vpack.c.bf16 %v584_v31, %v584_v31 }
 0x10e   : > { %v963_v0 = vpop.permute.xlu1 %962  ;;  %v942_v22 = vrot.slane %v15166_v59, 1 }
 0x10f   : > { %v889_v14 = vpop.permute.xlu0 %888  ;;  %v1326_v21 = vrot.slane %v15178_v40, 2  ;;  %v1327_v49 = vrot.slane %v15175_v3, 3  ;;  %v1183_v11 = vsel %vm21305_vm3, %v1180_v4, %v1182_v60  ;;  %v702_v30 = vunpack.c.l.b16 %v625_v18 }
 0x110   : > { %v1484_v6 = vsel %vm1470_vm7, %v14673_v8, %v889_v14  ;;  %v830_v8 = vor.u32 %v15007_v24, %v826_v29  ;;  %v1085_v24 = vrot.slane %v15119_v63, 2  ;;  %v842_v4 = vrot.slane %v15119_v63, 1 }
 0x111   : > { %1214 = vrot.lane.b32.xlu2 %v1179_v58, %s14410_s1  ;;  %v1521_v33 = vsel %vm1507_vm8, %v1484_v6, %v963_v0  ;;  %v15195_v17 = vor.u32 %v1327_v49, %v1326_v21  ;;  %v626_v6 = vpack.c.bf16 %v585_v57, %v585_v57  ;;  %v15231_v9 = vsel %vm912_vm0, %v940_v27, %v942_v22 }
 0x112   : > { %v1558_v23 = vsel %vm1544_vm9, %v1521_v33, %v1009_v36  ;;  %v835_v44 = vsel %vm727_vm2, %v830_v8, %v834_v16  ;;  %v15172_v36 = vor.u32 %v1085_v24, %v1084_v51  ;;  %v846_v31 = vor.u32 %v15122_v1, %v842_v4 }
 0x113   : > { %v1133_v34 = vpop.permute.xlu2 %1132  ;;  %v1329_v14 = vsel %vm21303_vm5, %v1324_v5, %v15195_v17 }
 0x114   : > { %1382 = vrot.lane.b32.xlu1 %v1325_v32, %s14415_s24  ;;  %v1087_v41 = vsel %vm21302_vm4, %v1082_v54, %v15172_v36  ;;  %v1422_v54 = vrot.slane %v15166_v59, 3  ;;  %v703_v32 = vunpack.c.l.b16 %v626_v6 }
 0x115   : > { %1260 = vrot.lane.b32.xlu0 %v1181_v7, %s14413_s22 }
 0x116   : > { %v1205_v47 = vpop.permute.xlu1 %1204  ;;  %v1423_v0 = vsel %vm21304_vm1, %v1420_v25, %v1422_v54 }
 0x117   : > { %v1131_v19 = vpop.permute.xlu0 %1130 }
 0x118   : > { %v1595_v58 = vsel %vm1581_vm10, %v1558_v23, %v1131_v19  ;;  %v15233_v19 = vpack.c.b16 %v703_v32, %v702_v30 }
 0x119   : > { %v1632_v29 = vsel %vm1618_vm11, %v1595_v58, %v1205_v47  ;;  %1456 = vrot.lane.b32.xlu2 %v1421_v37, %s14411_s20 }
 0x11a   : > { %v1669_v42 = vsel %vm1655_vm12, %v1632_v29, %v1251_v46  ;;  %v941_v46 = vsel %vm912_vm0, %v938_v28, %v940_v27  ;;  %v1486_v28 = vsel %vm1470_vm7, %v14716_v48, %v891_v38  ;;  %v838_v48 = vor.u32 %v15075_v61, %v834_v16  ;;  %v587_v27 = vld [vmem:[%s14526_s30 + $0x118] sm:$0xff] }
 0x11b   : > { %v1375_v52 = vpop.permute.xlu2 %1374  ;;  %v1088_v61 = vrot.slane %v15178_v40, 1  ;;  %v1089_v16 = vrot.slane %v15175_v3, 2  ;;  %v1184_v37 = vrot.slane %v15233_v19, 2  ;;  %v15246_v51 = vshrl.u32 %v15233_v19, 16 }
 0x11c   : > { %974 = vrot.lane.b32.xlu1 %v939_v15, %s14409_s19  ;;  %v843_v13 = vsel %vm727_vm2, %v838_v48, %v842_v4  ;;  %v628_v21 = vpack.c.bf16 %v587_v27, %v587_v27 }
 0x11d   : > { %900 = vrot.lane.b32.xlu0 %v835_v44, %s14412_s21  ;;  %v15243_v44 = vshll.u32 %v15233_v19, 16  ;;  %v1092_v18 = vrot.slane %v15246_v51, 1 }
 0x11e   : > { %v1447_v26 = vpop.permute.xlu1 %1446 }
 0x11f   : > { %v1373_v53 = vpop.permute.xlu0 %1372 }
 0x120   : > { %v1706_v39 = vsel %vm1692_vm13, %v1669_v42, %v1373_v53  ;;  %v586_v53 = vld [vmem:[%s14526_s30 + $0x110] sm:$0xff] }
 0x121   : > { %v1743_v55 = vsel %vm1729_vm14, %v1706_v39, %v1447_v26  ;;  %1020 = vrot.lane.b32.xlu2 %v941_v46, %s14408_s18  ;;  %v15248_v24 = vpop.f32.mrf.mxu0  ;;  %v1330_v39 = vrot.slane %v15246_v51, 2  ;;  %v1331_v26 = vrot.slane %v15243_v44, 3 }
 0x122   : > { %10839 = vmatmul.msk.bf16.gmra.mxu0 %vm1806_vm15, %v1743_v55  ;;  %v1185_v55 = vsel %vm21305_vm3, %v1182_v60, %v1184_v37  ;;  %v850_v60 = vrot.slane %v15175_v3, 1 }
 0x123   : > { %v15197_v43 = vpop.permute.xlu2 %966 }
 0x124   : > { %1216 = vrot.lane.b32.xlu1 %v1181_v7, %s14410_s1  ;;  %v851_v3 = vsel %vm727_vm2, %v846_v31, %v850_v60 }
 0x125   : > { %1142 = vrot.lane.b32.xlu0 %v1087_v41, %s14414_s23  ;;  %v627_v41 = vpack.c.bf16 %v586_v53, %v586_v53 }
 0x126   : > { %v1011_v15 = vpop.permute.xlu1 %1010 }
 0x127   : > { %v965_v2 = vpop.permute.xlu0 %964  ;;  %v704_v57 = vunpack.c.l.b16 %v627_v41 }
 0x128   : > { %v1523_v62 = vsel %vm1507_vm8, %v1486_v28, %v965_v2  ;;  %v705_v28 = vunpack.c.l.b16 %v628_v21 }
 0x129   : > { %1262 = vrot.lane.b32.xlu2 %v1183_v11, %s14413_s22  ;;  %v1560_v7 = vsel %vm1544_vm9, %v1523_v62, %v1011_v15 }
 0x12a   : > { %v1597_v33 = vsel %vm1581_vm10, %v1560_v7, %v1133_v34  ;;  %v1090_v34 = vor.u32 %v1089_v16, %v1088_v61  ;;  %v15286_v6 = vpack.c.b16 %v705_v28, %v704_v57 }
 0x12b   : > { %v15219_v38 = vpop.permute.xlu2 %1208 }
 0x12c   : > { %1458 = vrot.lane.b32.xlu1 %v1423_v0, %s14411_s20  ;;  %v15298_v32 = vshll.u32 %v15286_v6, 16  ;;  %v15301_v4 = vshrl.u32 %v15286_v6, 16 }
 0x12d   : > { %1384 = vrot.lane.b32.xlu0 %v1329_v14, %s14415_s24 }
 0x12e   : > { %v1253_v25 = vpop.permute.xlu1 %1252 }
 0x12f   : > { %v1207_v5 = vpop.permute.xlu0 %1206 }
 0x130   : > { %v1634_v8 = vsel %vm1618_vm11, %v1597_v33, %v1207_v5 }
 0x131   : > { %v1671_v63 = vsel %vm1655_vm12, %v1634_v8, %v1253_v25  ;;  %902 = vrot.lane.b32.xlu2 %v843_v13, %s14412_s21 }
 0x132   : > { %v1708_v47 = vsel %vm1692_vm13, %v1671_v63, %v1375_v52  ;;  %v1091_v52 = vsel %vm21302_vm4, %v15172_v36, %v1090_v34  ;;  %v1424_v36 = vrot.slane %v15233_v19, 3  ;;  %v1334_v63 = vrot.slane %v15301_v4, 2 }
 0x133   : > { %v1451_v23 = vpop.permute.xlu2 %1450 }
 0x134   : > { %1022 = vrot.lane.b32.xlu1 %v15231_v9, %s14408_s18  ;;  %v1425_v1 = vsel %vm21304_vm1, %v1422_v54, %v1424_v36 }
 0x135   : > { %976 = vrot.lane.b32.xlu0 %v941_v46, %s14409_s19  ;;  %v1332_v46 = vor.u32 %v1331_v26, %v1330_v39 }
 0x136   : > { %v893_v29 = vpop.permute.xlu1 %892 }
 0x137   : > { %v1449_v58 = vpop.permute.xlu0 %1448  ;;  %v1488_v49 = vsel %vm1470_vm7, %v14760_v12, %v893_v29  ;;  %v1333_v0 = vsel %vm21303_vm5, %v15195_v17, %v1332_v46  ;;  %v944_v17 = vrot.slane %v15233_v19, 1 }
 0x138   : > { %v1745_v42 = vsel %vm1729_vm14, %v1708_v47, %v1449_v58  ;;  %v1525_v62 = vsel %vm1507_vm8, %v1488_v49, %v15197_v43  ;;  %v1093_v43 = vrot.slane %v15243_v44, 2  ;;  %v1335_v47 = vrot.slane %v15298_v32, 3 }
 0x139   : > { %10840 = vmatmul.msk.bf16.gmra.mxu0 %vm1806_vm15, %v1745_v42  ;;  %1144 = vrot.lane.b32.xlu2 %v1091_v52, %s14414_s23  ;;  %v945_v61 = vsel %vm912_vm0, %v942_v22, %v944_v17  ;;  %v588_v42 = vld [vmem:[%s14526_s30 + $0x120] sm:$0xff]  ;;  %v854_v49 = vor.u32 %v15178_v40, %v850_v60  ;;  %v1097_v60 = vrot.slane %v15298_v32, 2 }
 0x13a   : > { %v15295_v30 = vor.u32 %v1093_v43, %v1092_v18  ;;  %v15325_v29 = vor.u32 %v1335_v47, %v1334_v63  ;;  %v629_v52 = vpack.c.bf16 %v588_v42, %v588_v42 }
 0x13b   : > { %v15267_v2 = vpop.permute.xlu2 %1014 }
 0x13c   : > { %1264 = vrot.lane.b32.xlu1 %v1185_v55, %s14413_s22  ;;  %v1095_v16 = vsel %vm21302_vm4, %v1090_v34, %v15295_v30  ;;  %v589_v34 = vld [vmem:[%s14526_s30 + $0x128] sm:$0xff]  ;;  %v1337_v26 = vsel %vm21303_vm5, %v1332_v46, %v15325_v29  ;;  %v15349_v31 = vunpack.c.l.b16 %v629_v52 }
 0x13d   : > { %1218 = vrot.lane.b32.xlu0 %v1183_v11, %s14410_s1  ;;  %v15276_v11 = vpop.f32.mrf.mxu0  ;;  %v630_v39 = vpack.c.bf16 %v589_v34, %v589_v34 }
 0x13e   : > { %v1135_v12 = vpop.permute.xlu1 %1134 }
 0x13f   : > { %v1013_v15 = vpop.permute.xlu0 %1012  ;;  %v988_v46 = vunpack.c.l.b16 %v630_v39 }
 0x140   : > { %v1562_v14 = vsel %vm1544_vm9, %v1525_v62, %v1013_v15 }
 0x141   : > { %v1599_v7 = vsel %vm1581_vm10, %v1562_v14, %v1135_v12  ;;  %1386 = vrot.lane.b32.xlu2 %v1333_v0, %s14415_s24  ;;  %v15361_v14 = vpack.c.b16 %v988_v46, %v15349_v31 }
 0x142   : > { %v1636_v54 = vsel %vm1618_vm11, %v1599_v7, %v15219_v38 }
 0x143   : > { %v1257_v48 = vpop.permute.xlu2 %1256  ;;  %v15398_v42 = vrot.slane %v15361_v14, 2 }
 0x144   : > { %904 = vrot.lane.b32.xlu1 %v851_v3, %s14412_s21  ;;  %v1104_v3 = vshll.u32 %v15361_v14, 16 }
 0x145   : > { %1460 = vrot.lane.b32.xlu0 %v1425_v1, %s14411_s20  ;;  %v15305_v13 = vpop.f32.mrf.mxu0  ;;  %v1101_v1 = vshrl.u32 %v15361_v14, 16 }
 0x146   : > { %v1377_v25 = vpop.permute.xlu1 %1376 }
 0x147   : > { %v1255_v5 = vpop.permute.xlu0 %1254 }
 0x148   : > { %v1673_v33 = vsel %vm1655_vm12, %v1636_v54, %v1255_v5  ;;  %v15375_v54 = vrot.slane %v15286_v6, 1 }
 0x149   : > { %v1710_v8 = vsel %vm1692_vm13, %v1673_v33, %v1377_v25  ;;  %978 = vrot.lane.b32.xlu2 %v15231_v9, %s14409_s19 }
 0x14a   : > { %v1747_v38 = vsel %vm1729_vm14, %v1710_v8, %v1451_v23  ;;  %v1186_v23 = vrot.slane %v15286_v6, 2 }
 0x14b   : > { %10841 = vmatmul.msk.bf16.gmra.mxu0 %vm1806_vm15, %v1747_v38  ;;  %v15323_v58 = vpop.permute.xlu2 %896  ;;  %v1338_v38 = vrot.slane %v1101_v1, 2 }
 0x14c   : > { %1146 = vrot.lane.b32.xlu1 %v1095_v16, %s14414_s23  ;;  %v1187_v9 = vsel %vm21305_vm3, %v1184_v37, %v1186_v23  ;;  %v858_v37 = vrot.slane %v15243_v44, 1  ;;  %v1096_v44 = vrot.slane %v15301_v4, 1 }
 0x14d   : > { %1024 = vrot.lane.b32.xlu0 %v945_v61, %s14408_s18  ;;  %v15338_v41 = vpop.f32.mrf.mxu0 }
 0x14e   : > { %v969_v53 = vpop.permute.xlu1 %968  ;;  %v859_v40 = vsel %vm727_vm2, %v854_v49, %v858_v37 }
 0x14f   : > { %v895_v22 = vpop.permute.xlu0 %894 }
 0x150   : > { %v1490_v27 = vsel %vm1470_vm7, %v14809_v56, %v895_v22  ;;  %v1426_v56 = vrot.slane %v15286_v6, 3  ;;  %v1428_v22 = vrot.slane %v15361_v14, 3 }
 0x151   : > { %1220 = vrot.lane.b32.xlu2 %v1185_v55, %s14410_s1  ;;  %v1527_v21 = vsel %vm1507_vm8, %v1490_v27, %v969_v53  ;;  %v591_v53 = vld [vmem:[%s14526_s30 + $0x138] sm:$0xff]  ;;  %v1492_v27 = vsel %vm1470_vm7, %v14887_v50, %v15323_v58  ;;  %v862_v58 = vor.u32 %v15246_v51, %v858_v37  ;;  %v1103_v37 = vrot.slane %v1101_v1, 1 }
 0x152   : > { %v1564_v55 = vsel %vm1544_vm9, %v1527_v21, %v15267_v2  ;;  %v1427_v12 = vsel %vm21304_vm1, %v1424_v36, %v1426_v56  ;;  %v15369_v36 = vor.u32 %v1097_v60, %v1096_v44  ;;  %v1429_v39 = vsel %vm21304_vm1, %v1426_v56, %v1428_v22 }
 0x153   : > { %v15347_v15 = vpop.permute.xlu2 %1138  ;;  %v632_v49 = vpack.c.bf16 %v591_v53, %v591_v53  ;;  %v1106_v44 = vrot.slane %v1104_v3, 2 }
 0x154   : > { %1388 = vrot.lane.b32.xlu1 %v1337_v26, %s14415_s24  ;;  %v1099_v8 = vsel %vm21302_vm4, %v15295_v30, %v15369_v36  ;;  %v1189_v26 = vsel %vm21305_vm3, %v1186_v23, %v15398_v42 }
 0x155   : > { %1266 = vrot.lane.b32.xlu0 %v1187_v9, %s14413_s22  ;;  %v15363_v0 = vpop.f32.mrf.mxu0 }
 0x156   : > { %v1211_v28 = vpop.permute.xlu1 %1210 }
 0x157   : > { %v1137_v57 = vpop.permute.xlu0 %1136 }
 0x158   : > { %v1601_v62 = vsel %vm1581_vm10, %v1564_v55, %v1137_v57  ;;  %v992_v57 = vrot.slane %v15361_v14, 1  ;;  %v1230_v55 = vunpack.c.l.b16 %v632_v49 }
 0x159   : > { %v1638_v2 = vsel %vm1618_vm11, %v1601_v62, %v1211_v28  ;;  %1462 = vrot.lane.b32.xlu2 %v1427_v12, %s14411_s20  ;;  %v866_v28 = vrot.slane %v15298_v32, 1 }
 0x15a   : > { %v1675_v43 = vsel %vm1655_vm12, %v1638_v2, %v1257_v48  ;;  %v947_v48 = vsel %vm912_vm0, %v944_v17, %v15375_v54  ;;  %v590_v17 = vld [vmem:[%s14526_s30 + $0x130] sm:$0xff]  ;;  %v993_v60 = vsel %vm912_vm0, %v15375_v54, %v992_v57 }
 0x15b   : > { %v1381_v18 = vpop.permute.xlu2 %1380  ;;  %v631_v21 = vpack.c.bf16 %v590_v17, %v590_v17  ;;  %v867_v51 = vsel %vm727_vm2, %v862_v58, %v866_v28 }
 0x15c   : > { %980 = vrot.lane.b32.xlu1 %v945_v61, %s14409_s19  ;;  %v1339_v61 = vrot.slane %v1104_v3, 3 }
 0x15d   : > { %906 = vrot.lane.b32.xlu0 %v859_v40, %s14412_s21  ;;  %v15389_v16 = vpop.f32.mrf.mxu0  ;;  %v989_v23 = vunpack.c.l.b16 %v631_v21 }
 0x15e   : > { %v1453_v33 = vpop.permute.xlu1 %1452  ;;  %v15392_v63 = vor.u32 %v1339_v61, %v1338_v38 }
 0x15f   : > { %v1379_v7 = vpop.permute.xlu0 %1378  ;;  %v15435_v2 = vpack.c.b16 %v1230_v55, %v989_v23  ;;  %v991_v53 = vpack.c.b16 %v989_v23, %v989_v23 }
 0x160   : > { %v1712_v5 = vsel %vm1692_vm13, %v1675_v43, %v1379_v7 }
 0x161   : > { %v1749_v25 = vsel %vm1729_vm14, %v1712_v5, %v1453_v33  ;;  %1026 = vrot.lane.b32.xlu2 %v947_v48, %s14408_s18  ;;  %v1343_v43 = vshrl.u32 %v15435_v2, 16  ;;  %v1346_v1 = vshll.u32 %v15435_v2, 16  ;;  %v1234_v33 = vrot.slane %v15435_v2, 2 }
 0x162   : > { %10842 = vmatmul.msk.bf16.gmra.mxu0 %vm1806_vm15, %v1749_v25  ;;  %v726_v25 = vpack.c.b16 %v15349_v31, %v15349_v31  ;;  %v1110_v58 = vshrl.u32 %v991_v53, 16 }
 0x163   : > { %v15394_v47 = vpop.permute.xlu2 %972  ;;  %v1235_v17 = vsel %vm21305_vm3, %v15398_v42, %v1234_v33 }
 0x164   : > { %1222 = vrot.lane.b32.xlu1 %v1187_v9, %s14410_s1  ;;  %v1341_v9 = vsel %vm21303_vm5, %v15325_v29, %v15392_v63  ;;  %v872_v31 = vshll.u32 %v726_v25, 16 }
 0x165   : > { %1148 = vrot.lane.b32.xlu0 %v1099_v8, %s14414_s23  ;;  %v15420_v29 = vpop.f32.mrf.mxu0 }
 0x166   : > { %v1017_v34 = vpop.permute.xlu1 %1016 }
 0x167   : > { %v971_v30 = vpop.permute.xlu0 %970 }
 0x168   : > { %v1529_v52 = vsel %vm1507_vm8, %v1492_v27, %v971_v30 }
 0x169   : > { %1268 = vrot.lane.b32.xlu2 %v1189_v26, %s14413_s22  ;;  %v1566_v50 = vsel %vm1544_vm9, %v1529_v52, %v1017_v34  ;;  %v1345_v34 = vrot.slane %v1343_v43, 2 }
 0x16a   : > { %v1603_v62 = vsel %vm1581_vm10, %v1566_v50, %v15347_v15  ;;  %v15440_v15 = vor.u32 %v1106_v44, %v1103_v37  ;;  %v874_v50 = vrot.slane %v872_v31, 1 }
 0x16b   : > { %v15423_v56 = vpop.permute.xlu2 %1214 }
 0x16c   : > { %1464 = vrot.lane.b32.xlu1 %v1429_v39, %s14411_s20  ;;  %v1108_v30 = vsel %vm21302_vm4, %v15369_v36, %v15440_v15  ;;  %v1430_v36 = vrot.slane %v15435_v2, 3  ;;  %v870_v39 = vor.u32 %v15301_v4, %v866_v28 }
 0x16d   : > { %1390 = vrot.lane.b32.xlu0 %v1341_v9, %s14415_s24  ;;  %v15449_v8 = vpop.f32.mrf.mxu0 }
 0x16e   : > { %v1259_v12 = vpop.permute.xlu1 %1258  ;;  %v1431_v4 = vsel %vm21304_vm1, %v1428_v22, %v1430_v36  ;;  %v875_v28 = vsel %vm727_vm2, %v870_v39, %v874_v50 }
 0x16f   : > { %v1213_v46 = vpop.permute.xlu0 %1212 }
 0x170   : > { %v1640_v40 = vsel %vm1618_vm11, %v1603_v62, %v1213_v46  ;;  %v1113_v46 = vshll.u32 %v991_v53, 16 }
 0x171   : > { %v1677_v32 = vsel %vm1655_vm12, %v1640_v40, %v1259_v12  ;;  %908 = vrot.lane.b32.xlu2 %v867_v51, %s14412_s21  ;;  %v1112_v40 = vrot.slane %v1110_v58, 1 }
 0x172   : > { %v1714_v7 = vsel %vm1692_vm13, %v1677_v32, %v1381_v18  ;;  %v1348_v18 = vrot.slane %v1346_v1, 3  ;;  %v1115_v51 = vrot.slane %v1113_v46, 2 }
 0x173   : > { %v1457_v3 = vpop.permute.xlu2 %1456 }
 0x174   : > { %1028 = vrot.lane.b32.xlu1 %v993_v60, %s14408_s18  ;;  %v1349_v9 = vor.u32 %v1348_v18, %v1345_v34  ;;  %v1116_v43 = vor.u32 %v1115_v51, %v1112_v40 }
 0x175   : > { %982 = vrot.lane.b32.xlu0 %v947_v48, %s14409_s19  ;;  %v592_v48 = vld [vmem:[%s14526_s30 + $0x140] sm:$0xff] }
 0x176   : > { %v899_v38 = vpop.permute.xlu1 %898  ;;  %v633_v27 = vpack.c.bf16 %v592_v48, %v592_v48  ;;  %v15468_v55 = vpop.f32.mrf.mxu0  ;;  %v1350_v12 = vsel %vm21303_vm5, %v15392_v63, %v1349_v9  ;;  %v994_v63 = vrot.slane %v991_v53, 1  ;;  %v1117_v34 = vsel %vm21302_vm4, %v15440_v15, %v1116_v43 }
 0x177   : > { %v1455_v5 = vpop.permute.xlu0 %1454  ;;  %v1494_v52 = vsel %vm1470_vm7, %v14937_v35, %v899_v38 }
 0x178   : > { %v1751_v61 = vsel %vm1729_vm14, %v1714_v7, %v1455_v5  ;;  %v1231_v23 = vunpack.c.l.b16 %v633_v27  ;;  %v1531_v35 = vsel %vm1507_vm8, %v1494_v52, %v15394_v47  ;;  %v948_v47 = vrot.slane %v726_v25, 1 }
 0x179   : > { %10843 = vmatmul.msk.bf16.gmra.mxu0 %vm1806_vm15, %v1751_v61  ;;  %1150 = vrot.lane.b32.xlu2 %v1108_v30, %s14414_s23 }
 0x17a   : > { %v1233_v37 = vpack.c.b16 %v1231_v23, %v1231_v23  ;;  %v949_v48 = vsel %vm912_vm0, %v15375_v54, %v948_v47  ;;  %v1190_v54 = vrot.slane %v991_v53, 2 }
 0x17b   : > { %v1021_v21 = vpop.permute.xlu2 %1020 }
 0x17c   : > { %1270 = vrot.lane.b32.xlu1 %v1235_v17, %s14413_s22  ;;  %v1352_v1 = vshrl.u32 %v1233_v37, 16  ;;  %v1355_v7 = vshll.u32 %v1233_v37, 16  ;;  %v1236_v31 = vrot.slane %v1233_v37, 2  ;;  %v1432_v58 = vrot.slane %v1233_v37, 3 }
 0x17d   : > { %1224 = vrot.lane.b32.xlu0 %v1189_v26, %s14410_s1 }
 0x17e   : > { %v1141_v62 = vpop.permute.xlu1 %1140  ;;  %v15491_v25 = vpop.f32.mrf.mxu0  ;;  %v1354_v18 = vrot.slane %v1352_v1, 2  ;;  %v1357_v17 = vrot.slane %v1355_v7, 3 }
 0x17f   : > { %v1019_v49 = vpop.permute.xlu0 %1018 }
 0x180   : > { %v1568_v26 = vsel %vm1544_vm9, %v1531_v35, %v1019_v49  ;;  %v1358_v14 = vor.u32 %v1357_v17, %v1354_v18  ;;  %v1237_v49 = vsel %vm21305_vm3, %v1234_v33, %v1236_v31  ;;  %v1433_v33 = vsel %vm21304_vm1, %v1430_v36, %v1432_v58 }
 0x181   : > { %v1605_v44 = vsel %vm1581_vm10, %v1568_v26, %v1141_v62  ;;  %1392 = vrot.lane.b32.xlu2 %v1350_v12, %s14415_s24 }
 0x182   : > { %v1642_v32 = vsel %vm1618_vm11, %v1605_v44, %v15423_v56  ;;  %v995_v56 = vsel %vm912_vm0, %v992_v57, %v994_v63  ;;  %v1191_v57 = vsel %vm21305_vm3, %v15398_v42, %v1190_v54  ;;  %v1359_v53 = vsel %vm21303_vm5, %v1349_v9, %v1358_v14 }
 0x183   : > { %v1263_v60 = vpop.permute.xlu2 %1262 }
 0x184   : > { %910 = vrot.lane.b32.xlu1 %v875_v28, %s14412_s21 }
 0x185   : > { %1466 = vrot.lane.b32.xlu0 %v1431_v4, %s14411_s20 }
 0x186   : > { %v1383_v38 = vpop.permute.xlu1 %1382 }
 0x187   : > { %v1261_v22 = vpop.permute.xlu0 %1260 }
 0x188   : > { %v1679_v5 = vsel %vm1655_vm12, %v1642_v32, %v1261_v22  ;;  %v1881_v39 = vpop.f32.mrf.mxu0 }
 0x189   : > { %v1716_v61 = vsel %vm1692_vm13, %v1679_v5, %v1383_v38  ;;  %984 = vrot.lane.b32.xlu2 %v949_v48, %s14409_s19 }
 0x18a   : > { %v1753_v30 = vsel %vm1729_vm14, %v1716_v61, %v1457_v3  ;;  %v15536_v61 = vld [vmem:[%s21284_s2] ss:$0 sm:$0xff] }
 0x18b   : > { %10844 = vmatmul.msk.bf16.gmra.mxu0 %vm1806_vm15, %v1753_v30  ;;  %v903_v3 = vpop.permute.xlu2 %902 }
 0x18c   : > { %1152 = vrot.lane.b32.xlu1 %v1117_v34, %s14414_s23  ;;  %v1498_v44 = vsel %vm1470_vm7, %v15062_v45, %v903_v3 }
 0x18d   : > { %1030 = vrot.lane.b32.xlu0 %v995_v56, %s14408_s18 }
 0x18e   : > { %v975_v52 = vpop.permute.xlu1 %974 }
 0x18f   : > { %v901_v27 = vpop.permute.xlu0 %900 }
 0x190   : > { %v1496_v15 = vsel %vm1470_vm7, %v14995_v20, %v901_v27  ;;  %v1883_v9 = vpop.f32.mrf.mxu0 }
 0x191   : > { %1226 = vrot.lane.b32.xlu2 %v1191_v57, %s14410_s1  ;;  %v1533_v50 = vsel %vm1507_vm8, %v1496_v15, %v975_v52  ;;  %v1884_v14 = vadd.f32 %v15536_v61, %v1883_v9 }
 0x192   : > { %v1570_v23 = vsel %vm1544_vm9, %v1533_v50, %v1021_v21 }
 0x193   : > { %v1145_v42 = vpop.permute.xlu2 %1144  ;;  %vm1957_vm3 = vcmp.ge.f32.partialorder %v1884_v14, 0.0 }
 0x194   : > { %1394 = vrot.lane.b32.xlu1 %v1359_v53, %s14415_s24  ;;  %s14370_s24 = smul.u32 24, %s21357_s27 }
 0x195   : > { %1272 = vrot.lane.b32.xlu0 %v1237_v49, %s14413_s22  ;;  %v1882_v49 = vadd.f32 %v15536_v61, %v1881_v39 }
 0x196   : > { %v1217_v20 = vpop.permute.xlu1 %1216  ;;  %s550_s25 = scalar_lea.vmem %s21299_s17, %s14370_s24 }
 0x197   : > { %v1143_v46 = vpop.permute.xlu0 %1142 }
 0x198   : > { %v1607_v35 = vsel %vm1581_vm10, %v1570_v23, %v1143_v46 }
 0x199   : > { %v1644_v62 = vsel %vm1618_vm11, %v1607_v35, %v1217_v20  ;;  %1468 = vrot.lane.b32.xlu2 %v1433_v33, %s14411_s20  ;;  %v1879_v20 = vadd.f32 %v15536_v61, %v15491_v25  ;;  %v1993_v35 = vmul.f32 0.2, %v1884_v14 }
 0x19a   : > { %v1681_v12 = vsel %vm1655_vm12, %v1644_v62, %v1263_v60 }
 0x19b   : > { %v1387_v26 = vpop.permute.xlu2 %1386  ;;  %v1991_v25 = vmul.f32 0.2, %v1879_v20 }
 0x19e   : > { %v1459_v40 = vpop.permute.xlu1 %1458 }
 0x19f   : > { %v1385_v4 = vpop.permute.xlu0 %1384  ;;  %v1886_v51 = vpop.f32.mrf.mxu0 }
 0x1a0   : > { %v1718_v28 = vsel %vm1692_vm13, %v1681_v12, %v1385_v4  ;;  %v1887_v54 = vadd.f32 %v15536_v61, %v1886_v51  ;;  %v1877_v12 = vadd.f32 %v15536_v61, %v15468_v55  ;;  %v1992_v4 = vmul.f32 0.2, %v1882_v49 }
 0x1a1   : > { %v1755_v21 = vsel %vm1729_vm14, %v1718_v28, %v1459_v40  ;;  %v1874_v51 = vadd.f32 %v15536_v61, %v15449_v8  ;;  %v1872_v55 = vadd.f32 %v15536_v61, %v15420_v29 }
 0x1a2   : > { %10845 = vmatmul.msk.bf16.gmra.mxu0 %vm1806_vm15, %v1755_v21  ;;  %v1994_v53 = vmul.f32 0.2, %v1887_v54  ;;  %vm1958_vm1 = vcmp.ge.f32.partialorder %v1887_v54, 0.0 }
 0x1a3   : > { %v979_v2 = vpop.permute.xlu2 %978 }
 0x1a4   : > { %v2030_v28 = vsel %vm1958_vm1, %v1887_v54, %v1994_v53  ;;  %vm1954_vm1 = vcmp.ge.f32.partialorder %v1877_v12, 0.0 }
 0x1a6   : > { %v1023_v36 = vpop.permute.xlu1 %1022 }
 0x1a7   : > { %v977_v37 = vpop.permute.xlu0 %976  ;;  %v1888_v60 = vpop.f32.mrf.mxu0 }
 0x1a8   : > { %v1535_v47 = vsel %vm1507_vm8, %v1498_v44, %v977_v37  ;;  %v1889_v17 = vadd.f32 %v15536_v61, %v1888_v60  ;;  %v1990_v60 = vmul.f32 0.2, %v1877_v12 }
 0x1a9   : > { %v1572_v63 = vsel %vm1544_vm9, %v1535_v47, %v1023_v36  ;;  %v2029_v36 = vsel %vm1957_vm3, %v1884_v14, %v1993_v35  ;;  %vm1953_vm3 = vcmp.ge.f32.partialorder %v1874_v51, 0.0  ;;  %v1862_v14 = vadd.f32 %v15536_v61, %v15305_v13 }
 0x1aa   : > { %v1609_v43 = vsel %vm1581_vm10, %v1572_v63, %v1145_v42  ;;  %v1995_v52 = vmul.f32 0.2, %v1889_v17  ;;  %vm1959_vm4 = vcmp.ge.f32.partialorder %v1889_v17, 0.0  ;;  %v2066_v63 = vmul.f32 1.4142135, %v2030_v28 }
 0x1ab   : > { %v1221_v32 = vpop.permute.xlu2 %1220  ;;  %v1984_v13 = vmul.f32 0.2, %v1862_v14 }
 0x1ac   : > { %v2031_v9 = vsel %vm1959_vm4, %v1889_v17, %v1995_v52  ;;  %vm1955_vm4 = vcmp.ge.f32.partialorder %v1879_v20, 0.0  ;;  %v1864_v17 = vadd.f32 %v15536_v61, %v15338_v41  ;;  %v1859_v41 = vadd.f32 %v15536_v61, %v15276_v11 }
 0x1ad   : > { %v2067_v21 = vmul.f32 1.4142135, %v2031_v9 }
 0x1ae   : > { %v1265_v1 = vpop.permute.xlu1 %1264  ;;  %v1985_v53 = vmul.f32 0.2, %v1864_v17 }
 0x1af   : > { %v1219_v22 = vpop.permute.xlu0 %1218 }
 0x1b0   : > { %v1646_v7 = vsel %vm1618_vm11, %v1609_v43, %v1219_v22 }
 0x1b1   : > { %v1683_v5 = vsel %vm1655_vm12, %v1646_v7, %v1265_v1  ;;  %v2065_v1 = vmul.f32 1.4142135, %v2029_v36  ;;  %v1869_v7 = vadd.f32 %v15536_v61, %v15389_v16 }
 0x1b2   : > { %v1720_v45 = vsel %vm1692_vm13, %v1683_v5, %v1387_v26  ;;  %v1989_v5 = vmul.f32 0.2, %v1874_v51 }
 0x1b3   : > { %v1463_v30 = vpop.permute.xlu2 %1462  ;;  %v1987_v16 = vmul.f32 0.2, %v1869_v7 }
 0x1b6   : > { %v1891_v38 = vpop.f32.mrf.mxu0  ;;  %v905_v34 = vpop.permute.xlu1 %904 }
 0x1b7   : > { %v1461_v48 = vpop.permute.xlu0 %1460  ;;  %v1892_v18 = vadd.f32 %v15536_v61, %v1891_v38  ;;  %v1500_v3 = vsel %vm1470_vm7, %v15109_v10, %v905_v34  ;;  %v2027_v38 = vsel %vm1955_vm4, %v1879_v20, %v1991_v25  ;;  %v2026_v34 = vsel %vm1954_vm1, %v1877_v12, %v1990_v60 }
 0x1b8   : > { %v1757_v56 = vsel %vm1729_vm14, %v1720_v45, %v1461_v48  ;;  %v1537_v50 = vsel %vm1507_vm8, %v1500_v3, %v979_v2  ;;  %v1867_v48 = vadd.f32 %v15536_v61, %v15363_v0  ;;  %vm1949_vm1 = vcmp.ge.f32.partialorder %v1864_v17, 0.0 }
 0x1b9   : > { %10846 = vmatmul.msk.bf16.gmra.mxu0 %vm1806_vm15, %v1757_v56  ;;  %v1996_v31 = vmul.f32 0.2, %v1892_v18  ;;  %vm1960_vm6 = vcmp.ge.f32.partialorder %v1892_v18, 0.0  ;;  %v1988_v56 = vmul.f32 0.2, %v1872_v55 }
 0x1ba   : > { %v1986_v52 = vmul.f32 0.2, %v1867_v48  ;;  %vm1950_vm4 = vcmp.ge.f32.partialorder %v1867_v48, 0.0 }
 0x1bb   : > { %v2032_v10 = vsel %vm1960_vm6, %v1892_v18, %v1996_v31  ;;  %v15551_v23 = vpop.permute.xlu2 %1026  ;;  %vm1956_vm6 = vcmp.ge.f32.partialorder %v1882_v49, 0.0  ;;  %v2063_v18 = vmul.f32 1.4142135, %v2027_v38  ;;  %v2025_v31 = vsel %vm1953_vm3, %v1874_v51, %v1989_v5 }
 0x1bc   : > { %v2068_v62 = vmul.f32 1.4142135, %v2032_v10  ;;  %v2028_v43 = vsel %vm1956_vm6, %v1882_v49, %v1992_v4  ;;  %vm1951_vm6 = vcmp.ge.f32.partialorder %v1869_v7, 0.0  ;;  %v2061_v49 = vmul.f32 1.4142135, %v2025_v31 }
 0x1bd   : > { %v2064_v29 = vmul.f32 1.4142135, %v2028_v43  ;;  %v2022_v10 = vsel %vm1950_vm4, %v1867_v48, %v1986_v52  ;;  %vm1948_vm3 = vcmp.ge.f32.partialorder %v1862_v14, 0.0 }
 0x1be   : > { %v1893_v27 = vpop.f32.mrf.mxu0  ;;  %v1147_v58 = vpop.permute.xlu1 %1146  ;;  %v2020_v4 = vsel %vm1948_vm3, %v1862_v14, %v1984_v13 }
 0x1bf   : > { %v1894_v57 = vadd.f32 %v15536_v61, %v1893_v27  ;;  %v1025_v15 = vpop.permute.xlu0 %1024  ;;  %v2062_v27 = vmul.f32 1.4142135, %v2026_v34  ;;  %v2056_v25 = vmul.f32 1.4142135, %v2020_v4 }
 0x1c0   : > { %v1574_v46 = vsel %vm1544_vm9, %v1537_v50, %v1025_v15  ;;  %v2023_v50 = vsel %vm1951_vm6, %v1869_v7, %v1987_v16 }
 0x1c1   : > { %v1997_v42 = vmul.f32 0.2, %v1894_v57  ;;  %vm1961_vm5 = vcmp.ge.f32.partialorder %v1894_v57, 0.0  ;;  %v1611_v39 = vsel %vm1581_vm10, %v1574_v46, %v1147_v58  ;;  %v2094_v15 = vpack.c.bf16 %v2063_v18, %v2062_v27 }
 0x1c2   : > { %v1648_v2 = vsel %vm1618_vm11, %v1611_v39, %v1221_v32  ;;  %v2096_v32 = vpack.c.bf16 %v2067_v21, %v2066_v63  ;;  %v2059_v35 = vmul.f32 1.4142135, %v2023_v50  ;;  %v2021_v39 = vsel %vm1949_vm1, %v1864_v17, %v1985_v53 }
 0x1c3   : > { %v2033_v33 = vsel %vm1961_vm5, %v1894_v57, %v1997_v42  ;;  %v1269_v45 = vpop.permute.xlu2 %1268  ;;  %vm1952_vm5 = vcmp.ge.f32.partialorder %v1872_v55, 0.0  ;;  %v1857_v42 = vadd.f32 %v15536_v61, %v15248_v24 }
 0x1c4   : > { %v2069_v26 = vmul.f32 1.4142135, %v2033_v33  ;;  %v2024_v0 = vsel %vm1952_vm5, %v1872_v55, %v1988_v56  ;;  %v1983_v33 = vmul.f32 0.2, %v1859_v41  ;;  %vm1947_vm5 = vcmp.ge.f32.partialorder %v1859_v41, 0.0 }
 0x1c5   : > { %v2060_v58 = vmul.f32 1.4142135, %v2024_v0  ;;  %v1982_v12 = vmul.f32 0.2, %v1857_v42  ;;  %vm1946_vm6 = vcmp.ge.f32.partialorder %v1857_v42, 0.0 }
 0x1c6   : > { %v2097_v40 = vpack.c.bf16 %v2069_v26, %v2068_v62  ;;  %v1389_v47 = vpop.permute.xlu1 %1388  ;;  %v2058_v26 = vmul.f32 1.4142135, %v2022_v10  ;;  %v2019_v21 = vsel %vm1947_vm5, %v1859_v41, %v1983_v33 }
 0x1c7   : > { %v1267_v37 = vpop.permute.xlu0 %1266  ;;  %v2055_v36 = vmul.f32 1.4142135, %v2019_v21 }
 0x1c8   : > { %v1685_v44 = vsel %vm1655_vm12, %v1648_v2, %v1267_v37  ;;  %3098 = vmatpush.bf16.msra.mxu1 %v2097_v40  ;;  %v2092_v28 = vpack.c.bf16 %v2059_v35, %v2058_v26  ;;  %v2057_v40 = vmul.f32 1.4142135, %v2021_v39  ;;  %v2018_v2 = vsel %vm1946_vm6, %v1857_v42, %v1982_v12 }
 0x1c9   : > { %v1722_v22 = vsel %vm1692_vm13, %v1685_v44, %v1389_v47  ;;  %v2054_v60 = vmul.f32 1.4142135, %v2018_v2 }
 0x1ca   : > { %v1759_v8 = vsel %vm1729_vm14, %v1722_v22, %v1463_v30  ;;  %v2095_v30 = vpack.c.bf16 %v2065_v1, %v2064_v29  ;;  %v2091_v37 = vpack.c.bf16 %v2057_v40, %v2056_v25  ;;  %v15589_v22 = vpop.f32.mrf.mxu0 }
 0x1cb   : > { %10847 = vmatmul.msk.bf16.gmra.mxu0 %vm1806_vm15, %v1759_v8  ;;  %v909_v20 = vpop.permute.xlu2 %908  ;;  %v2090_v8 = vpack.c.bf16 %v2055_v36, %v2054_v60 }
 0x1cc   : > { %3099 = vmatpush.bf16.msra.mxu1 %v2096_v32  ;;  %v1504_v7 = vsel %vm1470_vm7, %v15233_v19, %v909_v20 }
 0x1ce   : > { %v981_v3 = vpop.permute.xlu1 %980 }
 0x1cf   : > { %v907_v54 = vpop.permute.xlu0 %906 }
 0x1d0   : > { %3100 = vmatpush.bf16.msra.mxu1 %v2095_v30  ;;  %v1502_v57 = vsel %vm1470_vm7, %v15166_v59, %v907_v54  ;;  %v2093_v59 = vpack.c.bf16 %v2061_v49, %v2060_v58 }
 0x1d1   : > { %v1539_v46 = vsel %vm1507_vm8, %v1502_v57, %v981_v3 }
 0x1d2   : > { %v1576_v11 = vsel %vm1544_vm9, %v1539_v46, %v15551_v23 }
 0x1d3   : > { %v1151_v47 = vpop.permute.xlu2 %1150 }
 0x1d4   : > { %3101 = vmatpush.bf16.msra.mxu1 %v2094_v15 }
 0x1d6   : > { %v1223_v62 = vpop.permute.xlu1 %1222 }
 0x1d7   : > { %v1149_v9 = vpop.permute.xlu0 %1148 }
 0x1d8   : > { %3102 = vmatpush.bf16.msra.mxu1 %v2093_v59  ;;  %v1613_v24 = vsel %vm1581_vm10, %v1576_v11, %v1149_v9 }
 0x1d9   : > { %v1650_v51 = vsel %vm1618_vm11, %v1613_v24, %v1223_v62 }
 0x1da   : > { %v1687_v23 = vsel %vm1655_vm12, %v1650_v51, %v1269_v45  ;;  %v15596_v45 = vpop.f32.mrf.mxu0 }
 0x1db   : > { %v1393_v5 = vpop.permute.xlu2 %1392 }
 0x1dc   : > { %3103 = vmatpush.bf16.msra.mxu1 %v2092_v28 }
 0x1de   : > { %v1465_v55 = vpop.permute.xlu1 %1464 }
 0x1df   : > { %v1391_v44 = vpop.permute.xlu0 %1390 }
 0x1e0   : > { %v1724_v63 = vsel %vm1692_vm13, %v1687_v23, %v1391_v44  ;;  %3104 = vmatpush.bf16.msra.mxu1 %v2091_v37 }
 0x1e1   : > { %v1761_v43 = vsel %vm1729_vm14, %v1724_v63, %v1465_v55 }
 0x1e2   : > { %10848 = vmatmul.msk.bf16.gmra.mxu0 %vm1806_vm15, %v1761_v43  ;;  %v15601_v18 = vpop.f32.mrf.mxu0 }
 0x1e3   : > { %v985_v17 = vpop.permute.xlu2 %984 }
 0x1e4   : > { %3105 = vmatpush.bf16.msra.mxu1 %v2090_v8 }
 0x1e6   : > { %v1029_v1 = vpop.permute.xlu1 %1028 }
 0x1e7   : > { %v983_v32 = vpop.permute.xlu0 %982 }
 0x1e8   : > { %v1541_v38 = vsel %vm1507_vm8, %v1504_v7, %v983_v32 }
 0x1e9   : > { %v1578_v29 = vsel %vm1544_vm9, %v1541_v38, %v1029_v1 }
 0x1ea   : > { %v1615_v56 = vsel %vm1581_vm10, %v1578_v29, %v1151_v47  ;;  %v15607_v27 = vpop.f32.mrf.mxu0 }
 0x1eb   : > { %v1227_v52 = vpop.permute.xlu2 %1226 }
 0x1ee   : > { %v1271_v34 = vpop.permute.xlu1 %1270 }
 0x1ef   : > { %v1225_v48 = vpop.permute.xlu0 %1224 }
 0x1f0   : > { %v1652_v30 = vsel %vm1618_vm11, %v1615_v56, %v1225_v48 }
 0x1f1   : > { %v1689_v16 = vsel %vm1655_vm12, %v1652_v30, %v1271_v34 }
 0x1f2   : > { %v1726_v19 = vsel %vm1692_vm13, %v1689_v16, %v1393_v5 }
 0x1f3   : > { %v1469_v42 = vpop.permute.xlu2 %1468 }
 0x1f6   : > { %v911_v3 = vpop.permute.xlu1 %910  ;;  %v15614_v53 = vpop.f32.mrf.mxu0 }
 0x1f7   : > { %v1467_v54 = vpop.permute.xlu0 %1466  ;;  %v1506_v14 = vsel %vm1470_vm7, %v15286_v6, %v911_v3 }
 0x1f8   : > { %v1763_v31 = vsel %vm1729_vm14, %v1726_v19, %v1467_v54  ;;  %v1543_v57 = vsel %vm1507_vm8, %v1506_v14, %v985_v17 }
 0x1f9   : > { %10849 = vmatmul.msk.bf16.gmra.mxu0 %vm1806_vm15, %v1763_v31 }
 0x1fe   : > { %v1153_v15 = vpop.permute.xlu1 %1152  ;;  %v1908_v20 = vpop.f32.mrf.mxu0 }
 0x1ff   : > { %v1031_v0 = vpop.permute.xlu0 %1030  ;;  %v1909_v31 = vadd.f32 %v15536_v61, %v1908_v20  ;;  %v10853_v20 = vld [vmem:[%s21285_s3] sm:$0xf] }
 0x200   : > { %v1580_v49 = vsel %vm1544_vm9, %v1543_v57, %v1031_v0  ;;  %v1907_v0 = vadd.f32 %v15536_v61, %v15614_v53 }
 0x201   : > { %v1617_v41 = vsel %vm1581_vm10, %v1580_v49, %v1153_v15  ;;  %vm1967_vm5 = vcmp.ge.f32.partialorder %v1909_v31, 0.0 }
 0x202   : > { %v1654_v50 = vsel %vm1618_vm11, %v1617_v41, %v1227_v52  ;;  %vm1966_vm6 = vcmp.ge.f32.partialorder %v1907_v0, 0.0 }
 0x206   : > { %v1395_v46 = vpop.permute.xlu1 %1394 }
 0x207   : > { %v1273_v58 = vpop.permute.xlu0 %1272 }
 0x208   : > { %v1691_v13 = vsel %vm1655_vm12, %v1654_v50, %v1273_v58  ;;  %v1911_v59 = vpop.f32.mrf.mxu0  ;;  %v1904_v58 = vadd.f32 %v15536_v61, %v15607_v27 }
 0x209   : > { %v1728_v6 = vsel %vm1692_vm13, %v1691_v13, %v1395_v46  ;;  %v1912_v30 = vadd.f32 %v15536_v61, %v1911_v59  ;;  %v13674_v59 = vld [vmem:[%s21285_s3 + $0x8] sm:$0xf0] }
 0x20a   : > { %v1765_v10 = vsel %vm1729_vm14, %v1728_v6, %v1469_v42  ;;  %v2003_v42 = vmul.f32 0.2, %v1909_v31  ;;  %v1902_v6 = vadd.f32 %v15536_v61, %v15601_v18 }
 0x20b   : > { %10850 = vmatmul.msk.bf16.gmra.mxu0 %vm1806_vm15, %v1765_v10  ;;  %v2004_v57 = vmul.f32 0.2, %v1912_v30  ;;  %vm1968_vm3 = vcmp.ge.f32.partialorder %v1912_v30, 0.0  ;;  %v2002_v10 = vmul.f32 0.2, %v1907_v0 }
 0x20d   : > { %v2040_v53 = vsel %vm1968_vm3, %v1912_v30, %v2004_v57  ;;  %v13680_v57 = vld [vmem:[%s21285_s3 + $0x38] sm:$0xf0] }
 0x20e   : > { %v2076_v18 = vmul.f32 1.4142135, %v2040_v53 }
 0x210   : > { %v1913_v35 = vpop.f32.mrf.mxu0 }
 0x211   : > { %v1914_v29 = vadd.f32 %v15536_v61, %v1913_v35 }
 0x213   : > { %v2005_v3 = vmul.f32 0.2, %v1914_v29  ;;  %vm1969_vm1 = vcmp.ge.f32.partialorder %v1914_v29, 0.0 }
 0x215   : > { %v2041_v13 = vsel %vm1969_vm1, %v1914_v29, %v2005_v3 }
 0x216   : > { %v2077_v35 = vmul.f32 1.4142135, %v2041_v13  ;;  %v10861_v13 = vld [vmem:[%s21285_s3 + $0x8] sm:$0xf] }
 0x21f   : > { %v1916_v33 = vpop.f32.mrf.mxu0 }
 0x220   : > { %v1917_v32 = vadd.f32 %v15536_v61, %v1916_v33  ;;  %v10854_v33 = vor.u32 %v13674_v59, %v10853_v20  ;;  %v10889_v20 = vld [vmem:[%s21285_s3 + $0x48] sm:$0xf]  ;;  %v13683_v59 = vld [vmem:[%s21285_s3 + $0x50] sm:$0xf0] }
 0x222   : > { %v2006_v17 = vmul.f32 0.2, %v1917_v32  ;;  %vm1970_vm4 = vcmp.ge.f32.partialorder %v1917_v32, 0.0  ;;  %3106 = vmatmul.bf16.vlgmr.msra.gmra.mxu1 %v10854_v33  ;;  %v10890_v33 = vor.u32 %v13683_v59, %v10889_v20 }
 0x224   : > { %v2042_v49 = vsel %vm1970_vm4, %v1917_v32, %v2006_v17  ;;  %v10855_v32 = vld [vmem:[%s21285_s3 + $0xc] sm:$0xf0] }
 0x225   : > { %v2078_v46 = vmul.f32 1.4142135, %v2042_v49 }
 0x227   : > { %v1918_v9 = vpop.f32.mrf.mxu0 }
 0x228   : > { %v1919_v47 = vadd.f32 %v15536_v61, %v1918_v9  ;;  %v1899_v9 = vadd.f32 %v15536_v61, %v15596_v45 }
 0x22a   : > { %v2007_v48 = vmul.f32 0.2, %v1919_v47  ;;  %vm1971_vm15 = vcmp.ge.f32.partialorder %v1919_v47, 0.0 }
 0x22c   : > { %v2043_v14 = vsel %vm1971_vm15, %v1919_v47, %v2007_v48  ;;  %v13677_v47 = vld [vmem:[%s21285_s3 + $0x20] sm:$0xf0] }
 0x22d   : > { %v2079_v50 = vmul.f32 1.4142135, %v2043_v14 }
 0x22f   : > { %v2102_v27 = vpack.c.bf16 %v2079_v50, %v2078_v46  ;;  %v10867_v50 = vld [vmem:[%s21285_s3 + $0x24] sm:$0xf0]  ;;  %v13675_v46 = vld [vmem:[%s21285_s3 + $0x10] sm:$0xf0] }
 0x230   : > { %v10862_v53 = vor.u32 %v13675_v46, %v10861_v13  ;;  %v13696_v13 = vld [vmem:[%s21285_s3 + $0xb8] sm:$0xf0] }
 0x236   : > { %v1921_v39 = vpop.f32.mrf.mxu0 }
 0x237   : > { %v1922_v37 = vadd.f32 %v15536_v61, %v1921_v39  ;;  %v2001_v39 = vmul.f32 0.2, %v1904_v58 }
 0x239   : > { %v2008_v1 = vmul.f32 0.2, %v1922_v37  ;;  %vm1972_vm13 = vcmp.ge.f32.partialorder %v1922_v37, 0.0 }
 0x23b   : > { %v2044_v16 = vsel %vm1972_vm13, %v1922_v37, %v2008_v1 }
 0x23c   : > { %v2080_v52 = vmul.f32 1.4142135, %v2044_v16 }
 0x23e   : > { %v1923_v11 = vpop.f32.mrf.mxu0 }
 0x23f   : > { %v1924_v51 = vadd.f32 %v15536_v61, %v1923_v11  ;;  %v2039_v11 = vsel %vm1967_vm5, %v1909_v31, %v2003_v42 }
 0x241   : > { %v2009_v63 = vmul.f32 0.2, %v1924_v51  ;;  %vm1973_vm12 = vcmp.ge.f32.partialorder %v1924_v51, 0.0 }
 0x243   : > { %v2045_v56 = vsel %vm1973_vm12, %v1924_v51, %v2009_v63 }
 0x244   : > { %v2081_v54 = vmul.f32 1.4142135, %v2045_v56 }
 0x246   : > { %v2103_v41 = vpack.c.bf16 %v2081_v54, %v2080_v52 }
 0x248   : > { %v1926_v62 = vpop.f32.mrf.mxu0 }
 0x249   : > { %v1927_v28 = vadd.f32 %v15536_v61, %v1926_v62  ;;  %v1897_v62 = vadd.f32 %v15536_v61, %v15589_v22 }
 0x24b   : > { %v2010_v36 = vmul.f32 0.2, %v1927_v28  ;;  %vm1974_vm11 = vcmp.ge.f32.partialorder %v1927_v28, 0.0  ;;  %v1998_v45 = vmul.f32 0.2, %v1897_v62 }
 0x24d   : > { %v2046_v7 = vsel %vm1974_vm11, %v1927_v28, %v2010_v36  ;;  %v1999_v28 = vmul.f32 0.2, %v1899_v9  ;;  %vm1962_vm11 = vcmp.ge.f32.partialorder %v1897_v62, 0.0 }
 0x24e   : > { %v2082_v34 = vmul.f32 1.4142135, %v2046_v7  ;;  %v2034_v22 = vsel %vm1962_vm11, %v1897_v62, %v1998_v45  ;;  %v10901_v62 = vld [vmem:[%s21285_s3 + $0x60] sm:$0xf]  ;;  %v10913_v45 = vld [vmem:[%s21285_s3 + $0x78] sm:$0xf] }
 0x250   : > { %v1928_v26 = vpop.f32.mrf.mxu0 }
 0x251   : > { %v1929_v4 = vadd.f32 %v15536_v61, %v1928_v26  ;;  %v2000_v26 = vmul.f32 0.2, %v1902_v6 }
 0x253   : > { %v2011_v25 = vmul.f32 0.2, %v1929_v4  ;;  %vm1975_vm8 = vcmp.ge.f32.partialorder %v1929_v4, 0.0 }
 0x255   : > { %v2047_v60 = vsel %vm1975_vm8, %v1929_v4, %v2011_v25  ;;  %vm1964_vm8 = vcmp.ge.f32.partialorder %v1902_v6, 0.0  ;;  %v2075_v4 = vmul.f32 1.4142135, %v2039_v11 }
 0x256   : > { %v2083_v38 = vmul.f32 1.4142135, %v2047_v60  ;;  %v2036_v25 = vsel %vm1964_vm8, %v1902_v6, %v2000_v26  ;;  %v13686_v26 = vld [vmem:[%s21285_s3 + $0x68] sm:$0xf0]  ;;  %vm21311_vm8 = vcmask 1045504  }
 0x257   : > { %vm21312_vm11 = vmmov %vm21311_vm8 }
 0x258   : > { %v2104_v19 = vpack.c.bf16 %v2083_v38, %v2082_v34 }
 0x25f   : > { %v1931_v12 = vpop.f32.mrf.mxu0 }
 0x260   : > { %v1932_v24 = vadd.f32 %v15536_v61, %v1931_v12  ;;  %v2038_v12 = vsel %vm1966_vm6, %v1907_v0, %v2002_v10  ;;  %v10877_v0 = vld [vmem:[%s21285_s3 + $0x30] sm:$0xf] }
 0x261   : > { %v2074_v51 = vmul.f32 1.4142135, %v2038_v12  ;;  %v13682_v12 = vld [vmem:[%s21285_s3 + $0x4c] sm:$0xf] }
 0x262   : > { %v2012_v40 = vmul.f32 0.2, %v1932_v24  ;;  %vm1976_vm7 = vcmp.ge.f32.partialorder %v1932_v24, 0.0 }
 0x264   : > { %v2048_v44 = vsel %vm1976_vm7, %v1932_v24, %v2012_v40  ;;  %vm1965_vm7 = vcmp.ge.f32.partialorder %v1904_v58, 0.0  ;;  %v2101_v24 = vpack.c.bf16 %v2077_v35, %v2076_v18  ;;  %v10879_v35 = vld [vmem:[%s21285_s3 + $0x3c] sm:$0xf0] }
 0x265   : > { %v2084_v43 = vmul.f32 1.4142135, %v2048_v44  ;;  %v10865_v44 = vld [vmem:[%s21285_s3 + $0x18] sm:$0xf] }
 0x266   : > { %v10866_v1 = vor.u32 %v13677_v47, %v10865_v44 }
 0x267   : > { %v1933_v21 = vpop.f32.mrf.mxu0 }
 0x268   : > { %v1934_v2 = vadd.f32 %v15536_v61, %v1933_v21  ;;  %v2037_v21 = vsel %vm1965_vm7, %v1904_v58, %v2001_v39  ;;  %3111 = vmatmul.bf16.gmra.mxu1 %v10866_v1  ;;  %v10878_v58 = vor.u32 %v13680_v57, %v10877_v0  ;;  %v13678_v39 = vld [vmem:[%s21285_s3 + $0x28] sm:$0xf0]  ;;  %v13687_v1 = vld [vmem:[%s21285_s3 + $0x70] sm:$0xf0]  ;;  %v10933_v0 = vld [vmem:[%s21285_s3 + $0x98] sm:$0xf] }
 0x269   : > { %v2073_v37 = vmul.f32 1.4142135, %v2037_v21  ;;  %v13693_v57 = vld [vmem:[%s21285_s3 + $0xa0] sm:$0xf0] }
 0x26a   : > { %v2013_v23 = vmul.f32 0.2, %v1934_v2  ;;  %vm1977_vm9 = vcmp.ge.f32.partialorder %v1934_v2, 0.0 }
 0x26c   : > { %v2049_v55 = vsel %vm1977_vm9, %v1934_v2, %v2013_v23  ;;  %vm1963_vm9 = vcmp.ge.f32.partialorder %v1899_v9, 0.0  ;;  %v2100_v2 = vpack.c.bf16 %v2075_v4, %v2074_v51  ;;  %v2072_v23 = vmul.f32 1.4142135, %v2036_v25  ;;  %v13689_v25 = vld [vmem:[%s21285_s3 + $0x80] sm:$0xf0] }
 0x26d   : > { %v2085_v8 = vmul.f32 1.4142135, %v2049_v55  ;;  %v2035_v36 = vsel %vm1963_vm9, %v1899_v9, %v1999_v28  ;;  %v10873_v9 = vld [vmem:[%s21285_s3 + $0x20] sm:$0xf]  ;;  %v10902_v4 = vor.u32 %v13686_v26, %v10901_v62  ;;  %v10885_v28 = vld [vmem:[%s21285_s3 + $0x38] sm:$0xf] }
 0x26e   : > { %v2099_v63 = vpack.c.bf16 %v2073_v37, %v2072_v23  ;;  %v2071_v55 = vmul.f32 1.4142135, %v2035_v36  ;;  %v10874_v18 = vor.u32 %v13678_v39, %v10873_v9  ;;  %v10903_v37 = vld [vmem:[%s21285_s3 + $0x6c] sm:$0xf0]  ;;  %v10914_v36 = vor.u32 %v13689_v25, %v10913_v45  ;;  %v13700_v9 = vld [vmem:[%s21285_s3 + $0xdc] sm:$0xf] }
 0x26f   : > { %v2105_v5 = vpack.c.bf16 %v2085_v8, %v2084_v43  ;;  %v2070_v43 = vmul.f32 1.4142135, %v2034_v22  ;;  %v13673_v8 = vld [vmem:[%s21285_s3 + $0x4] sm:$0xf]  ;;  %v10897_v23 = vld [vmem:[%s21285_s3 + $0x50] sm:$0xf] }
 0x270   : > { %v10858_v38 = vor.u32 %v13673_v8, %v10855_v32  ;;  %v13684_v22 = vld [vmem:[%s21285_s3 + $0x58] sm:$0xf0]  ;;  %v10909_v32 = vld [vmem:[%s21285_s3 + $0x68] sm:$0xf] }
 0x271   : > { %3332 = vmatpush.bf16.msra.mxu2 %v2105_v5  ;;  %v2098_v5 = vpack.c.bf16 %v2071_v55, %v2070_v43  ;;  %v10898_v47 = vor.u32 %v13684_v22, %v10897_v23  ;;  %v13692_v55 = vld [vmem:[%s21285_s3 + $0x98] sm:$0xf0]  ;;  %v10915_v43 = vld [vmem:[%s21285_s3 + $0x84] sm:$0xf0]  ;;  %v10975_v23 = vld [vmem:[%s21285_s3 + $0xfc] sm:$0xf0] }
 0x272   : > { %v10963_v39 = vld [vmem:[%s21285_s3 + $0xe4] sm:$0xf0]  ;;  %v10969_v22 = vld [vmem:[%s21285_s3 + $0xe0] sm:$0xf] }
 0x275   : > { %3333 = vmatpush.bf16.msra.mxu2 %v2104_v19 }
 0x276   : > { %v15634_v15 = vpop.f32.mrf.mxu0 }
 0x277   : > { %v1937_v56 = vadd.f32 %v15536_v61, %v15634_v15 }
 0x278   : > { %3116 = vmatmul.bf16.gmra.mxu1 %v10878_v58  ;;  %v10951_v58 = vld [vmem:[%s21285_s3 + $0xcc] sm:$0xf0] }
 0x279   : > { %3334 = vmatpush.bf16.msra.mxu2 %v2103_v41  ;;  %v2014_v19 = vmul.f32 0.2, %v1937_v56  ;;  %vm1978_vm4 = vcmp.ge.f32.partialorder %v1937_v56, 0.0  ;;  %v13676_v41 = vld [vmem:[%s21285_s3 + $0x1c] sm:$0xf] }
 0x27a   : > { %v10870_v10 = vor.u32 %v13676_v41, %v10867_v50  ;;  %v13697_v50 = vld [vmem:[%s21285_s3 + $0xc4] sm:$0xf] }
 0x27b   : > { %v2050_v15 = vsel %vm1978_vm4, %v1937_v56, %v2014_v19  ;;  %v10927_v56 = vld [vmem:[%s21285_s3 + $0x9c] sm:$0xf0]  ;;  %vm21315_vm4 = vmmov %vm21311_vm8 }
 0x27c   : > { %v2086_v42 = vmul.f32 1.4142135, %v2050_v15 }
 0x27d   : > { %3335 = vmatpush.bf16.msra.mxu2 %v2102_v27  ;;  %v13679_v27 = vld [vmem:[%s21285_s3 + $0x34] sm:$0xf] }
 0x27e   : > { %v1938_v40 = vpop.f32.mrf.mxu0  ;;  %v10882_v11 = vor.u32 %v13679_v27, %v10879_v35 }
 0x27f   : > { %v1939_v29 = vadd.f32 %v15536_v61, %v1938_v40  ;;  %v13681_v40 = vld [vmem:[%s21285_s3 + $0x40] sm:$0xf0] }
 0x280   : > { %v10886_v51 = vor.u32 %v13681_v40, %v10885_v28  ;;  %v10966_v28 = vor.u32 %v13700_v9, %v10963_v39  ;;  %v13709_v39 = vld [vmem:[%s21285_s3 + $0x124] sm:$0xf] }
 0x281   : > { %3336 = vmatpush.bf16.msra.mxu2 %v2101_v24  ;;  %v2015_v30 = vmul.f32 0.2, %v1939_v29  ;;  %vm1979_vm13 = vcmp.ge.f32.partialorder %v1939_v29, 0.0  ;;  %v10891_v24 = vld [vmem:[%s21285_s3 + $0x54] sm:$0xf0] }
 0x282   : > { %v10894_v21 = vor.u32 %v13682_v12, %v10891_v24  ;;  %v10973_v12 = vld [vmem:[%s21285_s3 + $0xf0] sm:$0xf]  ;;  %v13704_v24 = vld [vmem:[%s21285_s3 + $0xf8] sm:$0xf0] }
 0x283   : > { %v2051_v14 = vsel %vm1979_vm13, %v1939_v29, %v2015_v30  ;;  %v13695_v29 = vld [vmem:[%s21285_s3 + $0xb0] sm:$0xf0]  ;;  %v10921_v30 = vld [vmem:[%s21285_s3 + $0x80] sm:$0xf]  ;;  %v10974_v40 = vor.u32 %v13704_v24, %v10973_v12  ;;  %v11009_v24 = vld [vmem:[%s21285_s3 + $0x138] sm:$0xf] }
 0x284   : > { %v2087_v49 = vmul.f32 1.4142135, %v2051_v14  ;;  %v10939_v14 = vld [vmem:[%s21285_s3 + $0xb4] sm:$0xf0]  ;;  %vm21314_vm13 = vsmask.f32 5376 }
 0x285   : > { %3337 = vmatpush.bf16.msra.mxu2 %v2100_v2  ;;  %v13685_v2 = vld [vmem:[%s21285_s3 + $0x64] sm:$0xf] }
 0x286   : > { %v2106_v6 = vpack.c.bf16 %v2087_v49, %v2086_v42  ;;  %v10906_v44 = vor.u32 %v13685_v2, %v10903_v37  ;;  %v10934_v49 = vor.u32 %v13693_v57, %v10933_v0  ;;  %v10945_v42 = vld [vmem:[%s21285_s3 + $0xb0] sm:$0xf] }
 0x287   : > { %v10946_v59 = vor.u32 %v13696_v13, %v10945_v42 }
 0x288   : > { %v1941_v60 = vpop.f32.mrf.mxu0  ;;  %3121 = vmatmul.bf16.gmra.mxu1 %v10890_v33 }
 0x289   : > { %3338 = vmatpush.bf16.msra.mxu2 %v2099_v63  ;;  %v1942_v7 = vadd.f32 %v15536_v61, %v1941_v60  ;;  %v10925_v63 = vld [vmem:[%s21285_s3 + $0x90] sm:$0xf]  ;;  %v13688_v60 = vld [vmem:[%s21285_s3 + $0x7c] sm:$0xf] }
 0x28a   : > { %v10926_v8 = vor.u32 %v13692_v55, %v10925_v63  ;;  %v10985_v55 = vld [vmem:[%s21285_s3 + $0x108] sm:$0xf] }
 0x28b   : > { %v2016_v48 = vmul.f32 0.2, %v1942_v7  ;;  %vm1980_vm12 = vcmp.ge.f32.partialorder %v1942_v7, 0.0 }
 0x28d   : > { %3339 = vmatpush.bf16.msra.mxu2 %v2098_v5  ;;  %v2052_v16 = vsel %vm1980_vm12, %v1942_v7, %v2016_v48  ;;  %v10918_v7 = vor.u32 %v13688_v60, %v10915_v43  ;;  %v10910_v5 = vor.u32 %v13687_v1, %v10909_v32  ;;  %v13691_v48 = vld [vmem:[%s21285_s3 + $0x94] sm:$0xf]  ;;  %vm21313_vm12 = vcmask 1044480  }
 0x28e   : > { %v2088_v3 = vmul.f32 1.4142135, %v2052_v16  ;;  %v10930_v16 = vor.u32 %v13691_v48, %v10927_v56  ;;  %v13707_v60 = vld [vmem:[%s21285_s3 + $0x110] sm:$0xf0] }
 0x28f   : > { %v10986_v1 = vor.u32 %v13707_v60, %v10985_v55 }
 0x290   : > { %v1943_v34 = vpop.f32.mrf.mxu0  ;;  %3340 = vmatmul.bf16.vlgmr.msra.gmra.mxu2 %v10858_v38  ;;  %v10937_v38 = vld [vmem:[%s21285_s3 + $0xa8] sm:$0xf] }
 0x291   : > { %v1944_v17 = vadd.f32 %v15536_v61, %v1943_v34  ;;  %v10938_v34 = vor.u32 %v13695_v29, %v10937_v38 }
 0x293   : > { %v2017_v54 = vmul.f32 0.2, %v1944_v17  ;;  %vm1981_vm15 = vcmp.ge.f32.partialorder %v1944_v17, 0.0 }
 0x295   : > { %v2053_v31 = vsel %vm1981_vm15, %v1944_v17, %v2017_v54  ;;  %v13690_v17 = vld [vmem:[%s21285_s3 + $0x88] sm:$0xf0]  ;;  %v10949_v54 = vld [vmem:[%s21285_s3 + $0xc0] sm:$0xf] }
 0x296   : > { %v2089_v52 = vmul.f32 1.4142135, %v2053_v31  ;;  %v10922_v19 = vor.u32 %v13690_v17, %v10921_v30  ;;  %v13698_v31 = vld [vmem:[%s21285_s3 + $0xc8] sm:$0xf0] }
 0x298   : > { %v2107_v61 = vpack.c.bf16 %v2089_v52, %v2088_v3  ;;  %3126 = vmatmul.bf16.gmra.mxu1 %v10902_v4  ;;  %v13694_v3 = vld [vmem:[%s21285_s3 + $0xac] sm:$0xf]  ;;  %v10950_v52 = vor.u32 %v13698_v31, %v10949_v54 }
 0x299   : > { %v13706_v31 = vld [vmem:[%s21285_s3 + $0x10c] sm:$0xf] }
 0x29a   : > { %3572 = vmatpush.bf16.msra.mxu3 %v2107_v61  ;;  %v10942_v61 = vor.u32 %v13694_v3, %v10939_v14  ;;  %v10987_v3 = vld [vmem:[%s21285_s3 + $0x114] sm:$0xf0] }
 0x29b   : > { %v10981_v14 = vld [vmem:[%s21285_s3 + $0xf8] sm:$0xf] }
 0x29e   : > { %3573 = vmatpush.bf16.msra.mxu3 %v2106_v6  ;;  %v10961_v6 = vld [vmem:[%s21285_s3 + $0xd8] sm:$0xf] }
 0x29f   : > { %v3107_v15 = vpop.f32.mrf.mxu1 }
 0x2a0   : > { %3345 = vmatmul.bf16.gmra.mxu2 %v10870_v10  ;;  %v13701_v10 = vld [vmem:[%s21285_s3 + $0xe0] sm:$0xf0] }
 0x2a1   : > { %11391 = vmatmul.msk.bf16.vlgmr.msra.gmra.mxu3 %vm1581_vm10, %v10862_v53  ;;  %v10954_v53 = vor.u32 %v13697_v50, %v10951_v58  ;;  %v10962_v20 = vor.u32 %v13701_v10, %v10961_v6  ;;  %v10990_v50 = vor.u32 %v13706_v31, %v10987_v3 }
 0x2a7   : > { %v3109_v41 = vpop.f32.mrf.mxu1 }
 0x2a8   : > { %3131 = vmatmul.bf16.gmra.mxu1 %v10914_v36  ;;  %v13703_v36 = vld [vmem:[%s21285_s3 + $0xf4] sm:$0xf] }
 0x2a9   : > { %v10978_v32 = vor.u32 %v13703_v36, %v10975_v23 }
 0x2b0   : > { %3350 = vmatmul.bf16.gmra.mxu2 %v10882_v11  ;;  %v10957_v11 = vld [vmem:[%s21285_s3 + $0xc8] sm:$0xf] }
 0x2b1   : > { %11392 = vmatmul.msk.bf16.gmra.mxu3 %vm1581_vm10, %v10874_v18  ;;  %v13699_v18 = vld [vmem:[%s21285_s3 + $0xd0] sm:$0xf0] }
 0x2b8   : > { %3136 = vmatmul.bf16.gmra.mxu1 %v10926_v8 }
 0x2c0   : > { %3355 = vmatmul.bf16.gmra.mxu2 %v10894_v21  ;;  %v10958_v21 = vor.u32 %v13699_v18, %v10957_v11  ;;  %v10999_v11 = vld [vmem:[%s21285_s3 + $0x12c] sm:$0xf0] }
 0x2c1   : > { %11393 = vmatmul.msk.bf16.gmra.mxu3 %vm1581_vm10, %v10886_v51  ;;  %v10993_v18 = vld [vmem:[%s21285_s3 + $0x110] sm:$0xf] }
 0x2c8   : > { %3141 = vmatmul.bf16.gmra.mxu1 %v10938_v34 }
 0x2d0   : > { %3360 = vmatmul.bf16.gmra.mxu2 %v10906_v44  ;;  %v13702_v44 = vld [vmem:[%s21285_s3 + $0xe8] sm:$0xf0] }
 0x2d1   : > { %11394 = vmatmul.msk.bf16.gmra.mxu3 %vm1581_vm10, %v10898_v47  ;;  %v10970_v38 = vor.u32 %v13702_v44, %v10969_v22 }
 0x2d8   : > { %3146 = vmatmul.bf16.gmra.mxu1 %v10950_v52  ;;  %v13705_v52 = vld [vmem:[%s21285_s3 + $0x100] sm:$0xf0] }
 0x2e0   : > { %3365 = vmatmul.bf16.gmra.mxu2 %v10918_v7 }
 0x2e1   : > { %11395 = vmatmul.msk.bf16.gmra.mxu3 %vm1581_vm10, %v10910_v5 }
 0x2e5   : > { %v3112_v46 = vpop.f32.mrf.mxu1 }
 0x2e8   : > { %3151 = vmatmul.bf16.gmra.mxu1 %v10962_v20 }
 0x2ed   : > { %v3114_v35 = vpop.f32.mrf.mxu1 }
 0x2f0   : > { %3370 = vmatmul.bf16.gmra.mxu2 %v10930_v16 }
 0x2f1   : > { %11396 = vmatmul.msk.bf16.gmra.mxu3 %vm1581_vm10, %v10922_v19 }
 0x2f5   : > { %v3117_v26 = vpop.f32.mrf.mxu1 }
 0x2f8   : > { %3156 = vmatmul.bf16.gmra.mxu1 %v10974_v40 }
 0x2fd   : > { %v3119_v45 = vpop.f32.mrf.mxu1 }
 0x300   : > { %3375 = vmatmul.bf16.gmra.mxu2 %v10942_v61  ;;  %v13710_v61 = vld [vmem:[%s21285_s3 + $0x128] sm:$0xf0] }
 0x301   : > { %11397 = vmatmul.msk.bf16.gmra.mxu3 %vm1581_vm10, %v10934_v49 }
 0x305   : > { %v3122_v63 = vpop.f32.mrf.mxu1 }
 0x308   : > { %3161 = vmatmul.bf16.gmra.mxu1 %v10986_v1  ;;  %v13711_v1 = vld [vmem:[%s21285_s3 + $0x130] sm:$0xf0] }
 0x30d   : > { %v3124_v17 = vpop.f32.mrf.mxu1 }
 0x310   : > { %3380 = vmatmul.bf16.gmra.mxu2 %v10954_v53 }
 0x311   : > { %11398 = vmatmul.msk.bf16.gmra.mxu3 %vm1581_vm10, %v10946_v59 }
 0x313   : > { %v3341_v27 = vpop.f32.mrf.mxu2 }
 0x314   : > { %v3342_v33 = vadd.f32 %v3341_v27, %v3107_v15  ;;  %v10997_v15 = vld [vmem:[%s21285_s3 + $0x120] sm:$0xf] }
 0x315   : > { %v3127_v57 = vpop.f32.mrf.mxu1  ;;  %v10998_v58 = vor.u32 %v13710_v61, %v10997_v15 }
 0x318   : > { %3166 = vmatmul.bf16.gmra.mxu1 %v10998_v58  ;;  %v11023_v58 = vld [vmem:[%s21285_s3 + $0x15c] sm:$0xf0] }
 0x31b   : > { %v3343_v62 = vpop.f32.mrf.mxu2 }
 0x31c   : > { %v3344_v4 = vadd.f32 %v3343_v62, %v3109_v41  ;;  %v13708_v62 = vld [vmem:[%s21285_s3 + $0x118] sm:$0xf0] }
 0x31d   : > { %v3129_v27 = vpop.f32.mrf.mxu1 }
 0x320   : > { %3385 = vmatmul.bf16.gmra.mxu2 %v10966_v28 }
 0x321   : > { %11399 = vmatmul.msk.bf16.gmra.mxu3 %vm1581_vm10, %v10958_v21  ;;  %v11002_v21 = vor.u32 %v13709_v39, %v10999_v11 }
 0x323   : > { %v3346_v51 = vpop.f32.mrf.mxu2 }
 0x324   : > { %v3575_v25 = vpop.f32.mrf.mxu3  ;;  %v3347_v2 = vadd.f32 %v3346_v51, %v3112_v46  ;;  %v10982_v46 = vor.u32 %v13705_v52, %v10981_v14 }
 0x325   : > { %v3576_v37 = vadd.f32 %v3575_v25, %v3342_v33  ;;  %v15900_v12 = vpop.f32.mrf.mxu1 }
 0x327   : > { %v3800_v7 = vpack.c.bf16 %v3576_v37, %v3576_v37 }
 0x329   : > { %v15856_v48 = vunpack.c.l.b16 %v3800_v7 }
 0x32b   : > { %v3348_v47 = vpop.f32.mrf.mxu2 }
 0x32c   : > { %v3577_v43 = vpop.f32.mrf.mxu3  ;;  %v3349_v8 = vadd.f32 %v3348_v47, %v3114_v35 }
 0x32d   : > { %v3578_v5 = vadd.f32 %v3577_v43, %v3344_v4  ;;  %v13713_v4 = vld [vmem:[%s21285_s3 + $0x140] sm:$0xf0]  ;;  %v3134_v47 = vpop.f32.mrf.mxu1  ;;  %v13712_v43 = vld [vmem:[%s21285_s3 + $0x13c] sm:$0xf] }
 0x32e   : > { %v11010_v51 = vor.u32 %v13713_v4, %v11009_v24 }
 0x32f   : > { %v3801_v29 = vpack.c.bf16 %v3578_v5, %v3578_v5 }
 0x330   : > { %3390 = vmatmul.bf16.gmra.mxu2 %v10978_v32  ;;  %3171 = vmatmul.bf16.gmra.mxu1 %v11010_v51  ;;  %v11005_v32 = vld [vmem:[%s21285_s3 + $0x128] sm:$0xf] }
 0x331   : > { %v15858_v56 = vunpack.c.l.b16 %v3801_v29  ;;  %11400 = vmatmul.msk.bf16.gmra.mxu3 %vm1581_vm10, %v10970_v38  ;;  %v11021_v38 = vld [vmem:[%s21285_s3 + $0x150] sm:$0xf]  ;;  %v13716_v29 = vld [vmem:[%s21285_s3 + $0x158] sm:$0xf0]  ;;  %v11006_v3 = vor.u32 %v13711_v1, %v11005_v32 }
 0x333   : > { %v3910_v34 = vpack.c.b16 %v15858_v56, %v15856_v48  ;;  %v3351_v30 = vpop.f32.mrf.mxu2 }
 0x334   : > { %v3580_v16 = vpop.f32.mrf.mxu3  ;;  %v3352_v19 = vadd.f32 %v3351_v30, %v3117_v26 }
 0x335   : > { %v3581_v54 = vadd.f32 %v3580_v16, %v3347_v2  ;;  %v10994_v2 = vor.u32 %v13708_v62, %v10993_v18  ;;  %v15927_v5 = vpop.f32.mrf.mxu1 }
 0x337   : > { %v3802_v42 = vpack.c.bf16 %v3581_v54, %v3581_v54 }
 0x339   : > { %v15881_v10 = vunpack.c.l.b16 %v3802_v42  ;;  %v11017_v42 = vld [vmem:[%s21285_s3 + $0x140] sm:$0xf] }
 0x33b   : > { %v3353_v0 = vpop.f32.mrf.mxu2 }
 0x33c   : > { %v3582_v49 = vpop.f32.mrf.mxu3  ;;  %v3354_v41 = vadd.f32 %v3353_v0, %v3119_v45 }
 0x33d   : > { %v3583_v13 = vadd.f32 %v3582_v49, %v3349_v8  ;;  %v11011_v8 = vld [vmem:[%s21285_s3 + $0x144] sm:$0xf0]  ;;  %v3139_v61 = vpop.f32.mrf.mxu1 }
 0x33e   : > { %v11014_v16 = vor.u32 %v13712_v43, %v11011_v8  ;;  %v13722_v43 = vld [vmem:[%s21285_s3 + $0x188] sm:$0xf0] }
 0x33f   : > { %v3803_v6 = vpack.c.bf16 %v3583_v13, %v3583_v13  ;;  %v13714_v13 = vld [vmem:[%s21285_s3 + $0x148] sm:$0xf0] }
 0x340   : > { %3395 = vmatmul.bf16.gmra.mxu2 %v10990_v50  ;;  %v13715_v50 = vld [vmem:[%s21285_s3 + $0x154] sm:$0xf]  ;;  %v11018_v18 = vor.u32 %v13714_v13, %v11017_v42  ;;  %v11057_v13 = vld [vmem:[%s21285_s3 + $0x198] sm:$0xf] }
 0x341   : > { %v15883_v53 = vunpack.c.l.b16 %v3803_v6  ;;  %11401 = vmatmul.msk.bf16.gmra.mxu3 %vm1581_vm10, %v10982_v46 }
 0x343   : > { %v3911_v20 = vpack.c.b16 %v15883_v53, %v15881_v10  ;;  %v3356_v59 = vpop.f32.mrf.mxu2 }
 0x344   : > { %v3585_v35 = vpop.f32.mrf.mxu3  ;;  %v3357_v33 = vadd.f32 %v3356_v59, %v3122_v63  ;;  %v11033_v59 = vld [vmem:[%s21285_s3 + $0x168] sm:$0xf] }
 0x345   : > { %v3586_v9 = vadd.f32 %v3585_v35, %v3352_v19  ;;  %v11022_v19 = vor.u32 %v13716_v29, %v11021_v38  ;;  %v15954_v6 = vpop.f32.mrf.mxu1 }
 0x347   : > { %v3804_v45 = vpack.c.bf16 %v3586_v9, %v3586_v9  ;;  %3176 = vmatmul.bf16.gmra.mxu1 %v11022_v19 }
 0x349   : > { %v15908_v36 = vunpack.c.l.b16 %v3804_v45 }
 0x34b   : > { %v3358_v26 = vpop.f32.mrf.mxu2 }
 0x34c   : > { %v3587_v28 = vpop.f32.mrf.mxu3  ;;  %v3359_v40 = vadd.f32 %v3358_v26, %v3124_v17 }
 0x34d   : > { %v3588_v25 = vadd.f32 %v3587_v28, %v3354_v41 }
 0x34f   : > { %v3805_v37 = vpack.c.bf16 %v3588_v25, %v3588_v25  ;;  %v13718_v25 = vld [vmem:[%s21285_s3 + $0x16c] sm:$0xf] }
 0x350   : > { %3400 = vmatmul.bf16.gmra.mxu2 %v11002_v21 }
 0x351   : > { %v15910_v23 = vunpack.c.l.b16 %v3805_v37  ;;  %11402 = vmatmul.msk.bf16.gmra.mxu3 %vm1581_vm10, %v10994_v2  ;;  %v11035_v2 = vld [vmem:[%s21285_s3 + $0x174] sm:$0xf0] }
 0x352   : > { %v11029_v37 = vld [vmem:[%s21285_s3 + $0x158] sm:$0xf]  ;;  %v11038_v32 = vor.u32 %v13718_v25, %v11035_v2  ;;  %v13724_v2 = vld [vmem:[%s21285_s3 + $0x19c] sm:$0xf] }
 0x353   : > { %v3912_v22 = vpack.c.b16 %v15910_v23, %v15908_v36  ;;  %v3361_v44 = vpop.f32.mrf.mxu2  ;;  %v13747_v36 = vld [vmem:[%s21285_s3 + $0x250] sm:$0xf0] }
 0x354   : > { %v3590_v63 = vpop.f32.mrf.mxu3  ;;  %v3362_v55 = vadd.f32 %v3361_v44, %v3127_v57  ;;  %v13717_v44 = vld [vmem:[%s21285_s3 + $0x160] sm:$0xf0] }
 0x355   : > { %v3591_v60 = vadd.f32 %v3590_v63, %v3357_v33  ;;  %v11026_v33 = vor.u32 %v13715_v50, %v11023_v58  ;;  %v11030_v29 = vor.u32 %v13717_v44, %v11029_v37  ;;  %v13720_v50 = vld [vmem:[%s21285_s3 + $0x178] sm:$0xf0]  ;;  %v11059_v37 = vld [vmem:[%s21285_s3 + $0x1a4] sm:$0xf0] }
 0x356   : > { %v11053_v44 = vld [vmem:[%s21285_s3 + $0x188] sm:$0xf] }
 0x357   : > { %v3806_v54 = vpack.c.bf16 %v3591_v60, %v3591_v60  ;;  %v11045_v60 = vld [vmem:[%s21285_s3 + $0x180] sm:$0xf] }
 0x358   : > { %v11046_v1 = vor.u32 %v13722_v43, %v11045_v60  ;;  %v11069_v43 = vld [vmem:[%s21285_s3 + $0x1b0] sm:$0xf] }
 0x359   : > { %v15935_v52 = vunpack.c.l.b16 %v3806_v54 }
 0x35b   : > { %v3363_v7 = vpop.f32.mrf.mxu2 }
 0x35c   : > { %v3592_v30 = vpop.f32.mrf.mxu3  ;;  %v3364_v17 = vadd.f32 %v3363_v7, %v3129_v27  ;;  %v13719_v27 = vld [vmem:[%s21285_s3 + $0x170] sm:$0xf0] }
 0x35d   : > { %v3593_v31 = vadd.f32 %v3592_v30, %v3359_v40  ;;  %v11034_v9 = vor.u32 %v13719_v27, %v11033_v59  ;;  %v15969_v40 = vpop.f32.mrf.mxu1 }
 0x35f   : > { %v3807_v14 = vpack.c.bf16 %v3593_v31, %v3593_v31  ;;  %3181 = vmatmul.bf16.gmra.mxu1 %v11034_v9 }
 0x360   : > { %3405 = vmatmul.bf16.gmra.mxu2 %v11014_v16 }
 0x361   : > { %v15937_v0 = vunpack.c.l.b16 %v3807_v14  ;;  %11403 = vmatmul.msk.bf16.gmra.mxu3 %vm1581_vm10, %v11006_v3 }
 0x363   : > { %v3913_v57 = vpack.c.b16 %v15937_v0, %v15935_v52  ;;  %v3366_v15 = vpop.f32.mrf.mxu2  ;;  %v13750_v52 = vld [vmem:[%s21285_s3 + $0x268] sm:$0xf0] }
 0x364   : > { %v3595_v49 = vpop.f32.mrf.mxu3  ;;  %v3367_v51 = vadd.f32 %v3366_v15, %v15900_v12  ;;  %v13721_v15 = vld [vmem:[%s21285_s3 + $0x184] sm:$0xf] }
 0x365   : > { %v3596_v41 = vadd.f32 %v3595_v49, %v3362_v55  ;;  %v15984_v12 = vpop.f32.mrf.mxu1  ;;  %v11047_v49 = vld [vmem:[%s21285_s3 + $0x18c] sm:$0xf0] }
 0x366   : > { %v11050_v27 = vor.u32 %v13721_v15, %v11047_v49  ;;  %v13727_v49 = vld [vmem:[%s21285_s3 + $0x1b4] sm:$0xf] }
 0x367   : > { %v3808_v39 = vpack.c.bf16 %v3596_v41, %v3596_v41  ;;  %v11041_v41 = vld [vmem:[%s21285_s3 + $0x170] sm:$0xf] }
 0x369   : > { %v15962_v26 = vunpack.c.l.b16 %v3808_v39  ;;  %v11042_v39 = vor.u32 %v13720_v50, %v11041_v41  ;;  %v11071_v41 = vld [vmem:[%s21285_s3 + $0x1bc] sm:$0xf0] }
 0x36a   : > { %v11065_v50 = vld [vmem:[%s21285_s3 + $0x1a0] sm:$0xf] }
 0x36b   : > { %v3368_v46 = vpop.f32.mrf.mxu2 }
 0x36c   : > { %v3597_v35 = vpop.f32.mrf.mxu3  ;;  %v3369_v63 = vadd.f32 %v3368_v46, %v3134_v47  ;;  %v13725_v46 = vld [vmem:[%s21285_s3 + $0x1a0] sm:$0xf0] }
 0x36d   : > { %v3598_v11 = vadd.f32 %v3597_v35, %v3364_v17  ;;  %v15993_v54 = vpop.f32.mrf.mxu1  ;;  %v11058_v35 = vor.u32 %v13725_v46, %v11057_v13  ;;  %v11081_v46 = vld [vmem:[%s21285_s3 + $0x1c8] sm:$0xf] }
 0x36f   : > { %v3809_v62 = vpack.c.bf16 %v3598_v11, %v3598_v11  ;;  %3186 = vmatmul.bf16.gmra.mxu1 %v11046_v1  ;;  %v11062_v1 = vor.u32 %v13724_v2, %v11059_v37 }
 0x370   : > { %3410 = vmatmul.bf16.gmra.mxu2 %v11026_v33 }
 0x371   : > { %v15964_v24 = vunpack.c.l.b16 %v3809_v62  ;;  %11404 = vmatmul.msk.bf16.gmra.mxu3 %vm1581_vm10, %v11018_v18 }
 0x373   : > { %v3914_v4 = vpack.c.b16 %v15964_v24, %v15962_v26  ;;  %v3371_v28 = vpop.f32.mrf.mxu2  ;;  %v13753_v26 = vld [vmem:[%s21285_s3 + $0x280] sm:$0xf0] }
 0x374   : > { %v3600_v21 = vpop.f32.mrf.mxu3  ;;  %v3372_v3 = vadd.f32 %v3371_v28, %v15927_v5 }
 0x375   : > { %v3601_v45 = vadd.f32 %v3600_v21, %v3367_v51  ;;  %v16009_v42 = vpop.f32.mrf.mxu1 }
 0x377   : > { %v3810_v7 = vpack.c.bf16 %v3601_v45, %v3601_v45 }
 0x379   : > { %v3925_v47 = vunpack.c.l.b16 %v3810_v7 }
 0x37b   : > { %v3373_v55 = vpop.f32.mrf.mxu2 }
 0x37c   : > { %v3602_v8 = vpop.f32.mrf.mxu3  ;;  %v3374_v5 = vadd.f32 %v3373_v55, %v3139_v61 }
 0x37d   : > { %v3603_v38 = vadd.f32 %v3602_v8, %v3369_v63  ;;  %v16018_v21 = vpop.f32.mrf.mxu1  ;;  %v13723_v63 = vld [vmem:[%s21285_s3 + $0x190] sm:$0xf0]  ;;  %v13728_v8 = vld [vmem:[%s21285_s3 + $0x1b8] sm:$0xf0] }
 0x37e   : > { %v11070_v7 = vor.u32 %v13728_v8, %v11069_v43 }
 0x37f   : > { %v3811_v30 = vpack.c.bf16 %v3603_v38, %v3603_v38  ;;  %3191 = vmatmul.bf16.gmra.mxu1 %v11058_v35  ;;  %v11074_v35 = vor.u32 %v13727_v49, %v11071_v41 }
 0x380   : > { %3415 = vmatmul.bf16.gmra.mxu2 %v11038_v32 }
 0x381   : > { %v3926_v17 = vunpack.c.l.b16 %v3811_v30  ;;  %11405 = vmatmul.msk.bf16.gmra.mxu3 %vm1581_vm10, %v11030_v29  ;;  %v11054_v30 = vor.u32 %v13723_v63, %v11053_v44  ;;  %v13730_v44 = vld [vmem:[%s21285_s3 + $0x1cc] sm:$0xf]  ;;  %v11083_v63 = vld [vmem:[%s21285_s3 + $0x1d4] sm:$0xf0] }
 0x383   : > { %v3935_v16 = vpack.c.b16 %v3926_v17, %v3925_v47  ;;  %v3376_v19 = vpop.f32.mrf.mxu2 }
 0x384   : > { %v3605_v31 = vpop.f32.mrf.mxu3  ;;  %v3377_v45 = vadd.f32 %v3376_v19, %v15954_v6 }
 0x385   : > { %3940 = vrot.lane.b32.xlu0 %v3935_v16, %s14411_s20  ;;  %v3606_v14 = vadd.f32 %v3605_v31, %v3372_v3  ;;  %v3157_v60 = vpop.f32.mrf.mxu1 }
 0x387   : > { %v3812_v33 = vpack.c.bf16 %v3606_v14, %v3606_v14 }
 0x389   : > { %v3927_v61 = vunpack.c.l.b16 %v3812_v33 }
 0x38b   : > { %v3378_v58 = vpop.f32.mrf.mxu2 }
 0x38c   : > { %v3607_v59 = vpop.f32.mrf.mxu3  ;;  %v3379_v6 = vadd.f32 %v3378_v58, %v15969_v40 }
 0x38d   : > { %v3608_v9 = vadd.f32 %v3607_v59, %v3374_v5  ;;  %v3159_v31 = vpop.f32.mrf.mxu1  ;;  %v13726_v5 = vld [vmem:[%s21285_s3 + $0x1a8] sm:$0xf0]  ;;  %v13731_v59 = vld [vmem:[%s21285_s3 + $0x1d0] sm:$0xf0] }
 0x38e   : > { %v11082_v33 = vor.u32 %v13731_v59, %v11081_v46  ;;  %v11095_v46 = vld [vmem:[%s21285_s3 + $0x1ec] sm:$0xf0] }
 0x38f   : > { %v3813_v11 = vpack.c.bf16 %v3608_v9, %v3608_v9  ;;  %3196 = vmatmul.bf16.gmra.mxu1 %v11070_v7  ;;  %v11089_v59 = vld [vmem:[%s21285_s3 + $0x1d0] sm:$0xf] }
 0x390   : > { %3420 = vmatmul.bf16.gmra.mxu2 %v11050_v27 }
 0x391   : > { %v3928_v18 = vunpack.c.l.b16 %v3813_v11  ;;  %11406 = vmatmul.msk.bf16.gmra.mxu3 %vm1581_vm10, %v11042_v39  ;;  %v11066_v11 = vor.u32 %v13726_v5, %v11065_v50 }
 0x393   : > { %v3936_v62 = vpack.c.b16 %v3928_v18, %v3927_v61  ;;  %v3381_v28 = vpop.f32.mrf.mxu2 }
 0x394   : > { %v3610_v51 = vpop.f32.mrf.mxu3  ;;  %v3382_v14 = vadd.f32 %v3381_v28, %v15984_v12 }
 0x395   : > { %3942 = vrot.lane.b32.xlu1 %v3936_v62, %s14411_s20  ;;  %v3611_v25 = vadd.f32 %v3610_v51, %v3377_v45  ;;  %v3162_v13 = vpop.f32.mrf.mxu1 }
 0x397   : > { %v3814_v38 = vpack.c.bf16 %v3611_v25, %v3611_v25 }
 0x399   : > { %v3929_v40 = vunpack.c.l.b16 %v3814_v38 }
 0x39b   : > { %v3383_v55 = vpop.f32.mrf.mxu2 }
 0x39c   : > { %v3612_v32 = vpop.f32.mrf.mxu3  ;;  %v3384_v12 = vadd.f32 %v3383_v55, %v15993_v54  ;;  %v11077_v55 = vld [vmem:[%s21285_s3 + $0x1b8] sm:$0xf] }
 0x39d   : > { %v3613_v29 = vadd.f32 %v3612_v32, %v3379_v6  ;;  %v3164_v51 = vpop.f32.mrf.mxu1  ;;  %v13815_v6 = vld [vmem:[%s21286_s4 + $0x38] sm:$0xff]  ;;  %v11093_v32 = vld [vmem:[%s21285_s3 + $0x1e0] sm:$0xf] }
 0x39e   : > { %4542 = vmatpush.bf16.msrb.mxu0 %v13815_v6 }
 0x39f   : > { %v3815_v47 = vpack.c.bf16 %v3613_v29, %v3613_v29  ;;  %3201 = vmatmul.bf16.gmra.mxu1 %v11082_v33  ;;  %v11086_v29 = vor.u32 %v13730_v44, %v11083_v63 }
 0x3a0   : > { %3425 = vmatmul.bf16.gmra.mxu2 %v11062_v1  ;;  %v13734_v1 = vld [vmem:[%s21285_s3 + $0x1e8] sm:$0xf0] }
 0x3a1   : > { %v3930_v17 = vunpack.c.l.b16 %v3815_v47  ;;  %11407 = vmatmul.msk.bf16.gmra.mxu3 %vm1581_vm10, %v11054_v30  ;;  %v11094_v30 = vor.u32 %v13734_v1, %v11093_v32  ;;  %v13808_v32 = vld [vmem:[%s21286_s4] sm:$0xff]  ;;  %v13736_v1 = vld [vmem:[%s21285_s3 + $0x1fc] sm:$0xf] }
 0x3a3   : > { %v3937_v16 = vpack.c.b16 %v3930_v17, %v3929_v40  ;;  %v3386_v19 = vpop.f32.mrf.mxu2 }
 0x3a4   : > { %v3615_v3 = vpop.f32.mrf.mxu3  ;;  %v3387_v2 = vadd.f32 %v3386_v19, %v16009_v42  ;;  %v13729_v42 = vld [vmem:[%s21285_s3 + $0x1c0] sm:$0xf0] }
 0x3a5   : > { %3944 = vrot.lane.b32.xlu2 %v3937_v16, %s14411_s20  ;;  %v3616_v15 = vadd.f32 %v3615_v3, %v3382_v14  ;;  %v3167_v8 = vpop.f32.mrf.mxu1  ;;  %v11078_v17 = vor.u32 %v13729_v42, %v11077_v55 }
 0x3a7   : > { %v3816_v9 = vpack.c.bf16 %v3616_v15, %v3616_v15 }
 0x3a9   : > { %v3931_v54 = vunpack.c.l.b16 %v3816_v9  ;;  %v11105_v9 = vld [vmem:[%s21285_s3 + $0x1f8] sm:$0xf] }
 0x3ab   : > { %v3388_v58 = vpop.f32.mrf.mxu2 }
 0x3ac   : > { %v3617_v27 = vpop.f32.mrf.mxu3 }
 0x3ad   : > { %v3618_v39 = vadd.f32 %v3617_v27, %v3384_v12  ;;  %v3169_v49 = vpop.f32.mrf.mxu1  ;;  %v13812_v12 = vld [vmem:[%s21286_s4 + $0x20] sm:$0xff]  ;;  %v13732_v27 = vld [vmem:[%s21285_s3 + $0x1d8] sm:$0xf0] }
 0x3af   : > { %v3817_v61 = vpack.c.bf16 %v3618_v39, %v3618_v39  ;;  %3206 = vmatmul.bf16.gmra.mxu1 %v11094_v30  ;;  %v13737_v39 = vld [vmem:[%s21285_s3 + $0x200] sm:$0xf0] }
 0x3b0   : > { %3430 = vmatmul.bf16.gmra.mxu2 %v11074_v35 }
 0x3b1   : > { %v3932_v18 = vunpack.c.l.b16 %v3817_v61  ;;  %11408 = vmatmul.msk.bf16.gmra.mxu3 %vm1581_vm10, %v11066_v11 }
 0x3b3   : > { %v3938_v62 = vpack.c.b16 %v3932_v18, %v3931_v54  ;;  %v3391_v28 = vpop.f32.mrf.mxu2  ;;  %v11106_v18 = vor.u32 %v13737_v39, %v11105_v9  ;;  %v13738_v9 = vld [vmem:[%s21285_s3 + $0x208] sm:$0xf0] }
 0x3b4   : > { %v3620_v45 = vpop.f32.mrf.mxu3  ;;  %v3392_v25 = vadd.f32 %v3391_v28, %v3157_v60  ;;  %v3389_v60 = vadd.f32 %v3388_v58, %v16018_v21  ;;  %v13814_v21 = vld [vmem:[%s21286_s4 + $0x30] sm:$0xff]  ;;  %v13733_v58 = vld [vmem:[%s21285_s3 + $0x1e4] sm:$0xf] }
 0x3b5   : > { %3946 = vrot.lane.b32.xlu0 %v3938_v62, %s14411_s20  ;;  %v3621_v37 = vadd.f32 %v3620_v45, %v3387_v2  ;;  %4543 = vmatpush.bf16.msrb.mxu0 %v13814_v21  ;;  %v3172_v33 = vpop.f32.mrf.mxu1  ;;  %v11098_v54 = vor.u32 %v13733_v58, %v11095_v46  ;;  %v11090_v45 = vor.u32 %v13732_v27, %v11089_v59  ;;  %v13739_v59 = vld [vmem:[%s21285_s3 + $0x214] sm:$0xf]  ;;  %v11119_v27 = vld [vmem:[%s21285_s3 + $0x21c] sm:$0xf0] }
 0x3b7   : > { %v3818_v47 = vpack.c.bf16 %v3621_v37, %v3621_v37 }
 0x3b9   : > { %v3933_v19 = vunpack.c.l.b16 %v3818_v47  ;;  %v11117_v47 = vld [vmem:[%s21285_s3 + $0x210] sm:$0xf] }
 0x3bb   : > { %v3393_v43 = vpop.f32.mrf.mxu2 }
 0x3bc   : > { %v3622_v7 = vpop.f32.mrf.mxu3  ;;  %v3394_v38 = vadd.f32 %v3393_v43, %v3159_v31  ;;  %v13813_v31 = vld [vmem:[%s21286_s4 + $0x28] sm:$0xff] }
 0x3bd   : > { %v3623_v40 = vadd.f32 %v3622_v7, %v3389_v60  ;;  %4544 = vmatpush.bf16.msrb.mxu0 %v13813_v31  ;;  %v3174_v55 = vpop.f32.mrf.mxu1  ;;  %v11107_v7 = vld [vmem:[%s21285_s3 + $0x204] sm:$0xf0] }
 0x3bf   : > { %v3819_v16 = vpack.c.bf16 %v3623_v40, %v3623_v40  ;;  %3211 = vmatmul.bf16.gmra.mxu1 %v11106_v18  ;;  %v13740_v40 = vld [vmem:[%s21285_s3 + $0x218] sm:$0xf0] }
 0x3c0   : > { %3435 = vmatmul.bf16.gmra.mxu2 %v11086_v29 }
 0x3c1   : > { %v3934_v3 = vunpack.c.l.b16 %v3819_v16  ;;  %11409 = vmatmul.msk.bf16.gmra.mxu3 %vm1581_vm10, %v11078_v17  ;;  %4545 = vmatpush.bf16.msrb.mxu0 %v13812_v12  ;;  %v11110_v16 = vor.u32 %v13736_v1, %v11107_v7 }
 0x3c3   : > { %v3939_v14 = vpack.c.b16 %v3934_v3, %v3933_v19  ;;  %v3396_v15 = vpop.f32.mrf.mxu2  ;;  %v11118_v19 = vor.u32 %v13740_v40, %v11117_v47  ;;  %v11131_v47 = vld [vmem:[%s21285_s3 + $0x234] sm:$0xf0]  ;;  %v13741_v40 = vld [vmem:[%s21285_s3 + $0x220] sm:$0xf0] }
 0x3c4   : > { %v3625_v41 = vpop.f32.mrf.mxu3  ;;  %v3397_v50 = vadd.f32 %v3396_v15, %v3162_v13  ;;  %v13811_v13 = vld [vmem:[%s21286_s4 + $0x18] sm:$0xff] }
 0x3c5   : > { %v3626_v5 = vadd.f32 %v3625_v41, %v3392_v25  ;;  %3948 = vrot.lane.b32.xlu1 %v3939_v14, %s14411_s20  ;;  %4546 = vmatpush.bf16.msrb.mxu0 %v13811_v13  ;;  %v13810_v25 = vld [vmem:[%s21286_s4 + $0x10] sm:$0xff]  ;;  %v3177_v30 = vpop.f32.mrf.mxu1 }
 0x3c7   : > { %v3820_v62 = vpack.c.bf16 %v3626_v5, %v3626_v5 }
 0x3c9   : > { %4547 = vmatpush.bf16.msrb.mxu0 %v13810_v25  ;;  %v16123_v37 = vunpack.c.l.b16 %v3820_v62  ;;  %v11122_v62 = vor.u32 %v13739_v59, %v11119_v27 }
 0x3cb   : > { %v3398_v35 = vpop.f32.mrf.mxu2 }
 0x3cc   : > { %v3627_v11 = vpop.f32.mrf.mxu3  ;;  %v3399_v61 = vadd.f32 %v3398_v35, %v3164_v51  ;;  %v13809_v51 = vld [vmem:[%s21286_s4 + $0x8] sm:$0xff]  ;;  %v11113_v35 = vld [vmem:[%s21285_s3 + $0x200] sm:$0xf] }
 0x3cd   : > { %v3628_v28 = vadd.f32 %v3627_v11, %v3394_v38  ;;  %4548 = vmatpush.bf16.msrb.mxu0 %v13809_v51  ;;  %v11101_v38 = vld [vmem:[%s21285_s3 + $0x1e8] sm:$0xf]  ;;  %v3179_v58 = vpop.f32.mrf.mxu1 }
 0x3cf   : > { %v3821_v2 = vpack.c.bf16 %v3628_v28, %v3628_v28  ;;  %3216 = vmatmul.bf16.gmra.mxu1 %v11118_v19 }
 0x3d0   : > { %3440 = vmatmul.bf16.gmra.mxu2 %v11098_v54 }
 0x3d1   : > { %v16125_v44 = vunpack.c.l.b16 %v3821_v2  ;;  %11410 = vmatmul.msk.bf16.gmra.mxu3 %vm1581_vm10, %v11090_v45  ;;  %4549 = vmatpush.bf16.msrb.mxu0 %v13808_v32  ;;  %v11114_v2 = vor.u32 %v13738_v9, %v11113_v35 }
 0x3d3   : > { %v3970_v63 = vpack.c.b16 %v16125_v44, %v16123_v37  ;;  %v3401_v6 = vpop.f32.mrf.mxu2  ;;  %v13769_v37 = vld [vmem:[%s21285_s3 + $0x304] sm:$0xf]  ;;  %v11239_v44 = vld [vmem:[%s21285_s3 + $0x30c] sm:$0xf0] }
 0x3d4   : > { %v3630_v42 = vpop.f32.mrf.mxu3  ;;  %v3402_v60 = vadd.f32 %v3401_v6, %v3167_v8  ;;  %v13735_v8 = vld [vmem:[%s21285_s3 + $0x1f0] sm:$0xf0] }
 0x3d5   : > { %v3631_v43 = vadd.f32 %v3630_v42, %v3397_v50  ;;  %v11102_v14 = vor.u32 %v13735_v8, %v11101_v38 }
 0x3d7   : > { %v3822_v3 = vpack.c.bf16 %v3631_v43, %v3631_v43 }
 0x3d9   : > { %v16154_v41 = vunpack.c.l.b16 %v3822_v3 }
 0x3db   : > { %v3403_v29 = vpop.f32.mrf.mxu2 }
 0x3dc   : > { %v3632_v17 = vpop.f32.mrf.mxu3  ;;  %v3404_v21 = vadd.f32 %v3403_v29, %v3169_v49  ;;  %v16173_v11 = vpop.f32.mrf.mxu1  ;;  %v13742_v29 = vld [vmem:[%s21285_s3 + $0x22c] sm:$0xf] }
 0x3dd   : > { %v3633_v31 = vadd.f32 %v3632_v17, %v3399_v61  ;;  %v13743_v61 = vld [vmem:[%s21285_s3 + $0x230] sm:$0xf0]  ;;  %v13746_v17 = vld [vmem:[%s21285_s3 + $0x248] sm:$0xf0]  ;;  %v11134_v19 = vor.u32 %v13742_v29, %v11131_v47 }
 0x3df   : > { %v3823_v15 = vpack.c.bf16 %v3633_v31, %v3633_v31 }
 0x3e0   : > { %3445 = vmatmul.bf16.gmra.mxu2 %v11110_v16 }
 0x3e1   : > { %v16156_v50 = vunpack.c.l.b16 %v3823_v15  ;;  %11411 = vmatmul.msk.bf16.gmra.mxu3 %vm1581_vm10, %v11102_v14 }
 0x3e3   : > { %v3971_v5 = vpack.c.b16 %v16156_v50, %v16154_v41  ;;  %v3406_v12 = vpop.f32.mrf.mxu2  ;;  %v13774_v41 = vld [vmem:[%s21285_s3 + $0x328] sm:$0xf0] }
 0x3e4   : > { %v3635_v49 = vpop.f32.mrf.mxu3  ;;  %v3407_v46 = vadd.f32 %v3406_v12, %v3172_v33  ;;  %v11129_v33 = vld [vmem:[%s21285_s3 + $0x228] sm:$0xf]  ;;  %v16188_v32 = vpop.f32.mrf.mxu1 }
 0x3e5   : > { %v3636_v13 = vadd.f32 %v3635_v49, %v3402_v60  ;;  %v11130_v28 = vor.u32 %v13743_v61, %v11129_v33  ;;  %v13745_v33 = vld [vmem:[%s21285_s3 + $0x244] sm:$0xf]  ;;  %v11143_v61 = vld [vmem:[%s21285_s3 + $0x24c] sm:$0xf0] }
 0x3e7   : > { %v3824_v45 = vpack.c.bf16 %v3636_v13, %v3636_v13  ;;  %3221 = vmatmul.bf16.gmra.mxu1 %v11130_v28 }
 0x3e9   : > { %v16181_v6 = vunpack.c.l.b16 %v3824_v45  ;;  %v11146_v45 = vor.u32 %v13745_v33, %v11143_v61 }
 0x3eb   : > { %v3408_v39 = vpop.f32.mrf.mxu2 }
 0x3ec   : > { %v3637_v54 = vpop.f32.mrf.mxu3  ;;  %v3409_v18 = vadd.f32 %v3408_v39, %v3174_v55  ;;  %v16206_v56 = vpop.f32.mrf.mxu1 }
 0x3ed   : > { %v3638_v25 = vadd.f32 %v3637_v54, %v3404_v21  ;;  %v11137_v54 = vld [vmem:[%s21285_s3 + $0x230] sm:$0xf] }
 0x3ef   : > { %v3825_v51 = vpack.c.bf16 %v3638_v25, %v3638_v25 }
 0x3f0   : > { %3450 = vmatmul.bf16.gmra.mxu2 %v11122_v62  ;;  %v13749_v62 = vld [vmem:[%s21285_s3 + $0x260] sm:$0xf0] }
 0x3f1   : > { %v16183_v42 = vunpack.c.l.b16 %v3825_v51  ;;  %11412 = vmatmul.msk.bf16.gmra.mxu3 %vm1581_vm10, %v11114_v2 }
 0x3f3   : > { %v3972_v60 = vpack.c.b16 %v16183_v42, %v16181_v6  ;;  %v3411_v43 = vpop.f32.mrf.mxu2  ;;  %v13777_v6 = vld [vmem:[%s21285_s3 + $0x340] sm:$0xf0] }
 0x3f4   : > { %v3640_v55 = vpop.f32.mrf.mxu3  ;;  %v3412_v1 = vadd.f32 %v3411_v43, %v3177_v30  ;;  %v11125_v30 = vld [vmem:[%s21285_s3 + $0x218] sm:$0xf]  ;;  %v16221_v27 = vpop.f32.mrf.mxu1 }
 0x3f5   : > { %v3641_v7 = vadd.f32 %v3640_v55, %v3407_v46  ;;  %v11126_v15 = vor.u32 %v13741_v40, %v11125_v30 }
 0x3f7   : > { %v3941_v38 = vpop.permute.xlu0 %3940  ;;  %v3826_v31 = vpack.c.bf16 %v3641_v7, %v3641_v7 }
 0x3f8   : > { %v4157_v8 = vsel %vm1729_vm14, %v3910_v34, %v3941_v38  ;;  %v11141_v34 = vld [vmem:[%s21285_s3 + $0x240] sm:$0xf] }
 0x3f9   : > { %4550 = vmatmul.bf16.vlgmr.msrb.gmra.mxu0 %v4157_v8  ;;  %v11142_v3 = vor.u32 %v13746_v17, %v11141_v34  ;;  %v16214_v49 = vunpack.c.l.b16 %v3826_v31  ;;  %v13748_v17 = vld [vmem:[%s21285_s3 + $0x25c] sm:$0xf] }
 0x3fb   : > { %v3413_v48 = vpop.f32.mrf.mxu2  ;;  %3226 = vmatmul.bf16.gmra.mxu1 %v11142_v3  ;;  %v13752_v3 = vld [vmem:[%s21285_s3 + $0x278] sm:$0xf0] }
 0x3fc   : > { %v3642_v21 = vpop.f32.mrf.mxu3  ;;  %v3414_v16 = vadd.f32 %v3413_v48, %v3179_v58  ;;  %v16239_v53 = vpop.f32.mrf.mxu1 }
 0x3fd   : > { %v3643_v14 = vadd.f32 %v3642_v21, %v3409_v18  ;;  %v13744_v18 = vld [vmem:[%s21285_s3 + $0x238] sm:$0xf0]  ;;  %v11155_v21 = vld [vmem:[%s21285_s3 + $0x264] sm:$0xf0] }
 0x3fe   : > { %v11138_v43 = vor.u32 %v13744_v18, %v11137_v54 }
 0x3ff   : > { %v3827_v12 = vpack.c.bf16 %v3643_v14, %v3643_v14  ;;  %v3945_v30 = vpop.permute.xlu2 %3944  ;;  %v11158_v14 = vor.u32 %v13748_v17, %v11155_v21 }
 0x400   : > { %3455 = vmatmul.bf16.gmra.mxu2 %v11134_v19  ;;  %v4165_v48 = vsel %vm1729_vm14, %v3912_v22, %v3945_v30  ;;  %v11165_v19 = vld [vmem:[%s21285_s3 + $0x270] sm:$0xf] }
 0x401   : > { %v16216_v46 = vunpack.c.l.b16 %v3827_v12  ;;  %11413 = vmatmul.msk.bf16.gmra.mxu3 %vm1581_vm10, %v11126_v15  ;;  %v11166_v15 = vor.u32 %v13752_v3, %v11165_v19 }
 0x403   : > { %v3973_v13 = vpack.c.b16 %v16216_v46, %v16214_v49  ;;  %v3416_v59 = vpop.f32.mrf.mxu2  ;;  %v13780_v49 = vld [vmem:[%s21285_s3 + $0x358] sm:$0xf0] }
 0x404   : > { %v3645_v58 = vpop.f32.mrf.mxu3  ;;  %v16254_v29 = vpop.f32.mrf.mxu1  ;;  %v3417_v40 = vadd.f32 %v3416_v59, %v16173_v11 }
 0x405   : > { %v3646_v35 = vadd.f32 %v3645_v58, %v3412_v1 }
 0x407   : > { %v3943_v9 = vpop.permute.xlu1 %3942  ;;  %v3828_v2 = vpack.c.bf16 %v3646_v35, %v3646_v35 }
 0x408   : > { %v4161_v39 = vsel %vm1729_vm14, %v3911_v20, %v3943_v9  ;;  %v11153_v20 = vld [vmem:[%s21285_s3 + $0x258] sm:$0xf] }
 0x409   : > { %4555 = vmatmul.bf16.gmra.mxu0 %v4161_v39  ;;  %v11154_v25 = vor.u32 %v13749_v62, %v11153_v20  ;;  %v16247_v1 = vunpack.c.l.b16 %v3828_v2  ;;  %v11177_v2 = vld [vmem:[%s21285_s3 + $0x288] sm:$0xf] }
 0x40b   : > { %v3418_v10 = vpop.f32.mrf.mxu2  ;;  %3231 = vmatmul.bf16.gmra.mxu1 %v11154_v25 }
 0x40c   : > { %v3647_v28 = vpop.f32.mrf.mxu3  ;;  %v3419_v23 = vadd.f32 %v3418_v10, %v16188_v32  ;;  %v16274_v11 = vpop.f32.mrf.mxu1 }
 0x40d   : > { %v3648_v51 = vadd.f32 %v3647_v28, %v3414_v16  ;;  %v11149_v16 = vld [vmem:[%s21285_s3 + $0x248] sm:$0xf]  ;;  %v13751_v28 = vld [vmem:[%s21285_s3 + $0x274] sm:$0xf] }
 0x40e   : > { %v11150_v58 = vor.u32 %v13747_v36, %v11149_v16 }
 0x40f   : > { %v3829_v55 = vpack.c.bf16 %v3648_v51, %v3648_v51  ;;  %v13755_v51 = vld [vmem:[%s21285_s3 + $0x290] sm:$0xf0] }
 0x410   : > { %3460 = vmatmul.bf16.gmra.mxu2 %v11146_v45  ;;  %v11167_v45 = vld [vmem:[%s21285_s3 + $0x27c] sm:$0xf0] }
 0x411   : > { %v16249_v7 = vunpack.c.l.b16 %v3829_v55  ;;  %11414 = vmatmul.msk.bf16.gmra.mxu3 %vm1581_vm10, %v11138_v43  ;;  %v11170_v55 = vor.u32 %v13751_v28, %v11167_v45 }
 0x413   : > { %v3974_v38 = vpack.c.b16 %v16249_v7, %v16247_v1  ;;  %v3421_v8 = vpop.f32.mrf.mxu2  ;;  %v13783_v1 = vld [vmem:[%s21285_s3 + $0x370] sm:$0xf0] }
 0x414   : > { %v3650_v47 = vpop.f32.mrf.mxu3  ;;  %v16283_v61 = vpop.f32.mrf.mxu1  ;;  %v3422_v18 = vadd.f32 %v3421_v8, %v16206_v56  ;;  %v11161_v56 = vld [vmem:[%s21285_s3 + $0x260] sm:$0xf]  ;;  %v11178_v8 = vor.u32 %v13755_v51, %v11177_v2  ;;  %v11191_v2 = vld [vmem:[%s21285_s3 + $0x2ac] sm:$0xf0] }
 0x415   : > { %v3651_v34 = vadd.f32 %v3650_v47, %v3417_v40  ;;  %v11162_v40 = vor.u32 %v13750_v52, %v11161_v56  ;;  %v13822_v52 = vld [vmem:[%s21286_s4 + $0x70] sm:$0xff] }
 0x416   : > { %v11185_v51 = vld [vmem:[%s21285_s3 + $0x290] sm:$0xf] }
 0x417   : > { %v3830_v12 = vpack.c.bf16 %v3651_v34, %v3651_v34 }
 0x419   : > { %4560 = vmatmul.bf16.gmra.mxu0 %v4165_v48  ;;  %v3985_v32 = vunpack.c.l.b16 %v3830_v12  ;;  %v11189_v12 = vld [vmem:[%s21285_s3 + $0x2a0] sm:$0xf] }
 0x41b   : > { %v3423_v22 = vpop.f32.mrf.mxu2  ;;  %3236 = vmatmul.bf16.gmra.mxu1 %v11166_v15 }
 0x41c   : > { %v3652_v31 = vpop.f32.mrf.mxu3  ;;  %v3424_v0 = vadd.f32 %v3423_v22, %v16221_v27  ;;  %v16304_v25 = vpop.f32.mrf.mxu1 }
 0x41d   : > { %v3653_v59 = vadd.f32 %v3652_v31, %v3419_v23  ;;  %v13754_v31 = vld [vmem:[%s21285_s3 + $0x28c] sm:$0xf] }
 0x41f   : > { %v3831_v35 = vpack.c.bf16 %v3653_v59, %v3653_v59  ;;  %v13758_v59 = vld [vmem:[%s21285_s3 + $0x2a8] sm:$0xf0] }
 0x420   : > { %3465 = vmatmul.bf16.gmra.mxu2 %v11158_v14  ;;  %v11179_v14 = vld [vmem:[%s21285_s3 + $0x294] sm:$0xf0] }
 0x421   : > { %v3986_v9 = vunpack.c.l.b16 %v3831_v35  ;;  %11415 = vmatmul.msk.bf16.gmra.mxu3 %vm1581_vm10, %v11150_v58  ;;  %v11182_v35 = vor.u32 %v13754_v31, %v11179_v14 }
 0x423   : > { %v3995_v39 = vpack.c.b16 %v3986_v9, %v3985_v32  ;;  %v3426_v33 = vpop.f32.mrf.mxu2  ;;  %v11190_v32 = vor.u32 %v13758_v59, %v11189_v12 }
 0x424   : > { %v3655_v54 = vpop.f32.mrf.mxu3  ;;  %v16313_v16 = vpop.f32.mrf.mxu1  ;;  %v3427_v23 = vadd.f32 %v3426_v33, %v16239_v53  ;;  %v11173_v53 = vld [vmem:[%s21285_s3 + $0x278] sm:$0xf] }
 0x425   : > { %4000 = vrot.lane.b32.xlu2 %v3995_v39, %s14411_s20  ;;  %v3656_v62 = vadd.f32 %v3655_v54, %v3422_v18  ;;  %v11174_v33 = vor.u32 %v13753_v26, %v11173_v53  ;;  %v13859_v53 = vld [vmem:[%s21289_s7 + $0x78] sm:$0xff] }
 0x426   : > { %5747 = vmatpush.bf16.msrb.mxu3 %v13859_v53 }
 0x427   : > { %v3947_v10 = vpop.permute.xlu0 %3946  ;;  %v3832_v47 = vpack.c.bf16 %v3656_v62, %v3656_v62 }
 0x428   : > { %v4169_v20 = vsel %vm1729_vm14, %v3913_v57, %v3947_v10  ;;  %v13823_v10 = vld [vmem:[%s21286_s4 + $0x78] sm:$0xff] }
 0x429   : > { %4565 = vmatmul.bf16.gmra.mxu0 %v4169_v20  ;;  %v3987_v27 = vunpack.c.l.b16 %v3832_v47 }
 0x42a   : > { %4576 = vmatpush.bf16.msra.mxu0 %v13823_v10  ;;  %v11213_v10 = vld [vmem:[%s21285_s3 + $0x2d0] sm:$0xf] }
 0x42b   : > { %v3428_v57 = vpop.f32.mrf.mxu2  ;;  %3241 = vmatmul.bf16.gmra.mxu1 %v11178_v8 }
 0x42c   : > { %v3657_v43 = vpop.f32.mrf.mxu3  ;;  %v3429_v24 = vadd.f32 %v3428_v57, %v16254_v29  ;;  %v3207_v15 = vpop.f32.mrf.mxu1  ;;  %v13757_v57 = vld [vmem:[%s21285_s3 + $0x2a4] sm:$0xf] }
 0x42d   : > { %v3658_v30 = vadd.f32 %v3657_v43, %v3424_v0  ;;  %v13756_v43 = vld [vmem:[%s21285_s3 + $0x298] sm:$0xf0] }
 0x42e   : > { %4577 = vmatpush.bf16.msra.mxu0 %v13822_v52 }
 0x42f   : > { %v3833_v48 = vpack.c.bf16 %v3658_v30, %v3658_v30  ;;  %v11201_v30 = vld [vmem:[%s21285_s3 + $0x2b8] sm:$0xf] }
 0x430   : > { %3470 = vmatmul.bf16.gmra.mxu2 %v11170_v55 }
 0x431   : > { %v3988_v34 = vunpack.c.l.b16 %v3833_v48  ;;  %11416 = vmatmul.msk.bf16.gmra.mxu3 %vm1581_vm10, %v11162_v40  ;;  %v13761_v40 = vld [vmem:[%s21285_s3 + $0x2c0] sm:$0xf0] }
 0x433   : > { %v3996_v17 = vpack.c.b16 %v3988_v34, %v3987_v27  ;;  %v3431_v21 = vpop.f32.mrf.mxu2  ;;  %v11194_v27 = vor.u32 %v13757_v57, %v11191_v2  ;;  %v11202_v34 = vor.u32 %v13761_v40, %v11201_v30  ;;  %v13816_v2 = vld [vmem:[%s21286_s4 + $0x40] sm:$0xff] }
 0x434   : > { %v3660_v36 = vpop.f32.mrf.mxu3  ;;  %v16344_v28 = vpop.f32.mrf.mxu1  ;;  %v3432_v56 = vadd.f32 %v3431_v21, %v16274_v11  ;;  %v13821_v11 = vld [vmem:[%s21286_s4 + $0x68] sm:$0xff] }
 0x435   : > { %4002 = vrot.lane.b32.xlu0 %v3996_v17, %s14411_s20  ;;  %v3661_v3 = vadd.f32 %v3660_v36, %v3427_v23  ;;  %4578 = vmatpush.bf16.msra.mxu0 %v13821_v11  ;;  %v11186_v36 = vor.u32 %v13756_v43, %v11185_v51 }
 0x437   : > { %v3949_v22 = vpop.permute.xlu1 %3948  ;;  %v3834_v9 = vpack.c.bf16 %v3661_v3, %v3661_v3  ;;  %v13819_v3 = vld [vmem:[%s21286_s4 + $0x58] sm:$0xff] }
 0x438   : > { %v4173_v19 = vsel %vm1729_vm14, %v3914_v4, %v3949_v22 }
 0x439   : > { %4570 = vmatmul.bf16.gmra.mxu0 %v4173_v19  ;;  %v3989_v29 = vunpack.c.l.b16 %v3834_v9  ;;  %v13817_v9 = vld [vmem:[%s21286_s4 + $0x48] sm:$0xff] }
 0x43b   : > { %v3433_v4 = vpop.f32.mrf.mxu2  ;;  %3246 = vmatmul.bf16.gmra.mxu1 %v11190_v32 }
 0x43c   : > { %v3662_v58 = vpop.f32.mrf.mxu3  ;;  %v3434_v55 = vadd.f32 %v3433_v4, %v16283_v61  ;;  %v16367_v47 = vpop.f32.mrf.mxu1  ;;  %v13820_v61 = vld [vmem:[%s21286_s4 + $0x60] sm:$0xff] }
 0x43d   : > { %v3663_v39 = vadd.f32 %v3662_v58, %v3429_v24  ;;  %4579 = vmatpush.bf16.msra.mxu0 %v13820_v61  ;;  %v13875_v24 = vld [vmem:[%s21289_s7 + $0xf8] sm:$0xff]  ;;  %v13818_v58 = vld [vmem:[%s21286_s4 + $0x50] sm:$0xff]  ;;  %v11225_v61 = vld [vmem:[%s21285_s3 + $0x2e8] sm:$0xf] }
 0x43e   : > { %5815 = vmatpush.bf16.msrb.mxu2 %v13875_v24 }
 0x43f   : > { %v3835_v54 = vpack.c.bf16 %v3663_v39, %v3663_v39  ;;  %v11197_v39 = vld [vmem:[%s21285_s3 + $0x2a8] sm:$0xf] }
 0x440   : > { %3475 = vmatmul.bf16.gmra.mxu2 %v11182_v35  ;;  %v13760_v35 = vld [vmem:[%s21285_s3 + $0x2bc] sm:$0xf] }
 0x441   : > { %v3990_v18 = vunpack.c.l.b16 %v3835_v54  ;;  %11417 = vmatmul.msk.bf16.gmra.mxu3 %vm1581_vm10, %v11174_v33  ;;  %4580 = vmatpush.bf16.msra.mxu0 %v13819_v3  ;;  %v13759_v33 = vld [vmem:[%s21285_s3 + $0x2b0] sm:$0xf0] }
 0x443   : > { %v3997_v20 = vpack.c.b16 %v3990_v18, %v3989_v29  ;;  %v3436_v62 = vpop.f32.mrf.mxu2 }
 0x444   : > { %v3665_v45 = vpop.f32.mrf.mxu3  ;;  %v3214_v26 = vpop.f32.mrf.mxu1  ;;  %v3437_v59 = vadd.f32 %v3436_v62, %v16304_v25  ;;  %v13867_v25 = vld [vmem:[%s21289_s7 + $0xb8] sm:$0xff] }
 0x445   : > { %4004 = vrot.lane.b32.xlu1 %v3997_v20, %s14411_s20  ;;  %v3666_v0 = vadd.f32 %v3665_v45, %v3432_v56  ;;  %4581 = vmatpush.bf16.msra.mxu0 %v13818_v58  ;;  %v13764_v20 = vld [vmem:[%s21285_s3 + $0x2d8] sm:$0xf0] }
 0x446   : > { %5781 = vmatpush.bf16.msrb.mxu1 %v13867_v25  ;;  %v11214_v52 = vor.u32 %v13764_v20, %v11213_v10  ;;  %v13770_v20 = vld [vmem:[%s21285_s3 + $0x308] sm:$0xf0] }
 0x447   : > { %v3836_v17 = vpack.c.bf16 %v3666_v0, %v3666_v0 }
 0x449   : > { %v3991_v22 = vunpack.c.l.b16 %v3836_v17  ;;  %4582 = vmatpush.bf16.msra.mxu0 %v13817_v9  ;;  %v11209_v17 = vld [vmem:[%s21285_s3 + $0x2c0] sm:$0xf]  ;;  %v13766_v9 = vld [vmem:[%s21285_s3 + $0x2ec] sm:$0xf] }
 0x44b   : > { %v3438_v8 = vpop.f32.mrf.mxu2  ;;  %3251 = vmatmul.bf16.gmra.mxu1 %v11202_v34  ;;  %v11215_v34 = vld [vmem:[%s21285_s3 + $0x2dc] sm:$0xf0] }
 0x44c   : > { %v3667_v48 = vpop.f32.mrf.mxu3  ;;  %v3439_v54 = vadd.f32 %v3438_v8, %v16313_v16  ;;  %v3217_v18 = vpop.f32.mrf.mxu1  ;;  %v11198_v16 = vor.u32 %v13759_v33, %v11197_v39  ;;  %v11227_v39 = vld [vmem:[%s21285_s3 + $0x2f4] sm:$0xf0] }
 0x44d   : > { %v3668_v21 = vadd.f32 %v3667_v48, %v3434_v55  ;;  %4583 = vmatpush.bf16.msra.mxu0 %v13816_v2  ;;  %v11221_v33 = vld [vmem:[%s21285_s3 + $0x2d8] sm:$0xf] }
 0x44f   : > { %v3837_v23 = vpack.c.bf16 %v3668_v21, %v3668_v21  ;;  %v13762_v21 = vld [vmem:[%s21285_s3 + $0x2c8] sm:$0xf0] }
 0x450   : > { %3480 = vmatmul.bf16.gmra.mxu2 %v11194_v27  ;;  %v13763_v27 = vld [vmem:[%s21285_s3 + $0x2d4] sm:$0xf]  ;;  %v11210_v24 = vor.u32 %v13762_v21, %v11209_v17 }
 0x451   : > { %v3992_v19 = vunpack.c.l.b16 %v3837_v23  ;;  %11418 = vmatmul.msk.bf16.gmra.mxu3 %vm1581_vm10, %v11186_v36  ;;  %v13767_v23 = vld [vmem:[%s21285_s3 + $0x2f0] sm:$0xf0]  ;;  %v11218_v3 = vor.u32 %v13763_v27, %v11215_v34  ;;  %v13768_v34 = vld [vmem:[%s21285_s3 + $0x2f8] sm:$0xf0] }
 0x453   : > { %v3998_v31 = vpack.c.b16 %v3992_v19, %v3991_v22  ;;  %v3441_v14 = vpop.f32.mrf.mxu2 }
 0x454   : > { %v3670_v4 = vpop.f32.mrf.mxu3  ;;  %v3442_v12 = vadd.f32 %v3441_v14, %v3207_v15  ;;  %v11203_v15 = vld [vmem:[%s21285_s3 + $0x2c4] sm:$0xf0] }
 0x455   : > { %4006 = vrot.lane.b32.xlu2 %v3998_v31, %s14411_s20  ;;  %v3671_v32 = vadd.f32 %v3670_v4, %v3437_v59  ;;  %v11206_v56 = vor.u32 %v13760_v35, %v11203_v15  ;;  %v11226_v31 = vor.u32 %v13767_v23, %v11225_v61 }
 0x457   : > { %v3838_v0 = vpack.c.bf16 %v3671_v32, %v3671_v32 }
 0x459   : > { %v3993_v51 = vunpack.c.l.b16 %v3838_v0 }
 0x45b   : > { %v3443_v29 = vpop.f32.mrf.mxu2  ;;  %3256 = vmatmul.bf16.gmra.mxu1 %v11214_v52 }
 0x45c   : > { %v3672_v62 = vpop.f32.mrf.mxu3  ;;  %v3444_v45 = vadd.f32 %v3443_v29, %v16344_v28  ;;  %v3219_v28 = vpop.f32.mrf.mxu1 }
 0x45d   : > { %v3673_v57 = vadd.f32 %v3672_v62, %v3439_v54  ;;  %v13765_v54 = vld [vmem:[%s21285_s3 + $0x2e0] sm:$0xf0] }
 0x45f   : > { %v3839_v11 = vpack.c.bf16 %v3673_v57, %v3673_v57 }
 0x460   : > { %3485 = vmatmul.bf16.gmra.mxu2 %v11206_v56  ;;  %v11230_v56 = vor.u32 %v13766_v9, %v11227_v39  ;;  %v13772_v39 = vld [vmem:[%s21285_s3 + $0x31c] sm:$0xf] }
 0x461   : > { %v3994_v43 = vunpack.c.l.b16 %v3839_v11  ;;  %11419 = vmatmul.msk.bf16.gmra.mxu3 %vm1581_vm10, %v11198_v16  ;;  %v11222_v16 = vor.u32 %v13765_v54, %v11221_v33  ;;  %v11251_v33 = vld [vmem:[%s21285_s3 + $0x324] sm:$0xf0] }
 0x462   : > { %v11245_v54 = vld [vmem:[%s21285_s3 + $0x308] sm:$0xf] }
 0x463   : > { %v3999_v55 = vpack.c.b16 %v3994_v43, %v3993_v51  ;;  %v3446_v8 = vpop.f32.mrf.mxu2 }
 0x464   : > { %v3675_v30 = vpop.f32.mrf.mxu3  ;;  %v3447_v40 = vadd.f32 %v3446_v8, %v16367_v47  ;;  %v3222_v36 = vpop.f32.mrf.mxu1 }
 0x465   : > { %v3676_v48 = vadd.f32 %v3675_v30, %v3442_v12  ;;  %4008 = vrot.lane.b32.xlu0 %v3999_v55, %s14411_s20 }
 0x467   : > { %v3840_v14 = vpack.c.bf16 %v3676_v48, %v3676_v48 }
 0x469   : > { %v16443_v12 = vunpack.c.l.b16 %v3840_v14 }
 0x46b   : > { %v3448_v47 = vpop.f32.mrf.mxu2  ;;  %3261 = vmatmul.bf16.gmra.mxu1 %v11226_v31 }
 0x46c   : > { %v3677_v22 = vpop.f32.mrf.mxu3  ;;  %v3449_v19 = vadd.f32 %v3448_v47, %v3214_v26  ;;  %v3224_v32 = vpop.f32.mrf.mxu1  ;;  %v11249_v47 = vld [vmem:[%s21285_s3 + $0x318] sm:$0xf] }
 0x46d   : > { %v3678_v53 = vadd.f32 %v3677_v22, %v3444_v45  ;;  %v11242_v22 = vor.u32 %v13769_v37, %v11239_v44 }
 0x46f   : > { %v3841_v4 = vpack.c.bf16 %v3678_v53, %v3678_v53 }
 0x470   : > { %3490 = vmatmul.bf16.gmra.mxu2 %v11218_v3 }
 0x471   : > { %v16445_v59 = vunpack.c.l.b16 %v3841_v4  ;;  %11420 = vmatmul.msk.bf16.gmra.mxu3 %vm1581_vm10, %v11210_v24 }
 0x473   : > { %v4030_v58 = vpack.c.b16 %v16445_v59, %v16443_v12  ;;  %v3451_v35 = vpop.f32.mrf.mxu2 }
 0x474   : > { %v3680_v26 = vpop.f32.mrf.mxu3  ;;  %v3452_v15 = vadd.f32 %v3451_v35, %v3217_v18  ;;  %v11237_v18 = vld [vmem:[%s21285_s3 + $0x300] sm:$0xf] }
 0x475   : > { %v3681_v25 = vadd.f32 %v3680_v26, %v3447_v40  ;;  %v11238_v52 = vor.u32 %v13770_v20, %v11237_v18 }
 0x477   : > { %v3842_v0 = vpack.c.bf16 %v3681_v25, %v3681_v25 }
 0x478   : > { %v3227_v10 = vpop.f32.mrf.mxu1 }
 0x479   : > { %v16472_v43 = vunpack.c.l.b16 %v3842_v0  ;;  %v11254_v0 = vor.u32 %v13772_v39, %v11251_v33 }
 0x47b   : > { %v3453_v29 = vpop.f32.mrf.mxu2  ;;  %3266 = vmatmul.bf16.gmra.mxu1 %v11238_v52 }
 0x47c   : > { %v3682_v62 = vpop.f32.mrf.mxu3  ;;  %v3454_v45 = vadd.f32 %v3453_v29, %v3219_v28  ;;  %v13771_v29 = vld [vmem:[%s21285_s3 + $0x310] sm:$0xf0] }
 0x47d   : > { %v3683_v57 = vadd.f32 %v3682_v62, %v3449_v19  ;;  %v13776_v62 = vld [vmem:[%s21285_s3 + $0x338] sm:$0xf0] }
 0x47f   : > { %v3843_v2 = vpack.c.bf16 %v3683_v57, %v3683_v57  ;;  %v4001_v11 = vpop.permute.xlu2 %4000 }
 0x480   : > { %v4177_v51 = vsel %vm1729_vm14, %v3970_v63, %v4001_v11  ;;  %3495 = vmatmul.bf16.gmra.mxu2 %v11230_v56  ;;  %v3229_v30 = vpop.f32.mrf.mxu1  ;;  %v11233_v63 = vld [vmem:[%s21285_s3 + $0x2f0] sm:$0xf]  ;;  %v11246_v11 = vor.u32 %v13771_v29, %v11245_v54 }
 0x481   : > { %v16474_v55 = vunpack.c.l.b16 %v3843_v2  ;;  %11421 = vmatmul.msk.bf16.gmra.mxu3 %vm1581_vm10, %v11222_v16  ;;  %4584 = vmatmul.bf16.vlgmr.msra.gmra.mxu0 %v4177_v51  ;;  %v11234_v14 = vor.u32 %v13768_v34, %v11233_v63 }
 0x483   : > { %v4031_v8 = vpack.c.b16 %v16474_v55, %v16472_v43  ;;  %v3456_v28 = vpop.f32.mrf.mxu2 }
 0x484   : > { %v3685_v40 = vpop.f32.mrf.mxu3  ;;  %v3457_v48 = vadd.f32 %v3456_v28, %v3222_v36  ;;  %v13773_v36 = vld [vmem:[%s21285_s3 + $0x320] sm:$0xf0] }
 0x485   : > { %v3686_v27 = vadd.f32 %v3685_v40, %v3452_v15  ;;  %v11250_v19 = vor.u32 %v13773_v36, %v11249_v47  ;;  %v13775_v47 = vld [vmem:[%s21285_s3 + $0x334] sm:$0xf]  ;;  %v11263_v36 = vld [vmem:[%s21285_s3 + $0x33c] sm:$0xf0] }
 0x487   : > { %v3844_v3 = vpack.c.bf16 %v3686_v27, %v3686_v27 }
 0x488   : > { %v16491_v21 = vpop.f32.mrf.mxu1 }
 0x489   : > { %v16499_v24 = vunpack.c.l.b16 %v3844_v3 }
 0x48b   : > { %v3458_v17 = vpop.f32.mrf.mxu2  ;;  %3271 = vmatmul.bf16.gmra.mxu1 %v11250_v19  ;;  %v13779_v19 = vld [vmem:[%s21285_s3 + $0x350] sm:$0xf0] }
 0x48c   : > { %v3687_v61 = vpop.f32.mrf.mxu3  ;;  %v3459_v23 = vadd.f32 %v3458_v17, %v3224_v32 }
 0x48d   : > { %v3688_v31 = vadd.f32 %v3687_v61, %v3454_v45  ;;  %v16528_v45 = vpop.f32.mrf.mxu0  ;;  %v13858_v61 = vld [vmem:[%s21289_s7 + $0x70] sm:$0xff] }
 0x48e   : > { %5748 = vmatpush.bf16.msrb.mxu3 %v13858_v61 }
 0x48f   : > { %v3845_v53 = vpack.c.bf16 %v3688_v31, %v3688_v31  ;;  %v11266_v31 = vor.u32 %v13775_v47, %v11263_v36 }
 0x490   : > { %3500 = vmatmul.bf16.gmra.mxu2 %v11242_v22  ;;  %v16506_v15 = vpop.f32.mrf.mxu1  ;;  %v11273_v22 = vld [vmem:[%s21285_s3 + $0x348] sm:$0xf] }
 0x491   : > { %v16501_v4 = vunpack.c.l.b16 %v3845_v53  ;;  %11422 = vmatmul.msk.bf16.gmra.mxu3 %vm1581_vm10, %v11234_v14  ;;  %v11274_v14 = vor.u32 %v13779_v19, %v11273_v22 }
 0x493   : > { %v4032_v35 = vpack.c.b16 %v16501_v4, %v16499_v24  ;;  %v3461_v26 = vpop.f32.mrf.mxu2  ;;  %v13872_v24 = vld [vmem:[%s21289_s7 + $0xe0] sm:$0xff] }
 0x494   : > { %v3690_v32 = vpop.f32.mrf.mxu3  ;;  %v3462_v25 = vadd.f32 %v3461_v26, %v3227_v10  ;;  %v11261_v10 = vld [vmem:[%s21285_s3 + $0x330] sm:$0xf] }
 0x495   : > { %v3691_v9 = vadd.f32 %v3690_v32, %v3457_v48  ;;  %v11262_v57 = vor.u32 %v13776_v62, %v11261_v10  ;;  %v16539_v63 = vpop.f32.mrf.mxu0  ;;  %v13866_v10 = vld [vmem:[%s21289_s7 + $0xb0] sm:$0xff] }
 0x496   : > { %5782 = vmatpush.bf16.msrb.mxu1 %v13866_v10  ;;  %v11287_v10 = vld [vmem:[%s21285_s3 + $0x36c] sm:$0xf0] }
 0x497   : > { %v3846_v16 = vpack.c.bf16 %v3691_v9, %v3691_v9 }
 0x498   : > { %v16520_v20 = vpop.f32.mrf.mxu1 }
 0x499   : > { %v16530_v28 = vunpack.c.l.b16 %v3846_v16 }
 0x49b   : > { %v3463_v18 = vpop.f32.mrf.mxu2  ;;  %3276 = vmatmul.bf16.gmra.mxu1 %v11262_v57 }
 0x49c   : > { %v3692_v56 = vpop.f32.mrf.mxu3  ;;  %v3464_v52 = vadd.f32 %v3463_v18, %v3229_v30  ;;  %v13874_v18 = vld [vmem:[%s21289_s7 + $0xf0] sm:$0xff] }
 0x49d   : > { %v3693_v2 = vadd.f32 %v3692_v56, %v3459_v23  ;;  %v11257_v23 = vld [vmem:[%s21285_s3 + $0x320] sm:$0xf]  ;;  %v16568_v9 = vpop.f32.mrf.mxu0  ;;  %5816 = vmatpush.bf16.msrb.mxu2 %v13874_v18  ;;  %v13781_v18 = vld [vmem:[%s21285_s3 + $0x364] sm:$0xf] }
 0x49e   : > { %v11258_v32 = vor.u32 %v13774_v41, %v11257_v23 }
 0x49f   : > { %v3847_v51 = vpack.c.bf16 %v3693_v2, %v3693_v2  ;;  %v13778_v2 = vld [vmem:[%s21285_s3 + $0x34c] sm:$0xf] }
 0x4a0   : > { %3505 = vmatmul.bf16.gmra.mxu2 %v11254_v0  ;;  %v16537_v37 = vpop.f32.mrf.mxu1 }
 0x4a1   : > { %v16532_v40 = vunpack.c.l.b16 %v3847_v51  ;;  %11423 = vmatmul.msk.bf16.gmra.mxu3 %vm1581_vm10, %v11246_v11  ;;  %v11275_v11 = vld [vmem:[%s21285_s3 + $0x354] sm:$0xf0] }
 0x4a3   : > { %v4033_v48 = vpack.c.b16 %v16532_v40, %v16530_v28  ;;  %v3466_v27 = vpop.f32.mrf.mxu2  ;;  %v11341_v28 = vld [vmem:[%s21285_s3 + $0x3c8] sm:$0xf]  ;;  %v13795_v40 = vld [vmem:[%s21285_s3 + $0x3d0] sm:$0xf0] }
 0x4a4   : > { %v3695_v30 = vpop.f32.mrf.mxu3 }
 0x4a5   : > { %v3696_v44 = vadd.f32 %v3695_v30, %v3462_v25  ;;  %v16596_v51 = vpop.f32.mrf.mxu0  ;;  %v11285_v30 = vld [vmem:[%s21285_s3 + $0x360] sm:$0xf] }
 0x4a7   : > { %v4003_v34 = vpop.permute.xlu0 %4002  ;;  %v3848_v53 = vpack.c.bf16 %v3696_v44, %v3696_v44  ;;  %v13782_v44 = vld [vmem:[%s21285_s3 + $0x368] sm:$0xf0] }
 0x4a8   : > { %v4181_v17 = vsel %vm1729_vm14, %v3971_v5, %v4003_v34  ;;  %v16560_v5 = vpop.f32.mrf.mxu1  ;;  %v11286_v47 = vor.u32 %v13782_v44, %v11285_v30 }
 0x4a9   : > { %4589 = vmatmul.bf16.gmra.mxu0 %v4181_v17  ;;  %v16570_v39 = vunpack.c.l.b16 %v3848_v53  ;;  %v11278_v17 = vor.u32 %v13778_v2, %v11275_v11 }
 0x4ab   : > { %v3468_v50 = vpop.f32.mrf.mxu2  ;;  %3281 = vmatmul.bf16.gmra.mxu1 %v11274_v14 }
 0x4ac   : > { %v3697_v3 = vpop.f32.mrf.mxu3  ;;  %v3469_v42 = vadd.f32 %v3468_v50, %v16506_v15 }
 0x4ad   : > { %v3698_v26 = vadd.f32 %v3697_v3, %v3464_v52  ;;  %v3467_v52 = vadd.f32 %v3466_v27, %v16491_v21  ;;  %v11269_v21 = vld [vmem:[%s21285_s3 + $0x338] sm:$0xf] }
 0x4ae   : > { %v11270_v23 = vor.u32 %v13777_v6, %v11269_v21 }
 0x4af   : > { %v3849_v25 = vpack.c.bf16 %v3698_v26, %v3698_v26  ;;  %v4007_v53 = vpop.permute.xlu2 %4006 }
 0x4b0   : > { %3510 = vmatmul.bf16.gmra.mxu2 %v11266_v31  ;;  %v16583_v62 = vpop.f32.mrf.mxu1  ;;  %v16616_v31 = vpop.f32.mrf.mxu0 }
 0x4b1   : > { %v16572_v33 = vunpack.c.l.b16 %v3849_v25  ;;  %11424 = vmatmul.msk.bf16.gmra.mxu3 %vm1581_vm10, %v11258_v32  ;;  %v4189_v32 = vsel %vm1729_vm14, %v3973_v13, %v4007_v53 }
 0x4b3   : > { %v3471_v29 = vpop.f32.mrf.mxu2 }
 0x4b4   : > { %v3700_v56 = vpop.f32.mrf.mxu3  ;;  %v3472_v26 = vadd.f32 %v3471_v29, %v16520_v20  ;;  %v11281_v20 = vld [vmem:[%s21285_s3 + $0x350] sm:$0xf] }
 0x4b5   : > { %v3701_v16 = vadd.f32 %v3700_v56, %v3467_v52  ;;  %v11297_v56 = vld [vmem:[%s21285_s3 + $0x378] sm:$0xf]  ;;  %v13785_v52 = vld [vmem:[%s21285_s3 + $0x380] sm:$0xf0]  ;;  %v11282_v21 = vor.u32 %v13780_v49, %v11281_v20 }
 0x4b7   : > { %v4005_v0 = vpop.permute.xlu1 %4004  ;;  %v3850_v36 = vpack.c.bf16 %v3701_v16, %v3701_v16  ;;  %v11298_v16 = vor.u32 %v13785_v52, %v11297_v56 }
 0x4b8   : > { %v4185_v57 = vsel %vm1729_vm14, %v3972_v60, %v4005_v0  ;;  %v16605_v27 = vpop.f32.mrf.mxu1  ;;  %v16645_v6 = vpop.f32.mrf.mxu0 }
 0x4b9   : > { %4594 = vmatmul.bf16.gmra.mxu0 %v4185_v57  ;;  %v4045_v15 = vunpack.c.l.b16 %v3850_v36  ;;  %v11290_v57 = vor.u32 %v13781_v18, %v11287_v10 }
 0x4bb   : > { %v3473_v60 = vpop.f32.mrf.mxu2  ;;  %3286 = vmatmul.bf16.gmra.mxu1 %v11286_v47 }
 0x4bc   : > { %v3702_v34 = vpop.f32.mrf.mxu3  ;;  %v3474_v46 = vadd.f32 %v3473_v60, %v16537_v37 }
 0x4bd   : > { %v3703_v61 = vadd.f32 %v3702_v34, %v3469_v42 }
 0x4bf   : > { %v3851_v41 = vpack.c.bf16 %v3703_v61, %v3703_v61 }
 0x4c0   : > { %3515 = vmatmul.bf16.gmra.mxu2 %v11278_v17  ;;  %v16614_v3 = vpop.f32.mrf.mxu1  ;;  %v16652_v61 = vpop.f32.mrf.mxu0 }
 0x4c1   : > { %v4046_v50 = vunpack.c.l.b16 %v3851_v41  ;;  %11425 = vmatmul.msk.bf16.gmra.mxu3 %vm1581_vm10, %v11270_v23 }
 0x4c3   : > { %v4055_v22 = vpack.c.b16 %v4046_v50, %v4045_v15  ;;  %v3476_v19 = vpop.f32.mrf.mxu2  ;;  %v13784_v15 = vld [vmem:[%s21285_s3 + $0x37c] sm:$0xf]  ;;  %v11293_v50 = vld [vmem:[%s21285_s3 + $0x368] sm:$0xf] }
 0x4c4   : > { %v3705_v14 = vpop.f32.mrf.mxu3  ;;  %v3477_v47 = vadd.f32 %v3476_v19, %v16560_v5  ;;  %v11299_v5 = vld [vmem:[%s21285_s3 + $0x384] sm:$0xf0]  ;;  %v11309_v19 = vld [vmem:[%s21285_s3 + $0x390] sm:$0xf]  ;;  %v11294_v10 = vor.u32 %v13783_v1, %v11293_v50 }
 0x4c5   : > { %4060 = vrot.lane.b32.xlu1 %v4055_v22, %s14411_s20  ;;  %v3706_v25 = vadd.f32 %v3705_v14, %v3472_v26  ;;  %v13788_v14 = vld [vmem:[%s21285_s3 + $0x398] sm:$0xf0]  ;;  %v11302_v26 = vor.u32 %v13784_v15, %v11299_v5 }
 0x4c7   : > { %v3852_v2 = vpack.c.bf16 %v3706_v25, %v3706_v25 }
 0x4c8   : > { %v16637_v29 = vpop.f32.mrf.mxu1 }
 0x4c9   : > { %4599 = vmatmul.bf16.gmra.mxu0 %v4189_v32  ;;  %v4047_v42 = vunpack.c.l.b16 %v3852_v2  ;;  %v11310_v32 = vor.u32 %v13788_v14, %v11309_v19  ;;  %v13787_v2 = vld [vmem:[%s21285_s3 + $0x394] sm:$0xf] }
 0x4cb   : > { %v3478_v13 = vpop.f32.mrf.mxu2  ;;  %3291 = vmatmul.bf16.gmra.mxu1 %v11298_v16 }
 0x4cc   : > { %v3707_v0 = vpop.f32.mrf.mxu3  ;;  %v3479_v7 = vadd.f32 %v3478_v13, %v16583_v62 }
 0x4cd   : > { %v3708_v11 = vadd.f32 %v3707_v0, %v3474_v46  ;;  %v16678_v46 = vpop.f32.mrf.mxu0 }
 0x4cf   : > { %v3853_v37 = vpack.c.bf16 %v3708_v11, %v3708_v11  ;;  %v11311_v11 = vld [vmem:[%s21285_s3 + $0x39c] sm:$0xf0] }
 0x4d0   : > { %3520 = vmatmul.bf16.gmra.mxu2 %v11290_v57  ;;  %v16648_v34 = vpop.f32.mrf.mxu1 }
 0x4d1   : > { %v4048_v60 = vunpack.c.l.b16 %v3853_v37  ;;  %11426 = vmatmul.msk.bf16.gmra.mxu3 %vm1581_vm10, %v11282_v21  ;;  %v11305_v21 = vld [vmem:[%s21285_s3 + $0x380] sm:$0xf]  ;;  %v13786_v37 = vld [vmem:[%s21285_s3 + $0x388] sm:$0xf0] }
 0x4d2   : > { %v11306_v15 = vor.u32 %v13786_v37, %v11305_v21  ;;  %v13830_v21 = vld [vmem:[%s21286_s4 + $0xb0] sm:$0xff] }
 0x4d3   : > { %v4056_v30 = vpack.c.b16 %v4048_v60, %v4047_v42  ;;  %v3481_v44 = vpop.f32.mrf.mxu2  ;;  %v11321_v60 = vld [vmem:[%s21285_s3 + $0x3a8] sm:$0xf] }
 0x4d4   : > { %v3710_v17 = vpop.f32.mrf.mxu3  ;;  %v3482_v57 = vadd.f32 %v3481_v44, %v16605_v27 }
 0x4d5   : > { %4062 = vrot.lane.b32.xlu2 %v4056_v30, %s14411_s20  ;;  %v3711_v41 = vadd.f32 %v3710_v17, %v3477_v47  ;;  %v13791_v30 = vld [vmem:[%s21285_s3 + $0x3b0] sm:$0xf0]  ;;  %v16703_v44 = vpop.f32.mrf.mxu0  ;;  %v11314_v47 = vor.u32 %v13787_v2, %v11311_v11 }
 0x4d7   : > { %v4009_v36 = vpop.permute.xlu0 %4008  ;;  %v3854_v25 = vpack.c.bf16 %v3711_v41, %v3711_v41 }
 0x4d8   : > { %v4193_v23 = vsel %vm1729_vm14, %v3974_v38, %v4009_v36  ;;  %v3257_v22 = vpop.f32.mrf.mxu1  ;;  %v11322_v36 = vor.u32 %v13791_v30, %v11321_v60 }
 0x4d9   : > { %4604 = vmatmul.bf16.gmra.mxu0 %v4193_v23  ;;  %v4049_v62 = vunpack.c.l.b16 %v3854_v25  ;;  %v16715_v25 = vld [vmem:[%s21287_s5] ss:$0 sm:$0xff] }
 0x4db   : > { %v3483_v38 = vpop.f32.mrf.mxu2  ;;  %3296 = vmatmul.bf16.gmra.mxu1 %v11310_v32 }
 0x4dc   : > { %v3712_v53 = vpop.f32.mrf.mxu3  ;;  %v3484_v27 = vadd.f32 %v3483_v38, %v16614_v3 }
 0x4dd   : > { %v3713_v18 = vadd.f32 %v3712_v53, %v3479_v7 }
 0x4df   : > { %v3855_v20 = vpack.c.bf16 %v3713_v18, %v3713_v18 }
 0x4e0   : > { %3525 = vmatmul.bf16.gmra.mxu2 %v11302_v26  ;;  %v16680_v52 = vpop.f32.mrf.mxu1  ;;  %v16708_v26 = vpop.f32.mrf.mxu0 }
 0x4e1   : > { %v4050_v49 = vunpack.c.l.b16 %v3855_v20  ;;  %11427 = vmatmul.msk.bf16.gmra.mxu3 %vm1581_vm10, %v11294_v10  ;;  %v13790_v10 = vld [vmem:[%s21285_s3 + $0x3ac] sm:$0xf]  ;;  %v11317_v20 = vld [vmem:[%s21285_s3 + $0x398] sm:$0xf] }
 0x4e3   : > { %v4057_v13 = vpack.c.b16 %v4050_v49, %v4049_v62  ;;  %v3486_v56 = vpop.f32.mrf.mxu2  ;;  %v13789_v62 = vld [vmem:[%s21285_s3 + $0x3a0] sm:$0xf0] }
 0x4e4   : > { %v3715_v0 = vpop.f32.mrf.mxu3  ;;  %v3487_v53 = vadd.f32 %v3486_v56, %v16637_v29  ;;  %v11323_v29 = vld [vmem:[%s21285_s3 + $0x3b4] sm:$0xf0]  ;;  %v11318_v11 = vor.u32 %v13789_v62, %v11317_v20 }
 0x4e5   : > { %4064 = vrot.lane.b32.xlu0 %v4057_v13, %s14411_s20  ;;  %v3716_v16 = vadd.f32 %v3715_v0, %v3482_v57  ;;  %v11326_v0 = vor.u32 %v13790_v10, %v11323_v29  ;;  %v4552_v57 = vadd.f32 %v16715_v25, %v16528_v45  ;;  %v13829_v45 = vld [vmem:[%s21286_s4 + $0xa8] sm:$0xff]  ;;  %v13826_v10 = vld [vmem:[%s21286_s4 + $0x90] sm:$0xff] }
 0x4e6   : > { %v13825_v29 = vld [vmem:[%s21286_s4 + $0x88] sm:$0xff] }
 0x4e7   : > { %v3856_v23 = vpack.c.bf16 %v3716_v16, %v3716_v16 }
 0x4e8   : > { %v3262_v5 = vpop.f32.mrf.mxu1 }
 0x4e9   : > { %v4051_v50 = vunpack.c.l.b16 %v3856_v23 }
 0x4eb   : > { %v3488_v42 = vpop.f32.mrf.mxu2  ;;  %3301 = vmatmul.bf16.gmra.mxu1 %v11322_v36  ;;  %v13857_v36 = vld [vmem:[%s21289_s7 + $0x68] sm:$0xff] }
 0x4ec   : > { %v3717_v17 = vpop.f32.mrf.mxu3  ;;  %v3489_v49 = vadd.f32 %v3488_v42, %v16648_v34  ;;  %5749 = vmatpush.bf16.msrb.mxu3 %v13857_v36 }
 0x4ed   : > { %v3718_v41 = vadd.f32 %v3717_v17, %v3484_v27 }
 0x4ef   : > { %v3857_v3 = vpack.c.bf16 %v3718_v41, %v3718_v41 }
 0x4f0   : > { %3530 = vmatmul.bf16.gmra.mxu2 %v11314_v47  ;;  %v16710_v32 = vpop.f32.mrf.mxu1 }
 0x4f1   : > { %v4052_v1 = vunpack.c.l.b16 %v3857_v3  ;;  %11428 = vmatmul.msk.bf16.gmra.mxu3 %vm1581_vm10, %v11306_v15  ;;  %v13828_v3 = vld [vmem:[%s21286_s4 + $0xa0] sm:$0xff] }
 0x4f3   : > { %v4058_v7 = vpack.c.b16 %v4052_v1, %v4051_v50  ;;  %v3491_v38 = vpop.f32.mrf.mxu2  ;;  %v13873_v50 = vld [vmem:[%s21289_s7 + $0xe8] sm:$0xff]  ;;  %v13827_v1 = vld [vmem:[%s21286_s4 + $0x98] sm:$0xff] }
 0x4f4   : > { %v3720_v19 = vpop.f32.mrf.mxu3  ;;  %v3492_v14 = vadd.f32 %v3491_v38, %v3257_v22  ;;  %v13831_v22 = vld [vmem:[%s21286_s4 + $0xb8] sm:$0xff]  ;;  %5817 = vmatpush.bf16.msrb.mxu2 %v13873_v50 }
 0x4f5   : > { %4066 = vrot.lane.b32.xlu1 %v4058_v7, %s14411_s20  ;;  %v3721_v18 = vadd.f32 %v3720_v19, %v3487_v53  ;;  %4610 = vmatpush.bf16.msrb.mxu0 %v13831_v22  ;;  %v11329_v7 = vld [vmem:[%s21285_s3 + $0x3b0] sm:$0xf]  ;;  %v13792_v38 = vld [vmem:[%s21285_s3 + $0x3b8] sm:$0xf0] }
 0x4f7   : > { %v3858_v16 = vpack.c.bf16 %v3721_v18, %v3721_v18  ;;  %v11330_v18 = vor.u32 %v13792_v38, %v11329_v7 }
 0x4f8   : > { %v3267_v30 = vpop.f32.mrf.mxu1  ;;  %5818 = vmatpush.bf16.msrb.mxu2 %v13872_v24 }
 0x4f9   : > { %4611 = vmatpush.bf16.msrb.mxu0 %v13830_v21  ;;  %v4053_v34 = vunpack.c.l.b16 %v3858_v16 }
 0x4fb   : > { %v16733_v13 = vpop.f32.mrf.mxu2 }
 0x4fc   : > { %v3722_v56 = vpop.f32.mrf.mxu3 }
 0x4fd   : > { %v3723_v2 = vadd.f32 %v3722_v56, %v3489_v49  ;;  %4612 = vmatpush.bf16.msrb.mxu0 %v13829_v45 }
 0x4fe   : > { %v4585_v37 = vpop.f32.mrf.mxu0 }
 0x4ff   : > { %v3859_v27 = vpack.c.bf16 %v3723_v2, %v3723_v2  ;;  %v16740_v60 = vadd.f32 %v4585_v37, %v4552_v57 }
 0x500   : > { %3535 = vmatmul.bf16.gmra.mxu2 %v11326_v0  ;;  %v13824_v0 = vld [vmem:[%s21286_s4 + $0x80] sm:$0xff] }
 0x501   : > { %v4054_v42 = vunpack.c.l.b16 %v3859_v27  ;;  %11429 = vmatmul.msk.bf16.gmra.mxu3 %vm1581_vm10, %v11318_v11  ;;  %4613 = vmatpush.bf16.msrb.mxu0 %v13828_v3 }
 0x503   : > { %v4059_v17 = vpack.c.b16 %v4054_v42, %v4053_v34  ;;  %v3496_v47 = vpop.f32.mrf.mxu2  ;;  %v4557_v34 = vadd.f32 %v16715_v25, %v16568_v9  ;;  %v4562_v9 = vadd.f32 %v16715_v25, %v16616_v31 }
 0x504   : > { %v3725_v23 = vpop.f32.mrf.mxu3  ;;  %v3497_v41 = vadd.f32 %v3496_v47, %v3262_v5  ;;  %v13865_v5 = vld [vmem:[%s21289_s7 + $0xa8] sm:$0xff] }
 0x505   : > { %v16749_v15 = vadd.f32 %v3725_v23, %v3492_v14  ;;  %4068 = vrot.lane.b32.xlu2 %v4059_v17, %s14411_s20  ;;  %v16772_v14 = vpop.f32.mrf.mxu1  ;;  %4614 = vmatpush.bf16.msrb.mxu0 %v13827_v1 }
 0x506   : > { %5783 = vmatpush.bf16.msrb.mxu1 %v13865_v5  ;;  %v16792_v2 = vpop.f32.mrf.mxu0 }
 0x509   : > { %4615 = vmatpush.bf16.msrb.mxu0 %v13826_v10 }
 0x50b   : > { %v16770_v19 = vpop.f32.mrf.mxu2 }
 0x50c   : > { %v16774_v53 = vpop.f32.mrf.mxu3 }
 0x50d   : > { %4616 = vmatpush.bf16.msrb.mxu0 %v13825_v29  ;;  %v3272_v56 = vpop.f32.mrf.mxu1 }
 0x511   : > { %11430 = vmatmul.msk.bf16.gmra.mxu3 %vm1581_vm10, %v11330_v18  ;;  %4617 = vmatpush.bf16.msrb.mxu0 %v13824_v0  ;;  %v4567_v0 = vadd.f32 %v16715_v25, %v16652_v61 }
 0x513   : > { %v3501_v22 = vpop.f32.mrf.mxu2 }
 0x514   : > { %v3730_v20 = vpop.f32.mrf.mxu3  ;;  %v3502_v62 = vadd.f32 %v3501_v22, %v3267_v30 }
 0x515   : > { %v16783_v49 = vadd.f32 %v3730_v20, %v3497_v41  ;;  %v16794_v11 = vpop.f32.mrf.mxu1 }
 0x51b   : > { %v16788_v57 = vpop.f32.mrf.mxu2 }
 0x51c   : > { %v16790_v16 = vpop.f32.mrf.mxu3 }
 0x51d   : > { %v3277_v17 = vpop.f32.mrf.mxu1 }
 0x523   : > { %v3506_v21 = vpop.f32.mrf.mxu2 }
 0x524   : > { %v3735_v37 = vpop.f32.mrf.mxu3  ;;  %v3507_v27 = vadd.f32 %v3506_v21, %v3272_v56 }
 0x525   : > { %v16798_v42 = vadd.f32 %v3735_v37, %v3502_v62  ;;  %v16808_v3 = vpop.f32.mrf.mxu1 }
 0x526   : > { %v4590_v30 = vpop.f32.mrf.mxu0 }
 0x527   : > { %v16800_v45 = vadd.f32 %v4590_v30, %v4557_v34 }
 0x52b   : > { %v16802_v47 = vpop.f32.mrf.mxu2 }
 0x52c   : > { %v16804_v36 = vpop.f32.mrf.mxu3 }
 0x52d   : > { %v3282_v20 = vpop.f32.mrf.mxu1 }
 0x52e   : > { %v16806_v23 = vpop.f32.mrf.mxu0 }
 0x52f   : > { %v4063_v21 = vpop.permute.xlu2 %4062 }
 0x533   : > { %v3511_v41 = vpop.f32.mrf.mxu2 }
 0x534   : > { %v3740_v50 = vpop.f32.mrf.mxu3  ;;  %v3512_v1 = vadd.f32 %v3511_v41, %v3277_v17 }
 0x535   : > { %v16812_v5 = vadd.f32 %v3740_v50, %v3507_v27  ;;  %v3284_v59 = vpop.f32.mrf.mxu1 }
 0x536   : > { %v4595_v7 = vpop.f32.mrf.mxu0 }
 0x537   : > { %v16814_v38 = vadd.f32 %v4595_v7, %v4562_v9  ;;  %v4061_v18 = vpop.permute.xlu1 %4060 }
 0x538   : > { %v4197_v10 = vsel %vm1729_vm14, %v4030_v58, %v4061_v18  ;;  %v4201_v58 = vsel %vm1729_vm14, %v4031_v8, %v4063_v21 }
 0x539   : > { %4618 = vmatmul.bf16.vlgmr.msrb.gmra.mxu0 %v4197_v10 }
 0x53b   : > { %v16820_v29 = vpop.f32.mrf.mxu2 }
 0x53c   : > { %v16822_v22 = vpop.f32.mrf.mxu3 }
 0x53d   : > { %v3287_v41 = vpop.f32.mrf.mxu1 }
 0x53e   : > { %v16824_v62 = vpop.f32.mrf.mxu0 }
 0x543   : > { %v3516_v31 = vpop.f32.mrf.mxu2 }
 0x544   : > { %v3745_v56 = vpop.f32.mrf.mxu3  ;;  %v3517_v9 = vadd.f32 %v3516_v31, %v3282_v20  ;;  %v13856_v31 = vld [vmem:[%s21289_s7 + $0x60] sm:$0xff] }
 0x545   : > { %v16828_v37 = vadd.f32 %v3745_v56, %v3512_v1  ;;  %v4572_v1 = vadd.f32 %v16715_v25, %v16703_v44  ;;  %v3289_v56 = vpop.f32.mrf.mxu1  ;;  %5750 = vmatpush.bf16.msrb.mxu3 %v13856_v31 }
 0x546   : > { %v4600_v27 = vpop.f32.mrf.mxu0 }
 0x547   : > { %v16830_v12 = vadd.f32 %v4600_v27, %v4567_v0 }
 0x549   : > { %4623 = vmatmul.bf16.gmra.mxu0 %v4201_v58 }
 0x54b   : > { %v3518_v34 = vpop.f32.mrf.mxu2 }
 0x54c   : > { %v16836_v30 = vpop.f32.mrf.mxu3  ;;  %v3519_v8 = vadd.f32 %v3518_v34, %v3284_v59 }
 0x54d   : > { %v3292_v59 = vpop.f32.mrf.mxu1 }
 0x54e   : > { %v16838_v17 = vpop.f32.mrf.mxu0 }
 0x553   : > { %v3521_v61 = vpop.f32.mrf.mxu2 }
 0x554   : > { %v3750_v50 = vpop.f32.mrf.mxu3 }
 0x555   : > { %v3751_v55 = vadd.f32 %v3750_v50, %v3517_v9  ;;  %v13864_v9 = vld [vmem:[%s21289_s7 + $0xa0] sm:$0xff] }
 0x556   : > { %v4605_v7 = vpop.f32.mrf.mxu0  ;;  %5784 = vmatpush.bf16.msrb.mxu1 %v13864_v9 }
 0x557   : > { %v16842_v18 = vadd.f32 %v4605_v7, %v4572_v1  ;;  %v4065_v10 = vpop.permute.xlu0 %4064  ;;  %v3870_v27 = vpack.c.bf16 %v3751_v55, %v3751_v55 }
 0x558   : > { %v4205_v43 = vsel %vm1729_vm14, %v4032_v35, %v4065_v10  ;;  %v3522_v35 = vadd.f32 %v3521_v61, %v3287_v41  ;;  %v13793_v41 = vld [vmem:[%s21285_s3 + $0x3c4] sm:$0xf]  ;;  %v11335_v61 = vld [vmem:[%s21285_s3 + $0x3cc] sm:$0xf0] }
 0x559   : > { %4628 = vmatmul.bf16.gmra.mxu0 %v4205_v43  ;;  %v4105_v44 = vunpack.c.l.b16 %v3870_v27  ;;  %v11338_v7 = vor.u32 %v13793_v41, %v11335_v61  ;;  %v11342_v43 = vor.u32 %v13795_v40, %v11341_v28  ;;  %v3294_v27 = vpop.f32.mrf.mxu1  ;;  %v13796_v41 = vld [vmem:[%s21285_s3 + $0x3dc] sm:$0xf]  ;;  %v11347_v61 = vld [vmem:[%s21285_s3 + $0x3e4] sm:$0xf0] }
 0x55b   : > { %v3523_v21 = vpop.f32.mrf.mxu2  ;;  %3540 = vmatmul.bf16.gmra.mxu2 %v11338_v7  ;;  %11431 = vmatmul.msk.bf16.gmra.mxu3 %vm1581_vm10, %v11342_v43 }
 0x55c   : > { %v3752_v0 = vpop.f32.mrf.mxu3  ;;  %v3524_v10 = vadd.f32 %v3523_v21, %v3289_v56  ;;  %v11333_v56 = vld [vmem:[%s21285_s3 + $0x3c0] sm:$0xf]  ;;  %v13794_v21 = vld [vmem:[%s21285_s3 + $0x3c8] sm:$0xf0] }
 0x55d   : > { %v3753_v58 = vadd.f32 %v3752_v0, %v3519_v8 }
 0x55f   : > { %v3871_v54 = vpack.c.bf16 %v3753_v58, %v3753_v58 }
 0x561   : > { %v4106_v25 = vunpack.c.l.b16 %v3871_v54  ;;  %v3297_v9 = vpop.f32.mrf.mxu1 }
 0x563   : > { %v4115_v20 = vpack.c.b16 %v4106_v25, %v4105_v44  ;;  %v3526_v34 = vpop.f32.mrf.mxu2  ;;  %v11334_v44 = vor.u32 %v13794_v21, %v11333_v56 }
 0x564   : > { %v3755_v4 = vpop.f32.mrf.mxu3 }
 0x565   : > { %4120 = vrot.lane.b32.xlu0 %v4115_v20, %s14411_s20  ;;  %v3756_v1 = vadd.f32 %v3755_v4, %v3522_v35  ;;  %3306 = vmatmul.bf16.gmra.mxu1 %v11334_v44  ;;  %v4069_v4 = vpop.permute.xlu2 %4068  ;;  %v3527_v35 = vadd.f32 %v3526_v34, %v3292_v59  ;;  %v11350_v59 = vor.u32 %v13796_v41, %v11347_v61  ;;  %v11357_v41 = vld [vmem:[%s21285_s3 + $0x3f0] sm:$0xf]  ;;  %v13800_v61 = vld [vmem:[%s21285_s3 + $0x3f8] sm:$0xf0] }
 0x567   : > { %v4067_v50 = vpop.permute.xlu1 %4066  ;;  %v3872_v55 = vpack.c.bf16 %v3756_v1, %v3756_v1 }
 0x568   : > { %v4209_v54 = vsel %vm1729_vm14, %v4033_v48, %v4067_v50  ;;  %v21310_v50 = vpack.c.b16 %v16572_v33, %v16570_v39  ;;  %v11353_v39 = vld [vmem:[%s21285_s3 + $0x3e0] sm:$0xf]  ;;  %v13798_v33 = vld [vmem:[%s21285_s3 + $0x3e8] sm:$0xf0] }
 0x569   : > { %4633 = vmatmul.bf16.gmra.mxu0 %v4209_v54  ;;  %v4107_v25 = vunpack.c.l.b16 %v3872_v55  ;;  %v11354_v28 = vor.u32 %v13798_v33, %v11353_v39  ;;  %v11345_v55 = vld [vmem:[%s21285_s3 + $0x3d8] sm:$0xf] }
 0x56a   : > { %v4213_v54 = vsel %vm1729_vm14, %v21310_v50, %v4069_v4  ;;  %v11365_v4 = vld [vmem:[%s21285_s3 + $0x3f8] sm:$0xf] }
 0x56b   : > { %v3528_v58 = vpop.f32.mrf.mxu2  ;;  %3545 = vmatmul.bf16.gmra.mxu2 %v11350_v59  ;;  %11432 = vmatmul.msk.bf16.gmra.mxu3 %vm1581_vm10, %v11354_v28 }
 0x56c   : > { %v3757_v48 = vpop.f32.mrf.mxu3  ;;  %v3529_v34 = vadd.f32 %v3528_v58, %v3294_v27  ;;  %v3299_v58 = vpop.f32.mrf.mxu1 }
 0x56d   : > { %v3758_v8 = vadd.f32 %v3757_v48, %v3524_v10 }
 0x56f   : > { %v3873_v0 = vpack.c.bf16 %v3758_v8, %v3758_v8  ;;  %v13797_v8 = vld [vmem:[%s21285_s3 + $0x3e0] sm:$0xf0] }
 0x571   : > { %v4108_v20 = vunpack.c.l.b16 %v3873_v0  ;;  %v11346_v0 = vor.u32 %v13797_v8, %v11345_v55 }
 0x573   : > { %v4116_v31 = vpack.c.b16 %v4108_v20, %v4107_v25  ;;  %v3531_v7 = vpop.f32.mrf.mxu2 }
 0x574   : > { %v3760_v24 = vpop.f32.mrf.mxu3  ;;  %v3532_v20 = vadd.f32 %v3531_v7, %v3297_v9  ;;  %v3302_v39 = vpop.f32.mrf.mxu1 }
 0x575   : > { %4122 = vrot.lane.b32.xlu1 %v4116_v31, %s14411_s20  ;;  %v3761_v1 = vadd.f32 %v3760_v24, %v3527_v35  ;;  %3311 = vmatmul.bf16.gmra.mxu1 %v11346_v0  ;;  %v13799_v31 = vld [vmem:[%s21285_s3 + $0x3f4] sm:$0xf]  ;;  %v11359_v24 = vld [vmem:[%s21285_s3 + $0x3fc] sm:$0xf0]  ;;  %v13801_v35 = vld [vmem:[%s21285_s3 + $0x400] sm:$0xf0] }
 0x576   : > { %v11362_v50 = vor.u32 %v13799_v31, %v11359_v24  ;;  %v13839_v0 = vld [vmem:[%s21286_s4 + $0xf8] sm:$0xff] }
 0x577   : > { %v3874_v40 = vpack.c.bf16 %v3761_v1, %v3761_v1  ;;  %v11366_v1 = vor.u32 %v13801_v35, %v11365_v4  ;;  %4644 = vmatpush.bf16.msra.mxu0 %v13839_v0 }
 0x579   : > { %4638 = vmatmul.bf16.gmra.mxu0 %v4213_v54  ;;  %v4109_v27 = vunpack.c.l.b16 %v3874_v40 }
 0x57b   : > { %v3533_v44 = vpop.f32.mrf.mxu2  ;;  %3550 = vmatmul.bf16.gmra.mxu2 %v11362_v50  ;;  %11433 = vmatmul.msk.bf16.gmra.mxu3 %vm1581_vm10, %v11366_v1  ;;  %v13838_v1 = vld [vmem:[%s21286_s4 + $0xf0] sm:$0xff] }
 0x57c   : > { %v3762_v10 = vpop.f32.mrf.mxu3  ;;  %v3534_v9 = vadd.f32 %v3533_v44, %v3299_v58  ;;  %4645 = vmatpush.bf16.msra.mxu0 %v13838_v1 }
 0x57d   : > { %v3763_v48 = vadd.f32 %v3762_v10, %v3529_v34  ;;  %v11358_v10 = vor.u32 %v13800_v61, %v11357_v41  ;;  %v11369_v41 = vld [vmem:[%s21285_s3 + $0x408] sm:$0xf]  ;;  %v13803_v61 = vld [vmem:[%s21285_s3 + $0x410] sm:$0xf0] }
 0x57f   : > { %v3875_v43 = vpack.c.bf16 %v3763_v48, %v3763_v48 }
 0x581   : > { %v4110_v56 = vunpack.c.l.b16 %v3875_v43 }
 0x583   : > { %v4117_v21 = vpack.c.b16 %v4110_v56, %v4109_v27  ;;  %v3536_v33 = vpop.f32.mrf.mxu2  ;;  %v13802_v27 = vld [vmem:[%s21285_s3 + $0x40c] sm:$0xf]  ;;  %v11371_v56 = vld [vmem:[%s21285_s3 + $0x414] sm:$0xf0] }
 0x584   : > { %v3765_v25 = vpop.f32.mrf.mxu3  ;;  %v3537_v8 = vadd.f32 %v3536_v33, %v3302_v39  ;;  %v11374_v44 = vor.u32 %v13802_v27, %v11371_v56  ;;  %v13834_v27 = vld [vmem:[%s21286_s4 + $0xd0] sm:$0xff]  ;;  %v16976_v56 = vpop.f32.mrf.mxu0 }
 0x585   : > { %4124 = vrot.lane.b32.xlu2 %v4117_v21, %s14411_s20  ;;  %v3766_v54 = vadd.f32 %v3765_v25, %v3532_v20  ;;  %3316 = vmatmul.bf16.gmra.mxu1 %v11358_v10  ;;  %v3304_v21 = vpop.f32.mrf.mxu1  ;;  %v11377_v25 = vld [vmem:[%s21285_s3 + $0x410] sm:$0xf]  ;;  %v13804_v20 = vld [vmem:[%s21285_s3 + $0x418] sm:$0xf0]  ;;  %v13836_v10 = vld [vmem:[%s21286_s4 + $0xe0] sm:$0xff] }
 0x586   : > { %v11378_v24 = vor.u32 %v13804_v20, %v11377_v25  ;;  %v13832_v20 = vld [vmem:[%s21286_s4 + $0xc0] sm:$0xff] }
 0x587   : > { %v3876_v59 = vpack.c.bf16 %v3766_v54, %v3766_v54 }
 0x589   : > { %v4111_v40 = vunpack.c.l.b16 %v3876_v59  ;;  %v11370_v59 = vor.u32 %v13803_v61, %v11369_v41 }
 0x58b   : > { %v3538_v58 = vpop.f32.mrf.mxu2  ;;  %3555 = vmatmul.bf16.gmra.mxu2 %v11374_v44  ;;  %11434 = vmatmul.msk.bf16.gmra.mxu3 %vm1581_vm10, %v11378_v24  ;;  %v13833_v44 = vld [vmem:[%s21286_s4 + $0xc8] sm:$0xff] }
 0x58c   : > { %v3767_v7 = vpop.f32.mrf.mxu3  ;;  %v3539_v4 = vadd.f32 %v3538_v58, %v3304_v21  ;;  %v11381_v21 = vld [vmem:[%s21285_s3 + $0x420] sm:$0xf]  ;;  %v13806_v58 = vld [vmem:[%s21285_s3 + $0x428] sm:$0xf0] }
 0x58d   : > { %v3768_v34 = vadd.f32 %v3767_v7, %v3534_v9  ;;  %v13837_v7 = vld [vmem:[%s21286_s4 + $0xe8] sm:$0xff]  ;;  %v11382_v25 = vor.u32 %v13806_v58, %v11381_v21 }
 0x58e   : > { %4646 = vmatpush.bf16.msra.mxu0 %v13837_v7 }
 0x58f   : > { %v3877_v28 = vpack.c.bf16 %v3768_v34, %v3768_v34 }
 0x591   : > { %v4112_v48 = vunpack.c.l.b16 %v3877_v28  ;;  %v13835_v28 = vld [vmem:[%s21286_s4 + $0xd8] sm:$0xff] }
 0x592   : > { %4647 = vmatpush.bf16.msra.mxu0 %v13836_v10 }
 0x593   : > { %v4118_v43 = vpack.c.b16 %v4112_v48, %v4111_v40  ;;  %v13805_v40 = vld [vmem:[%s21285_s3 + $0x424] sm:$0xf]  ;;  %v11383_v48 = vld [vmem:[%s21285_s3 + $0x42c] sm:$0xf0] }
 0x594   : > { %v3770_v55 = vpop.f32.mrf.mxu3 }
 0x595   : > { %4126 = vrot.lane.b32.xlu0 %v4118_v43, %s14411_s20  ;;  %v3771_v31 = vadd.f32 %v3770_v55, %v3537_v8  ;;  %3321 = vmatmul.bf16.gmra.mxu1 %v11370_v59  ;;  %v11386_v43 = vor.u32 %v13805_v40, %v11383_v48  ;;  %v11389_v55 = vld [vmem:[%s21285_s3 + $0x428] sm:$0xf]  ;;  %v13807_v8 = vld [vmem:[%s21285_s3 + $0x430] sm:$0xf0]  ;;  %v3860_v59 = vpack.c.bf16 %v16749_v15, %v16749_v15 }
 0x596   : > { %v11390_v0 = vor.u32 %v13807_v8, %v11389_v55  ;;  %4648 = vmatpush.bf16.msra.mxu0 %v13835_v28  ;;  %v3499_v40 = vadd.f32 %v16770_v19, %v16710_v32  ;;  %v3862_v15 = vpack.c.bf16 %v16783_v49, %v16783_v49  ;;  %v3504_v32 = vadd.f32 %v16788_v57, %v16772_v14 }
 0x597   : > { %v3878_v50 = vpack.c.bf16 %v3771_v31, %v3771_v31 }
 0x598   : > { %v4082_v55 = vunpack.c.l.b16 %v3862_v15  ;;  %v3738_v49 = vadd.f32 %v16804_v36, %v3504_v32  ;;  %v14416_v15 = vmov 0   ;;  %v4758_v32 = vld [vmem:[%s21288_s6 + $0x30] sm:$0xff] }
 0x599   : > { %v4113_v34 = vunpack.c.l.b16 %v3878_v50  ;;  %14391 = vset.pattern.permute.xlu1 %v14416_v15  ;;  %14390 = vset.pattern.permute.xlu0 %v14416_v15 }
 0x59a   : > { %4649 = vmatpush.bf16.msra.mxu0 %v13834_v27  ;;  %v3865_v21 = vpack.c.bf16 %v3738_v49, %v3738_v49  ;;  %14389 = vset.pattern.permute.xlu2 %v14416_v15 }
 0x59b   : > { %3560 = vmatmul.bf16.gmra.mxu2 %v11386_v43  ;;  %11435 = vmatmul.msk.bf16.gmra.mxu3 %vm1581_vm10, %v11390_v0 }
 0x59c   : > { %v3772_v35 = vpop.f32.mrf.mxu3 }
 0x59d   : > { %v3773_v54 = vadd.f32 %v3772_v35, %v3539_v4  ;;  %v13855_v4 = vld [vmem:[%s21289_s7 + $0x58] sm:$0xff] }
 0x59e   : > { %4650 = vmatpush.bf16.msra.mxu0 %v13833_v44  ;;  %5751 = vmatpush.bf16.msrb.mxu3 %v13855_v4  ;;  %v13871_v35 = vld [vmem:[%s21289_s7 + $0xd8] sm:$0xff]  ;;  %v4085_v44 = vunpack.c.l.b16 %v3865_v21  ;;  %v3509_v4 = vadd.f32 %v16802_v47, %v16794_v11  ;;  %v13840_v11 = vld [vmem:[%s21286_s4 + $0x100] sm:$0xff]  ;;  %v3866_v47 = vpack.c.bf16 %v16812_v5, %v16812_v5  ;;  %v4754_v5 = vld [vmem:[%s21288_s6 + $0x10] sm:$0xff] }
 0x59f   : > { %v3879_v9 = vpack.c.bf16 %v3773_v54, %v3773_v54  ;;  %5819 = vmatpush.bf16.msrb.mxu2 %v13871_v35  ;;  %v13863_v54 = vld [vmem:[%s21289_s7 + $0x98] sm:$0xff]  ;;  %v13842_v35 = vld [vmem:[%s21286_s4 + $0x110] sm:$0xff] }
 0x5a0   : > { %5785 = vmatpush.bf16.msrb.mxu1 %v13863_v54 }
 0x5a1   : > { %v4114_v39 = vunpack.c.l.b16 %v3879_v9  ;;  %v3494_v9 = vadd.f32 %v16733_v13, %v16680_v52  ;;  %v3733_v13 = vadd.f32 %v16790_v16, %v3499_v40  ;;  %v13843_v16 = vld [vmem:[%s21286_s4 + $0x118] sm:$0xff] }
 0x5a2   : > { %4651 = vmatpush.bf16.msra.mxu0 %v13832_v20 }
 0x5a3   : > { %v4119_v33 = vpack.c.b16 %v4114_v39, %v4113_v34  ;;  %v3728_v41 = vadd.f32 %v16774_v53, %v3494_v9  ;;  %v4080_v39 = vunpack.c.l.b16 %v3860_v59  ;;  %v3863_v53 = vpack.c.bf16 %v3733_v13, %v3733_v13  ;;  %v4753_v13 = vld [vmem:[%s21288_s6 + $0x8] sm:$0xff] }
 0x5a4   : > { %4769 = vperm.xlu0 %14390, %v4753_v13  }
 0x5a5   : > { %4128 = vrot.lane.b32.xlu1 %v4119_v33, %s14411_s20  ;;  %3326 = vmatmul.bf16.gmra.mxu1 %v11382_v25  ;;  %v3861_v61 = vpack.c.bf16 %v3728_v41, %v3728_v41  ;;  %v4083_v43 = vunpack.c.l.b16 %v3863_v53 }
 0x5a6   : > { %4682 = vmatpush.bf16.msrb.mxu0 %v13843_v16 }
 0x5a7   : > { %v4081_v34 = vunpack.c.l.b16 %v3861_v61  ;;  %v4091_v8 = vpack.c.b16 %v4083_v43, %v4082_v55 }
 0x5a9   : > { %v4090_v33 = vpack.c.b16 %v4081_v34, %v4080_v39 }
 0x5aa   : > { %4683 = vmatpush.bf16.msrb.mxu0 %v13842_v35  ;;  %v4761_v35 = vld [vmem:[%s21288_s6 + $0x48] sm:$0xff] }
 0x5ac   : > { %4794 = vperm.xlu0 %14390, %v4758_v32  }
 0x5ad   : > { %4774 = vperm.xlu1 %14391, %v4754_v5  }
 0x5b4   : > { %4809 = vperm.xlu0 %14390, %v4761_v35  }
 0x5b6   : > { %v4619_v31 = vpop.f32.mrf.mxu0 }
 0x5b7   : > { %v16992_v24 = vadd.f32 %v4619_v31, %v16740_v60 }
 0x5be   : > { %v17000_v50 = vpop.f32.mrf.mxu0 }
 0x5c6   : > { %v4624_v60 = vpop.f32.mrf.mxu0 }
 0x5c7   : > { %v17006_v1 = vadd.f32 %v4624_v60, %v16800_v45 }
 0x5ce   : > { %v17011_v7 = vpop.f32.mrf.mxu0 }
 0x5d6   : > { %v4629_v10 = vpop.f32.mrf.mxu0 }
 0x5d7   : > { %v17016_v28 = vadd.f32 %v4629_v10, %v16814_v38  ;;  %v4121_v45 = vpop.permute.xlu0 %4120  ;;  %v3514_v10 = vadd.f32 %v16820_v29, %v16808_v3  ;;  %v13854_v3 = vld [vmem:[%s21289_s7 + $0x50] sm:$0xff] }
 0x5d8   : > { %v4217_v52 = vsel %vm1729_vm14, %v4090_v33, %v4121_v45  ;;  %v13870_v29 = vld [vmem:[%s21289_s7 + $0xd0] sm:$0xff]  ;;  %5752 = vmatpush.bf16.msrb.mxu3 %v13854_v3 }
 0x5d9   : > { %4652 = vmatmul.bf16.vlgmr.msra.gmra.mxu0 %v4217_v52  ;;  %v4752_v52 = vld [vmem:[%s21288_s6] sm:$0xff]  ;;  %v3748_v53 = vadd.f32 %v16836_v30, %v3514_v10  ;;  %5820 = vmatpush.bf16.msrb.mxu2 %v13870_v29 }
 0x5da   : > { %4764 = vperm.xlu2 %14389, %v4752_v52  }
 0x5db   : > { %v3869_v43 = vpack.c.bf16 %v3748_v53, %v3748_v53 }
 0x5de   : > { %v17022_v48 = vpop.f32.mrf.mxu0  ;;  %v3541_v60 = vpop.f32.mrf.mxu2 }
 0x5df   : > { %v4125_v20 = vpop.permute.xlu2 %4124  ;;  %v3775_v41 = vpop.f32.mrf.mxu3 }
 0x5e2   : > { %v3307_v54 = vpop.f32.mrf.mxu1 }
 0x5e6   : > { %v4634_v38 = vpop.f32.mrf.mxu0  ;;  %v3543_v34 = vpop.f32.mrf.mxu2 }
 0x5e7   : > { %v17027_v0 = vadd.f32 %v4634_v38, %v16830_v12  ;;  %v4123_v27 = vpop.permute.xlu1 %4122  ;;  %v3864_v12 = vpack.c.bf16 %v16798_v42, %v16798_v42  ;;  %v3743_v42 = vadd.f32 %v16822_v22, %v3509_v4  ;;  %v4086_v22 = vunpack.c.l.b16 %v3866_v47  ;;  %v3777_v40 = vpop.f32.mrf.mxu3  ;;  %v4756_v38 = vld [vmem:[%s21288_s6 + $0x20] sm:$0xff]  ;;  %v4757_v4 = vld [vmem:[%s21288_s6 + $0x28] sm:$0xff] }
 0x5e8   : > { %v4221_v19 = vsel %vm1729_vm14, %v4091_v8, %v4123_v27  ;;  %v3868_v8 = vpack.c.bf16 %v16828_v37, %v16828_v37  ;;  %v4755_v27 = vld [vmem:[%s21288_s6 + $0x18] sm:$0xff]  ;;  %4784 = vperm.xlu1 %14391, %v4756_v38   ;;  %v3542_v37 = vadd.f32 %v3541_v60, %v3307_v54  ;;  %v4760_v47 = vld [vmem:[%s21288_s6 + $0x40] sm:$0xff] }
 0x5e9   : > { %4657 = vmatmul.bf16.gmra.mxu0 %v4221_v19  ;;  %v4084_v25 = vunpack.c.l.b16 %v3864_v12  ;;  %v3867_v9 = vpack.c.bf16 %v3743_v42, %v3743_v42  ;;  %v4089_v19 = vunpack.c.l.b16 %v3869_v43  ;;  %4779 = vperm.xlu2 %14389, %v4755_v27  }
 0x5ea   : > { %v3309_v59 = vpop.f32.mrf.mxu1  ;;  %v4088_v49 = vunpack.c.l.b16 %v3868_v8  ;;  %v3776_v42 = vadd.f32 %v3775_v41, %v3542_v37  ;;  %v7617_v41 = vld [vmem:[%s21294_s12 + $0x10] sm:$0xff] }
 0x5eb   : > { %v4092_v14 = vpack.c.b16 %v4085_v44, %v4084_v25  ;;  %v4087_v61 = vunpack.c.l.b16 %v3867_v9  ;;  %v3544_v12 = vadd.f32 %v3543_v34, %v3309_v59  ;;  %7630 = vperm.xlu0 %14390, %v7617_v41  }
 0x5ec   : > { %v4094_v21 = vpack.c.b16 %v4089_v19, %v4088_v49 }
 0x5ed   : > { %v4225_v36 = vsel %vm1729_vm14, %v4092_v14, %v4125_v20  ;;  %v4093_v39 = vpack.c.b16 %v4087_v61, %v4086_v22  ;;  %v3778_v54 = vadd.f32 %v3777_v40, %v3544_v12  ;;  %v7616_v40 = vld [vmem:[%s21294_s12 + $0x8] sm:$0xff] }
 0x5ee   : > { %v17036_v58 = vpop.f32.mrf.mxu0  ;;  %v3546_v30 = vpop.f32.mrf.mxu2 }
 0x5ef   : > { %v3780_v16 = vpop.f32.mrf.mxu3  ;;  %v3881_v9 = vpack.c.bf16 %v3778_v54, %v3778_v54 }
 0x5f1   : > { %4789 = vperm.xlu2 %14389, %v4757_v4   ;;  %v4141_v34 = vunpack.c.l.b16 %v3881_v9 }
 0x5f2   : > { %v3312_v55 = vpop.f32.mrf.mxu1 }
 0x5f3   : > { %v3547_v10 = vadd.f32 %v3546_v30, %v3312_v55  ;;  %10282 = vperm.xlu0 %14390, %v7617_v41  }
 0x5f5   : > { %v3781_v52 = vadd.f32 %v3780_v16, %v3547_v10 }
 0x5f6   : > { %v4639_v57 = vpop.f32.mrf.mxu0  ;;  %v3548_v14 = vpop.f32.mrf.mxu2 }
 0x5f7   : > { %v17041_v31 = vadd.f32 %v4639_v57, %v16842_v18  ;;  %v13841_v18 = vld [vmem:[%s21286_s4 + $0x108] sm:$0xff]  ;;  %v13862_v57 = vld [vmem:[%s21289_s7 + $0x90] sm:$0xff]  ;;  %v3782_v60 = vpop.f32.mrf.mxu3  ;;  %v3882_v15 = vpack.c.bf16 %v3781_v52, %v3781_v52 }
 0x5f8   : > { %4684 = vmatpush.bf16.msrb.mxu0 %v13841_v18  ;;  %5786 = vmatpush.bf16.msrb.mxu1 %v13862_v57  ;;  %v3880_v18 = vpack.c.bf16 %v3776_v42, %v3776_v42 }
 0x5f9   : > { %4662 = vmatmul.bf16.gmra.mxu0 %v4225_v36  ;;  %v4759_v36 = vld [vmem:[%s21288_s6 + $0x38] sm:$0xff]  ;;  %4804 = vperm.xlu2 %14389, %v4760_v47   ;;  %v4142_v43 = vunpack.c.l.b16 %v3882_v15 }
 0x5fa   : > { %v3314_v20 = vpop.f32.mrf.mxu1  ;;  %4799 = vperm.xlu1 %14391, %v4759_v36   ;;  %v4140_v59 = vunpack.c.l.b16 %v3880_v18 }
 0x5fc   : > { %4685 = vmatpush.bf16.msrb.mxu0 %v13840_v11  ;;  %v7615_v11 = vld [vmem:[%s21294_s12] sm:$0xff] }
 0x5fe   : > { %v3551_v22 = vpop.f32.mrf.mxu2  ;;  %v17116_v18 = vpop.f32.mrf.mxu0 }
 0x601   : > { %7625 = vperm.xlu2 %14389, %v7616_v40  }
 0x602   : > { %v3317_v61 = vpop.f32.mrf.mxu1  ;;  %7620 = vperm.xlu1 %14391, %v7615_v11  }
 0x603   : > { %v3552_v27 = vadd.f32 %v3551_v22, %v3317_v61 }
 0x606   : > { %v3553_v53 = vpop.f32.mrf.mxu2 }
 0x607   : > { %v4127_v33 = vpop.permute.xlu0 %4126 }
 0x608   : > { %v4229_v45 = vsel %vm1729_vm14, %v4093_v39, %v4127_v33  ;;  %v3785_v39 = vpop.f32.mrf.mxu3  ;;  %v4150_v33 = vpack.c.b16 %v4141_v34, %v4140_v59 }
 0x609   : > { %4667 = vmatmul.bf16.gmra.mxu0 %v4229_v45  ;;  %v3549_v45 = vadd.f32 %v3548_v14, %v3314_v20  ;;  %10277 = vperm.xlu2 %14389, %v7616_v40   ;;  %v3786_v16 = vadd.f32 %v3785_v39, %v3552_v27  ;;  %v13861_v27 = vld [vmem:[%s21289_s7 + $0x88] sm:$0xff] }
 0x60a   : > { %10272 = vperm.xlu1 %14391, %v7615_v11   ;;  %v3319_v13 = vpop.f32.mrf.mxu1  ;;  %5787 = vmatpush.bf16.msrb.mxu1 %v13861_v27 }
 0x60b   : > { %v3783_v5 = vadd.f32 %v3782_v60, %v3549_v45  ;;  %v3554_v32 = vadd.f32 %v3553_v53, %v3319_v13 }
 0x60d   : > { %v3883_v3 = vpack.c.bf16 %v3783_v5, %v3783_v5 }
 0x60e   : > { %v3556_v30 = vpop.f32.mrf.mxu2 }
 0x60f   : > { %v4143_v8 = vunpack.c.l.b16 %v3883_v3 }
 0x610   : > { %v3787_v29 = vpop.f32.mrf.mxu3 }
 0x611   : > { %v4151_v38 = vpack.c.b16 %v4143_v8, %v4142_v43  ;;  %v3788_v49 = vadd.f32 %v3787_v29, %v3554_v32 }
 0x612   : > { %v3322_v55 = vpop.f32.mrf.mxu1 }
 0x613   : > { %v3885_v37 = vpack.c.bf16 %v3788_v49, %v3788_v49  ;;  %v3557_v4 = vadd.f32 %v3556_v30, %v3322_v55  ;;  %v13850_v49 = vld [vmem:[%s21289_s7 + $0x30] sm:$0xff] }
 0x615   : > { %v4145_v20 = vunpack.c.l.b16 %v3885_v37  ;;  %v13849_v37 = vld [vmem:[%s21289_s7 + $0x28] sm:$0xff] }
 0x617   : > { %v4129_v44 = vpop.permute.xlu1 %4128 }
 0x618   : > { %v4233_v25 = vsel %vm1729_vm14, %v4094_v21, %v4129_v44  ;;  %v3790_v19 = vpop.f32.mrf.mxu3  ;;  %v3884_v21 = vpack.c.bf16 %v3786_v16, %v3786_v16  ;;  %v3558_v44 = vpop.f32.mrf.mxu2  ;;  %v13851_v16 = vld [vmem:[%s21289_s7 + $0x38] sm:$0xff] }
 0x619   : > { %4672 = vmatmul.bf16.gmra.mxu0 %v4233_v25  ;;  %v3791_v54 = vadd.f32 %v3790_v19, %v3557_v4 }
 0x61a   : > { %v3324_v12 = vpop.f32.mrf.mxu1  ;;  %v4144_v25 = vunpack.c.l.b16 %v3884_v21  ;;  %5713 = vmatpush.bf16.msra.mxu0 %v13851_v16 }
 0x61b   : > { %v3559_v36 = vadd.f32 %v3558_v44, %v3324_v12  ;;  %v3886_v11 = vpack.c.bf16 %v3791_v54, %v3791_v54  ;;  %v13848_v12 = vld [vmem:[%s21289_s7 + $0x20] sm:$0xff] }
 0x61c   : > { %v4152_v57 = vpack.c.b16 %v4145_v20, %v4144_v25  ;;  %v13847_v25 = vld [vmem:[%s21289_s7 + $0x18] sm:$0xff]  ;;  %v14417_v20 = vmov 0.0  }
 0x61d   : > { %v4146_v41 = vunpack.c.l.b16 %v3886_v11  ;;  %4822 = vst [vmem:[#allocation2] sm:$0xff] %v14417_v20 }
 0x61e   : > { %5714 = vmatpush.bf16.msra.mxu0 %v13850_v49  ;;  %4823 = vst [vmem:[#allocation2 + $0x8] sm:$0x7] %v14417_v20 }
 0x61f   : > { %4824 = vst [vmem:[#allocation2 + $0x5b] sm:$0xff] %v14417_v20 }
 0x620   : > { %v3792_v14 = vpop.f32.mrf.mxu3  ;;  %v3561_v42 = vpop.f32.mrf.mxu2  ;;  %4825 = vst [vmem:[#allocation2 + $0x63] sm:$0xff] %v14417_v20 }
 0x621   : > { %v3793_v60 = vadd.f32 %v3792_v14, %v3559_v36  ;;  %v13844_v36 = vld [vmem:[%s21289_s7] sm:$0xff]  ;;  %7639 = vst [vmem:[#allocation3 + $0x50] sm:$0x7f] %v14417_v20 }
 0x622   : > { %v3327_v35 = vpop.f32.mrf.mxu1  ;;  %5715 = vmatpush.bf16.msra.mxu0 %v13849_v37  ;;  %7640 = vst [vmem:[#allocation3] sm:$0x7f] %v14417_v20 }
 0x623   : > { %v3887_v47 = vpack.c.bf16 %v3793_v60, %v3793_v60  ;;  %7641 = vst [vmem:[#allocation3 + $0x28] sm:$0x80] %v14417_v20 }
 0x624   : > { %7642 = vst [vmem:[#allocation3 + $0x38] sm:$0x80] %v14417_v20 }
 0x625   : > { %v4147_v61 = vunpack.c.l.b16 %v3887_v47  ;;  %10291 = vst [vmem:[#allocation4 + $0x18] sm:$0x7f] %v14417_v20 }
 0x626   : > { %5716 = vmatpush.bf16.msra.mxu0 %v13848_v12  ;;  %10292 = vst [vmem:[#allocation4] sm:$0x7f] %v14417_v20 }
 0x627   : > { %v4153_v39 = vpack.c.b16 %v4147_v61, %v4146_v41  ;;  %10293 = vst [vmem:[#allocation4 + $0x20] sm:$0x80] %v14417_v20 }
 0x628   : > { %v3795_v9 = vpop.f32.mrf.mxu3  ;;  %v3563_v59 = vpop.f32.mrf.mxu2  ;;  %10294 = vst [vmem:[#allocation4 + $0x50] sm:$0x80] %v14417_v20 }
 0x629   : > { %11580 = vmatmul.msk.bf16.vlgmr.msrb.gmra.mxu0 %vm1729_vm14, %v4150_v33  ;;  %v3562_v33 = vadd.f32 %v3561_v42, %v3327_v35  ;;  %v17179_v42 = vld [vmem:[%s21287_s5] ss:$0 sm:$0xff] }
 0x62a   : > { %v3329_v22 = vpop.f32.mrf.mxu1  ;;  %5717 = vmatpush.bf16.msra.mxu0 %v13847_v25  ;;  %v4554_v54 = vadd.f32 %v17179_v42, %v16539_v63  ;;  %v13852_v63 = vld [vmem:[%s21289_s7 + $0x40] sm:$0xff] }
 0x62b   : > { %v3564_v10 = vadd.f32 %v3563_v59, %v3329_v22  ;;  %v3796_v52 = vadd.f32 %v3795_v9, %v3562_v33 }
 0x62c   : > { %v4588_v9 = vadd.f32 %v16792_v2, %v4554_v54  ;;  %v4564_v54 = vadd.f32 %v17179_v42, %v16645_v6 }
 0x62d   : > { %v3888_v53 = vpack.c.bf16 %v3796_v52, %v3796_v52  ;;  %v13868_v52 = vld [vmem:[%s21289_s7 + $0xc0] sm:$0xff] }
 0x62e   : > { %v4622_v47 = vadd.f32 %v17000_v50, %v4588_v9 }
 0x62f   : > { %v4148_v3 = vunpack.c.l.b16 %v3888_v53  ;;  %v4559_v53 = vadd.f32 %v17179_v42, %v16596_v51 }
 0x630   : > { %v3797_v40 = vpop.f32.mrf.mxu3 }
 0x631   : > { %v3798_v5 = vadd.f32 %v3797_v40, %v3564_v10  ;;  %v4770_v40 = vpop.permute.xlu0 %4769 }
 0x633   : > { %v3889_v15 = vpack.c.bf16 %v3798_v5, %v3798_v5 }
 0x634   : > { %v4765_v59 = vpop.permute.xlu2 %4764 }
 0x635   : > { %v4149_v29 = vunpack.c.l.b16 %v3889_v15 }
 0x637   : > { %v4154_v8 = vpack.c.b16 %v4149_v29, %v4148_v3 }
 0x639   : > { %11581 = vmatmul.msk.bf16.gmra.mxu0 %vm1729_vm14, %v4151_v38  ;;  %v13869_v38 = vld [vmem:[%s21289_s7 + $0xc8] sm:$0xff] }
 0x63a   : > { %5821 = vmatpush.bf16.msrb.mxu2 %v13869_v38 }
 0x63e   : > { %5822 = vmatpush.bf16.msrb.mxu2 %v13868_v52  ;;  %v13883_v52 = vld [vmem:[%s21289_s7 + $0x138] sm:$0xff] }
 0x649   : > { %11582 = vmatmul.msk.bf16.gmra.mxu0 %vm1729_vm14, %v4152_v57  ;;  %v13845_v57 = vld [vmem:[%s21289_s7 + $0x8] sm:$0xff] }
 0x656   : > { %v4653_v34 = vpop.f32.mrf.mxu0 }
 0x657   : > { %v4654_v45 = vadd.f32 %v4653_v34, %v16992_v24  ;;  %v13853_v24 = vld [vmem:[%s21289_s7 + $0x48] sm:$0xff]  ;;  %v13860_v34 = vld [vmem:[%s21289_s7 + $0x80] sm:$0xff] }
 0x658   : > { %5753 = vmatpush.bf16.msrb.mxu3 %v13853_v24  ;;  %5788 = vmatpush.bf16.msrb.mxu1 %v13860_v34  ;;  %v4593_v24 = vadd.f32 %v16806_v23, %v4559_v53 }
 0x659   : > { %11583 = vmatmul.msk.bf16.gmra.mxu0 %vm1729_vm14, %v4153_v39 }
 0x65c   : > { %5754 = vmatpush.bf16.msrb.mxu3 %v13852_v63 }
 0x65e   : > { %v17120_v13 = vpop.f32.mrf.mxu0 }
 0x65f   : > { %v4656_v22 = vadd.f32 %v17120_v13, %v4622_v47  ;;  %v4598_v47 = vadd.f32 %v16824_v62, %v4564_v54 }
 0x666   : > { %v4658_v43 = vpop.f32.mrf.mxu0 }
 0x667   : > { %v17123_v55 = vadd.f32 %v4658_v43, %v17006_v1  ;;  %v14418_v43 = vmov 0.0|0.0  }
 0x669   : > { %11584 = vmatmul.msk.bf16.gmra.mxu0 %vm1729_vm14, %v4154_v8  ;;  %v4873_v8 = vunpack.c.l.b16 %v14418_v43 }
 0x66e   : > { %v17129_v30 = vpop.f32.mrf.mxu0 }
 0x676   : > { %v4663_v1 = vpop.f32.mrf.mxu0 }
 0x677   : > { %v17138_v32 = vadd.f32 %v4663_v1, %v17016_v28  ;;  %v4627_v1 = vadd.f32 %v17011_v7, %v4593_v24 }
 0x67e   : > { %v17140_v19 = vpop.f32.mrf.mxu0 }
 0x686   : > { %v4668_v21 = vpop.f32.mrf.mxu0 }
 0x687   : > { %v17152_v28 = vadd.f32 %v4668_v21, %v17027_v0  ;;  %v13846_v0 = vld [vmem:[%s21289_s7 + $0x10] sm:$0xff]  ;;  %v4775_v21 = vpop.permute.xlu1 %4774 }
 0x688   : > { %5718 = vmatpush.bf16.msra.mxu0 %v13846_v0 }
 0x68c   : > { %5719 = vmatpush.bf16.msra.mxu0 %v13845_v57  ;;  %v4780_v57 = vpop.permute.xlu2 %4779 }
 0x68e   : > { %v17157_v44 = vpop.f32.mrf.mxu0 }
 0x690   : > { %5720 = vmatpush.bf16.msra.mxu0 %v13844_v36 }
 0x694   : > { %5849 = vmatpush.bf16.msrb.mxu0 %v13883_v52 }
 0x696   : > { %v4673_v14 = vpop.f32.mrf.mxu0 }
 0x697   : > { %v17169_v4 = vadd.f32 %v4673_v14, %v17041_v31 }
 0x69e   : > { %v17174_v35 = vpop.f32.mrf.mxu0 }
 0x6a6   : > { %v4687_v31 = vpop.f32.mrf.mxu0 }
 0x6a7   : > { %v4688_v60 = vadd.f32 %v4687_v31, %v4654_v45 }
 0x6a9   : > { %vm4712_vm10 = vcmp.ge.f32.partialorder %v4688_v60, 0.0  ;;  %v4722_v11 = vmul.f32 0.2, %v4688_v60 }
 0x6ab   : > { %v4732_v41 = vsel %vm4712_vm10, %v4688_v60, %v4722_v11 }
 0x6ac   : > { %v4742_v61 = vmul.f32 1.4142135, %v4732_v41 }
 0x6ae   : > { %v4812_v39 = vmul.f32 %v4765_v59, %v4742_v61  ;;  %v4689_v33 = vpop.f32.mrf.mxu0  ;;  %v4632_v59 = vadd.f32 %v17022_v48, %v4598_v47 }
 0x6af   : > { %v4690_v10 = vadd.f32 %v4689_v33, %v4656_v22 }
 0x6b0   : > { %4827 = vst [vmem:[#allocation2 + $0xb] sm:$0xff] %v4812_v39  ;;  %v4666_v6 = vadd.f32 %v17140_v19, %v4632_v59 }
 0x6b1   : > { %vm4713_vm14 = vcmp.ge.f32.partialorder %v4690_v10, 0.0  ;;  %v4723_v2 = vmul.f32 0.2, %v4690_v10 }
 0x6b3   : > { %v4733_v50 = vsel %vm4713_vm14, %v4690_v10, %v4723_v2  ;;  %vm21316_vm14 = vmmov %vm21315_vm4 }
 0x6b4   : > { %v4743_v45 = vmul.f32 1.4142135, %v4733_v50 }
 0x6b6   : > { %v4813_v5 = vmul.f32 %v4770_v40, %v4743_v45  ;;  %v4692_v13 = vpop.f32.mrf.mxu0 }
 0x6b7   : > { %v4693_v15 = vadd.f32 %v4692_v13, %v17123_v55  ;;  %v4838_v3 = vld [vmem:[#allocation2 + $0x8] sm:$0xff]  ;;  %v4661_v55 = vadd.f32 %v17129_v30, %v4627_v1 }
 0x6b8   : > { %4828 = vst [vmem:[#allocation2 + $0x13] sm:$0xff] %v4813_v5  ;;  %v4851_v29 = vpack.c.bf16 %v4838_v3, %v4838_v3 }
 0x6b9   : > { %vm4714_vm1 = vcmp.ge.f32.partialorder %v4693_v15, 0.0  ;;  %v4724_v38 = vmul.f32 0.2, %v4693_v15 }
 0x6ba   : > { %v17199_v27 = vunpack.c.l.b16 %v4851_v29 }
 0x6bb   : > { %v4734_v16 = vsel %vm4714_vm1, %v4693_v15, %v4724_v38  ;;  %vm21317_vm1 = vmmov %vm21313_vm12 }
 0x6bc   : > { %v4744_v49 = vmul.f32 1.4142135, %v4734_v16  ;;  %v4883_v51 = vpack.c.b16 %v17199_v27, %v4873_v8  ;;  %v13882_v16 = vld [vmem:[%s21289_s7 + $0x130] sm:$0xff] }
 0x6bd   : > { %5850 = vmatpush.bf16.msrb.mxu0 %v13882_v16  ;;  %v13891_v16 = vld [vmem:[%s21289_s7 + $0x178] sm:$0xff] }
 0x6be   : > { %v4814_v37 = vmul.f32 %v4775_v21, %v4744_v49  ;;  %v4694_v12 = vpop.f32.mrf.mxu0  ;;  %5721 = vmatmul.bf16.vlgmr.msra.gmra.mxu0 %v4883_v51  ;;  %v4899_v9 = vshll.u32 %v4883_v51, 16  ;;  %v4945_v63 = vrot.slane %v4883_v51, 1  ;;  %v4897_v2 = vshrl.u32 %v4883_v51, 16  ;;  %5883 = vmatpush.bf16.msra.mxu3 %v13891_v16 }
 0x6bf   : > { %v4695_v25 = vadd.f32 %v4694_v12, %v4661_v55  ;;  %v4839_v0 = vld [vmem:[#allocation2 + $0x10] sm:$0xff] }
 0x6c0   : > { %4829 = vst [vmem:[#allocation2 + $0x1b] sm:$0xff] %v4814_v37  ;;  %v4852_v31 = vpack.c.bf16 %v4839_v0, %v4839_v0  ;;  %v4901_v39 = vrot.slane %v4899_v9, 1  ;;  %v4790_v37 = vpop.permute.xlu2 %4789  ;;  %v4569_v0 = vadd.f32 %v17179_v42, %v16678_v46  ;;  %v13880_v46 = vld [vmem:[%s21289_s7 + $0x120] sm:$0xff] }
 0x6c1   : > { %vm4715_vm3 = vcmp.ge.f32.partialorder %v4695_v25, 0.0  ;;  %v4725_v23 = vmul.f32 0.2, %v4695_v25 }
 0x6c2   : > { %v4875_v61 = vunpack.c.l.b16 %v4852_v31  ;;  %v4902_v13 = vor.u32 %v4901_v39, %v4897_v2 }
 0x6c3   : > { %v4735_v20 = vsel %vm4715_vm3, %v4695_v25, %v4725_v23  ;;  %vm21318_vm3 = vmmov %vm21314_vm13 }
 0x6c4   : > { %v4745_v14 = vmul.f32 1.4142135, %v4735_v20  ;;  %v17230_v1 = vpack.c.b16 %v4875_v61, %v17199_v27  ;;  %v13881_v20 = vld [vmem:[%s21289_s7 + $0x128] sm:$0xff] }
 0x6c5   : > { %5851 = vmatpush.bf16.msrb.mxu0 %v13881_v20  ;;  %v13890_v20 = vld [vmem:[%s21289_s7 + $0x170] sm:$0xff] }
 0x6c6   : > { %v4815_v36 = vmul.f32 %v4780_v57, %v4745_v14  ;;  %v4697_v7 = vpop.f32.mrf.mxu0  ;;  %v4969_v23 = vrot.slane %v17230_v1, 1  ;;  %5884 = vmatpush.bf16.msra.mxu3 %v13890_v20 }
 0x6c7   : > { %v4698_v30 = vadd.f32 %v4697_v7, %v17138_v32  ;;  %v4840_v60 = vld [vmem:[#allocation2 + $0x18] sm:$0xff]  ;;  %v4785_v32 = vpop.permute.xlu1 %4784 }
 0x6c8   : > { %4830 = vst [vmem:[#allocation2 + $0x23] sm:$0xff] %v4815_v36  ;;  %v4853_v11 = vpack.c.bf16 %v4840_v60, %v4840_v60  ;;  %v5043_v36 = vrot.slane %v17230_v1, 2 }
 0x6c9   : > { %vm4716_vm5 = vcmp.ge.f32.partialorder %v4698_v30, 0.0  ;;  %v4726_v41 = vmul.f32 0.2, %v4698_v30  ;;  %5852 = vmatpush.bf16.msrb.mxu0 %v13880_v46 }
 0x6ca   : > { %v4876_v22 = vunpack.c.l.b16 %v4853_v11 }
 0x6cb   : > { %v4736_v34 = vsel %vm4716_vm5, %v4698_v30, %v4726_v41  ;;  %v4603_v30 = vadd.f32 %v16838_v17, %v4569_v0  ;;  %vm21319_vm5 = vmmov %vm21315_vm4 }
 0x6cc   : > { %v4746_v33 = vmul.f32 1.4142135, %v4736_v34  ;;  %v17209_v10 = vpack.c.b16 %v4876_v22, %v4875_v61 }
 0x6cd   : > { %v4637_v11 = vadd.f32 %v17036_v58, %v4603_v30 }
 0x6ce   : > { %v4816_v50 = vmul.f32 %v4785_v32, %v4746_v33  ;;  %v4699_v45 = vpop.f32.mrf.mxu0  ;;  %5726 = vmatmul.bf16.gmra.mxu0 %v17209_v10  ;;  %v4946_v62 = vrot.slane %v17209_v10, 1  ;;  %v4904_v40 = vshll.u32 %v17209_v10, 16  ;;  %v4908_v48 = vshrl.u32 %v17209_v10, 16 }
 0x6cf   : > { %v4700_v5 = vadd.f32 %v4699_v45, %v4666_v6  ;;  %v4841_v19 = vld [vmem:[#allocation2 + $0x20] sm:$0xff]  ;;  %v4671_v17 = vadd.f32 %v17157_v44, %v4637_v11  ;;  %v5063_v59 = vrot.slane %v17209_v10, 2  ;;  %v5117_v34 = vrot.slane %v17209_v10, 3 }
 0x6d0   : > { %4831 = vst [vmem:[#allocation2 + $0x2b] sm:$0xff] %v4816_v50  ;;  %v4947_v53 = vsel %vm912_vm0, %v4945_v63, %v4946_v62  ;;  %v4906_v15 = vrot.slane %v4904_v40, 1  ;;  %v17222_v3 = vrot.slane %v4904_v40, 3  ;;  %v4854_v29 = vpack.c.bf16 %v4841_v19, %v4841_v19  ;;  %v13879_v63 = vld [vmem:[%s21289_s7 + $0x118] sm:$0xff] }
 0x6d1   : > { %vm4717_vm6 = vcmp.ge.f32.partialorder %v4700_v5, 0.0  ;;  %v4727_v43 = vmul.f32 0.2, %v4700_v5  ;;  %5789 = vmatmul.bf16.vlgmr.msrb.gmra.mxu1 %v4947_v53  ;;  %v17226_v8 = vrot.slane %v4908_v48, 2  ;;  %5853 = vmatpush.bf16.msrb.mxu0 %v13879_v63 }
 0x6d2   : > { %v4907_v24 = vsel %vm727_vm2, %v4902_v13, %v4906_v15  ;;  %v4877_v38 = vunpack.c.l.b16 %v4854_v29  ;;  %v4910_v2 = vor.u32 %v4908_v48, %v4906_v15  ;;  %v13899_v15 = vld [vmem:[%s21289_s7 + $0x1b8] sm:$0xff] }
 0x6d3   : > { %v4737_v49 = vsel %vm4717_vm6, %v4700_v5, %v4727_v43  ;;  %5755 = vmatmul.bf16.vlgmr.msrb.gmra.mxu3 %v4907_v24  ;;  %v5081_v51 = vor.u32 %v17222_v3, %v17226_v8  ;;  %v13878_v43 = vld [vmem:[%s21289_s7 + $0x110] sm:$0xff]  ;;  %5917 = vmatpush.bf16.msra.mxu1 %v13899_v15  ;;  %vm21320_vm6 = vmmov %vm21315_vm4 }
 0x6d4   : > { %v4747_v55 = vmul.f32 1.4142135, %v4737_v49  ;;  %v17237_v21 = vpack.c.b16 %v4877_v38, %v4876_v22  ;;  %v4795_v22 = vpop.permute.xlu0 %4794  ;;  %v13898_v49 = vld [vmem:[%s21289_s7 + $0x1b0] sm:$0xff] }
 0x6d5   : > { %5854 = vmatpush.bf16.msrb.mxu0 %v13878_v43 }
 0x6d6   : > { %v4817_v12 = vmul.f32 %v4790_v37, %v4747_v55  ;;  %v4702_v25 = vpop.f32.mrf.mxu0  ;;  %v4970_v27 = vrot.slane %v17237_v21, 1  ;;  %v5044_v7 = vrot.slane %v17237_v21, 2 }
 0x6d7   : > { %v4703_v14 = vadd.f32 %v4702_v25, %v17152_v28  ;;  %v4842_v57 = vld [vmem:[#allocation2 + $0x28] sm:$0xff]  ;;  %5918 = vmatpush.bf16.msra.mxu1 %v13898_v49 }
 0x6d8   : > { %4832 = vst [vmem:[#allocation2 + $0x33] sm:$0xff] %v4817_v12  ;;  %v4971_v31 = vsel %vm912_vm0, %v4969_v23, %v4970_v27  ;;  %v4855_v54 = vpack.c.bf16 %v4842_v57, %v4842_v57  ;;  %v17259_v28 = vsel %vm21311_vm8, %v5043_v36, %v5044_v7  ;;  %v13877_v25 = vld [vmem:[%s21289_s7 + $0x108] sm:$0xff]  ;;  %v4800_v23 = vpop.permute.xlu1 %4799  ;;  %vm21322_vm8 = vmmov %vm21318_vm3 }
 0x6d9   : > { %vm4718_vm7 = vcmp.ge.f32.partialorder %v4703_v14, 0.0  ;;  %v4728_v60 = vmul.f32 0.2, %v4703_v14  ;;  %5823 = vmatmul.bf16.vlgmr.msrb.gmra.mxu2 %v4971_v31  ;;  %v4574_v31 = vadd.f32 %v17179_v42, %v16708_v26  ;;  %5855 = vmatpush.bf16.msrb.mxu0 %v13877_v25  ;;  %v13897_v26 = vld [vmem:[%s21289_s7 + $0x1a8] sm:$0xff]  ;;  %v13876_v42 = vld [vmem:[%s21289_s7 + $0x100] sm:$0xff] }
 0x6da   : > { %v4878_v9 = vunpack.c.l.b16 %v4855_v54 }
 0x6db   : > { %v4738_v47 = vsel %vm4718_vm7, %v4703_v14, %v4728_v60  ;;  %5919 = vmatpush.bf16.msra.mxu1 %v13897_v26  ;;  %v13885_v26 = vld [vmem:[%s21289_s7 + $0x148] sm:$0xff]  ;;  %vm21321_vm7 = vmmov %vm21317_vm1 }
 0x6dc   : > { %v4748_v41 = vmul.f32 1.4142135, %v4738_v47  ;;  %v17262_v61 = vpack.c.b16 %v4878_v9, %v4877_v38 }
 0x6dd   : > { %5856 = vmatpush.bf16.msrb.mxu0 %v13876_v42 }
 0x6de   : > { %v4818_v39 = vmul.f32 %v4795_v22, %v4748_v41  ;;  %v4704_v33 = vpop.f32.mrf.mxu0  ;;  %5731 = vmatmul.bf16.gmra.mxu0 %v17262_v61  ;;  %v4948_v6 = vrot.slane %v17262_v61, 1  ;;  %v4912_v58 = vshll.u32 %v17262_v61, 16  ;;  %v4916_v32 = vshrl.u32 %v17262_v61, 16  ;;  %v4805_v22 = vpop.permute.xlu2 %4804 }
 0x6df   : > { %v4705_v44 = vadd.f32 %v4704_v33, %v4671_v17  ;;  %v4843_v50 = vld [vmem:[#allocation2 + $0x30] sm:$0xff]  ;;  %v5064_v45 = vrot.slane %v17262_v61, 2  ;;  %v5118_v40 = vrot.slane %v17262_v61, 3  ;;  %v13904_v61 = vld [vmem:[%s21289_s7 + $0x1e0] sm:$0xff] }
 0x6e0   : > { %4833 = vst [vmem:[#allocation2 + $0x3b] sm:$0xff] %v4818_v39  ;;  %v4949_v52 = vsel %vm912_vm0, %v4946_v62, %v4948_v6  ;;  %v17283_v5 = vrot.slane %v4912_v58, 1  ;;  %v5083_v13 = vrot.slane %v4912_v58, 3  ;;  %v4856_v19 = vpack.c.bf16 %v4843_v50, %v4843_v50 }
 0x6e1   : > { %vm4719_vm9 = vcmp.ge.f32.partialorder %v4705_v44, 0.0  ;;  %v4729_v53 = vmul.f32 0.2, %v4705_v44  ;;  %5794 = vmatmul.bf16.gmra.mxu1 %v4949_v52  ;;  %v5082_v48 = vrot.slane %v4916_v32, 2  ;;  %v17293_v10 = vsel %vm21312_vm11, %v5063_v59, %v5064_v45  ;;  %vm21324_vm11 = vmmov %vm21315_vm4 }
 0x6e2   : > { %v4915_v62 = vsel %vm727_vm2, %v4910_v2, %v17283_v5  ;;  %v4879_v29 = vunpack.c.l.b16 %v4856_v19  ;;  %v17303_v24 = vsel %vm21313_vm12, %v5117_v34, %v5118_v40  ;;  %v13906_v34 = vld [vmem:[%s21289_s7 + $0x1f0] sm:$0xff]  ;;  %v4918_v2 = vor.u32 %v4916_v32, %v17283_v5  ;;  %v13895_v5 = vld [vmem:[%s21289_s7 + $0x198] sm:$0xff] }
 0x6e3   : > { %v4739_v38 = vsel %vm4719_vm9, %v4705_v44, %v4729_v53  ;;  %5760 = vmatmul.bf16.gmra.mxu3 %v4915_v62  ;;  %v17311_v55 = vor.u32 %v5083_v13, %v5082_v48  ;;  %v13905_v62 = vld [vmem:[%s21289_s7 + $0x1e8] sm:$0xff]  ;;  %vm21323_vm9 = vmmov %vm21315_vm4  ;;  %vm21325_vm12 = vsmask.f32 6400 }
 0x6e4   : > { %v4749_v37 = vmul.f32 1.4142135, %v4739_v38  ;;  %v17313_v12 = vpack.c.b16 %v4879_v29, %v4878_v9  ;;  %v13889_v9 = vld [vmem:[%s21289_s7 + $0x168] sm:$0xff] }
 0x6e5   : > { %v17326_v0 = vsel %vm21314_vm13, %v5081_v51, %v17311_v55  ;;  %v4608_v51 = vadd.f32 %v16976_v56, %v4574_v31  ;;  %5885 = vmatpush.bf16.msra.mxu3 %v13889_v9  ;;  %v13902_v9 = vld [vmem:[%s21289_s7 + $0x1d0] sm:$0xff]  ;;  %vm21326_vm13 = vmmov %vm21315_vm4 }
 0x6e6   : > { %v4819_v14 = vmul.f32 %v4800_v23, %v4749_v37  ;;  %v4707_v57 = vpop.f32.mrf.mxu0  ;;  %v4972_v36 = vrot.slane %v17313_v12, 1  ;;  %v5046_v60 = vrot.slane %v17313_v12, 2  ;;  %v13887_v37 = vld [vmem:[%s21289_s7 + $0x158] sm:$0xff] }
 0x6e7   : > { %v4708_v54 = vadd.f32 %v4707_v57, %v17169_v4  ;;  %v4844_v30 = vld [vmem:[#allocation2 + $0x38] sm:$0xff]  ;;  %v4642_v11 = vadd.f32 %v17116_v18, %v4608_v51 }
 0x6e8   : > { %4834 = vst [vmem:[#allocation2 + $0x43] sm:$0xff] %v4819_v14  ;;  %v4973_v3 = vsel %vm912_vm0, %v4970_v27, %v4972_v36  ;;  %v4857_v8 = vpack.c.bf16 %v4844_v30, %v4844_v30  ;;  %v13907_v4 = vld [vmem:[%s21289_s7 + $0x1f8] sm:$0xff]  ;;  %v17353_v56 = vsel %vm21315_vm4, %v5044_v7, %v5046_v60  ;;  %v13896_v7 = vld [vmem:[%s21289_s7 + $0x1a0] sm:$0xff]  ;;  %v13886_v14 = vld [vmem:[%s21289_s7 + $0x150] sm:$0xff] }
 0x6e9   : > { %vm4720_vm15 = vcmp.ge.f32.partialorder %v4708_v54, 0.0  ;;  %v4730_v46 = vmul.f32 0.2, %v4708_v54  ;;  %5828 = vmatmul.bf16.gmra.mxu2 %v4973_v3  ;;  %v4676_v59 = vadd.f32 %v17174_v35, %v4642_v11  ;;  %v13888_v35 = vld [vmem:[%s21289_s7 + $0x160] sm:$0xff]  ;;  %5920 = vmatpush.bf16.msra.mxu1 %v13896_v7  ;;  %vm21328_vm4 = vmmov %vm21318_vm3 }
 0x6ea   : > { %v4880_v27 = vunpack.c.l.b16 %v4857_v8  ;;  %5951 = vmatpush.bf16.msra.mxu2 %v13907_v4  ;;  %5886 = vmatpush.bf16.msra.mxu3 %v13888_v35 }
 0x6eb   : > { %v4740_v47 = vsel %vm4720_vm15, %v4708_v54, %v4730_v46  ;;  %v13903_v46 = vld [vmem:[%s21289_s7 + $0x1d8] sm:$0xff]  ;;  %vm21327_vm15 = vmmov %vm21317_vm1 }
 0x6ec   : > { %v4750_v41 = vmul.f32 1.4142135, %v4740_v47  ;;  %v17359_v17 = vpack.c.b16 %v4880_v27, %v4879_v29 }
 0x6ed   : > { %5921 = vmatpush.bf16.msra.mxu1 %v13895_v5  ;;  %v4986_v5 = vshrl.u32 %v17230_v1, 16 }
 0x6ee   : > { %v4820_v18 = vmul.f32 %v4805_v22, %v4750_v41  ;;  %v4709_v39 = vpop.f32.mrf.mxu0  ;;  %5736 = vmatmul.bf16.gmra.mxu0 %v17359_v17  ;;  %v4950_v33 = vrot.slane %v17359_v17, 1  ;;  %v4920_v58 = vshll.u32 %v17359_v17, 16  ;;  %v4924_v63 = vshrl.u32 %v17359_v17, 16  ;;  %5952 = vmatpush.bf16.msra.mxu2 %v13906_v34  ;;  %v13884_v41 = vld [vmem:[%s21289_s7 + $0x140] sm:$0xff] }
 0x6ef   : > { %v4710_v44 = vadd.f32 %v4709_v39, %v4676_v59  ;;  %v4845_v50 = vld [vmem:[#allocation2 + $0x40] sm:$0xff]  ;;  %v5066_v52 = vrot.slane %v17359_v17, 2  ;;  %v5120_v13 = vrot.slane %v17359_v17, 3  ;;  %5887 = vmatpush.bf16.msra.mxu3 %v13887_v37  ;;  %v4994_v34 = vshrl.u32 %v17237_v21, 16 }
 0x6f0   : > { %4835 = vst [vmem:[#allocation2 + $0x4b] sm:$0xff] %v4820_v18  ;;  %v4951_v19 = vsel %vm912_vm0, %v4948_v6, %v4950_v33  ;;  %v4922_v53 = vrot.slane %v4920_v58, 1  ;;  %v4858_v48 = vpack.c.bf16 %v4845_v50, %v4845_v50  ;;  %v5086_v15 = vrot.slane %v4924_v63, 2  ;;  %v13900_v17 = vld [vmem:[%s21289_s7 + $0x1c0] sm:$0xff] }
 0x6f1   : > { %vm4721_vm10 = vcmp.ge.f32.partialorder %v4710_v44, 0.0  ;;  %v4731_v32 = vmul.f32 0.2, %v4710_v44  ;;  %5799 = vmatmul.bf16.gmra.mxu1 %v4951_v19  ;;  %v17398_v6 = vsel %vm21316_vm14, %v5064_v45, %v5066_v52  ;;  %v5087_v29 = vrot.slane %v4920_v58, 3  ;;  %v13894_v45 = vld [vmem:[%s21289_s7 + $0x190] sm:$0xff] }
 0x6f2   : > { %v4923_v43 = vsel %vm727_vm2, %v4918_v2, %v4922_v53  ;;  %v4881_v38 = vunpack.c.l.b16 %v4858_v48  ;;  %v17406_v16 = vsel %vm21317_vm1, %v5118_v40, %v5120_v13  ;;  %5953 = vmatpush.bf16.msra.mxu2 %v13905_v62  ;;  %v4810_v40 = vpop.permute.xlu0 %4809  ;;  %5922 = vmatpush.bf16.msra.mxu1 %v13894_v45  ;;  %v4926_v59 = vor.u32 %v4924_v63, %v4922_v53 }
 0x6f3   : > { %v4741_v49 = vsel %vm4721_vm10, %v4710_v44, %v4731_v32  ;;  %5765 = vmatmul.bf16.gmra.mxu3 %v4923_v43  ;;  %v17414_v25 = vor.u32 %v5087_v29, %v5086_v15  ;;  %v4997_v18 = vshll.u32 %v17237_v21, 16  ;;  %v13901_v21 = vld [vmem:[%s21289_s7 + $0x1c8] sm:$0xff]  ;;  %v4989_v62 = vshll.u32 %v17230_v1, 16  ;;  %vm21329_vm10 = vmmov %vm21325_vm12 }
 0x6f4   : > { %v4751_v23 = vmul.f32 1.4142135, %v4741_v49  ;;  %v17416_v20 = vpack.c.b16 %v4881_v38, %v4880_v27  ;;  %5888 = vmatpush.bf16.msra.mxu3 %v13886_v14  ;;  %v13892_v27 = vld [vmem:[%s21289_s7 + $0x180] sm:$0xff]  ;;  %v4996_v43 = vrot.slane %v4994_v34, 1  ;;  %v4988_v1 = vrot.slane %v4986_v5, 1  ;;  %vm21330_vm14 = vmmov %vm21329_vm10 }
 0x6f5   : > { %v17427_v57 = vsel %vm21318_vm3, %v17311_v55, %v17414_v25  ;;  %v13893_v55 = vld [vmem:[%s21289_s7 + $0x188] sm:$0xff]  ;;  %vm21331_vm1 = vmmov %vm21329_vm10 }
 0x6f6   : > { %v4821_v31 = vmul.f32 %v4810_v40, %v4751_v23  ;;  %v4974_v54 = vrot.slane %v17416_v20, 1  ;;  %v5048_v3 = vrot.slane %v17416_v20, 2  ;;  %5954 = vmatpush.bf16.msra.mxu2 %v13904_v61  ;;  %5923 = vmatpush.bf16.msra.mxu1 %v13893_v55  ;;  %v4991_v23 = vrot.slane %v4989_v62, 2  ;;  %vm21332_vm3 = vmmov %vm21331_vm1 }
 0x6f7   : > { %v4846_v30 = vld [vmem:[#allocation2 + $0x48] sm:$0xff] }
 0x6f8   : > { %4836 = vst [vmem:[#allocation2 + $0x53] sm:$0xff] %v4821_v31  ;;  %v4975_v8 = vsel %vm912_vm0, %v4972_v36, %v4974_v54  ;;  %v4859_v51 = vpack.c.bf16 %v4846_v30, %v4846_v30  ;;  %v17450_v36 = vsel %vm21319_vm5, %v5046_v60, %v5048_v3  ;;  %5889 = vmatpush.bf16.msra.mxu3 %v13885_v26 }
 0x6f9   : > { %5833 = vmatmul.bf16.gmra.mxu2 %v4975_v8 }
 0x6fa   : > { %v4882_v4 = vunpack.c.l.b16 %v4859_v51  ;;  %5955 = vmatpush.bf16.msra.mxu2 %v13903_v46  ;;  %5924 = vmatpush.bf16.msra.mxu1 %v13892_v27  ;;  %v4992_v51 = vor.u32 %v4991_v23, %v4988_v1 }
 0x6fc   : > { %v17452_v42 = vpack.c.b16 %v4882_v4, %v4881_v38  ;;  %5890 = vmatpush.bf16.msra.mxu3 %v13884_v41 }
 0x6fe   : > { %5741 = vmatmul.bf16.gmra.mxu0 %v17452_v42  ;;  %v4952_v11 = vrot.slane %v17452_v42, 1  ;;  %v4928_v60 = vshll.u32 %v17452_v42, 16  ;;  %v4932_v47 = vshrl.u32 %v17452_v42, 16  ;;  %v5068_v22 = vrot.slane %v17452_v42, 2  ;;  %5956 = vmatpush.bf16.msra.mxu2 %v13902_v9 }
 0x6ff   : > { %v4847_v7 = vld [vmem:[#allocation2 + $0x50] sm:$0xff]  ;;  %v4848_v39 = vld [vmem:[#allocation2 + $0x58] sm:$0xff]  ;;  %v5122_v58 = vrot.slane %v17452_v42, 3 }
 0x700   : > { %v4953_v35 = vsel %vm912_vm0, %v4950_v33, %v4952_v11  ;;  %v4930_v44 = vrot.slane %v4928_v60, 1  ;;  %v4860_v2 = vpack.c.bf16 %v4847_v7, %v4847_v7  ;;  %v4861_v50 = vpack.c.bf16 %v4848_v39, %v4848_v39 }
 0x701   : > { %5804 = vmatmul.bf16.gmra.mxu1 %v4953_v35  ;;  %v17484_v63 = vsel %vm21320_vm6, %v5066_v52, %v5068_v22  ;;  %v5090_v19 = vrot.slane %v4932_v47, 2  ;;  %v5091_v53 = vrot.slane %v4928_v60, 3  ;;  %v17491_v33 = vsel %vm21321_vm7, %v5120_v13, %v5122_v58  ;;  %vm21333_vm6 = vmmov %vm21328_vm4 }
 0x702   : > { %v4931_v48 = vsel %vm727_vm2, %v4926_v59, %v4930_v44  ;;  %v4894_v15 = vunpack.c.l.b16 %v4860_v2  ;;  %v4962_v32 = vunpack.c.l.b16 %v4861_v50  ;;  %5957 = vmatpush.bf16.msra.mxu2 %v13901_v21  ;;  %v4999_v13 = vrot.slane %v4997_v18, 2 }
 0x703   : > { %5770 = vmatmul.bf16.gmra.mxu3 %v4931_v48  ;;  %v5092_v52 = vor.u32 %v5091_v53, %v5090_v19  ;;  %v5003_v39 = vshrl.u32 %v17313_v12, 16  ;;  %v5006_v35 = vshll.u32 %v17313_v12, 16  ;;  %v13915_v12 = vld [vmem:[%s21289_s7 + $0x238] sm:$0xff]  ;;  %v5012_v19 = vshrl.u32 %v17416_v20, 16  ;;  %v13914_v48 = vld [vmem:[%s21289_s7 + $0x230] sm:$0xff] }
 0x704   : > { %v17496_v29 = vpack.c.b16 %v4894_v15, %v4882_v4  ;;  %v4895_v37 = vpack.c.b16 %v4894_v15, %v4894_v15  ;;  %v17506_v45 = vpack.c.b16 %v4962_v32, %v4894_v15  ;;  %v17508_v61 = vpack.c.b16 %v4962_v32, %v4962_v32  ;;  %5985 = vmatpush.bf16.msra.mxu0 %v13915_v12  ;;  %v13913_v15 = vld [vmem:[%s21289_s7 + $0x228] sm:$0xff] }
 0x705   : > { %v17503_v38 = vsel %vm21322_vm8, %v17414_v25, %v5092_v52  ;;  %v5000_v14 = vor.u32 %v4999_v13, %v4996_v43  ;;  %v5015_v53 = vshll.u32 %v17416_v20, 16  ;;  %v5014_v32 = vrot.slane %v5012_v19, 1  ;;  %v13912_v20 = vld [vmem:[%s21289_s7 + $0x220] sm:$0xff] }
 0x706   : > { %v4976_v49 = vrot.slane %v17496_v29, 1  ;;  %5958 = vmatpush.bf16.msra.mxu2 %v13900_v17  ;;  %v4936_v31 = vshll.u32 %v4895_v37, 16  ;;  %v5070_v25 = vrot.slane %v17506_v45, 2  ;;  %v5050_v30 = vrot.slane %v17496_v29, 2  ;;  %v13910_v17 = vld [vmem:[%s21289_s7 + $0x210] sm:$0xff] }
 0x707   : > { %v5095_v8 = vshrl.u32 %v17506_v45, 16  ;;  %v5098_v55 = vshll.u32 %v17506_v45, 16  ;;  %v5052_v46 = vrot.slane %v17508_v61, 2  ;;  %v4954_v26 = vrot.slane %v4895_v37, 1 }
 0x708   : > { %v4977_v40 = vsel %vm912_vm0, %v4974_v54, %v4976_v49  ;;  %v17521_v54 = vsel %vm21323_vm9, %v5068_v22, %v5070_v25  ;;  %v17526_v4 = vsel %vm21324_vm11, %v5048_v3, %v5050_v30  ;;  %v5001_v9 = vsel %vm21325_vm12, %v4992_v51, %v5000_v14  ;;  %5986 = vmatpush.bf16.msra.mxu0 %v13914_v48  ;;  %v4849_v51 = vld [vmem:[#allocation2 + $0x60] sm:$0xff] }
 0x709   : > { %5838 = vmatmul.bf16.gmra.mxu2 %v4977_v40  ;;  %v5097_v27 = vrot.slane %v5095_v8, 2  ;;  %v5100_v60 = vrot.slane %v5098_v55, 3  ;;  %v17530_v41 = vsel %vm21326_vm13, %v5050_v30, %v5052_v46  ;;  %v4938_v59 = vrot.slane %v4936_v31, 1 }
 0x70a   : > { %v5124_v7 = vrot.slane %v17506_v45, 3  ;;  %v4955_v22 = vsel %vm912_vm0, %v4952_v11, %v4954_v26  ;;  %v4934_v3 = vor.u32 %v4932_v47, %v4930_v44  ;;  %v4978_v42 = vrot.slane %v17508_v61, 1 }
 0x70b   : > { %v17533_v34 = vor.u32 %v5100_v60, %v5097_v27  ;;  %v5005_v11 = vrot.slane %v5003_v39, 1  ;;  %v5008_v47 = vrot.slane %v5006_v35, 2  ;;  %v5017_v5 = vrot.slane %v5015_v53, 2 }
 0x70c   : > { %v17543_v18 = vsel %vm21327_vm15, %v5122_v58, %v5124_v7  ;;  %v4939_v50 = vsel %vm727_vm2, %v4934_v3, %v4938_v59  ;;  %v4979_v44 = vsel %vm912_vm0, %v4976_v49, %v4978_v42  ;;  %5987 = vmatpush.bf16.msra.mxu0 %v13913_v15  ;;  %v13909_v49 = vld [vmem:[%s21289_s7 + $0x208] sm:$0xff]  ;;  %v5030_v1 = vshrl.u32 %v17508_v61, 16 }
 0x70d   : > { %v17549_v2 = vsel %vm21328_vm4, %v5092_v52, %v17533_v34  ;;  %v5009_v58 = vor.u32 %v5008_v47, %v5005_v11  ;;  %v5021_v52 = vshrl.u32 %v17496_v29, 16  ;;  %v5033_v23 = vshll.u32 %v17508_v61, 16  ;;  %v17602_v61 = vld [vmem:[%s21290_s8] ss:$0 sm:$0xff] }
 0x70e   : > { %5857 = vmatmul.bf16.vlgmr.msrb.gmra.mxu0 %v5001_v9 }
 0x70f   : > { %v5010_v21 = vsel %vm21329_vm10, %v5000_v14, %v5009_v58  ;;  %v5023_v43 = vrot.slane %v5021_v52, 1  ;;  %v5035_v14 = vrot.slane %v5033_v23, 2 }
 0x710   : > { %5988 = vmatpush.bf16.msra.mxu0 %v13912_v20 }
 0x711   : > { %5809 = vmatmul.bf16.gmra.mxu1 %v4955_v22 }
 0x713   : > { %5775 = vmatmul.bf16.gmra.mxu3 %v4939_v50 }
 0x719   : > { %5843 = vmatmul.bf16.gmra.mxu2 %v4979_v44 }
 0x71e   : > { %5862 = vmatmul.bf16.gmra.mxu0 %v5010_v21 }
 0x721   : > { %5925 = vmatmul.bf16.vlgmr.msra.gmra.mxu1 %v17293_v10  ;;  %v5018_v10 = vor.u32 %v5017_v5, %v5014_v32 }
 0x723   : > { %5891 = vmatmul.bf16.vlgmr.msra.gmra.mxu3 %v17259_v28  ;;  %v5019_v62 = vsel %vm21330_vm14, %v5009_v58, %v5018_v10  ;;  %v13911_v28 = vld [vmem:[%s21289_s7 + $0x218] sm:$0xff] }
 0x724   : > { %5989 = vmatpush.bf16.msra.mxu0 %v13911_v28 }
 0x728   : > { %5990 = vmatpush.bf16.msra.mxu0 %v13910_v17 }
 0x729   : > { %5959 = vmatmul.bf16.vlgmr.msra.gmra.mxu2 %v17326_v0  ;;  %v5024_v0 = vshll.u32 %v17496_v29, 16 }
 0x72b   : > { %v5026_v13 = vrot.slane %v5024_v0, 2 }
 0x72c   : > { %5991 = vmatpush.bf16.msra.mxu0 %v13909_v49 }
 0x72e   : > { %5867 = vmatmul.bf16.gmra.mxu0 %v5019_v62 }
 0x731   : > { %5930 = vmatmul.bf16.gmra.mxu1 %v17398_v6  ;;  %v5027_v6 = vor.u32 %v5026_v13, %v5023_v43 }
 0x733   : > { %5896 = vmatmul.bf16.gmra.mxu3 %v17353_v56  ;;  %v13908_v56 = vld [vmem:[%s21289_s7 + $0x200] sm:$0xff]  ;;  %v5028_v29 = vsel %vm21331_vm1, %v5018_v10, %v5027_v6 }
 0x734   : > { %5992 = vmatpush.bf16.msra.mxu0 %v13908_v56 }
 0x739   : > { %5964 = vmatmul.bf16.gmra.mxu2 %v17427_v57  ;;  %v5032_v57 = vrot.slane %v5030_v1, 1 }
 0x73b   : > { %v5722_v37 = vpop.f32.mrf.mxu0  ;;  %v5036_v31 = vor.u32 %v5035_v14, %v5032_v57 }
 0x73c   : > { %v5723_v46 = vadd.f32 %v17602_v61, %v5722_v37 }
 0x73d   : > { %v5037_v8 = vsel %vm21332_vm3, %v5027_v6, %v5036_v31  ;;  %vm6159_vm3 = vcmask 654336  }
 0x73e   : > { %5872 = vmatmul.bf16.gmra.mxu0 %v5028_v29 }
 0x741   : > { %5935 = vmatmul.bf16.gmra.mxu1 %v17484_v63  ;;  %v4862_v63 = vpack.c.bf16 %v4849_v51, %v4849_v51 }
 0x743   : > { %v17594_v40 = vpop.f32.mrf.mxu0  ;;  %5901 = vmatmul.bf16.gmra.mxu3 %v17450_v36 }
 0x749   : > { %5969 = vmatmul.bf16.gmra.mxu2 %v17503_v38  ;;  %v5060_v38 = vunpack.c.l.b16 %v4862_v63 }
 0x74b   : > { %v5727_v30 = vpop.f32.mrf.mxu0  ;;  %v17611_v60 = vpack.c.b16 %v5060_v38, %v5060_v38 }
 0x74c   : > { %v5728_v12 = vadd.f32 %v17602_v61, %v5727_v30 }
 0x74d   : > { %v5104_v39 = vshrl.u32 %v17611_v60, 16 }
 0x74e   : > { %v5790_v55 = vpop.f32.mrf.mxu1  ;;  %5877 = vmatmul.bf16.gmra.mxu0 %v5037_v8 }
 0x751   : > { %5940 = vmatmul.bf16.gmra.mxu1 %v17521_v54  ;;  %v5072_v54 = vrot.slane %v17611_v60, 2 }
 0x753   : > { %v17605_v36 = vpop.f32.mrf.mxu0  ;;  %5906 = vmatmul.bf16.gmra.mxu3 %v17526_v4  ;;  %v5107_v4 = vshll.u32 %v17611_v60, 16  ;;  %v5073_v11 = vsel %vm21319_vm5, %v5070_v25, %v5072_v54 }
 0x755   : > { %v5109_v47 = vrot.slane %v5107_v4, 3 }
 0x756   : > { %v5756_v26 = vpop.f32.mrf.mxu3  ;;  %v17609_v27 = vpop.f32.mrf.mxu1 }
 0x757   : > { %v5757_v9 = vadd.f32 %v5756_v26, %v5723_v46 }
 0x759   : > { %5974 = vmatmul.bf16.gmra.mxu2 %v17549_v2  ;;  %v5791_v59 = vadd.f32 %v5790_v55, %v5757_v9  ;;  %v5106_v2 = vrot.slane %v5104_v39, 2 }
 0x75b   : > { %v5732_v22 = vpop.f32.mrf.mxu0  ;;  %v5110_v21 = vor.u32 %v5109_v47, %v5106_v2 }
 0x75c   : > { %v5824_v3 = vpop.f32.mrf.mxu2  ;;  %v5733_v28 = vadd.f32 %v17602_v61, %v5732_v22  ;;  %v5126_v22 = vrot.slane %v17611_v60, 3 }
 0x75d   : > { %v5825_v35 = vadd.f32 %v5824_v3, %v5791_v59  ;;  %v5111_v48 = vsel %vm21333_vm6, %v17533_v34, %v5110_v21 }
 0x75e   : > { %v17617_v50 = vpop.f32.mrf.mxu3  ;;  %v5795_v42 = vpop.f32.mrf.mxu1  ;;  %5993 = vmatmul.bf16.vlgmr.msra.gmra.mxu0 %v17303_v24 }
 0x761   : > { %5945 = vmatmul.bf16.gmra.mxu1 %v5073_v11 }
 0x763   : > { %v17623_v44 = vpop.f32.mrf.mxu0  ;;  %5911 = vmatmul.bf16.gmra.mxu3 %v17530_v41 }
 0x764   : > { %v17626_v58 = vpop.f32.mrf.mxu2 }
 0x766   : > { %v5761_v19 = vpop.f32.mrf.mxu3  ;;  %v17629_v53 = vpop.f32.mrf.mxu1 }
 0x767   : > { %v5762_v24 = vadd.f32 %v5761_v19, %v5728_v12 }
 0x769   : > { %5979 = vmatmul.bf16.gmra.mxu2 %v5111_v48  ;;  %v5796_v25 = vadd.f32 %v5795_v42, %v5762_v24 }
 0x76b   : > { %v5737_v15 = vpop.f32.mrf.mxu0 }
 0x76c   : > { %v5829_v32 = vpop.f32.mrf.mxu2  ;;  %v5738_v29 = vadd.f32 %v17602_v61, %v5737_v15 }
 0x76d   : > { %v5830_v5 = vadd.f32 %v5829_v32, %v5796_v25 }
 0x76e   : > { %v17633_v10 = vpop.f32.mrf.mxu3  ;;  %v5800_v41 = vpop.f32.mrf.mxu1  ;;  %5998 = vmatmul.bf16.gmra.mxu0 %v17406_v16 }
 0x773   : > { %v17636_v20 = vpop.f32.mrf.mxu0 }
 0x774   : > { %v17638_v62 = vpop.f32.mrf.mxu2 }
 0x776   : > { %v5766_v52 = vpop.f32.mrf.mxu3  ;;  %v17641_v0 = vpop.f32.mrf.mxu1 }
 0x777   : > { %v5767_v34 = vadd.f32 %v5766_v52, %v5733_v28 }
 0x779   : > { %v5801_v17 = vadd.f32 %v5800_v41, %v5767_v34 }
 0x77b   : > { %v5742_v43 = vpop.f32.mrf.mxu0 }
 0x77c   : > { %v5834_v13 = vpop.f32.mrf.mxu2  ;;  %v5743_v46 = vadd.f32 %v17602_v61, %v5742_v43 }
 0x77d   : > { %v5835_v49 = vadd.f32 %v5834_v13, %v5801_v17 }
 0x77e   : > { %v17643_v6 = vpop.f32.mrf.mxu3  ;;  %v5805_v37 = vpop.f32.mrf.mxu1  ;;  %6003 = vmatmul.bf16.gmra.mxu0 %v17491_v33 }
 0x783   : > { %v17646_v16 = vpop.f32.mrf.mxu0 }
 0x784   : > { %v17648_v56 = vpop.f32.mrf.mxu2 }
 0x786   : > { %v5771_v1 = vpop.f32.mrf.mxu3  ;;  %v17651_v23 = vpop.f32.mrf.mxu1 }
 0x787   : > { %v5772_v57 = vadd.f32 %v5771_v1, %v5738_v29  ;;  %v5725_v1 = vadd.f32 %v17602_v61, %v17594_v40 }
 0x789   : > { %v5806_v14 = vadd.f32 %v5805_v37, %v5772_v57  ;;  %v5759_v57 = vadd.f32 %v17617_v50, %v5725_v1 }
 0x78b   : > { %v5858_v31 = vpop.f32.mrf.mxu0 }
 0x78c   : > { %v5859_v30 = vadd.f32 %v5858_v31, %v5825_v35  ;;  %v5839_v8 = vpop.f32.mrf.mxu2  ;;  %v5793_v31 = vadd.f32 %v17609_v27, %v5759_v57 }
 0x78d   : > { %v5840_v51 = vadd.f32 %v5839_v8, %v5806_v14 }
 0x78e   : > { %v17653_v55 = vpop.f32.mrf.mxu3  ;;  %6008 = vmatmul.bf16.gmra.mxu0 %v17543_v18  ;;  %v5810_v33 = vpop.f32.mrf.mxu1  ;;  %v5127_v18 = vsel %vm21321_vm7, %v5124_v7, %v5126_v22 }
 0x793   : > { %v5860_v63 = vpop.f32.mrf.mxu0 }
 0x794   : > { %v17656_v38 = vpop.f32.mrf.mxu2 }
 0x796   : > { %v5776_v26 = vpop.f32.mrf.mxu3  ;;  %v17660_v3 = vpop.f32.mrf.mxu1 }
 0x797   : > { %v5777_v9 = vadd.f32 %v5776_v26, %v5743_v46 }
 0x799   : > { %v5811_v59 = vadd.f32 %v5810_v33, %v5777_v9  ;;  %v5730_v9 = vadd.f32 %v17602_v61, %v17605_v36 }
 0x79b   : > { %v5863_v54 = vpop.f32.mrf.mxu0  ;;  %v5764_v22 = vadd.f32 %v17633_v10, %v5730_v9 }
 0x79c   : > { %v5864_v39 = vadd.f32 %v5863_v54, %v5830_v5  ;;  %v5844_v4 = vpop.f32.mrf.mxu2 }
 0x79d   : > { %v5845_v35 = vadd.f32 %v5844_v4, %v5811_v59 }
 0x79e   : > { %v17665_v42 = vpop.f32.mrf.mxu3  ;;  %6013 = vmatmul.bf16.gmra.mxu0 %v5127_v18  ;;  %v5926_v2 = vpop.f32.mrf.mxu1 }
 0x7a3   : > { %v5865_v11 = vpop.f32.mrf.mxu0 }
 0x7a4   : > { %v17667_v47 = vpop.f32.mrf.mxu2 }
 0x7a6   : > { %v5892_v21 = vpop.f32.mrf.mxu3  ;;  %v5928_v15 = vpop.f32.mrf.mxu1 }
 0x7a7   : > { %v5893_v12 = vadd.f32 %v5892_v21, %v5859_v30  ;;  %v5827_v30 = vadd.f32 %v17626_v58, %v5793_v31  ;;  %v5798_v58 = vadd.f32 %v17629_v53, %v5764_v22 }
 0x7a9   : > { %v5927_v60 = vadd.f32 %v5926_v2, %v5893_v12  ;;  %v5861_v8 = vadd.f32 %v5860_v63, %v5827_v30  ;;  %v5832_v2 = vadd.f32 %v17638_v62, %v5798_v58 }
 0x7ab   : > { %v5868_v19 = vpop.f32.mrf.mxu0  ;;  %v5866_v10 = vadd.f32 %v5865_v11, %v5832_v2 }
 0x7ac   : > { %v17669_v24 = vadd.f32 %v5868_v19, %v5835_v49  ;;  %v5960_v48 = vpop.f32.mrf.mxu2 }
 0x7ad   : > { %v5961_v25 = vadd.f32 %v5960_v48, %v5927_v60 }
 0x7ae   : > { %v5894_v32 = vpop.f32.mrf.mxu3  ;;  %v5931_v28 = vpop.f32.mrf.mxu1 }
 0x7af   : > { %v5895_v33 = vadd.f32 %v5894_v32, %v5861_v8  ;;  %v5735_v32 = vadd.f32 %v17602_v61, %v17623_v44 }
 0x7b1   : > { %v5929_v59 = vadd.f32 %v5928_v15, %v5895_v33  ;;  %v5769_v62 = vadd.f32 %v17643_v6, %v5735_v32 }
 0x7b3   : > { %v17671_v45 = vpop.f32.mrf.mxu0 }
 0x7b4   : > { %v5962_v7 = vpop.f32.mrf.mxu2 }
 0x7b5   : > { %v5963_v40 = vadd.f32 %v5962_v7, %v5929_v59 }
 0x7b6   : > { %v5897_v5 = vpop.f32.mrf.mxu3  ;;  %v5933_v54 = vpop.f32.mrf.mxu1 }
 0x7b7   : > { %v5898_v41 = vadd.f32 %v5897_v5, %v5864_v39 }
 0x7b9   : > { %v5932_v52 = vadd.f32 %v5931_v28, %v5898_v41 }
 0x7bb   : > { %v5873_v34 = vpop.f32.mrf.mxu0 }
 0x7bc   : > { %v17673_v17 = vadd.f32 %v5873_v34, %v5840_v51  ;;  %v5965_v43 = vpop.f32.mrf.mxu2  ;;  %v5803_v34 = vadd.f32 %v17641_v0, %v5769_v62 }
 0x7bd   : > { %v5966_v13 = vadd.f32 %v5965_v43, %v5932_v52 }
 0x7be   : > { %v5899_v26 = vpop.f32.mrf.mxu3  ;;  %v5837_v44 = vadd.f32 %v17648_v56, %v5803_v34 }
 0x7bf   : > { %v5900_v48 = vadd.f32 %v5899_v26, %v5866_v10 }
 0x7c0   : > { %v5871_v8 = vadd.f32 %v17671_v45, %v5837_v44 }
 0x7c1   : > { %v5934_v7 = vadd.f32 %v5933_v54, %v5900_v48 }
 0x7c3   : > { %v17675_v37 = vpop.f32.mrf.mxu0 }
 0x7c4   : > { %v5967_v39 = vpop.f32.mrf.mxu2 }
 0x7c5   : > { %v5968_v41 = vadd.f32 %v5967_v39, %v5934_v7 }
 0x7c6   : > { %v5902_v18 = vpop.f32.mrf.mxu3 }
 0x7c7   : > { %v5903_v43 = vadd.f32 %v5902_v18, %v17669_v24 }
 0x7cb   : > { %v5878_v49 = vpop.f32.mrf.mxu0 }
 0x7cc   : > { %v17677_v29 = vadd.f32 %v5878_v49, %v5845_v35  ;;  %v5970_v53 = vpop.f32.mrf.mxu2 }
 0x7ce   : > { %v5904_v5 = vpop.f32.mrf.mxu3 }
 0x7cf   : > { %v5905_v26 = vadd.f32 %v5904_v5, %v5871_v8 }
 0x7d3   : > { %v17682_v14 = vpop.f32.mrf.mxu0 }
 0x7d4   : > { %v5972_v57 = vpop.f32.mrf.mxu2 }
 0x7d6   : > { %v5907_v33 = vpop.f32.mrf.mxu3 }
 0x7db   : > { %v5994_v51 = vpop.f32.mrf.mxu0 }
 0x7dc   : > { %v5995_v46 = vadd.f32 %v5994_v51, %v5961_v25  ;;  %v5936_v25 = vpop.f32.mrf.mxu1 }
 0x7dd   : > { %v5937_v51 = vadd.f32 %v5936_v25, %v5903_v43 }
 0x7de   : > { %v6029_v50 = vmul.f32 0.2, %v5995_v46  ;;  %vm6019_vm8 = vcmp.ge.f32.partialorder %v5995_v46, 0.0 }
 0x7df   : > { %v5971_v24 = vadd.f32 %v5970_v53, %v5937_v51 }
 0x7e0   : > { %v6039_v63 = vsel %vm6019_vm8, %v5995_v46, %v6029_v50 }
 0x7e1   : > { %v17691_v36 = vmul.f32 1.4142135, %v6039_v63 }
 0x7e3   : > { %v5996_v4 = vpop.f32.mrf.mxu0 }
 0x7e4   : > { %v5997_v27 = vadd.f32 %v5996_v4, %v5963_v40  ;;  %v5938_v49 = vpop.f32.mrf.mxu1  ;;  %v5975_v40 = vpop.f32.mrf.mxu2 }
 0x7e5   : > { %v5939_v22 = vadd.f32 %v5938_v49, %v5905_v26  ;;  %v5909_v4 = vpop.f32.mrf.mxu3 }
 0x7e6   : > { %vm6020_vm9 = vcmp.ge.f32.partialorder %v5997_v27, 0.0  ;;  %v6030_v35 = vmul.f32 0.2, %v5997_v27 }
 0x7e7   : > { %v5973_v56 = vadd.f32 %v5972_v57, %v5939_v22 }
 0x7e8   : > { %v6040_v21 = vsel %vm6020_vm9, %v5997_v27, %v6030_v35 }
 0x7e9   : > { %v17693_v12 = vmul.f32 1.4142135, %v6040_v21 }
 0x7eb   : > { %v5999_v60 = vpop.f32.mrf.mxu0  ;;  %v6059_v19 = vpack.c.bf16 %v17693_v12, %v17691_v36  ;;  %v13919_v36 = vld [vmem:[%s21291_s9 + $0x18] sm:$0xff]  ;;  %v13920_v12 = vld [vmem:[%s21291_s9 + $0x20] sm:$0xff] }
 0x7ec   : > { %v6000_v15 = vadd.f32 %v5999_v60, %v5966_v13  ;;  %v5941_v59 = vpop.f32.mrf.mxu1  ;;  %v5977_v2 = vpop.f32.mrf.mxu2  ;;  %v5740_v60 = vadd.f32 %v17602_v61, %v17636_v20 }
 0x7ed   : > { %v5912_v25 = vpop.f32.mrf.mxu3 }
 0x7ee   : > { %v6031_v28 = vmul.f32 0.2, %v6000_v15  ;;  %vm6021_vm11 = vcmp.ge.f32.partialorder %v6000_v15, 0.0  ;;  %v5774_v48 = vadd.f32 %v17653_v55, %v5740_v60  ;;  %v5913_v20 = vadd.f32 %v5912_v25, %v17677_v29  ;;  %v13938_v25 = vld [vmem:[%s21292_s10 + $0x44] sm:$0xf0] }
 0x7f0   : > { %v6041_v1 = vsel %vm6021_vm11, %v6000_v15, %v6031_v28  ;;  %v5745_v15 = vadd.f32 %v17602_v61, %v17646_v16  ;;  %v5808_v53 = vadd.f32 %v17651_v23, %v5774_v48  ;;  %v5908_v16 = vadd.f32 %v5907_v33, %v17673_v17  ;;  %v11973_v48 = vld [vmem:[%s21292_s10 + $0x40] sm:$0xf] }
 0x7f1   : > { %v17703_v30 = vmul.f32 1.4142135, %v6041_v1 }
 0x7f2   : > { %v5779_v32 = vadd.f32 %v17665_v42, %v5745_v15  ;;  %v5842_v62 = vadd.f32 %v17656_v38, %v5808_v53  ;;  %v5942_v1 = vadd.f32 %v5941_v59, %v5908_v16  ;;  %v11974_v15 = vor.u32 %v13938_v25, %v11973_v48  ;;  %v11965_v53 = vld [vmem:[%s21292_s10 + $0x30] sm:$0xf]  ;;  %v12053_v16 = vld [vmem:[%s21292_s10 + $0xe0] sm:$0xf] }
 0x7f3   : > { %v6001_v52 = vpop.f32.mrf.mxu0 }
 0x7f4   : > { %v6002_v11 = vadd.f32 %v6001_v52, %v5968_v41  ;;  %v5943_v18 = vpop.f32.mrf.mxu1  ;;  %v5980_v41 = vpop.f32.mrf.mxu2  ;;  %v5813_v28 = vadd.f32 %v17660_v3, %v5779_v32  ;;  %v5876_v52 = vadd.f32 %v17675_v37, %v5842_v62  ;;  %v5976_v44 = vadd.f32 %v5975_v40, %v5942_v1  ;;  %v13936_v32 = vld [vmem:[%s21292_s10 + $0x34] sm:$0xf0]  ;;  %v12045_v1 = vld [vmem:[%s21292_s10 + $0xd0] sm:$0xf] }
 0x7f5   : > { %v5914_v34 = vpop.f32.mrf.mxu3  ;;  %v13923_v62 = vld [vmem:[%s21291_s9 + $0x38] sm:$0xff] }
 0x7f6   : > { %vm6022_vm12 = vcmp.ge.f32.partialorder %v6002_v11, 0.0  ;;  %v6032_v13 = vmul.f32 0.2, %v6002_v11  ;;  %v5847_v55 = vadd.f32 %v17667_v47, %v5813_v28 }
 0x7f8   : > { %v6042_v31 = vsel %vm6022_vm12, %v6002_v11, %v6032_v13  ;;  %v5910_v11 = vadd.f32 %v5909_v4, %v5876_v52  ;;  %v5881_v61 = vadd.f32 %v17682_v14, %v5847_v55  ;;  %v12061_v52 = vld [vmem:[%s21292_s10 + $0xf0] sm:$0xf] }
 0x7f9   : > { %v17705_v6 = vmul.f32 1.4142135, %v6042_v31 }
 0x7fa   : > { %v5944_v43 = vadd.f32 %v5943_v18, %v5910_v11  ;;  %v5915_v49 = vadd.f32 %v5914_v34, %v5881_v61  ;;  %v13942_v18 = vld [vmem:[%s21292_s10 + $0x64] sm:$0xf0]  ;;  %v11949_v11 = vld [vmem:[%s21292_s10 + $0x10] sm:$0xf]  ;;  %v13932_v34 = vld [vmem:[%s21292_s10 + $0x14] sm:$0xf0] }
 0x7fb   : > { %v6004_v46 = vpop.f32.mrf.mxu0  ;;  %v6060_v0 = vpack.c.bf16 %v17705_v6, %v17703_v30  ;;  %v13918_v30 = vld [vmem:[%s21291_s9 + $0x10] sm:$0xff]  ;;  %v11950_v61 = vor.u32 %v13932_v34, %v11949_v11  ;;  %v13964_v11 = vld [vmem:[%s21292_s10 + $0x114] sm:$0xf0]  ;;  %v12181_v34 = vld [vmem:[%s21292_s10 + $0x1e0] sm:$0xf] }
 0x7fc   : > { %v6005_v9 = vadd.f32 %v6004_v46, %v5971_v24  ;;  %v5946_v5 = vpop.f32.mrf.mxu1  ;;  %v5978_v13 = vadd.f32 %v5977_v2, %v5944_v43  ;;  %v5982_v37 = vpop.f32.mrf.mxu2  ;;  %v11997_v6 = vld [vmem:[%s21292_s10 + $0x70] sm:$0xf] }
 0x7fd   : > { %v5947_v23 = vadd.f32 %v5946_v5, %v5913_v20  ;;  %v11957_v5 = vld [vmem:[%s21292_s10 + $0x20] sm:$0xf]  ;;  %v13960_v20 = vld [vmem:[%s21292_s10 + $0xf4] sm:$0xf0] }
 0x7fe   : > { %v6033_v54 = vmul.f32 0.2, %v6005_v9  ;;  %vm6023_vm13 = vcmp.ge.f32.partialorder %v6005_v9, 0.0  ;;  %v12062_v55 = vor.u32 %v13960_v20, %v12061_v52  ;;  %v13992_v52 = vld [vmem:[%s21292_s10 + $0x1f4] sm:$0xf0] }
 0x7ff   : > { %v5981_v38 = vadd.f32 %v5980_v41, %v5947_v23  ;;  %v13934_v41 = vld [vmem:[%s21292_s10 + $0x24] sm:$0xf0]  ;;  %v12077_v20 = vld [vmem:[%s21292_s10 + $0x110] sm:$0xf] }
 0x800   : > { %v6043_v27 = vsel %vm6023_vm13, %v6005_v9, %v6033_v54  ;;  %v11958_v28 = vor.u32 %v13934_v41, %v11957_v5  ;;  %7285 = vmatpush.bf16.msrb.mxu2 %v12062_v55  ;;  %v13958_v23 = vld [vmem:[%s21292_s10 + $0xe4] sm:$0xf0]  ;;  %v13926_v5 = vld [vmem:[%s21291_s9 + $0x50] sm:$0xff]  ;;  %vm7771_vm13 = vsmask.f32 4352 }
 0x801   : > { %v6053_v63 = vmul.f32 1.4142135, %v6043_v27  ;;  %v13916_v27 = vld [vmem:[%s21291_s9] sm:$0xff]  ;;  %v12054_v43 = vor.u32 %v13958_v23, %v12053_v16  ;;  %v12078_v23 = vor.u32 %v13964_v11, %v12077_v20  ;;  %v14000_v20 = vld [vmem:[%s21292_s10 + $0x234] sm:$0xf0] }
 0x803   : > { %v6006_v50 = vpop.f32.mrf.mxu0 }
 0x804   : > { %v6007_v39 = vadd.f32 %v6006_v50, %v5973_v56  ;;  %v5948_v57 = vpop.f32.mrf.mxu1  ;;  %7286 = vmatpush.bf16.msrb.mxu2 %v12054_v43  ;;  %v13962_v43 = vld [vmem:[%s21292_s10 + $0x104] sm:$0xf0] }
 0x805   : > { %v5949_v29 = vadd.f32 %v5948_v57, %v5915_v49  ;;  %v13924_v57 = vld [vmem:[%s21291_s9 + $0x40] sm:$0xff] }
 0x806   : > { %vm6024_vm15 = vcmp.ge.f32.partialorder %v6007_v39, 0.0  ;;  %v6034_v45 = vmul.f32 0.2, %v6007_v39 }
 0x807   : > { %v5983_v47 = vadd.f32 %v5982_v37, %v5949_v29  ;;  %v12037_v37 = vld [vmem:[%s21292_s10 + $0xc0] sm:$0xf] }
 0x808   : > { %v6044_v58 = vsel %vm6024_vm15, %v6007_v39, %v6034_v45  ;;  %v13917_v45 = vld [vmem:[%s21291_s9 + $0x8] sm:$0xff]  ;;  %vm21336_vm15 = vcmask 1045504  }
 0x809   : > { %v6054_v35 = vmul.f32 1.4142135, %v6044_v58 }
 0x80b   : > { %v6009_v21 = vpop.f32.mrf.mxu0  ;;  %v6061_v10 = vpack.c.bf16 %v6054_v35, %v6053_v63  ;;  %v13922_v63 = vld [vmem:[%s21291_s9 + $0x30] sm:$0xff]  ;;  %v11989_v35 = vld [vmem:[%s21292_s10 + $0x60] sm:$0xf] }
 0x80c   : > { %v6010_v8 = vadd.f32 %v6009_v21, %v5976_v44  ;;  %v11990_v2 = vor.u32 %v13942_v18, %v11989_v35  ;;  %v11981_v21 = vld [vmem:[%s21292_s10 + $0x50] sm:$0xf]  ;;  %v13954_v44 = vld [vmem:[%s21292_s10 + $0xc4] sm:$0xf0]  ;;  %v12101_v35 = vld [vmem:[%s21292_s10 + $0x140] sm:$0xf] }
 0x80d   : > { %v12038_v29 = vor.u32 %v13954_v44, %v12037_v37  ;;  %v13970_v18 = vld [vmem:[%s21292_s10 + $0x144] sm:$0xf0]  ;;  %v12173_v44 = vld [vmem:[%s21292_s10 + $0x1d0] sm:$0xf] }
 0x80e   : > { %v6035_v33 = vmul.f32 0.2, %v6010_v8  ;;  %vm6025_vm1 = vcmp.ge.f32.partialorder %v6010_v8, 0.0 }
 0x810   : > { %v6045_v40 = vsel %vm6025_vm1, %v6010_v8, %v6035_v33  ;;  %v12125_v33 = vld [vmem:[%s21292_s10 + $0x170] sm:$0xf] }
 0x811   : > { %v6055_v39 = vmul.f32 1.4142135, %v6045_v40 }
 0x813   : > { %v6011_v7 = vpop.f32.mrf.mxu0 }
 0x814   : > { %v6012_v31 = vadd.f32 %v6011_v7, %v5978_v13  ;;  %v11966_v7 = vor.u32 %v13936_v32, %v11965_v53  ;;  %v13956_v13 = vld [vmem:[%s21292_s10 + $0xd4] sm:$0xf0]  ;;  %v13966_v53 = vld [vmem:[%s21292_s10 + $0x124] sm:$0xf0] }
 0x816   : > { %v6036_v46 = vmul.f32 0.2, %v6012_v31  ;;  %vm6026_vm10 = vcmp.ge.f32.partialorder %v6012_v31, 0.0 }
 0x818   : > { %v6046_v59 = vsel %vm6026_vm10, %v6012_v31, %v6036_v46  ;;  %v12029_v31 = vld [vmem:[%s21292_s10 + $0xb0] sm:$0xf]  ;;  %v13950_v46 = vld [vmem:[%s21292_s10 + $0xa4] sm:$0xf0]  ;;  %vm21338_vm10 = vsmask.f32 5376 }
 0x819   : > { %v6056_v50 = vmul.f32 1.4142135, %v6046_v59  ;;  %v13974_v59 = vld [vmem:[%s21292_s10 + $0x164] sm:$0xf0] }
 0x81b   : > { %v6014_v42 = vpop.f32.mrf.mxu0  ;;  %v6062_v4 = vpack.c.bf16 %v6056_v50, %v6055_v39 }
 0x81c   : > { %v6015_v3 = vadd.f32 %v6014_v42, %v5981_v38  ;;  %v11941_v42 = vld [vmem:[%s21292_s10] sm:$0xf]  ;;  %v13930_v38 = vld [vmem:[%s21292_s10 + $0x4] sm:$0xf0] }
 0x81d   : > { %v11942_v49 = vor.u32 %v13930_v38, %v11941_v42  ;;  %v12069_v42 = vld [vmem:[%s21292_s10 + $0x100] sm:$0xf] }
 0x81e   : > { %v6037_v51 = vmul.f32 0.2, %v6015_v3  ;;  %vm6027_vm4 = vcmp.ge.f32.partialorder %v6015_v3, 0.0 }
 0x820   : > { %v6047_v24 = vsel %vm6027_vm4, %v6015_v3, %v6037_v51  ;;  %v12046_v3 = vor.u32 %v13956_v13, %v12045_v1  ;;  %v12070_v13 = vor.u32 %v13962_v43, %v12069_v42  ;;  %vm21337_vm4 = vmmov %vm21336_vm15 }
 0x821   : > { %v6057_v22 = vmul.f32 1.4142135, %v6047_v24  ;;  %v13976_v24 = vld [vmem:[%s21292_s10 + $0x174] sm:$0xf0] }
 0x822   : > { %7287 = vmatpush.bf16.msrb.mxu2 %v12046_v3 }
 0x823   : > { %v6016_v14 = vpop.f32.mrf.mxu0 }
 0x824   : > { %v6017_v17 = vadd.f32 %v6016_v14, %v5983_v47  ;;  %v13952_v47 = vld [vmem:[%s21292_s10 + $0xb4] sm:$0xf0]  ;;  %v12021_v14 = vld [vmem:[%s21292_s10 + $0xa0] sm:$0xf] }
 0x825   : > { %v12030_v8 = vor.u32 %v13952_v47, %v12029_v31  ;;  %v12165_v31 = vld [vmem:[%s21292_s10 + $0x1c0] sm:$0xf] }
 0x826   : > { %vm6028_vm14 = vcmp.ge.f32.partialorder %v6017_v17, 0.0  ;;  %v6038_v26 = vmul.f32 0.2, %v6017_v17  ;;  %7288 = vmatpush.bf16.msrb.mxu2 %v12038_v29  ;;  %v13988_v29 = vld [vmem:[%s21292_s10 + $0x1d4] sm:$0xf0] }
 0x827   : > { %v12174_v47 = vor.u32 %v13988_v29, %v12173_v44  ;;  %v14024_v44 = vld [vmem:[%s21292_s10 + $0x2f4] sm:$0xf0]  ;;  %v12197_v29 = vld [vmem:[%s21292_s10 + $0x200] sm:$0xf] }
 0x828   : > { %v6048_v9 = vsel %vm6028_vm14, %v6017_v17, %v6038_v26  ;;  %v12022_v17 = vor.u32 %v13950_v46, %v12021_v14  ;;  %v12117_v26 = vld [vmem:[%s21292_s10 + $0x160] sm:$0xf]  ;;  %v13927_v46 = vld [vmem:[%s21291_s9 + $0x58] sm:$0xff]  ;;  %vm21339_vm14 = vmmov %vm21338_vm10 }
 0x829   : > { %v6058_v56 = vmul.f32 1.4142135, %v6048_v9  ;;  %v12126_v9 = vor.u32 %v13976_v24, %v12125_v33  ;;  %v12118_v39 = vor.u32 %v13974_v59, %v12117_v26  ;;  %v13984_v33 = vld [vmem:[%s21292_s10 + $0x1b4] sm:$0xf0]  ;;  %v13982_v59 = vld [vmem:[%s21292_s10 + $0x1a4] sm:$0xf0] }
 0x82a   : > { %7289 = vmatpush.bf16.msrb.mxu2 %v12030_v8  ;;  %v13986_v8 = vld [vmem:[%s21292_s10 + $0x1c4] sm:$0xf0] }
 0x82b   : > { %v6063_v54 = vpack.c.bf16 %v6058_v56, %v6057_v22  ;;  %v12013_v22 = vld [vmem:[%s21292_s10 + $0x90] sm:$0xf]  ;;  %v13948_v56 = vld [vmem:[%s21292_s10 + $0x94] sm:$0xf0]  ;;  %v12166_v14 = vor.u32 %v13986_v8, %v12165_v31  ;;  %v13994_v31 = vld [vmem:[%s21292_s10 + $0x204] sm:$0xf0] }
 0x82d   : > { %6205 = vmatpush.bf16.msrb.mxu3 %v6063_v54  ;;  %v12014_v54 = vor.u32 %v13948_v56, %v12013_v22 }
 0x82e   : > { %7290 = vmatpush.bf16.msrb.mxu2 %v12022_v17  ;;  %v12157_v17 = vld [vmem:[%s21292_s10 + $0x1b0] sm:$0xf] }
 0x82f   : > { %v12158_v24 = vor.u32 %v13984_v33, %v12157_v17  ;;  %v12198_v33 = vor.u32 %v13994_v31, %v12197_v29  ;;  %v12341_v31 = vld [vmem:[%s21292_s10 + $0x320] sm:$0xf] }
 0x831   : > { %6206 = vmatpush.bf16.msrb.mxu3 %v6062_v4 }
 0x832   : > { %7291 = vmatpush.bf16.msrb.mxu2 %v12014_v54 }
 0x835   : > { %6207 = vmatpush.bf16.msrb.mxu3 %v6061_v10  ;;  %v13940_v10 = vld [vmem:[%s21292_s10 + $0x54] sm:$0xf0] }
 0x836   : > { %v11982_v60 = vor.u32 %v13940_v10, %v11981_v21  ;;  %v12102_v21 = vor.u32 %v13970_v18, %v12101_v35  ;;  %v12093_v10 = vld [vmem:[%s21292_s10 + $0x130] sm:$0xf] }
 0x839   : > { %6208 = vmatpush.bf16.msrb.mxu3 %v6060_v0  ;;  %v13944_v0 = vld [vmem:[%s21292_s10 + $0x74] sm:$0xf0] }
 0x83a   : > { %v11998_v58 = vor.u32 %v13944_v0, %v11997_v6  ;;  %v12109_v0 = vld [vmem:[%s21292_s10 + $0x150] sm:$0xf] }
 0x83c   : > { %7267 = vmatpush.bf16.msrb.mxu1 %v11998_v58  ;;  %v13972_v58 = vld [vmem:[%s21292_s10 + $0x154] sm:$0xf0] }
 0x83d   : > { %6209 = vmatpush.bf16.msrb.mxu3 %v6059_v19  ;;  %v13921_v19 = vld [vmem:[%s21291_s9 + $0x28] sm:$0xff] }
 0x840   : > { %11925 = vmatmul.msk.bf16.vlgmr.msrb.gmra.mxu3 %vm6159_vm3, %v13916_v27  ;;  %7268 = vmatpush.bf16.msrb.mxu1 %v11990_v2  ;;  %v13925_v27 = vld [vmem:[%s21291_s9 + $0x48] sm:$0xff] }
 0x844   : > { %7269 = vmatpush.bf16.msrb.mxu1 %v11982_v60  ;;  %v13968_v60 = vld [vmem:[%s21292_s10 + $0x134] sm:$0xf0] }
 0x845   : > { %v12094_v48 = vor.u32 %v13968_v60, %v12093_v10 }
 0x848   : > { %7270 = vmatpush.bf16.msrb.mxu1 %v11974_v15  ;;  %v12085_v15 = vld [vmem:[%s21292_s10 + $0x120] sm:$0xf] }
 0x84c   : > { %7271 = vmatpush.bf16.msrb.mxu1 %v11966_v7  ;;  %v12086_v7 = vor.u32 %v13966_v53, %v12085_v15  ;;  %v14004_v15 = vld [vmem:[%s21292_s10 + $0x254] sm:$0xf0] }
 0x850   : > { %11926 = vmatmul.msk.bf16.gmra.mxu3 %vm6159_vm3, %v13917_v45  ;;  %7272 = vmatpush.bf16.msrb.mxu1 %v11958_v28  ;;  %v12005_v45 = vld [vmem:[%s21292_s10 + $0x80] sm:$0xf]  ;;  %v12189_v28 = vld [vmem:[%s21292_s10 + $0x1f0] sm:$0xf] }
 0x851   : > { %v12190_v55 = vor.u32 %v13992_v52, %v12189_v28  ;;  %v6090_v28 = vld [vmem:[%s21291_s9 + $0x68] sm:$0xf]  ;;  %v12221_v52 = vld [vmem:[%s21292_s10 + $0x230] sm:$0xf] }
 0x852   : > { %v6144_v11 = vunpack.c.l.b16 %v6090_v28 }
 0x854   : > { %7273 = vmatpush.bf16.msrb.mxu1 %v11950_v61  ;;  %v13990_v61 = vld [vmem:[%s21292_s10 + $0x1e4] sm:$0xf0]  ;;  %v6158_v43 = vpack.c.b16 %v6144_v11, %v6144_v11 }
 0x858   : > { %7274 = vmatpush.bf16.msrb.mxu1 %v11942_v49  ;;  %v12182_v49 = vor.u32 %v13990_v61, %v12181_v34  ;;  %v12222_v34 = vor.u32 %v14000_v20, %v12221_v52  ;;  %v12213_v61 = vld [vmem:[%s21292_s10 + $0x220] sm:$0xf] }
 0x85c   : > { %7303 = vmatpush.bf16.msra.mxu1 %v12126_v9  ;;  %v12149_v9 = vld [vmem:[%s21292_s10 + $0x1a0] sm:$0xf] }
 0x85d   : > { %v12150_v56 = vor.u32 %v13982_v59, %v12149_v9 }
 0x860   : > { %11927 = vmatmul.msk.bf16.gmra.mxu3 %vm6159_vm3, %v13918_v30  ;;  %v13946_v30 = vld [vmem:[%s21292_s10 + $0x84] sm:$0xf0]  ;;  %7304 = vmatpush.bf16.msra.mxu1 %v12118_v39  ;;  %v13980_v39 = vld [vmem:[%s21292_s10 + $0x194] sm:$0xf0] }
 0x870   : > { %11928 = vmatmul.msk.bf16.gmra.mxu3 %vm6159_vm3, %v13919_v36  ;;  %v12006_v36 = vor.u32 %v13946_v30, %v12005_v45  ;;  %v14008_v45 = vld [vmem:[%s21292_s10 + $0x274] sm:$0xf0]  ;;  %v12133_v30 = vld [vmem:[%s21292_s10 + $0x180] sm:$0xf] }
 0x872   : > { %7292 = vmatpush.bf16.msrb.mxu2 %v12006_v36  ;;  %v13978_v36 = vld [vmem:[%s21292_s10 + $0x184] sm:$0xf0] }
 0x873   : > { %v12134_v35 = vor.u32 %v13978_v36, %v12133_v30  ;;  %v14016_v30 = vld [vmem:[%s21292_s10 + $0x2b4] sm:$0xf0] }
 0x876   : > { %7321 = vmatpush.bf16.msra.mxu2 %v12190_v55 }
 0x87a   : > { %7322 = vmatpush.bf16.msra.mxu2 %v12182_v49 }
 0x87e   : > { %7323 = vmatpush.bf16.msra.mxu2 %v12174_v47 }
 0x880   : > { %11929 = vmatmul.msk.bf16.gmra.mxu3 %vm6159_vm3, %v13920_v12 }
 0x882   : > { %7324 = vmatpush.bf16.msra.mxu2 %v12166_v14  ;;  %v14022_v14 = vld [vmem:[%s21292_s10 + $0x2e4] sm:$0xf0] }
 0x886   : > { %7325 = vmatpush.bf16.msra.mxu2 %v12158_v24 }
 0x88a   : > { %7326 = vmatpush.bf16.msra.mxu2 %v12150_v56  ;;  %v14020_v56 = vld [vmem:[%s21292_s10 + $0x2d4] sm:$0xf0] }
 0x890   : > { %11930 = vmatmul.msk.bf16.gmra.mxu3 %vm6159_vm3, %v13921_v19 }
 0x8a0   : > { %11931 = vmatmul.msk.bf16.gmra.mxu3 %vm6159_vm3, %v13922_v63  ;;  %v12110_v63 = vor.u32 %v13972_v58, %v12109_v0  ;;  %v12245_v0 = vld [vmem:[%s21292_s10 + $0x260] sm:$0xf]  ;;  %v14006_v58 = vld [vmem:[%s21292_s10 + $0x264] sm:$0xf0] }
 0x8a2   : > { %7305 = vmatpush.bf16.msra.mxu1 %v12110_v63 }
 0x8a6   : > { %7306 = vmatpush.bf16.msra.mxu1 %v12102_v21  ;;  %v12246_v21 = vor.u32 %v14006_v58, %v12245_v0  ;;  %v14014_v0 = vld [vmem:[%s21292_s10 + $0x2a4] sm:$0xf0] }
 0x8aa   : > { %7307 = vmatpush.bf16.msra.mxu1 %v12094_v48 }
 0x8ae   : > { %7308 = vmatpush.bf16.msra.mxu1 %v12086_v7  ;;  %v14002_v7 = vld [vmem:[%s21292_s10 + $0x244] sm:$0xf0] }
 0x8b0   : > { %11932 = vmatmul.msk.bf16.gmra.mxu3 %vm6159_vm3, %v13923_v62 }
 0x8b2   : > { %7309 = vmatpush.bf16.msra.mxu1 %v12078_v23 }
 0x8b6   : > { %7310 = vmatpush.bf16.msra.mxu1 %v12070_v13  ;;  %v13996_v13 = vld [vmem:[%s21292_s10 + $0x214] sm:$0xf0] }
 0x8c0   : > { %11933 = vmatmul.msk.bf16.gmra.mxu3 %vm6159_vm3, %v13924_v57 }
 0x8c3   : > { %v6211_v51 = vpop.f32.mrf.mxu3 }
 0x8c4   : > { %v6280_v40 = vpack.c.bf16 %v6211_v51, %v6211_v51 }
 0x8c6   : > { %v6310_v12 = vunpack.c.l.b16 %v6280_v40 }
 0x8cb   : > { %v6213_v50 = vpop.f32.mrf.mxu3 }
 0x8cc   : > { %v6281_v4 = vpack.c.bf16 %v6213_v50, %v6213_v50  ;;  %v12141_v50 = vld [vmem:[%s21292_s10 + $0x190] sm:$0xf] }
 0x8ce   : > { %v6311_v19 = vunpack.c.l.b16 %v6281_v4  ;;  %v12253_v4 = vld [vmem:[%s21292_s10 + $0x270] sm:$0xf] }
 0x8d0   : > { %v17877_v6 = vpack.c.b16 %v6311_v19, %v6310_v12  ;;  %11934 = vmatmul.msk.bf16.gmra.mxu3 %vm6159_vm3, %v13925_v27  ;;  %v12142_v27 = vor.u32 %v13980_v39, %v12141_v50  ;;  %v12254_v19 = vor.u32 %v14008_v45, %v12253_v4  ;;  %v12293_v50 = vld [vmem:[%s21292_s10 + $0x2c0] sm:$0xf]  ;;  %v14018_v39 = vld [vmem:[%s21292_s10 + $0x2c4] sm:$0xf0]  ;;  %v12285_v45 = vld [vmem:[%s21292_s10 + $0x2b0] sm:$0xf] }
 0x8d2   : > { %7275 = vmatmul.bf16.vlgmr.msrb.gmra.mxu1 %v17877_v6  ;;  %7327 = vmatpush.bf16.msra.mxu2 %v12142_v27  ;;  %v12294_v27 = vor.u32 %v14018_v39, %v12293_v50  ;;  %v12437_v39 = vld [vmem:[%s21292_s10 + $0x3e0] sm:$0xf] }
 0x8d3   : > { %v6216_v2 = vpop.f32.mrf.mxu3  ;;  %7339 = vmatpush.bf16.msrb.mxu0 %v12254_v19  ;;  %v12277_v19 = vld [vmem:[%s21292_s10 + $0x2a0] sm:$0xf] }
 0x8d4   : > { %v6282_v25 = vpack.c.bf16 %v6216_v2, %v6216_v2  ;;  %v13928_v2 = vld [vmem:[%s21291_s9 + $0x60] sm:$0xff] }
 0x8d6   : > { %v6312_v62 = vunpack.c.l.b16 %v6282_v25  ;;  %7328 = vmatpush.bf16.msra.mxu2 %v12134_v35  ;;  %v12237_v25 = vld [vmem:[%s21292_s10 + $0x250] sm:$0xf]  ;;  %v12278_v35 = vor.u32 %v14014_v0, %v12277_v19 }
 0x8d7   : > { %7340 = vmatpush.bf16.msrb.mxu0 %v12246_v21  ;;  %v12238_v53 = vor.u32 %v14004_v15, %v12237_v25  ;;  %v14012_v21 = vld [vmem:[%s21292_s10 + $0x294] sm:$0xf0]  ;;  %v12261_v15 = vld [vmem:[%s21292_s10 + $0x280] sm:$0xf] }
 0x8d8   : > { %v17908_v41 = vpack.c.b16 %v6312_v62, %v6312_v62  ;;  %v14040_v25 = vld [vmem:[%s21292_s10 + $0x374] sm:$0xf0] }
 0x8db   : > { %v6218_v32 = vpop.f32.mrf.mxu3  ;;  %7341 = vmatpush.bf16.msrb.mxu0 %v12238_v53  ;;  %v14010_v53 = vld [vmem:[%s21292_s10 + $0x284] sm:$0xf0] }
 0x8dc   : > { %v6283_v16 = vpack.c.bf16 %v6218_v32, %v6218_v32  ;;  %v12229_v32 = vld [vmem:[%s21292_s10 + $0x240] sm:$0xf]  ;;  %v12262_v20 = vor.u32 %v14010_v53, %v12261_v15  ;;  %v13941_v15 = vld [vmem:[%s21292_s10 + $0x64] sm:$0xf]  ;;  %v11991_v53 = vld [vmem:[%s21292_s10 + $0x68] sm:$0xf0] }
 0x8de   : > { %v6320_v3 = vunpack.c.l.b16 %v6283_v16  ;;  %v13998_v16 = vld [vmem:[%s21292_s10 + $0x224] sm:$0xf0] }
 0x8e0   : > { %11935 = vmatmul.msk.bf16.gmra.mxu3 %vm6159_vm3, %v13926_v5  ;;  %v12230_v5 = vor.u32 %v14002_v7, %v12229_v32 }
 0x8e2   : > { %7280 = vmatmul.bf16.gmra.mxu1 %v17908_v41  ;;  %7342 = vmatpush.bf16.msrb.mxu0 %v12230_v5  ;;  %v14038_v5 = vld [vmem:[%s21292_s10 + $0x364] sm:$0xf0] }
 0x8e3   : > { %v6221_v38 = vpop.f32.mrf.mxu3 }
 0x8e4   : > { %v6284_v1 = vpack.c.bf16 %v6221_v38, %v6221_v38  ;;  %v12214_v38 = vor.u32 %v13998_v16, %v12213_v61  ;;  %v12365_v16 = vld [vmem:[%s21292_s10 + $0x350] sm:$0xf] }
 0x8e6   : > { %v6321_v57 = vunpack.c.l.b16 %v6284_v1  ;;  %7343 = vmatpush.bf16.msrb.mxu0 %v12222_v34  ;;  %v12205_v1 = vld [vmem:[%s21292_s10 + $0x210] sm:$0xf] }
 0x8e8   : > { %v17936_v37 = vpack.c.b16 %v6321_v57, %v6320_v3  ;;  %v12317_v3 = vld [vmem:[%s21292_s10 + $0x2f0] sm:$0xf]  ;;  %v12206_v57 = vor.u32 %v13996_v13, %v12205_v1 }
 0x8e9   : > { %v12318_v8 = vor.u32 %v14024_v44, %v12317_v3  ;;  %v12349_v3 = vld [vmem:[%s21292_s10 + $0x330] sm:$0xf] }
 0x8ea   : > { %7293 = vmatmul.bf16.vlgmr.msrb.gmra.mxu2 %v17936_v37  ;;  %7344 = vmatpush.bf16.msrb.mxu0 %v12214_v38  ;;  %v14034_v38 = vld [vmem:[%s21292_s10 + $0x344] sm:$0xf0] }
 0x8eb   : > { %v6223_v51 = vpop.f32.mrf.mxu3  ;;  %7357 = vmatpush.bf16.msrb.mxu1 %v12318_v8 }
 0x8ec   : > { %v6285_v26 = vpack.c.bf16 %v6223_v51, %v6223_v51  ;;  %v12309_v51 = vld [vmem:[%s21292_s10 + $0x2e0] sm:$0xf] }
 0x8ed   : > { %v12310_v24 = vor.u32 %v14022_v14, %v12309_v51 }
 0x8ee   : > { %v6322_v40 = vunpack.c.l.b16 %v6285_v26  ;;  %7345 = vmatpush.bf16.msrb.mxu0 %v12206_v57  ;;  %v14032_v57 = vld [vmem:[%s21292_s10 + $0x334] sm:$0xf0] }
 0x8ef   : > { %7358 = vmatpush.bf16.msrb.mxu1 %v12310_v24  ;;  %v12350_v29 = vor.u32 %v14032_v57, %v12349_v3  ;;  %v12445_v24 = vld [vmem:[%s21292_s10 + $0x3f0] sm:$0xf] }
 0x8f0   : > { %11936 = vmatmul.msk.bf16.gmra.mxu3 %vm6159_vm3, %v13927_v46  ;;  %v17967_v54 = vpack.c.b16 %v6322_v40, %v6322_v40 }
 0x8f2   : > { %7346 = vmatpush.bf16.msrb.mxu0 %v12198_v33  ;;  %v14028_v33 = vld [vmem:[%s21292_s10 + $0x314] sm:$0xf0] }
 0x8f3   : > { %v6226_v22 = vpop.f32.mrf.mxu3 }
 0x8f4   : > { %v6286_v12 = vpack.c.bf16 %v6226_v22, %v6226_v22  ;;  %v12301_v22 = vld [vmem:[%s21292_s10 + $0x2d0] sm:$0xf] }
 0x8f5   : > { %v12302_v40 = vor.u32 %v14020_v56, %v12301_v22  ;;  %v12325_v22 = vld [vmem:[%s21292_s10 + $0x300] sm:$0xf]  ;;  %v14026_v56 = vld [vmem:[%s21292_s10 + $0x304] sm:$0xf0] }
 0x8f6   : > { %v6330_v10 = vunpack.c.l.b16 %v6286_v12  ;;  %v12286_v12 = vor.u32 %v14016_v30, %v12285_v45  ;;  %v12326_v30 = vor.u32 %v14026_v56, %v12325_v22  ;;  %v12389_v22 = vld [vmem:[%s21292_s10 + $0x380] sm:$0xf]  ;;  %v14042_v56 = vld [vmem:[%s21292_s10 + $0x384] sm:$0xf0] }
 0x8f7   : > { %7359 = vmatpush.bf16.msrb.mxu1 %v12302_v40 }
 0x8fa   : > { %7298 = vmatmul.bf16.gmra.mxu2 %v17967_v54 }
 0x8fb   : > { %v6228_v63 = vpop.f32.mrf.mxu3  ;;  %7360 = vmatpush.bf16.msrb.mxu1 %v12294_v27 }
 0x8fc   : > { %v6287_v18 = vpack.c.bf16 %v6228_v63, %v6228_v63 }
 0x8fe   : > { %v6331_v60 = vunpack.c.l.b16 %v6287_v18 }
 0x8ff   : > { %7361 = vmatpush.bf16.msrb.mxu1 %v12286_v12 }
 0x900   : > { %v17997_v48 = vpack.c.b16 %v6331_v60, %v6330_v10  ;;  %11937 = vmatmul.msk.bf16.gmra.mxu3 %vm6159_vm3, %v13928_v2  ;;  %v12269_v2 = vld [vmem:[%s21292_s10 + $0x290] sm:$0xf] }
 0x901   : > { %v12381_v10 = vld [vmem:[%s21292_s10 + $0x370] sm:$0xf]  ;;  %v12270_v60 = vor.u32 %v14012_v21, %v12269_v2  ;;  %v11999_v21 = vld [vmem:[%s21292_s10 + $0x78] sm:$0xf0] }
 0x902   : > { %7311 = vmatmul.bf16.vlgmr.msra.gmra.mxu1 %v17997_v48  ;;  %v12382_v7 = vor.u32 %v14040_v25, %v12381_v10  ;;  %v12421_v10 = vld [vmem:[%s21292_s10 + $0x3c0] sm:$0xf] }
 0x903   : > { %v6231_v62 = vpop.f32.mrf.mxu3  ;;  %7362 = vmatpush.bf16.msrb.mxu1 %v12278_v35  ;;  %v13943_v35 = vld [vmem:[%s21292_s10 + $0x74] sm:$0xf] }
 0x904   : > { %v6288_v55 = vpack.c.bf16 %v6231_v62, %v6231_v62  ;;  %v12373_v62 = vld [vmem:[%s21292_s10 + $0x360] sm:$0xf]  ;;  %7375 = vmatpush.bf16.msrb.mxu2 %v12382_v7  ;;  %v12002_v25 = vor.u32 %v13943_v35, %v11999_v21  ;;  %v12493_v21 = vld [vmem:[%s21292_s10 + $0x450] sm:$0xf] }
 0x906   : > { %v6332_v42 = vunpack.c.l.b16 %v6288_v55  ;;  %v12374_v55 = vor.u32 %v14038_v5, %v12373_v62  ;;  %v11994_v62 = vor.u32 %v13941_v15, %v11991_v53  ;;  %v12413_v5 = vld [vmem:[%s21292_s10 + $0x3b0] sm:$0xf]  ;;  %v11951_v15 = vld [vmem:[%s21292_s10 + $0x18] sm:$0xf0]  ;;  %v13959_v53 = vld [vmem:[%s21292_s10 + $0xf4] sm:$0xf] }
 0x907   : > { %7363 = vmatpush.bf16.msrb.mxu1 %v12270_v60  ;;  %v14050_v60 = vld [vmem:[%s21292_s10 + $0x3c4] sm:$0xf0] }
 0x908   : > { %v18028_v49 = vpack.c.b16 %v6332_v42, %v6332_v42  ;;  %7376 = vmatpush.bf16.msrb.mxu2 %v12374_v55  ;;  %v12422_v7 = vor.u32 %v14050_v60, %v12421_v10  ;;  %v11983_v55 = vld [vmem:[%s21292_s10 + $0x58] sm:$0xf0]  ;;  %v14068_v10 = vld [vmem:[%s21292_s10 + $0x454] sm:$0xf0]  ;;  %v13931_v60 = vld [vmem:[%s21292_s10 + $0x14] sm:$0xf] }
 0x90b   : > { %v6233_v23 = vpop.f32.mrf.mxu3  ;;  %7364 = vmatpush.bf16.msrb.mxu1 %v12262_v20 }
 0x90c   : > { %v6289_v47 = vpack.c.bf16 %v6233_v23, %v6233_v23  ;;  %v14036_v23 = vld [vmem:[%s21292_s10 + $0x354] sm:$0xf0] }
 0x90d   : > { %v12366_v42 = vor.u32 %v14036_v23, %v12365_v16  ;;  %v12405_v23 = vld [vmem:[%s21292_s10 + $0x3a0] sm:$0xf] }
 0x90e   : > { %v6340_v26 = vunpack.c.l.b16 %v6289_v47  ;;  %v14030_v47 = vld [vmem:[%s21292_s10 + $0x324] sm:$0xf0] }
 0x90f   : > { %7377 = vmatpush.bf16.msrb.mxu2 %v12366_v42  ;;  %v12342_v14 = vor.u32 %v14030_v47, %v12341_v31  ;;  %v14046_v42 = vld [vmem:[%s21292_s10 + $0x3a4] sm:$0xf0]  ;;  %v12397_v31 = vld [vmem:[%s21292_s10 + $0x390] sm:$0xf]  ;;  %v14044_v47 = vld [vmem:[%s21292_s10 + $0x394] sm:$0xf0] }
 0x910   : > { %11938 = vmatmul.msk.bf16.gmra.mxu3 %vm6159_vm3, %v6158_v43  ;;  %v12357_v43 = vld [vmem:[%s21292_s10 + $0x340] sm:$0xf]  ;;  %v12406_v3 = vor.u32 %v14046_v42, %v12405_v23 }
 0x911   : > { %v12358_v13 = vor.u32 %v14034_v38, %v12357_v43  ;;  %v13937_v43 = vld [vmem:[%s21292_s10 + $0x44] sm:$0xf]  ;;  %v11975_v38 = vld [vmem:[%s21292_s10 + $0x48] sm:$0xf0] }
 0x912   : > { %7316 = vmatmul.bf16.gmra.mxu1 %v18028_v49  ;;  %v11978_v57 = vor.u32 %v13937_v43, %v11975_v38 }
 0x913   : > { %v6236_v46 = vpop.f32.mrf.mxu3  ;;  %7378 = vmatpush.bf16.msrb.mxu2 %v12358_v13 }
 0x914   : > { %v6290_v17 = vpack.c.bf16 %v6236_v46, %v6236_v46 }
 0x916   : > { %v6341_v9 = vunpack.c.l.b16 %v6290_v17  ;;  %v12333_v17 = vld [vmem:[%s21292_s10 + $0x310] sm:$0xf] }
 0x917   : > { %7379 = vmatpush.bf16.msrb.mxu2 %v12350_v29 }
 0x918   : > { %v18056_v59 = vpack.c.b16 %v6341_v9, %v6340_v26  ;;  %v12334_v26 = vor.u32 %v14028_v33, %v12333_v17  ;;  %v14056_v9 = vld [vmem:[%s21292_s10 + $0x3f4] sm:$0xf0]  ;;  %v13935_v17 = vld [vmem:[%s21292_s10 + $0x34] sm:$0xf]  ;;  %v11967_v33 = vld [vmem:[%s21292_s10 + $0x38] sm:$0xf0] }
 0x919   : > { %v12446_v50 = vor.u32 %v14056_v9, %v12445_v24  ;;  %v11970_v9 = vor.u32 %v13935_v17, %v11967_v33 }
 0x91a   : > { %7329 = vmatmul.bf16.vlgmr.msra.gmra.mxu2 %v18056_v59 }
 0x91b   : > { %v6238_v4 = vpop.f32.mrf.mxu3  ;;  %7380 = vmatpush.bf16.msrb.mxu2 %v12342_v14  ;;  %7393 = vmatpush.bf16.msra.mxu0 %v12446_v50  ;;  %v14072_v14 = vld [vmem:[%s21292_s10 + $0x474] sm:$0xf0] }
 0x91c   : > { %v6291_v36 = vpack.c.bf16 %v6238_v4, %v6238_v4  ;;  %v14054_v4 = vld [vmem:[%s21292_s10 + $0x3e4] sm:$0xf0] }
 0x91e   : > { %v6342_v63 = vunpack.c.l.b16 %v6291_v36  ;;  %v12438_v36 = vor.u32 %v14054_v4, %v12437_v39  ;;  %v14070_v39 = vld [vmem:[%s21292_s10 + $0x464] sm:$0xf0]  ;;  %v13933_v4 = vld [vmem:[%s21292_s10 + $0x24] sm:$0xf] }
 0x91f   : > { %7381 = vmatpush.bf16.msrb.mxu2 %v12334_v26 }
 0x920   : > { %v18083_v18 = vpack.c.b16 %v6342_v63, %v6342_v63  ;;  %7394 = vmatpush.bf16.msra.mxu0 %v12438_v36  ;;  %v14052_v63 = vld [vmem:[%s21292_s10 + $0x3d4] sm:$0xf0] }
 0x923   : > { %v6241_v58 = vpop.f32.mrf.mxu3  ;;  %7382 = vmatpush.bf16.msrb.mxu2 %v12326_v30  ;;  %v12390_v30 = vor.u32 %v14042_v56, %v12389_v22  ;;  %v12039_v22 = vld [vmem:[%s21292_s10 + $0xc8] sm:$0xf0]  ;;  %v13989_v56 = vld [vmem:[%s21292_s10 + $0x1e4] sm:$0xf] }
 0x924   : > { %v6292_v32 = vpack.c.bf16 %v6241_v58, %v6241_v58  ;;  %v12429_v58 = vld [vmem:[%s21292_s10 + $0x3d0] sm:$0xf] }
 0x925   : > { %v12430_v2 = vor.u32 %v14052_v63, %v12429_v58 }
 0x926   : > { %v6350_v11 = vunpack.c.l.b16 %v6292_v32 }
 0x927   : > { %7395 = vmatpush.bf16.msra.mxu0 %v12430_v2  ;;  %7429 = vmatpush.bf16.msra.mxu2 %v12002_v25  ;;  %v18265_v2 = vld [vmem:[%s21293_s11] sm:$0x3]  ;;  %v12494_v25 = vor.u32 %v14068_v10, %v12493_v21  ;;  %v13951_v21 = vld [vmem:[%s21292_s10 + $0xb4] sm:$0xf] }
 0x928   : > { %v18305_v43 = vperm.slane %v18265_v2, 0 }
 0x92a   : > { %7334 = vmatmul.bf16.gmra.mxu2 %v18083_v18 }
 0x92b   : > { %v6243_v28 = vpop.f32.mrf.mxu3  ;;  %7396 = vmatpush.bf16.msra.mxu0 %v12422_v7  ;;  %7430 = vmatpush.bf16.msra.mxu2 %v11994_v62  ;;  %v11954_v7 = vor.u32 %v13931_v60, %v11951_v15  ;;  %v12031_v60 = vld [vmem:[%s21292_s10 + $0xb8] sm:$0xf0] }
 0x92c   : > { %v6293_v52 = vpack.c.bf16 %v6243_v28, %v6243_v28  ;;  %v14048_v28 = vld [vmem:[%s21292_s10 + $0x3b4] sm:$0xf0]  ;;  %v12175_v15 = vld [vmem:[%s21292_s10 + $0x1d8] sm:$0xf0] }
 0x92e   : > { %v6351_v34 = vunpack.c.l.b16 %v6293_v52  ;;  %v13939_v52 = vld [vmem:[%s21292_s10 + $0x54] sm:$0xf] }
 0x92f   : > { %v11986_v16 = vor.u32 %v13939_v52, %v11983_v55  ;;  %v13929_v52 = vld [vmem:[%s21292_s10 + $0x4] sm:$0xf] }
 0x930   : > { %v18110_v61 = vpack.c.b16 %v6351_v34, %v6350_v11  ;;  %v12414_v34 = vor.u32 %v14048_v28, %v12413_v5  ;;  %v12485_v5 = vld [vmem:[%s21292_s10 + $0x440] sm:$0xf]  ;;  %v14066_v28 = vld [vmem:[%s21292_s10 + $0x444] sm:$0xf0] }
 0x931   : > { %7431 = vmatpush.bf16.msra.mxu2 %v11986_v16  ;;  %v12055_v16 = vld [vmem:[%s21292_s10 + $0xe8] sm:$0xf0]  ;;  %v12486_v23 = vor.u32 %v14066_v28, %v12485_v5  ;;  %v14058_v5 = vld [vmem:[%s21292_s10 + $0x404] sm:$0xf0]  ;;  %v13949_v28 = vld [vmem:[%s21292_s10 + $0xa4] sm:$0xf] }
 0x932   : > { %7347 = vmatmul.bf16.vlgmr.msrb.gmra.mxu0 %v18110_v61 }
 0x933   : > { %v6246_v1 = vpop.f32.mrf.mxu3  ;;  %7397 = vmatpush.bf16.msra.mxu0 %v12414_v34  ;;  %v13957_v34 = vld [vmem:[%s21292_s10 + $0xe4] sm:$0xf] }
 0x934   : > { %v6294_v44 = vpack.c.bf16 %v6246_v1, %v6246_v1  ;;  %v12058_v42 = vor.u32 %v13957_v34, %v12055_v16  ;;  %v12167_v34 = vld [vmem:[%s21292_s10 + $0x1c8] sm:$0xf0] }
 0x935   : > { %7432 = vmatpush.bf16.msra.mxu2 %v11978_v57 }
 0x936   : > { %v6352_v51 = vunpack.c.l.b16 %v6294_v44 }
 0x937   : > { %7398 = vmatpush.bf16.msra.mxu0 %v12406_v3  ;;  %v13955_v3 = vld [vmem:[%s21292_s10 + $0xd4] sm:$0xf] }
 0x938   : > { %v18137_v46 = vpack.c.b16 %v6352_v51, %v6352_v51  ;;  %v12398_v51 = vor.u32 %v14044_v47, %v12397_v31  ;;  %v12047_v47 = vld [vmem:[%s21292_s10 + $0xd8] sm:$0xf0] }
 0x939   : > { %7433 = vmatpush.bf16.msra.mxu2 %v11970_v9  ;;  %v12050_v17 = vor.u32 %v13955_v3, %v12047_v47  ;;  %v13953_v9 = vld [vmem:[%s21292_s10 + $0xc4] sm:$0xf]  ;;  %v13947_v3 = vld [vmem:[%s21292_s10 + $0x94] sm:$0xf] }
 0x93b   : > { %v6248_v8 = vpop.f32.mrf.mxu3  ;;  %7399 = vmatpush.bf16.msra.mxu0 %v12398_v51  ;;  %v12191_v51 = vld [vmem:[%s21292_s10 + $0x1f8] sm:$0xf0] }
 0x93c   : > { %v6295_v40 = vpack.c.bf16 %v6248_v8, %v6248_v8  ;;  %v12509_v8 = vld [vmem:[%s21292_s10 + $0x470] sm:$0xf] }
 0x93d   : > { %v12510_v26 = vor.u32 %v14072_v14, %v12509_v8  ;;  %v13991_v8 = vld [vmem:[%s21292_s10 + $0x1f4] sm:$0xf] }
 0x93e   : > { %v6360_v12 = vunpack.c.l.b16 %v6295_v40  ;;  %v12501_v40 = vld [vmem:[%s21292_s10 + $0x460] sm:$0xf]  ;;  %v12194_v33 = vor.u32 %v13991_v8, %v12191_v51 }
 0x93f   : > { %7411 = vmatpush.bf16.msra.mxu1 %v12510_v26  ;;  %v12502_v36 = vor.u32 %v14070_v39, %v12501_v40  ;;  %7400 = vmatpush.bf16.msra.mxu0 %v12390_v30  ;;  %v14062_v26 = vld [vmem:[%s21292_s10 + $0x424] sm:$0xf0]  ;;  %v12183_v40 = vld [vmem:[%s21292_s10 + $0x1e8] sm:$0xf0]  ;;  %v12042_v30 = vor.u32 %v13953_v9, %v12039_v22 }
 0x942   : > { %7352 = vmatmul.bf16.gmra.mxu0 %v18137_v46 }
 0x943   : > { %v6251_v27 = vpop.f32.mrf.mxu3  ;;  %7412 = vmatpush.bf16.msra.mxu1 %v12502_v36 }
 0x944   : > { %v6296_v45 = vpack.c.bf16 %v6251_v27, %v6251_v27  ;;  %v11959_v27 = vld [vmem:[%s21292_s10 + $0x28] sm:$0xf0] }
 0x946   : > { %v6361_v19 = vunpack.c.l.b16 %v6296_v45 }
 0x947   : > { %7413 = vmatpush.bf16.msra.mxu1 %v12494_v25  ;;  %v13987_v25 = vld [vmem:[%s21292_s10 + $0x1d4] sm:$0xf] }
 0x948   : > { %v18164_v0 = vpack.c.b16 %v6361_v19, %v6360_v12  ;;  %v11962_v12 = vor.u32 %v13933_v4, %v11959_v27 }
 0x94a   : > { %7365 = vmatmul.bf16.vlgmr.msrb.gmra.mxu1 %v18164_v0  ;;  %7434 = vmatpush.bf16.msra.mxu2 %v11962_v12 }
 0x94b   : > { %v6253_v32 = vpop.f32.mrf.mxu3  ;;  %7414 = vmatpush.bf16.msra.mxu1 %v12486_v23 }
 0x94c   : > { %v6297_v11 = vpack.c.bf16 %v6253_v32, %v6253_v32  ;;  %v12063_v32 = vld [vmem:[%s21292_s10 + $0xf8] sm:$0xf0] }
 0x94d   : > { %v12066_v62 = vor.u32 %v13959_v53, %v12063_v32  ;;  %v12034_v32 = vor.u32 %v13951_v21, %v12031_v60 }
 0x94e   : > { %v6362_v13 = vunpack.c.l.b16 %v6297_v11  ;;  %v11943_v11 = vld [vmem:[%s21292_s10 + $0x8] sm:$0xf0]  ;;  %7435 = vmatpush.bf16.msra.mxu2 %v11954_v7  ;;  %v12178_v7 = vor.u32 %v13987_v25, %v12175_v15  ;;  %v13979_v15 = vld [vmem:[%s21292_s10 + $0x194] sm:$0xf] }
 0x94f   : > { %v18200_v20 = vpop.f32.mrf.mxu1  ;;  %7447 = vmatpush.bf16.msrb.mxu0 %v12066_v62  ;;  %v11946_v38 = vor.u32 %v13929_v52, %v11943_v11  ;;  %v12453_v62 = vld [vmem:[%s21292_s10 + $0x400] sm:$0xf]  ;;  %v13985_v11 = vld [vmem:[%s21292_s10 + $0x1c4] sm:$0xf] }
 0x950   : > { %v18219_v29 = vpack.c.b16 %v6362_v13, %v6362_v13  ;;  %v14064_v13 = vld [vmem:[%s21292_s10 + $0x434] sm:$0xf0]  ;;  %v7277_v4 = vadd.f32 %v18200_v20, %v18305_v43  ;;  %v12454_v23 = vor.u32 %v14058_v5, %v12453_v62  ;;  %v12103_v62 = vld [vmem:[%s21292_s10 + $0x148] sm:$0xf0] }
 0x951   : > { %v14060_v20 = vld [vmem:[%s21292_s10 + $0x414] sm:$0xf0] }
 0x952   : > { %7436 = vmatpush.bf16.msra.mxu2 %v11946_v38  ;;  %v13975_v38 = vld [vmem:[%s21292_s10 + $0x174] sm:$0xf] }
 0x953   : > { %v6256_v1 = vpop.f32.mrf.mxu3  ;;  %7448 = vmatpush.bf16.msrb.mxu0 %v12058_v42 }
 0x954   : > { %v6298_v24 = vpack.c.bf16 %v6256_v1, %v6256_v1  ;;  %v12477_v1 = vld [vmem:[%s21292_s10 + $0x430] sm:$0xf] }
 0x955   : > { %v12478_v14 = vor.u32 %v14064_v13, %v12477_v1  ;;  %v12170_v13 = vor.u32 %v13985_v11, %v12167_v34 }
 0x956   : > { %v6370_v19 = vunpack.c.l.b16 %v6298_v24  ;;  %v12469_v24 = vld [vmem:[%s21292_s10 + $0x420] sm:$0xf] }
 0x957   : > { %v18217_v44 = vpop.f32.mrf.mxu1  ;;  %7415 = vmatpush.bf16.msra.mxu1 %v12478_v14  ;;  %7449 = vmatpush.bf16.msrb.mxu0 %v12050_v17  ;;  %v13983_v14 = vld [vmem:[%s21292_s10 + $0x1b4] sm:$0xf]  ;;  %v12159_v17 = vld [vmem:[%s21292_s10 + $0x1b8] sm:$0xf0] }
 0x958   : > { %v12162_v22 = vor.u32 %v13983_v14, %v12159_v17 }
 0x95a   : > { %7370 = vmatmul.bf16.gmra.mxu1 %v18219_v29 }
 0x95b   : > { %v6258_v50 = vpop.f32.mrf.mxu3  ;;  %7450 = vmatpush.bf16.msrb.mxu0 %v12042_v30 }
 0x95c   : > { %v6299_v45 = vpack.c.bf16 %v6258_v50, %v6258_v50  ;;  %v12186_v50 = vor.u32 %v13989_v56, %v12183_v40  ;;  %v13945_v56 = vld [vmem:[%s21292_s10 + $0x84] sm:$0xf]  ;;  %v12007_v40 = vld [vmem:[%s21292_s10 + $0x88] sm:$0xf0] }
 0x95d   : > { %v12010_v21 = vor.u32 %v13945_v56, %v12007_v40  ;;  %v14037_v40 = vld [vmem:[%s21292_s10 + $0x364] sm:$0xf] }
 0x95e   : > { %v6371_v58 = vunpack.c.l.b16 %v6299_v45  ;;  %v12470_v45 = vor.u32 %v14062_v26, %v12469_v24  ;;  %v12119_v24 = vld [vmem:[%s21292_s10 + $0x168] sm:$0xf0] }
 0x95f   : > { %v18258_v63 = vpop.f32.mrf.mxu1  ;;  %7451 = vmatpush.bf16.msrb.mxu0 %v12034_v32  ;;  %v12143_v32 = vld [vmem:[%s21292_s10 + $0x198] sm:$0xf0] }
 0x960   : > { %v18260_v35 = vpack.c.b16 %v6371_v58, %v6370_v19  ;;  %7416 = vmatpush.bf16.msra.mxu1 %v12470_v45  ;;  %v12461_v58 = vld [vmem:[%s21292_s10 + $0x410] sm:$0xf]  ;;  %v12111_v45 = vld [vmem:[%s21292_s10 + $0x158] sm:$0xf0]  ;;  %v12146_v34 = vor.u32 %v13979_v15, %v12143_v32  ;;  %v14035_v32 = vld [vmem:[%s21292_s10 + $0x354] sm:$0xf] }
 0x961   : > { %v12462_v10 = vor.u32 %v14060_v20, %v12461_v58  ;;  %v12255_v58 = vld [vmem:[%s21292_s10 + $0x278] sm:$0xf0]  ;;  %v7282_v20 = vadd.f32 %v18258_v63, %v18305_v43  ;;  %v13969_v63 = vld [vmem:[%s21292_s10 + $0x144] sm:$0xf] }
 0x962   : > { %7383 = vmatmul.bf16.vlgmr.msrb.gmra.mxu2 %v18260_v35  ;;  %v12223_v15 = vld [vmem:[%s21292_s10 + $0x238] sm:$0xf0] }
 0x963   : > { %v6261_v55 = vpop.f32.mrf.mxu3  ;;  %7483 = vmatpush.bf16.msrb.mxu2 %v12194_v33  ;;  %v13973_v33 = vld [vmem:[%s21292_s10 + $0x164] sm:$0xf] }
 0x964   : > { %v6300_v57 = vpack.c.bf16 %v6261_v55, %v6261_v55  ;;  %v12023_v55 = vld [vmem:[%s21292_s10 + $0xa8] sm:$0xf0]  ;;  %7417 = vmatpush.bf16.msra.mxu1 %v12462_v10 }
 0x965   : > { %v12026_v42 = vor.u32 %v13949_v28, %v12023_v55  ;;  %v14005_v28 = vld [vmem:[%s21292_s10 + $0x264] sm:$0xf] }
 0x966   : > { %v6372_v27 = vunpack.c.l.b16 %v6300_v57  ;;  %v12015_v57 = vld [vmem:[%s21292_s10 + $0x98] sm:$0xf0] }
 0x967   : > { %v7283_v31 = vpop.f32.mrf.mxu1  ;;  %7484 = vmatpush.bf16.msrb.mxu2 %v12186_v50  ;;  %7452 = vmatpush.bf16.msrb.mxu0 %v12026_v42  ;;  %v12018_v9 = vor.u32 %v13947_v3, %v12015_v57  ;;  %v12122_v50 = vor.u32 %v13973_v33, %v12119_v24  ;;  %v12135_v42 = vld [vmem:[%s21292_s10 + $0x188] sm:$0xf0]  ;;  %v14039_v57 = vld [vmem:[%s21292_s10 + $0x374] sm:$0xf]  ;;  %v13965_v24 = vld [vmem:[%s21292_s10 + $0x124] sm:$0xf] }
 0x968   : > { %v18347_v19 = vpack.c.b16 %v6372_v27, %v6372_v27  ;;  %v12127_v31 = vld [vmem:[%s21292_s10 + $0x178] sm:$0xf0]  ;;  %7418 = vmatpush.bf16.msra.mxu1 %v12454_v23  ;;  %v13971_v27 = vld [vmem:[%s21292_s10 + $0x154] sm:$0xf]  ;;  %v13977_v23 = vld [vmem:[%s21292_s10 + $0x184] sm:$0xf] }
 0x969   : > { %v12130_v51 = vor.u32 %v13975_v38, %v12127_v31  ;;  %v12114_v25 = vor.u32 %v13971_v27, %v12111_v45  ;;  %v12138_v14 = vor.u32 %v13977_v23, %v12135_v42  ;;  %v12231_v27 = vld [vmem:[%s21292_s10 + $0x248] sm:$0xf0]  ;;  %v13961_v23 = vld [vmem:[%s21292_s10 + $0x104] sm:$0xf] }
 0x96a   : > { %v12071_v42 = vld [vmem:[%s21292_s10 + $0x108] sm:$0xf0] }
 0x96b   : > { %v6263_v39 = vpop.f32.mrf.mxu3  ;;  %7485 = vmatpush.bf16.msrb.mxu2 %v12178_v7  ;;  %7453 = vmatpush.bf16.msrb.mxu0 %v12018_v9  ;;  %v12087_v9 = vld [vmem:[%s21292_s10 + $0x128] sm:$0xf0] }
 0x96c   : > { %v6301_v53 = vpack.c.bf16 %v6263_v39, %v6263_v39  ;;  %7465 = vmatpush.bf16.msrb.mxu1 %v12130_v51  ;;  %v13981_v39 = vld [vmem:[%s21292_s10 + $0x1a4] sm:$0xf]  ;;  %v12090_v45 = vor.u32 %v13965_v24, %v12087_v9 }
 0x96d   : > { %v7294_v36 = vpop.f32.mrf.mxu2 }
 0x96e   : > { %v18345_v12 = vadd.f32 %v7294_v36, %v7277_v4  ;;  %v6380_v47 = vunpack.c.l.b16 %v6301_v53  ;;  %v12151_v4 = vld [vmem:[%s21292_s10 + $0x1a8] sm:$0xf0]  ;;  %v14007_v36 = vld [vmem:[%s21292_s10 + $0x274] sm:$0xf] }
 0x96f   : > { %7486 = vmatpush.bf16.msrb.mxu2 %v12170_v13  ;;  %v12154_v60 = vor.u32 %v13981_v39, %v12151_v4  ;;  %v12258_v7 = vor.u32 %v14007_v36, %v12255_v58  ;;  %7454 = vmatpush.bf16.msrb.mxu0 %v12010_v21  ;;  %v12095_v13 = vld [vmem:[%s21292_s10 + $0x138] sm:$0xf0]  ;;  %v14001_v4 = vld [vmem:[%s21292_s10 + $0x244] sm:$0xf]  ;;  %v13963_v58 = vld [vmem:[%s21292_s10 + $0x114] sm:$0xf] }
 0x970   : > { %7466 = vmatpush.bf16.msrb.mxu1 %v12122_v50  ;;  %v12375_v50 = vld [vmem:[%s21292_s10 + $0x368] sm:$0xf0] }
 0x971   : > { %v12378_v36 = vor.u32 %v14037_v40, %v12375_v50  ;;  %v13993_v50 = vld [vmem:[%s21292_s10 + $0x204] sm:$0xf] }
 0x972   : > { %7388 = vmatmul.bf16.gmra.mxu2 %v18347_v19 }
 0x973   : > { %v6266_v52 = vpop.f32.mrf.mxu3  ;;  %7487 = vmatpush.bf16.msrb.mxu2 %v12162_v22 }
 0x974   : > { %v6302_v16 = vpack.c.bf16 %v6266_v52, %v6266_v52  ;;  %v12247_v52 = vld [vmem:[%s21292_s10 + $0x268] sm:$0xf0]  ;;  %7467 = vmatpush.bf16.msrb.mxu1 %v12114_v25 }
 0x975   : > { %v18389_v1 = vpop.f32.mrf.mxu2  ;;  %v12250_v38 = vor.u32 %v14005_v28, %v12247_v52 }
 0x976   : > { %v6381_v8 = vunpack.c.l.b16 %v6302_v16  ;;  %v12106_v16 = vor.u32 %v13969_v63, %v12103_v62 }
 0x977   : > { %7488 = vmatpush.bf16.msrb.mxu2 %v12154_v60  ;;  %v13999_v60 = vld [vmem:[%s21292_s10 + $0x234] sm:$0xf] }
 0x978   : > { %v18412_v26 = vpack.c.b16 %v6381_v8, %v6380_v47  ;;  %v14003_v47 = vld [vmem:[%s21292_s10 + $0x254] sm:$0xf]  ;;  %v12239_v8 = vld [vmem:[%s21292_s10 + $0x258] sm:$0xf0]  ;;  %7468 = vmatpush.bf16.msrb.mxu1 %v12106_v16  ;;  %v12226_v52 = vor.u32 %v13999_v60, %v12223_v15 }
 0x979   : > { %v12242_v56 = vor.u32 %v14003_v47, %v12239_v8  ;;  %v13995_v8 = vld [vmem:[%s21292_s10 + $0x214] sm:$0xf] }
 0x97a   : > { %7401 = vmatmul.bf16.vlgmr.msra.gmra.mxu0 %v18412_v26  ;;  %v14055_v15 = vld [vmem:[%s21292_s10 + $0x3f4] sm:$0xf] }
 0x97b   : > { %v6268_v30 = vpop.f32.mrf.mxu3  ;;  %7501 = vmatpush.bf16.msra.mxu0 %v12258_v7  ;;  %7489 = vmatpush.bf16.msrb.mxu2 %v12146_v34  ;;  %v12367_v7 = vld [vmem:[%s21292_s10 + $0x358] sm:$0xf0] }
 0x97c   : > { %v6303_v55 = vpack.c.bf16 %v6268_v30, %v6268_v30 }
 0x97d   : > { %v7299_v10 = vpop.f32.mrf.mxu2 }
 0x97e   : > { %v18444_v53 = vadd.f32 %v7299_v10, %v7282_v20  ;;  %v6382_v31 = vunpack.c.l.b16 %v6303_v55  ;;  %v12079_v20 = vld [vmem:[%s21292_s10 + $0x118] sm:$0xf0]  ;;  %v12234_v10 = vor.u32 %v14001_v4, %v12231_v27  ;;  %v12370_v55 = vor.u32 %v14035_v32, %v12367_v7  ;;  %v12199_v4 = vld [vmem:[%s21292_s10 + $0x208] sm:$0xf0]  ;;  %v14021_v27 = vld [vmem:[%s21292_s10 + $0x2e4] sm:$0xf] }
 0x97f   : > { %v7312_v5 = vpop.f32.mrf.mxu1  ;;  %7502 = vmatpush.bf16.msra.mxu0 %v12250_v38  ;;  %7490 = vmatpush.bf16.msrb.mxu2 %v12138_v14  ;;  %v12082_v63 = vor.u32 %v13963_v58, %v12079_v20  ;;  %v13997_v38 = vld [vmem:[%s21292_s10 + $0x224] sm:$0xf]  ;;  %v12202_v60 = vor.u32 %v13993_v50, %v12199_v4  ;;  %v14011_v50 = vld [vmem:[%s21292_s10 + $0x294] sm:$0xf]  ;;  %v12271_v4 = vld [vmem:[%s21292_s10 + $0x298] sm:$0xf0] }
 0x980   : > { %v18462_v11 = vadd.f32 %v7312_v5, %v18345_v12  ;;  %v13967_v12 = vld [vmem:[%s21292_s10 + $0x134] sm:$0xf]  ;;  %v18503_v39 = vpack.c.b16 %v6382_v31, %v6382_v31 }
 0x981   : > { %v12098_v17 = vor.u32 %v13967_v12, %v12095_v13  ;;  %v12074_v12 = vor.u32 %v13961_v23, %v12071_v42  ;;  %v12215_v13 = vld [vmem:[%s21292_s10 + $0x228] sm:$0xf0]  ;;  %v14017_v42 = vld [vmem:[%s21292_s10 + $0x2c4] sm:$0xf] }
 0x982   : > { %7437 = vmatmul.bf16.vlgmr.msra.gmra.mxu2 %v17877_v6  ;;  %v12383_v6 = vld [vmem:[%s21292_s10 + $0x378] sm:$0xf0]  ;;  %v12218_v31 = vor.u32 %v13997_v38, %v12215_v13  ;;  %v12295_v38 = vld [vmem:[%s21292_s10 + $0x2c8] sm:$0xf0] }
 0x983   : > { %v6271_v3 = vpop.f32.mrf.mxu3  ;;  %v12386_v33 = vor.u32 %v14039_v57, %v12383_v6  ;;  %7469 = vmatpush.bf16.msrb.mxu1 %v12098_v17  ;;  %7503 = vmatpush.bf16.msra.mxu0 %v12242_v56  ;;  %v14023_v57 = vld [vmem:[%s21292_s10 + $0x2f4] sm:$0xf]  ;;  %v12298_v13 = vor.u32 %v14017_v42, %v12295_v38  ;;  %v14069_v42 = vld [vmem:[%s21292_s10 + $0x464] sm:$0xf] }
 0x984   : > { %v6304_v30 = vpack.c.bf16 %v6271_v3, %v6271_v3  ;;  %v12359_v3 = vld [vmem:[%s21292_s10 + $0x348] sm:$0xf0]  ;;  %v14031_v17 = vld [vmem:[%s21292_s10 + $0x334] sm:$0xf] }
 0x985   : > { %v7301_v51 = vpop.f32.mrf.mxu2  ;;  %7537 = vmatpush.bf16.msra.mxu2 %v12386_v33  ;;  %v12351_v33 = vld [vmem:[%s21292_s10 + $0x338] sm:$0xf0] }
 0x986   : > { %v6390_v62 = vunpack.c.l.b16 %v6304_v30  ;;  %v12319_v51 = vld [vmem:[%s21292_s10 + $0x2f8] sm:$0xf0]  ;;  %v12354_v56 = vor.u32 %v14031_v17, %v12351_v33  ;;  %v14029_v30 = vld [vmem:[%s21292_s10 + $0x324] sm:$0xf]  ;;  %v12279_v33 = vld [vmem:[%s21292_s10 + $0x2a8] sm:$0xf0] }
 0x987   : > { %v18495_v22 = vpop.f32.mrf.mxu1  ;;  %7470 = vmatpush.bf16.msrb.mxu1 %v12090_v45  ;;  %7504 = vmatpush.bf16.msra.mxu0 %v12234_v10  ;;  %v12322_v14 = vor.u32 %v14023_v57, %v12319_v51  ;;  %v12311_v45 = vld [vmem:[%s21292_s10 + $0x2e8] sm:$0xf0]  ;;  %v12303_v10 = vld [vmem:[%s21292_s10 + $0x2d8] sm:$0xf0]  ;;  %v14013_v17 = vld [vmem:[%s21292_s10 + $0x2a4] sm:$0xf] }
 0x988   : > { %v12314_v20 = vor.u32 %v14021_v27, %v12311_v45  ;;  %v12431_v51 = vld [vmem:[%s21292_s10 + $0x3d8] sm:$0xf0]  ;;  %v14047_v27 = vld [vmem:[%s21292_s10 + $0x3b4] sm:$0xf] }
 0x989   : > { %7538 = vmatpush.bf16.msra.mxu2 %v12378_v36  ;;  %v12343_v36 = vld [vmem:[%s21292_s10 + $0x328] sm:$0xf0]  ;;  %v12415_v45 = vld [vmem:[%s21292_s10 + $0x3b8] sm:$0xf0] }
 0x98a   : > { %7406 = vmatmul.bf16.gmra.mxu0 %v18503_v39 }
 0x98b   : > { %v6273_v21 = vpop.f32.mrf.mxu3  ;;  %7471 = vmatpush.bf16.msrb.mxu1 %v12082_v63  ;;  %7505 = vmatpush.bf16.msra.mxu0 %v12226_v52  ;;  %v14027_v63 = vld [vmem:[%s21292_s10 + $0x314] sm:$0xf] }
 0x98c   : > { %v6305_v25 = vpack.c.bf16 %v6273_v21, %v6273_v21  ;;  %v14019_v21 = vld [vmem:[%s21292_s10 + $0x2d4] sm:$0xf] }
 0x98d   : > { %7539 = vmatpush.bf16.msra.mxu2 %v12370_v55  ;;  %v12306_v7 = vor.u32 %v14019_v21, %v12303_v10  ;;  %v14009_v10 = vld [vmem:[%s21292_s10 + $0x284] sm:$0xf] }
 0x98e   : > { %v6391_v5 = vunpack.c.l.b16 %v6305_v25  ;;  %v12346_v25 = vor.u32 %v14029_v30, %v12343_v36  ;;  %v12418_v30 = vor.u32 %v14047_v27, %v12415_v45 }
 0x98f   : > { %v7317_v28 = vpop.f32.mrf.mxu1  ;;  %7472 = vmatpush.bf16.msrb.mxu1 %v12074_v12  ;;  %7506 = vmatpush.bf16.msra.mxu0 %v12218_v31  ;;  %v14025_v12 = vld [vmem:[%s21292_s10 + $0x304] sm:$0xf]  ;;  %v12287_v31 = vld [vmem:[%s21292_s10 + $0x2b8] sm:$0xf0] }
 0x990   : > { %v18530_v34 = vpack.c.b16 %v6391_v5, %v6390_v62  ;;  %v18533_v16 = vadd.f32 %v7317_v28, %v18444_v53  ;;  %v14033_v53 = vld [vmem:[%s21292_s10 + $0x344] sm:$0xf]  ;;  %v12335_v62 = vld [vmem:[%s21292_s10 + $0x318] sm:$0xf0] }
 0x991   : > { %v12362_v47 = vor.u32 %v14033_v53, %v12359_v3  ;;  %v12338_v23 = vor.u32 %v14027_v63, %v12335_v62  ;;  %v14053_v53 = vld [vmem:[%s21292_s10 + $0x3e4] sm:$0xf]  ;;  %v12439_v3 = vld [vmem:[%s21292_s10 + $0x3e8] sm:$0xf0]  ;;  %v14071_v63 = vld [vmem:[%s21292_s10 + $0x474] sm:$0xf] }
 0x992   : > { %7419 = vmatmul.bf16.vlgmr.msra.gmra.mxu1 %v18530_v34  ;;  %7442 = vmatmul.bf16.gmra.mxu2 %v17908_v41  ;;  %v12207_v41 = vld [vmem:[%s21292_s10 + $0x218] sm:$0xf0]  ;;  %v12442_v57 = vor.u32 %v14053_v53, %v12439_v3 }
 0x993   : > { %v6276_v6 = vpop.f32.mrf.mxu3  ;;  %7519 = vmatpush.bf16.msra.mxu1 %v12322_v14  ;;  %7540 = vmatpush.bf16.msra.mxu2 %v12362_v47  ;;  %v12210_v9 = vor.u32 %v13995_v8, %v12207_v41  ;;  %v14051_v47 = vld [vmem:[%s21292_s10 + $0x3d4] sm:$0xf]  ;;  %v12511_v62 = vld [vmem:[%s21292_s10 + $0x478] sm:$0xf0] }
 0x994   : > { %v6306_v24 = vpack.c.bf16 %v6276_v6, %v6276_v6  ;;  %v14015_v6 = vld [vmem:[%s21292_s10 + $0x2b4] sm:$0xf]  ;;  %v12434_v41 = vor.u32 %v14051_v47, %v12431_v51  ;;  %v12495_v53 = vld [vmem:[%s21292_s10 + $0x458] sm:$0xf0] }
 0x995   : > { %7507 = vmatpush.bf16.msra.mxu0 %v12210_v9  ;;  %v12282_v9 = vor.u32 %v14013_v17, %v12279_v33  ;;  %v12479_v51 = vld [vmem:[%s21292_s10 + $0x438] sm:$0xf0] }
 0x996   : > { %v6392_v58 = vunpack.c.l.b16 %v6306_v24  ;;  %v14049_v24 = vld [vmem:[%s21292_s10 + $0x3c4] sm:$0xf] }
 0x997   : > { %v7319_v40 = vpop.f32.mrf.mxu1  ;;  %7541 = vmatpush.bf16.msra.mxu2 %v12354_v56  ;;  %7520 = vmatpush.bf16.msra.mxu1 %v12314_v20  ;;  %v12423_v56 = vld [vmem:[%s21292_s10 + $0x3c8] sm:$0xf0] }
 0x998   : > { %v18610_v52 = vpack.c.b16 %v6392_v58, %v6392_v58  ;;  %v12426_v40 = vor.u32 %v14049_v24, %v12423_v56  ;;  %v12463_v56 = vld [vmem:[%s21292_s10 + $0x418] sm:$0xf0] }
 0x999   : > { %7508 = vmatpush.bf16.msra.mxu0 %v12202_v60  ;;  %v12263_v60 = vld [vmem:[%s21292_s10 + $0x288] sm:$0xf0] }
 0x99a   : > { %7455 = vmatmul.bf16.vlgmr.msrb.gmra.mxu0 %v17936_v37  ;;  %v12447_v37 = vld [vmem:[%s21292_s10 + $0x3f8] sm:$0xf0] }
 0x99b   : > { %v6278_v32 = vpop.f32.mrf.mxu3  ;;  %v12450_v5 = vor.u32 %v14055_v15, %v12447_v37  ;;  %7542 = vmatpush.bf16.msra.mxu2 %v12346_v25  ;;  %7521 = vmatpush.bf16.msra.mxu1 %v12306_v7  ;;  %v14045_v25 = vld [vmem:[%s21292_s10 + $0x3a4] sm:$0xf]  ;;  %v12266_v15 = vor.u32 %v14009_v10, %v12263_v60  ;;  %v12399_v7 = vld [vmem:[%s21292_s10 + $0x398] sm:$0xf0] }
 0x99c   : > { %v14043_v32 = vld [vmem:[%s21292_s10 + $0x394] sm:$0xf] }
 0x99d   : > { %v7330_v28 = vpop.f32.mrf.mxu2  ;;  %7555 = vmatpush.bf16.msrb.mxu0 %v12450_v5 }
 0x99e   : > { %v7331_v55 = vadd.f32 %v7330_v28, %v18462_v11  ;;  %v12327_v11 = vld [vmem:[%s21292_s10 + $0x308] sm:$0xf0] }
 0x99f   : > { %7543 = vmatpush.bf16.msra.mxu2 %v12338_v23  ;;  %v12330_v8 = vor.u32 %v14025_v12, %v12327_v11  ;;  %7522 = vmatpush.bf16.msra.mxu1 %v12298_v13  ;;  %v12391_v23 = vld [vmem:[%s21292_s10 + $0x388] sm:$0xf0]  ;;  %v14067_v11 = vld [vmem:[%s21292_s10 + $0x454] sm:$0xf] }
 0x9a0   : > { %v12503_v12 = vld [vmem:[%s21292_s10 + $0x468] sm:$0xf0]  ;;  %v12498_v3 = vor.u32 %v14067_v11, %v12495_v53 }
 0x9a1   : > { %7556 = vmatpush.bf16.msrb.mxu0 %v12442_v57  ;;  %v12506_v13 = vor.u32 %v14069_v42, %v12503_v12  ;;  %v14065_v57 = vld [vmem:[%s21292_s10 + $0x444] sm:$0xf] }
 0x9a2   : > { %7424 = vmatmul.bf16.gmra.mxu1 %v18610_v52  ;;  %7491 = vmatmul.bf16.vlgmr.msrb.gmra.mxu2 %v18056_v59  ;;  %v12290_v59 = vor.u32 %v14015_v6, %v12287_v31 }
 0x9a3   : > { %7544 = vmatpush.bf16.msra.mxu2 %v12330_v8  ;;  %v14063_v8 = vld [vmem:[%s21292_s10 + $0x434] sm:$0xf] }
 0x9a4   : > { %7523 = vmatpush.bf16.msra.mxu1 %v12290_v59  ;;  %v12482_v59 = vor.u32 %v14063_v8, %v12479_v51 }
 0x9a5   : > { %v18645_v14 = vpop.f32.mrf.mxu2  ;;  %7557 = vmatpush.bf16.msrb.mxu0 %v12434_v41  ;;  %v14061_v41 = vld [vmem:[%s21292_s10 + $0x424] sm:$0xf] }
 0x9a8   : > { %7524 = vmatpush.bf16.msra.mxu1 %v12282_v9  ;;  %v14059_v9 = vld [vmem:[%s21292_s10 + $0x414] sm:$0xf] }
 0x9a9   : > { %7558 = vmatpush.bf16.msrb.mxu0 %v12426_v40  ;;  %v12466_v40 = vor.u32 %v14059_v9, %v12463_v56 }
 0x9aa   : > { %7460 = vmatmul.bf16.gmra.mxu0 %v17967_v54  ;;  %v12274_v54 = vor.u32 %v14011_v50, %v12271_v4  ;;  %v14057_v50 = vld [vmem:[%s21292_s10 + $0x404] sm:$0xf]  ;;  %v12455_v4 = vld [vmem:[%s21292_s10 + $0x408] sm:$0xf0] }
 0x9ac   : > { %7525 = vmatpush.bf16.msra.mxu1 %v12274_v54 }
 0x9ad   : > { %v7335_v36 = vpop.f32.mrf.mxu2  ;;  %7559 = vmatpush.bf16.msrb.mxu0 %v12418_v30  ;;  %v12701_v30 = vld [vmem:[%s21295_s13 + $0x170] sm:$0xf] }
 0x9ae   : > { %v7336_v58 = vadd.f32 %v7335_v36, %v18533_v16  ;;  %v12407_v16 = vld [vmem:[%s21292_s10 + $0x3a8] sm:$0xf0]  ;;  %v14120_v36 = vld [vmem:[%s21295_s13 + $0x174] sm:$0xf0] }
 0x9af   : > { %v7348_v20 = vpop.f32.mrf.mxu0  ;;  %v12410_v37 = vor.u32 %v14045_v25, %v12407_v16 }
 0x9b0   : > { %v7349_v21 = vadd.f32 %v7348_v20, %v7331_v55  ;;  %7526 = vmatpush.bf16.msra.mxu1 %v12266_v15  ;;  %v14041_v55 = vld [vmem:[%s21292_s10 + $0x384] sm:$0xf] }
 0x9b1   : > { %7560 = vmatpush.bf16.msrb.mxu0 %v12410_v37  ;;  %v12394_v38 = vor.u32 %v14041_v55, %v12391_v23  ;;  %v12685_v23 = vld [vmem:[%s21295_s13 + $0x150] sm:$0xf] }
 0x9b2   : > { %7473 = vmatmul.bf16.vlgmr.msrb.gmra.mxu1 %v17997_v48  ;;  %7496 = vmatmul.bf16.gmra.mxu2 %v18083_v18  ;;  %v12402_v48 = vor.u32 %v14043_v32, %v12399_v7  ;;  %v12514_v18 = vor.u32 %v14071_v63, %v12511_v62 }
 0x9b4   : > { %7573 = vmatpush.bf16.msrb.mxu1 %v12514_v18 }
 0x9b5   : > { %v7337_v5 = vpop.f32.mrf.mxu2  ;;  %7561 = vmatpush.bf16.msrb.mxu0 %v12402_v48 }
 0x9b7   : > { %v18699_v28 = vpop.f32.mrf.mxu0 }
 0x9b8   : > { %7574 = vmatpush.bf16.msrb.mxu1 %v12506_v13  ;;  %v18789_v13 = vpop.permute.xlu1 %7620 }
 0x9b9   : > { %7562 = vmatpush.bf16.msrb.mxu0 %v12394_v38 }
 0x9ba   : > { %7509 = vmatmul.bf16.vlgmr.msra.gmra.mxu0 %v18110_v61  ;;  %v12487_v61 = vld [vmem:[%s21292_s10 + $0x448] sm:$0xf0] }
 0x9bb   : > { %v12490_v47 = vor.u32 %v14065_v57, %v12487_v61 }
 0x9bc   : > { %7575 = vmatpush.bf16.msrb.mxu1 %v12498_v3 }
 0x9bf   : > { %v7353_v6 = vpop.f32.mrf.mxu0 }
 0x9c0   : > { %v7354_v31 = vadd.f32 %v7353_v6, %v7336_v58  ;;  %7576 = vmatpush.bf16.msrb.mxu1 %v12490_v47  ;;  %v12702_v58 = vor.u32 %v14120_v36, %v12701_v30 }
 0x9c2   : > { %7478 = vmatmul.bf16.gmra.mxu1 %v18028_v49  ;;  %7545 = vmatmul.bf16.vlgmr.msra.gmra.mxu2 %v18260_v35  ;;  %v12471_v49 = vld [vmem:[%s21292_s10 + $0x428] sm:$0xf0] }
 0x9c3   : > { %v12474_v24 = vor.u32 %v14061_v41, %v12471_v49  ;;  %9631 = vmatpush.bf16.msra.mxu3 %v12702_v58  ;;  %v18793_v49 = vpop.permute.xlu2 %7625 }
 0x9c4   : > { %7577 = vmatpush.bf16.msrb.mxu1 %v12482_v59 }
 0x9c7   : > { %v7366_v17 = vpop.f32.mrf.mxu1  ;;  %v7355_v35 = vpop.f32.mrf.mxu0 }
 0x9c8   : > { %v7367_v33 = vadd.f32 %v7366_v17, %v7349_v21  ;;  %7578 = vmatpush.bf16.msrb.mxu1 %v12474_v24 }
 0x9ca   : > { %7514 = vmatmul.bf16.gmra.mxu0 %v18137_v46  ;;  %v12458_v46 = vor.u32 %v14057_v50, %v12455_v4 }
 0x9cc   : > { %7579 = vmatpush.bf16.msrb.mxu1 %v12466_v40 }
 0x9cf   : > { %v7368_v27 = vpop.f32.mrf.mxu1 }
 0x9d0   : > { %7580 = vmatpush.bf16.msrb.mxu1 %v12458_v46 }
 0x9d2   : > { %7527 = vmatmul.bf16.vlgmr.msra.gmra.mxu1 %v18164_v0  ;;  %7550 = vmatmul.bf16.gmra.mxu2 %v18347_v19 }
 0x9d7   : > { %v7371_v45 = vpop.f32.mrf.mxu1 }
 0x9d8   : > { %v7372_v54 = vadd.f32 %v7371_v45, %v7354_v31  ;;  %v18801_v45 = vpop.permute.xlu0 %7630 }
 0x9da   : > { %7563 = vmatmul.bf16.vlgmr.msrb.gmra.mxu0 %v18412_v26  ;;  %v12693_v26 = vld [vmem:[%s21295_s13 + $0x160] sm:$0xf] }
 0x9df   : > { %v7373_v20 = vpop.f32.mrf.mxu1 }
 0x9e2   : > { %7532 = vmatmul.bf16.gmra.mxu1 %v18219_v29  ;;  %v14118_v29 = vld [vmem:[%s21295_s13 + $0x164] sm:$0xf0] }
 0x9e3   : > { %v12694_v16 = vor.u32 %v14118_v29, %v12693_v26  ;;  %v12677_v26 = vld [vmem:[%s21295_s13 + $0x140] sm:$0xf]  ;;  %v14114_v29 = vld [vmem:[%s21295_s13 + $0x144] sm:$0xf0] }
 0x9e5   : > { %v7384_v0 = vpop.f32.mrf.mxu2  ;;  %9632 = vmatpush.bf16.msra.mxu3 %v12694_v16 }
 0x9ea   : > { %7568 = vmatmul.bf16.gmra.mxu0 %v18503_v39 }
 0x9ed   : > { %v7386_v19 = vpop.f32.mrf.mxu2 }
 0x9f2   : > { %7581 = vmatmul.bf16.vlgmr.msrb.gmra.mxu1 %v18530_v34  ;;  %v7279_v34 = vadd.f32 %v18217_v44, %v18305_v43  ;;  %v14116_v44 = vld [vmem:[%s21295_s13 + $0x154] sm:$0xf0] }
 0x9f3   : > { %v12686_v43 = vor.u32 %v14116_v44, %v12685_v23  ;;  %v12669_v23 = vld [vmem:[%s21295_s13 + $0x130] sm:$0xf]  ;;  %v14112_v44 = vld [vmem:[%s21295_s13 + $0x134] sm:$0xf0] }
 0x9f4   : > { %v7297_v37 = vadd.f32 %v18389_v1, %v7279_v34 }
 0x9f5   : > { %v7389_v21 = vpop.f32.mrf.mxu2  ;;  %9633 = vmatpush.bf16.msra.mxu3 %v12686_v43  ;;  %v12670_v43 = vor.u32 %v14112_v44, %v12669_v23  ;;  %v14094_v23 = vld [vmem:[%s21295_s13 + $0xa4] sm:$0xf0] }
 0x9f6   : > { %v7315_v32 = vadd.f32 %v18495_v22, %v7297_v37  ;;  %v18787_v22 = vperm.slane %v18265_v2, 1  ;;  %v7390_v8 = vadd.f32 %v7389_v21, %v7372_v54 }
 0x9f7   : > { %v7402_v10 = vpop.f32.mrf.mxu0 }
 0x9f8   : > { %v7333_v63 = vadd.f32 %v18645_v14, %v7315_v32 }
 0x9fa   : > { %v7351_v5 = vadd.f32 %v18699_v28, %v7333_v63 }
 0x9fc   : > { %v7369_v1 = vadd.f32 %v7368_v27, %v7351_v5 }
 0x9fd   : > { %v7391_v60 = vpop.f32.mrf.mxu2 }
 0x9fe   : > { %v7387_v42 = vadd.f32 %v7386_v19, %v7369_v1 }
 0x9ff   : > { %v7404_v25 = vpop.f32.mrf.mxu0 }
 0xa00   : > { %v7405_v11 = vadd.f32 %v7404_v25, %v7387_v42 }
 0xa02   : > { %7586 = vmatmul.bf16.gmra.mxu1 %v18610_v52  ;;  %v7385_v52 = vadd.f32 %v7384_v0, %v7367_v33 }
 0xa04   : > { %v7403_v62 = vadd.f32 %v7402_v10, %v7385_v52 }
 0xa05   : > { %v7438_v15 = vpop.f32.mrf.mxu2 }
 0xa06   : > { %v7439_v53 = vadd.f32 %v7438_v15, %v18787_v22  ;;  %v12678_v15 = vor.u32 %v14114_v29, %v12677_v26  ;;  %v14096_v26 = vld [vmem:[%s21295_s13 + $0xb4] sm:$0xf0] }
 0xa07   : > { %v7407_v39 = vpop.f32.mrf.mxu0 }
 0xa08   : > { %v7408_v17 = vadd.f32 %v7407_v39, %v7390_v8  ;;  %9634 = vmatpush.bf16.msra.mxu3 %v12678_v15 }
 0xa0c   : > { %9635 = vmatpush.bf16.msra.mxu3 %v12670_v43 }
 0xa0d   : > { %v18776_v7 = vpop.f32.mrf.mxu2 }
 0xa0e   : > { %v7441_v15 = vadd.f32 %v18776_v7, %v18787_v22  ;;  %v14078_v7 = vld [vmem:[%s21295_s13 + $0x24] sm:$0xf0] }
 0xa0f   : > { %v7409_v48 = vpop.f32.mrf.mxu0  ;;  %v7420_v18 = vpop.f32.mrf.mxu1 }
 0xa10   : > { %v7421_v55 = vadd.f32 %v7420_v18, %v7403_v62 }
 0xa12   : > { %vm7591_vm5 = vcmp.ge.f32.partialorder %v7421_v55, 0.0  ;;  %v7597_v14 = vmul.f32 0.2, %v7421_v55 }
 0xa14   : > { %v7603_v38 = vsel %vm7591_vm5, %v7421_v55, %v7597_v14 }
 0xa15   : > { %v7609_v28 = vmul.f32 1.4142135, %v7603_v38  ;;  %v7443_v12 = vpop.f32.mrf.mxu2  ;;  %v12573_v38 = vld [vmem:[%s21295_s13 + $0x70] sm:$0xf] }
 0xa16   : > { %v7444_v54 = vadd.f32 %v7443_v12, %v18787_v22  ;;  %v12637_v12 = vld [vmem:[%s21295_s13 + $0xf0] sm:$0xf]  ;;  %v12597_v22 = vld [vmem:[%s21295_s13 + $0xa0] sm:$0xf] }
 0xa17   : > { %v7633_v3 = vmul.f32 %v18789_v13, %v7609_v28  ;;  %v7422_v57 = vpop.f32.mrf.mxu1  ;;  %v7456_v61 = vpop.f32.mrf.mxu0  ;;  %v14088_v28 = vld [vmem:[%s21295_s13 + $0x74] sm:$0xf0] }
 0xa18   : > { %v7423_v6 = vadd.f32 %v7422_v57, %v7405_v11  ;;  %v7457_v31 = vadd.f32 %v7456_v61, %v7439_v53  ;;  %v12574_v11 = vor.u32 %v14088_v28, %v12573_v38  ;;  %v14104_v53 = vld [vmem:[%s21295_s13 + $0xf4] sm:$0xf0]  ;;  %v12565_v57 = vld [vmem:[%s21295_s13 + $0x60] sm:$0xf]  ;;  %v14086_v61 = vld [vmem:[%s21295_s13 + $0x64] sm:$0xf0] }
 0xa19   : > { %v7654_v2 = vrot.slane %v7633_v3, 1  ;;  %v12638_v3 = vor.u32 %v14104_v53, %v12637_v12  ;;  %v14134_v53 = vld [vmem:[%s21295_s13 + $0x1e4] sm:$0xf0] }
 0xa1a   : > { %vm7593_vm6 = vcmp.ge.f32.partialorder %v7423_v6, 0.0  ;;  %v7599_v47 = vmul.f32 0.2, %v7423_v6  ;;  %9595 = vmatpush.bf16.msrb.mxu2 %v12574_v11  ;;  %v12757_v11 = vld [vmem:[%s21295_s13 + $0x1e0] sm:$0xf] }
 0xa1b   : > { %7672 = vst [vmem:[#allocation3 + $0x50] sm:$0x80] %v7654_v2  ;;  %9613 = vmatpush.bf16.msra.mxu0 %v12638_v3  ;;  %v14092_v3 = vld [vmem:[%s21295_s13 + $0x94] sm:$0xf0] }
 0xa1c   : > { %v7605_v51 = vsel %vm7593_vm6, %v7423_v6, %v7599_v47  ;;  %v12629_v6 = vld [vmem:[%s21295_s13 + $0xe0] sm:$0xf]  ;;  %v14102_v47 = vld [vmem:[%s21295_s13 + $0xe4] sm:$0xf0] }
 0xa1d   : > { %v7611_v59 = vmul.f32 1.4142135, %v7605_v51  ;;  %v7445_v41 = vpop.f32.mrf.mxu2  ;;  %v12630_v8 = vor.u32 %v14102_v47, %v12629_v6  ;;  %v12661_v47 = vld [vmem:[%s21295_s13 + $0x120] sm:$0xf] }
 0xa1e   : > { %v12557_v41 = vld [vmem:[%s21295_s13 + $0x50] sm:$0xf] }
 0xa1f   : > { %v7635_v35 = vmul.f32 %v18793_v49, %v7611_v59  ;;  %v7425_v33 = vpop.f32.mrf.mxu1  ;;  %v18796_v24 = vpop.f32.mrf.mxu0  ;;  %9614 = vmatpush.bf16.msra.mxu0 %v12630_v8  ;;  %v14110_v8 = vld [vmem:[%s21295_s13 + $0x124] sm:$0xf0] }
 0xa20   : > { %v7426_v9 = vadd.f32 %v7425_v33, %v7408_v17  ;;  %v14084_v17 = vld [vmem:[%s21295_s13 + $0x54] sm:$0xf0] }
 0xa21   : > { %v7656_v56 = vrot.slane %v7635_v35, 1  ;;  %v12621_v35 = vld [vmem:[%s21295_s13 + $0xd0] sm:$0xf]  ;;  %v12558_v33 = vor.u32 %v14084_v17, %v12557_v41 }
 0xa22   : > { %vm7595_vm7 = vcmp.ge.f32.partialorder %v7426_v9, 0.0  ;;  %v7601_v40 = vmul.f32 0.2, %v7426_v9  ;;  %v12749_v41 = vld [vmem:[%s21295_s13 + $0x1d0] sm:$0xf] }
 0xa23   : > { %v18799_v50 = vsel %vm912_vm0, %v7654_v2, %v7656_v56  ;;  %v12566_v2 = vor.u32 %v14086_v61, %v12565_v57 }
 0xa24   : > { %v7607_v4 = vsel %vm7595_vm7, %v7426_v9, %v7601_v40  ;;  %v14100_v9 = vld [vmem:[%s21295_s13 + $0xd4] sm:$0xf0]  ;;  %v12549_v40 = vld [vmem:[%s21295_s13 + $0x40] sm:$0xf] }
 0xa25   : > { %v7613_v27 = vmul.f32 1.4142135, %v7607_v4  ;;  %v7492_v46 = vpop.f32.mrf.mxu2  ;;  %9596 = vmatpush.bf16.msrb.mxu2 %v12566_v2  ;;  %v14082_v4 = vld [vmem:[%s21295_s13 + $0x44] sm:$0xf0] }
 0xa27   : > { %v7637_v30 = vmul.f32 %v18801_v45, %v7613_v27  ;;  %v7427_v36 = vpop.f32.mrf.mxu1  ;;  %v7461_v58 = vpop.f32.mrf.mxu0  ;;  %v12613_v27 = vld [vmem:[%s21295_s13 + $0xc0] sm:$0xf] }
 0xa28   : > { %v7462_v20 = vadd.f32 %v7461_v58, %v7444_v54  ;;  %v12550_v54 = vor.u32 %v14082_v4, %v12549_v40  ;;  %v14074_v40 = vld [vmem:[%s21295_s13 + $0x4] sm:$0xf0]  ;;  %v12581_v4 = vld [vmem:[%s21295_s13 + $0x80] sm:$0xf] }
 0xa29   : > { %v7660_v0 = vrot.slane %v7637_v30, 1  ;;  %9597 = vmatpush.bf16.msrb.mxu2 %v12558_v33  ;;  %v14098_v30 = vld [vmem:[%s21295_s13 + $0xc4] sm:$0xf0] }
 0xa2a   : > { %v12614_v36 = vor.u32 %v14098_v30, %v12613_v27  ;;  %v14130_v33 = vld [vmem:[%s21295_s13 + $0x1c4] sm:$0xf0] }
 0xa2b   : > { %v18806_v19 = vsel %vm912_vm0, %v7656_v56, %v7660_v0  ;;  %7678 = vst [vmem:[#allocation3 + $0x28] sm:$0x7f] %v7660_v0  ;;  %v12622_v56 = vor.u32 %v14100_v9, %v12621_v35  ;;  %v12541_v0 = vld [vmem:[%s21295_s13 + $0x30] sm:$0xf]  ;;  %v12741_v35 = vld [vmem:[%s21295_s13 + $0x1c0] sm:$0xf] }
 0xa2d   : > { %v18808_v21 = vpop.f32.mrf.mxu2  ;;  %9615 = vmatpush.bf16.msra.mxu0 %v12622_v56  ;;  %9598 = vmatpush.bf16.msrb.mxu2 %v12550_v54 }
 0xa2f   : > { %v7463_v10 = vpop.f32.mrf.mxu0  ;;  %v7474_v60 = vpop.f32.mrf.mxu1 }
 0xa30   : > { %v7475_v25 = vadd.f32 %v7474_v60, %v7457_v31  ;;  %v14080_v10 = vld [vmem:[%s21295_s13 + $0x34] sm:$0xf0]  ;;  %v12605_v60 = vld [vmem:[%s21295_s13 + $0xb0] sm:$0xf] }
 0xa31   : > { %9616 = vmatpush.bf16.msra.mxu0 %v12614_v36  ;;  %v12606_v29 = vor.u32 %v14096_v26, %v12605_v60  ;;  %v12733_v36 = vld [vmem:[%s21295_s13 + $0x1b0] sm:$0xf]  ;;  %v12742_v60 = vor.u32 %v14130_v33, %v12741_v35  ;;  %v14152_v26 = vld [vmem:[%s21295_s13 + $0x274] sm:$0xf0]  ;;  %v12709_v33 = vld [vmem:[%s21295_s13 + $0x180] sm:$0xf] }
 0xa32   : > { %v18816_v16 = vadd.f32 %v7492_v46, %v7475_v25  ;;  %v12542_v25 = vor.u32 %v14080_v10, %v12541_v0  ;;  %v14128_v0 = vld [vmem:[%s21295_s13 + $0x1b4] sm:$0xf0] }
 0xa34   : > { %9599 = vmatpush.bf16.msrb.mxu2 %v12542_v25  ;;  %v12829_v25 = vld [vmem:[%s21295_s13 + $0x270] sm:$0xf] }
 0xa35   : > { %v7497_v39 = vpop.f32.mrf.mxu2  ;;  %9617 = vmatpush.bf16.msra.mxu0 %v12606_v29  ;;  %v12893_v29 = vld [vmem:[%s21295_s13 + $0x2f0] sm:$0xf] }
 0xa37   : > { %v18818_v34 = vpop.f32.mrf.mxu1  ;;  %v18820_v37 = vpop.f32.mrf.mxu0 }
 0xa38   : > { %v7511_v44 = vadd.f32 %v18820_v37, %v18816_v16  ;;  %v12525_v16 = vld [vmem:[%s21295_s13 + $0x10] sm:$0xf]  ;;  %v14076_v37 = vld [vmem:[%s21295_s13 + $0x14] sm:$0xf0] }
 0xa39   : > { %v12526_v57 = vor.u32 %v14076_v37, %v12525_v16  ;;  %v12813_v16 = vld [vmem:[%s21295_s13 + $0x250] sm:$0xf] }
 0xa3d   : > { %v7499_v32 = vpop.f32.mrf.mxu2 }
 0xa3e   : > { %v14136_v32 = vld [vmem:[%s21295_s13 + $0x1f4] sm:$0xf0] }
 0xa3f   : > { %v7479_v52 = vpop.f32.mrf.mxu1  ;;  %v18822_v63 = vpop.f32.mrf.mxu0 }
 0xa40   : > { %v7480_v62 = vadd.f32 %v7479_v52, %v7462_v20  ;;  %v12533_v52 = vld [vmem:[%s21295_s13 + $0x20] sm:$0xf] }
 0xa41   : > { %v12534_v43 = vor.u32 %v14078_v7, %v12533_v52 }
 0xa42   : > { %v18824_v48 = vadd.f32 %v7497_v39, %v7480_v62  ;;  %v12765_v39 = vld [vmem:[%s21295_s13 + $0x1f0] sm:$0xf]  ;;  %v7459_v62 = vadd.f32 %v18796_v24, %v7441_v15  ;;  %v12830_v15 = vor.u32 %v14152_v26, %v12829_v25 }
 0xa43   : > { %9600 = vmatpush.bf16.msrb.mxu2 %v12534_v43  ;;  %v12885_v43 = vld [vmem:[%s21295_s13 + $0x2e0] sm:$0xf] }
 0xa44   : > { %v7477_v24 = vadd.f32 %v18818_v34, %v7459_v62  ;;  %v12758_v34 = vor.u32 %v14134_v53, %v12757_v11  ;;  %v12725_v62 = vld [vmem:[%s21295_s13 + $0x1a0] sm:$0xf] }
 0xa45   : > { %v18826_v18 = vpop.f32.mrf.mxu2 }
 0xa46   : > { %v7495_v6 = vadd.f32 %v18808_v21, %v7477_v24  ;;  %v12662_v21 = vor.u32 %v14110_v8, %v12661_v47  ;;  %v14106_v47 = vld [vmem:[%s21295_s13 + $0x104] sm:$0xf0] }
 0xa47   : > { %v7481_v5 = vpop.f32.mrf.mxu1  ;;  %v18828_v55 = vpop.f32.mrf.mxu0  ;;  %9601 = vmatpush.bf16.msrb.mxu2 %v12526_v57  ;;  %v14164_v57 = vld [vmem:[%s21295_s13 + $0x2d4] sm:$0xf0] }
 0xa48   : > { %v12766_v5 = vor.u32 %v14136_v32, %v12765_v39  ;;  %v7513_v17 = vadd.f32 %v18822_v63, %v7495_v6  ;;  %v12517_v63 = vld [vmem:[%s21295_s13] sm:$0xf]  ;;  %9636 = vmatpush.bf16.msra.mxu3 %v12662_v21  ;;  %v14168_v39 = vld [vmem:[%s21295_s13 + $0x2f4] sm:$0xf0]  ;;  %v7516_v7 = vadd.f32 %v18828_v55, %v18824_v48  ;;  %v14126_v48 = vld [vmem:[%s21295_s13 + $0x1a4] sm:$0xf0] }
 0xa49   : > { %v12518_v30 = vor.u32 %v14074_v40, %v12517_v63  ;;  %v12894_v52 = vor.u32 %v14168_v39, %v12893_v29  ;;  %v12717_v21 = vld [vmem:[%s21295_s13 + $0x190] sm:$0xf]  ;;  %v12805_v40 = vld [vmem:[%s21295_s13 + $0x240] sm:$0xf] }
 0xa4a   : > { %9649 = vmatpush.bf16.msra.mxu1 %v12766_v5  ;;  %v12821_v5 = vld [vmem:[%s21295_s13 + $0x260] sm:$0xf]  ;;  %v12797_v29 = vld [vmem:[%s21295_s13 + $0x230] sm:$0xf] }
 0xa4b   : > { %9602 = vmatpush.bf16.msrb.mxu2 %v12518_v30  ;;  %v14162_v30 = vld [vmem:[%s21295_s13 + $0x2c4] sm:$0xf0] }
 0xa4d   : > { %v18836_v1 = vpop.f32.mrf.mxu2 }
 0xa4e   : > { %9650 = vmatpush.bf16.msra.mxu1 %v12758_v34 }
 0xa4f   : > { %v7517_v14 = vpop.f32.mrf.mxu0  ;;  %v18838_v42 = vpop.f32.mrf.mxu1  ;;  %9667 = vmatpush.bf16.msra.mxu2 %v12830_v15  ;;  %v14144_v15 = vld [vmem:[%s21295_s13 + $0x234] sm:$0xf0] }
 0xa50   : > { %v12598_v14 = vor.u32 %v14094_v23, %v12597_v22  ;;  %v7529_v12 = vadd.f32 %v18838_v42, %v7511_v44  ;;  %v12589_v42 = vld [vmem:[%s21295_s13 + $0x90] sm:$0xf]  ;;  %v12734_v23 = vor.u32 %v14128_v0, %v12733_v36  ;;  %v14150_v44 = vld [vmem:[%s21295_s13 + $0x264] sm:$0xf0] }
 0xa51   : > { %v12590_v61 = vor.u32 %v14092_v3, %v12589_v42  ;;  %v12822_v55 = vor.u32 %v14150_v44, %v12821_v5  ;;  %v14148_v42 = vld [vmem:[%s21295_s13 + $0x254] sm:$0xf0]  ;;  %v12877_v3 = vld [vmem:[%s21295_s13 + $0x2d0] sm:$0xf]  ;;  %v12949_v5 = vld [vmem:[%s21295_s13 + $0x360] sm:$0xf] }
 0xa52   : > { %9618 = vmatpush.bf16.msra.mxu0 %v12598_v14  ;;  %v7547_v2 = vadd.f32 %v18826_v18, %v7529_v12  ;;  %v14132_v18 = vld [vmem:[%s21295_s13 + $0x1d4] sm:$0xf0]  ;;  %v14166_v14 = vld [vmem:[%s21295_s13 + $0x2e4] sm:$0xf0]  ;;  %v12957_v0 = vld [vmem:[%s21295_s13 + $0x370] sm:$0xf] }
 0xa53   : > { %v12750_v56 = vor.u32 %v14132_v18, %v12749_v41  ;;  %v14108_v12 = vld [vmem:[%s21295_s13 + $0x114] sm:$0xf0]  ;;  %9668 = vmatpush.bf16.msra.mxu2 %v12822_v55  ;;  %v12878_v41 = vor.u32 %v14164_v57, %v12877_v3  ;;  %v14158_v57 = vld [vmem:[%s21295_s13 + $0x2a4] sm:$0xf0] }
 0xa54   : > { %v14124_v18 = vld [vmem:[%s21295_s13 + $0x194] sm:$0xf0] }
 0xa55   : > { %v18861_v31 = vpop.f32.mrf.mxu2  ;;  %9651 = vmatpush.bf16.msra.mxu1 %v12750_v56  ;;  %v12718_v63 = vor.u32 %v14124_v18, %v12717_v21  ;;  %v12781_v21 = vld [vmem:[%s21295_s13 + $0x210] sm:$0xf]  ;;  %v14140_v18 = vld [vmem:[%s21295_s13 + $0x214] sm:$0xf0] }
 0xa56   : > { %9619 = vmatpush.bf16.msra.mxu0 %v12590_v61 }
 0xa57   : > { %v18866_v51 = vpop.f32.mrf.mxu1  ;;  %v18868_v59 = vpop.f32.mrf.mxu0 }
 0xa58   : > { %v7565_v9 = vadd.f32 %v18868_v59, %v7547_v2  ;;  %v7531_v27 = vadd.f32 %v18866_v51, %v7513_v17  ;;  %v14090_v59 = vld [vmem:[%s21295_s13 + $0x84] sm:$0xf0]  ;;  %v12726_v2 = vor.u32 %v14126_v48, %v12725_v62  ;;  %v14160_v62 = vld [vmem:[%s21295_s13 + $0x2b4] sm:$0xf0] }
 0xa59   : > { %v12582_v51 = vor.u32 %v14090_v59, %v12581_v4  ;;  %9652 = vmatpush.bf16.msra.mxu1 %v12742_v60  ;;  %v14146_v4 = vld [vmem:[%s21295_s13 + $0x244] sm:$0xf0]  ;;  %v13021_v60 = vld [vmem:[%s21295_s13 + $0x3f0] sm:$0xf] }
 0xa5a   : > { %v7549_v22 = vadd.f32 %v18836_v1, %v7531_v27  ;;  %v12886_v1 = vor.u32 %v14166_v14, %v12885_v43  ;;  %v12869_v27 = vld [vmem:[%s21295_s13 + $0x2c0] sm:$0xf]  ;;  %v14182_v43 = vld [vmem:[%s21295_s13 + $0x364] sm:$0xf0] }
 0xa5b   : > { %9620 = vmatpush.bf16.msra.mxu0 %v12582_v51  ;;  %v12870_v36 = vor.u32 %v14162_v30, %v12869_v27  ;;  %v13013_v14 = vld [vmem:[%s21295_s13 + $0x3e0] sm:$0xf]  ;;  %v12950_v55 = vor.u32 %v14182_v43, %v12949_v5 }
 0xa5d   : > { %v7553_v46 = vpop.f32.mrf.mxu2  ;;  %9653 = vmatpush.bf16.msra.mxu1 %v12734_v23 }
 0xa5f   : > { %v18894_v58 = vpop.f32.mrf.mxu1  ;;  %v18896_v20 = vpop.f32.mrf.mxu0  ;;  %9685 = vmatpush.bf16.msrb.mxu0 %v12894_v52  ;;  %v12861_v52 = vld [vmem:[%s21295_s13 + $0x2b0] sm:$0xf] }
 0xa60   : > { %v7534_v34 = vadd.f32 %v18894_v58, %v7516_v7  ;;  %v7567_v37 = vadd.f32 %v18896_v20, %v7549_v22  ;;  %v12814_v58 = vor.u32 %v14148_v42, %v12813_v16  ;;  %v12645_v20 = vld [vmem:[%s21295_s13 + $0x100] sm:$0xf]  ;;  %v12862_v44 = vor.u32 %v14160_v62, %v12861_v52  ;;  %v14142_v16 = vld [vmem:[%s21295_s13 + $0x224] sm:$0xf0] }
 0xa61   : > { %v12646_v17 = vor.u32 %v14106_v47, %v12645_v20  ;;  %9654 = vmatpush.bf16.msra.mxu1 %v12726_v2  ;;  %v7680_v22 = vld [vmem:[#allocation3 + $0x50] sm:$0xff]  ;;  %v13005_v47 = vld [vmem:[%s21295_s13 + $0x3d0] sm:$0xf] }
 0xa62   : > { %9669 = vmatpush.bf16.msra.mxu2 %v12814_v58 }
 0xa63   : > { %9686 = vmatpush.bf16.msrb.mxu0 %v12886_v1  ;;  %v14198_v1 = vld [vmem:[%s21295_s13 + $0x3e4] sm:$0xf0] }
 0xa65   : > { %9655 = vmatpush.bf16.msra.mxu1 %v12718_v63  ;;  %v14156_v63 = vld [vmem:[%s21295_s13 + $0x294] sm:$0xf0] }
 0xa67   : > { %v7535_v38 = vpop.f32.mrf.mxu1  ;;  %v18934_v28 = vpop.f32.mrf.mxu0  ;;  %9687 = vmatpush.bf16.msrb.mxu0 %v12878_v41 }
 0xa68   : > { %v12653_v38 = vld [vmem:[%s21295_s13 + $0x110] sm:$0xf] }
 0xa69   : > { %v12654_v53 = vor.u32 %v14108_v12, %v12653_v38 }
 0xa6b   : > { %9637 = vmatpush.bf16.msra.mxu3 %v12654_v53  ;;  %9688 = vmatpush.bf16.msrb.mxu0 %v12870_v36  ;;  %v12789_v53 = vld [vmem:[%s21295_s13 + $0x220] sm:$0xf]  ;;  %v14194_v36 = vld [vmem:[%s21295_s13 + $0x3c4] sm:$0xf0] }
 0xa6c   : > { %v12790_v3 = vor.u32 %v14142_v16, %v12789_v53 }
 0xa6f   : > { %v7571_v46 = vpop.f32.mrf.mxu0  ;;  %v7582_v54 = vpop.f32.mrf.mxu1  ;;  %9638 = vmatpush.bf16.msra.mxu3 %v12646_v17  ;;  %9689 = vmatpush.bf16.msrb.mxu0 %v12862_v44  ;;  %v7686_v44 = vld [vmem:[#allocation3 + $0x28] sm:$0xff] }
 0xa70   : > { %v7583_v10 = vadd.f32 %v7582_v54, %v7565_v9  ;;  %v7552_v9 = vadd.f32 %v18861_v31, %v7534_v34  ;;  %v14122_v31 = vld [vmem:[%s21295_s13 + $0x184] sm:$0xf0]  ;;  %v12806_v54 = vor.u32 %v14146_v4, %v12805_v40  ;;  %v12853_v34 = vld [vmem:[%s21295_s13 + $0x2a0] sm:$0xf] }
 0xa71   : > { %v12854_v20 = vor.u32 %v14158_v57, %v12853_v34  ;;  %v12933_v40 = vld [vmem:[%s21295_s13 + $0x340] sm:$0xf] }
 0xa72   : > { %vm7592_vm8 = vcmp.ge.f32.partialorder %v7583_v10, 0.0  ;;  %v7598_v32 = vmul.f32 0.2, %v7583_v10  ;;  %v7570_v59 = vadd.f32 %v18934_v28, %v7552_v9  ;;  %9670 = vmatpush.bf16.msra.mxu2 %v12806_v54  ;;  %v14200_v28 = vld [vmem:[%s21295_s13 + $0x3f4] sm:$0xf0]  ;;  %v12782_v9 = vor.u32 %v14140_v18, %v12781_v21 }
 0xa73   : > { %v13022_v23 = vor.u32 %v14200_v28, %v13021_v60  ;;  %9690 = vmatpush.bf16.msrb.mxu0 %v12854_v20  ;;  %v12837_v28 = vld [vmem:[%s21295_s13 + $0x280] sm:$0xf]  ;;  %v12909_v20 = vld [vmem:[%s21295_s13 + $0x310] sm:$0xf]  ;;  %v14212_v18 = vld [vmem:[%s21295_s13 + $0x454] sm:$0xf0] }
 0xa74   : > { %v7604_v24 = vsel %vm7592_vm8, %v7583_v10, %v7598_v32  ;;  %v14184_v10 = vld [vmem:[%s21295_s13 + $0x374] sm:$0xf0]  ;;  %v12710_v32 = vor.u32 %v14122_v31, %v12709_v33  ;;  %v13077_v57 = vld [vmem:[%s21295_s13 + $0x460] sm:$0xf]  ;;  %v13069_v21 = vld [vmem:[%s21295_s13 + $0x450] sm:$0xf] }
 0xa75   : > { %v7610_v11 = vmul.f32 1.4142135, %v7604_v24  ;;  %v12958_v26 = vor.u32 %v14184_v10, %v12957_v0 }
 0xa76   : > { %9656 = vmatpush.bf16.msra.mxu1 %v12710_v32  ;;  %v14176_v32 = vld [vmem:[%s21295_s13 + $0x334] sm:$0xf0] }
 0xa77   : > { %v19050_v61 = vmul.f32 %v18789_v13, %v7610_v11  ;;  %v7584_v6 = vpop.f32.mrf.mxu1  ;;  %9703 = vmatpush.bf16.msrb.mxu3 %v12958_v26  ;;  %v13014_v11 = vor.u32 %v14198_v1, %v13013_v14  ;;  %v14138_v26 = vld [vmem:[%s21295_s13 + $0x204] sm:$0xf0] }
 0xa78   : > { %v7585_v8 = vadd.f32 %v7584_v6, %v7567_v37 }
 0xa79   : > { %v7655_v13 = vrot.slane %v19050_v61, 1  ;;  %v12941_v61 = vld [vmem:[%s21295_s13 + $0x350] sm:$0xf] }
 0xa7a   : > { %vm7594_vm9 = vcmp.ge.f32.partialorder %v7585_v8, 0.0  ;;  %v7600_v35 = vmul.f32 0.2, %v7585_v8  ;;  %9721 = vmatpush.bf16.msrb.mxu1 %v13022_v23  ;;  %v14216_v23 = vld [vmem:[%s21295_s13 + $0x474] sm:$0xf0] }
 0xa7b   : > { %7673 = vst [vmem:[#allocation3] sm:$0x80] %v7655_v13  ;;  %9704 = vmatpush.bf16.msrb.mxu3 %v12950_v55  ;;  %v12917_v55 = vld [vmem:[%s21295_s13 + $0x320] sm:$0xf] }
 0xa7c   : > { %v7606_v56 = vsel %vm7594_vm9, %v7585_v8, %v7600_v35  ;;  %vm21342_vm9 = vcmask 1043456  }
 0xa7d   : > { %v7612_v46 = vmul.f32 1.4142135, %v7606_v56  ;;  %v12845_v56 = vld [vmem:[%s21295_s13 + $0x290] sm:$0xf] }
 0xa7e   : > { %v12846_v27 = vor.u32 %v14156_v63, %v12845_v56  ;;  %9722 = vmatpush.bf16.msrb.mxu1 %v13014_v11  ;;  %v14190_v11 = vld [vmem:[%s21295_s13 + $0x3a4] sm:$0xf0]  ;;  %v14188_v56 = vld [vmem:[%s21295_s13 + $0x394] sm:$0xf0] }
 0xa7f   : > { %v19095_v51 = vmul.f32 %v18793_v49, %v7612_v46  ;;  %v7587_v25 = vpop.f32.mrf.mxu1  ;;  %v12798_v49 = vor.u32 %v14144_v15, %v12797_v29  ;;  %v14178_v46 = vld [vmem:[%s21295_s13 + $0x344] sm:$0xf0]  ;;  %v14228_v63 = vld [vmem:[%s21295_s13 + $0x4d4] sm:$0xf0] }
 0xa80   : > { %v7588_v39 = vadd.f32 %v7587_v25, %v7570_v59  ;;  %v12934_v30 = vor.u32 %v14178_v46, %v12933_v40  ;;  %v12997_v59 = vld [vmem:[%s21295_s13 + $0x3c0] sm:$0xf]  ;;  %9691 = vmatpush.bf16.msrb.mxu0 %v12846_v27 }
 0xa81   : > { %v7658_v7 = vrot.slane %v19095_v51, 1  ;;  %9671 = vmatpush.bf16.msra.mxu2 %v12798_v49  ;;  %v12773_v51 = vld [vmem:[%s21295_s13 + $0x200] sm:$0xf]  ;;  %v12998_v25 = vor.u32 %v14194_v36, %v12997_v59  ;;  %v12989_v49 = vld [vmem:[%s21295_s13 + $0x3b0] sm:$0xf] }
 0xa82   : > { %vm7596_vm11 = vcmp.ge.f32.partialorder %v7588_v39, 0.0  ;;  %v7602_v24 = vmul.f32 0.2, %v7588_v39  ;;  %v7681_v48 = vld [vmem:[#allocation3] sm:$0xff]  ;;  %v12774_v52 = vor.u32 %v14138_v26, %v12773_v51 }
 0xa83   : > { %v7659_v38 = vsel %vm912_vm0, %v7655_v13, %v7658_v7  ;;  %v7690_v12 = vpack.c.bf16 %v7681_v48, %v7680_v22  ;;  %v14196_v13 = vld [vmem:[%s21295_s13 + $0x3d4] sm:$0xf0]  ;;  %v13085_v22 = vld [vmem:[%s21295_s13 + $0x470] sm:$0xf] }
 0xa84   : > { %v7608_v37 = vsel %vm7596_vm11, %v7588_v39, %v7602_v24  ;;  %v19136_v42 = vpack.c.bf16 %v7659_v38, %v18799_v50  ;;  %v14180_v50 = vld [vmem:[%s21295_s13 + $0x354] sm:$0xf0]  ;;  %v13006_v54 = vor.u32 %v14196_v13, %v13005_v47  ;;  %v12925_v39 = vld [vmem:[%s21295_s13 + $0x330] sm:$0xf]  ;;  %v13086_v14 = vor.u32 %v14216_v23, %v13085_v22  ;;  %v14174_v38 = vld [vmem:[%s21295_s13 + $0x324] sm:$0xf0] }
 0xa85   : > { %v7614_v6 = vmul.f32 1.4142135, %v7608_v37  ;;  %v7698_v2 = vunpack.c.l.b16 %v7690_v12  ;;  %v7699_v58 = vunpack.c.h.b16 %v7690_v12  ;;  %v12942_v17 = vor.u32 %v14180_v50, %v12941_v61  ;;  %9672 = vmatpush.bf16.msra.mxu2 %v12790_v3  ;;  %v13149_v24 = vld [vmem:[%s21295_s13 + $0x4f0] sm:$0xf]  ;;  %v14232_v48 = vld [vmem:[%s21295_s13 + $0x4f4] sm:$0xf0]  ;;  %vm21343_vm11 = vmmov %vm21342_vm9 }
 0xa86   : > { %v7700_v8 = vunpack.c.l.b16 %v19136_v42  ;;  %v7701_v41 = vunpack.c.h.b16 %v19136_v42  ;;  %9723 = vmatpush.bf16.msrb.mxu1 %v13006_v54  ;;  %v12926_v5 = vor.u32 %v14176_v32, %v12925_v39  ;;  %v13150_v1 = vor.u32 %v14232_v48, %v13149_v24  ;;  %v12981_v12 = vld [vmem:[%s21295_s13 + $0x3a0] sm:$0xf]  ;;  %v14214_v61 = vld [vmem:[%s21295_s13 + $0x464] sm:$0xf0]  ;;  %v14248_v24 = vld [vmem:[%s21295_s13 + $0x574] sm:$0xf0] }
 0xa87   : > { %v7638_v35 = vmul.f32 %v18801_v45, %v7614_v6  ;;  %v7589_v33 = vpop.f32.mrf.mxu1  ;;  %9705 = vmatpush.bf16.msrb.mxu3 %v12942_v17  ;;  %v12918_v3 = vor.u32 %v14174_v38, %v12917_v55  ;;  %v13078_v42 = vor.u32 %v14214_v61, %v13077_v57  ;;  %v12982_v13 = vor.u32 %v14190_v11, %v12981_v12  ;;  %v13277_v48 = vld [vmem:[%s21295_s13 + $0x5f0] sm:$0xf]  ;;  %v14264_v12 = vld [vmem:[%s21295_s13 + $0x5f4] sm:$0xf0] }
 0xa88   : > { %v19173_v4 = vpack.c.b16 %v7700_v8, %v7698_v2  ;;  %v19177_v45 = vpack.c.b16 %v7701_v41, %v7699_v58  ;;  %v13141_v2 = vld [vmem:[%s21295_s13 + $0x4e0] sm:$0xf]  ;;  %v14230_v58 = vld [vmem:[%s21295_s13 + $0x4e4] sm:$0xf0]  ;;  %v13053_v11 = vld [vmem:[%s21295_s13 + $0x430] sm:$0xf] }
 0xa89   : > { %v7662_v31 = vrot.slane %v7638_v35, 1  ;;  %9673 = vmatpush.bf16.msra.mxu2 %v12782_v9  ;;  %v13142_v47 = vor.u32 %v14230_v58, %v13141_v2  ;;  %v13133_v35 = vld [vmem:[%s21295_s13 + $0x4d0] sm:$0xf]  ;;  %v14224_v61 = vld [vmem:[%s21295_s13 + $0x4b4] sm:$0xf0] }
 0xa8a   : > { %9603 = vmatmul.bf16.vlgmr.msrb.gmra.mxu2 %v19173_v4  ;;  %9621 = vmatmul.bf16.vlgmr.msra.gmra.mxu0 %v19177_v45  ;;  %v7720_v60 = vshll.u32 %v19173_v4, 16  ;;  %v7732_v37 = vshll.u32 %v19177_v45, 16  ;;  %v12973_v9 = vld [vmem:[%s21295_s13 + $0x390] sm:$0xf]  ;;  %v7718_v54 = vshrl.u32 %v19173_v4, 16  ;;  %v13134_v36 = vor.u32 %v14228_v63, %v13133_v35 }
 0xa8b   : > { %v7663_v0 = vsel %vm912_vm0, %v7658_v7, %v7662_v31  ;;  %7679 = vst [vmem:[#allocation3 + $0x38] sm:$0x7f] %v7662_v31  ;;  %9706 = vmatpush.bf16.msrb.mxu3 %v12934_v30  ;;  %v14192_v7 = vld [vmem:[%s21295_s13 + $0x3b4] sm:$0xf0]  ;;  %9724 = vmatpush.bf16.msrb.mxu1 %v12998_v25  ;;  %v13070_v31 = vor.u32 %v14212_v18, %v13069_v21  ;;  %v7730_v25 = vshrl.u32 %v19177_v45, 16 }
 0xa8c   : > { %v7692_v10 = vpack.c.bf16 %v7663_v0, %v18806_v19  ;;  %v14154_v19 = vld [vmem:[%s21295_s13 + $0x284] sm:$0xf0]  ;;  %v12990_v43 = vor.u32 %v14192_v7, %v12989_v49  ;;  %v7722_v50 = vrot.slane %v7720_v60, 1  ;;  %v7734_v46 = vrot.slane %v7732_v37, 1  ;;  %v12901_v0 = vld [vmem:[%s21295_s13 + $0x300] sm:$0xf] }
 0xa8d   : > { %v12838_v62 = vor.u32 %v14154_v19, %v12837_v28  ;;  %9674 = vmatpush.bf16.msra.mxu2 %v12774_v52  ;;  %v12974_v28 = vor.u32 %v14188_v56, %v12973_v9  ;;  %v13117_v57 = vld [vmem:[%s21295_s13 + $0x4b0] sm:$0xf]  ;;  %v14246_v2 = vld [vmem:[%s21295_s13 + $0x564] sm:$0xf0]  ;;  %v13269_v58 = vld [vmem:[%s21295_s13 + $0x5e0] sm:$0xf] }
 0xa8e   : > { %v7702_v29 = vunpack.c.l.b16 %v7692_v10  ;;  %v7703_v15 = vunpack.c.h.b16 %v7692_v10  ;;  %v14170_v10 = vld [vmem:[%s21295_s13 + $0x304] sm:$0xf0]  ;;  %v7723_v19 = vor.u32 %v7722_v50, %v7718_v54  ;;  %v7735_v32 = vor.u32 %v7734_v46, %v7730_v25  ;;  %v13109_v18 = vld [vmem:[%s21295_s13 + $0x4a0] sm:$0xf]  ;;  %v14244_v9 = vld [vmem:[%s21295_s13 + $0x554] sm:$0xf0] }
 0xa8f   : > { %9692 = vmatpush.bf16.msrb.mxu0 %v12838_v62  ;;  %9707 = vmatpush.bf16.msrb.mxu3 %v12926_v5  ;;  %v12902_v52 = vor.u32 %v14170_v10, %v12901_v0  ;;  %v13061_v62 = vld [vmem:[%s21295_s13 + $0x440] sm:$0xf]  ;;  %v14210_v5 = vld [vmem:[%s21295_s13 + $0x444] sm:$0xf0]  ;;  %v13118_v50 = vor.u32 %v14224_v61, %v13117_v57  ;;  %v13037_v0 = vld [vmem:[%s21295_s13 + $0x410] sm:$0xf] }
 0xa90   : > { %v19243_v53 = vpack.c.b16 %v7702_v29, %v7700_v8  ;;  %v19247_v16 = vpack.c.b16 %v7703_v15, %v7701_v41  ;;  %v14172_v8 = vld [vmem:[%s21295_s13 + $0x314] sm:$0xf0]  ;;  %9725 = vmatpush.bf16.msrb.mxu1 %v12990_v43  ;;  %v19301_v30 = vpack.c.b16 %v7702_v29, %v7702_v29  ;;  %v19303_v59 = vpack.c.b16 %v7703_v15, %v7703_v15  ;;  %v14226_v43 = vld [vmem:[%s21295_s13 + $0x4c4] sm:$0xf0]  ;;  %v13029_v57 = vld [vmem:[%s21295_s13 + $0x400] sm:$0xf] }
 0xa91   : > { %9739 = vmatpush.bf16.msrb.mxu2 %v13086_v14  ;;  %v12910_v33 = vor.u32 %v14172_v8, %v12909_v20  ;;  %v13213_v14 = vld [vmem:[%s21295_s13 + $0x570] sm:$0xf]  ;;  %v13062_v55 = vor.u32 %v14210_v5, %v13061_v62  ;;  %v14262_v20 = vld [vmem:[%s21295_s13 + $0x5e4] sm:$0xf0]  ;;  %v13045_v8 = vld [vmem:[%s21295_s13 + $0x420] sm:$0xf] }
 0xa92   : > { %v7687_v34 = vld [vmem:[#allocation3 + $0x38] sm:$0xff]  ;;  %v13214_v38 = vor.u32 %v14248_v24, %v13213_v14  ;;  %v13270_v21 = vor.u32 %v14262_v20, %v13269_v58  ;;  %v14204_v10 = vld [vmem:[%s21295_s13 + $0x414] sm:$0xf0]  ;;  %v13189_v5 = vld [vmem:[%s21295_s13 + $0x540] sm:$0xf] }
 0xa93   : > { %v7693_v6 = vpack.c.bf16 %v7687_v34, %v7686_v44  ;;  %9757 = vmatpush.bf16.msra.mxu0 %v13150_v1  ;;  %9708 = vmatpush.bf16.msrb.mxu3 %v12918_v3  ;;  %v13125_v44 = vld [vmem:[%s21295_s13 + $0x4c0] sm:$0xf]  ;;  %v14208_v34 = vld [vmem:[%s21295_s13 + $0x434] sm:$0xf0]  ;;  %v13278_v3 = vor.u32 %v14264_v12, %v13277_v48  ;;  %v14222_v35 = vld [vmem:[%s21295_s13 + $0x4a4] sm:$0xf0]  ;;  %v13038_v14 = vor.u32 %v14204_v10, %v13037_v0 }
 0xa94   : > { %9726 = vmatpush.bf16.msrb.mxu1 %v12982_v13  ;;  %v13126_v1 = vor.u32 %v14226_v43, %v13125_v44  ;;  %v14206_v13 = vld [vmem:[%s21295_s13 + $0x424] sm:$0xf0]  ;;  %v14220_v62 = vld [vmem:[%s21295_s13 + $0x494] sm:$0xf0]  ;;  %v13253_v24 = vld [vmem:[%s21295_s13 + $0x5c0] sm:$0xf] }
 0xa95   : > { %v19270_v41 = vunpack.c.l.b16 %v7693_v6  ;;  %v19272_v17 = vunpack.c.h.b16 %v7693_v6  ;;  %9740 = vmatpush.bf16.msrb.mxu2 %v13078_v42  ;;  %v13205_v6 = vld [vmem:[%s21295_s13 + $0x560] sm:$0xf]  ;;  %v13054_v42 = vor.u32 %v14208_v34, %v13053_v11  ;;  %v13046_v46 = vor.u32 %v14206_v13, %v13045_v8  ;;  %v14258_v48 = vld [vmem:[%s21295_s13 + $0x5c4] sm:$0xf0]  ;;  %v13245_v58 = vld [vmem:[%s21295_s13 + $0x5b0] sm:$0xf] }
 0xa96   : > { %v14202_v61 = vld [vmem:[%s21295_s13 + $0x404] sm:$0xf0]  ;;  %v13341_v8 = vld [vmem:[%s21295_s13 + $0x670] sm:$0xf]  ;;  %v14280_v13 = vld [vmem:[%s21295_s13 + $0x674] sm:$0xf0] }
 0xa97   : > { %v19293_v40 = vpack.c.b16 %v19270_v41, %v7702_v29  ;;  %v19296_v27 = vpack.c.b16 %v19272_v17, %v7703_v15  ;;  %9758 = vmatpush.bf16.msra.mxu0 %v13142_v47  ;;  %v12965_v29 = vld [vmem:[%s21295_s13 + $0x380] sm:$0xf]  ;;  %v14186_v15 = vld [vmem:[%s21295_s13 + $0x384] sm:$0xf0]  ;;  %9709 = vmatpush.bf16.msrb.mxu3 %v12910_v33  ;;  %v13206_v47 = vor.u32 %v14246_v2, %v13205_v6  ;;  %v13197_v33 = vld [vmem:[%s21295_s13 + $0x550] sm:$0xf] }
 0xa98   : > { %9727 = vmatpush.bf16.msrb.mxu1 %v12974_v28  ;;  %v12966_v23 = vor.u32 %v14186_v15, %v12965_v29  ;;  %v7751_v28 = vrot.slane %v19173_v4, 1  ;;  %v13110_v29 = vor.u32 %v14222_v35, %v13109_v18  ;;  %v13198_v15 = vor.u32 %v14244_v9, %v13197_v33  ;;  %v14240_v2 = vld [vmem:[%s21295_s13 + $0x534] sm:$0xf0]  ;;  %v13405_v35 = vld [vmem:[%s21295_s13 + $0x6f0] sm:$0xf] }
 0xa99   : > { %v7725_v51 = vshll.u32 %v19293_v40, 16  ;;  %v7737_v26 = vshll.u32 %v19296_v27, 16  ;;  %9741 = vmatpush.bf16.msrb.mxu2 %v13070_v31  ;;  %v19411_v56 = vrot.slane %v19293_v40, 1  ;;  %v19414_v63 = vrot.slane %v19296_v27, 1  ;;  %v13261_v31 = vld [vmem:[%s21295_s13 + $0x5d0] sm:$0xf] }
 0xa9a   : > { %9608 = vmatmul.bf16.gmra.mxu2 %v19301_v30  ;;  %9626 = vmatmul.bf16.gmra.mxu0 %v19303_v59  ;;  %v13030_v6 = vor.u32 %v14202_v61, %v13029_v57  ;;  %v13342_v18 = vor.u32 %v14280_v13, %v13341_v8  ;;  %v14296_v33 = vld [vmem:[%s21295_s13 + $0x6f4] sm:$0xf0]  ;;  %v13173_v9 = vld [vmem:[%s21295_s13 + $0x520] sm:$0xf]  ;;  %v14254_v0 = vld [vmem:[%s21295_s13 + $0x5a4] sm:$0xf0] }
 0xa9b   : > { %v19326_v39 = vrot.slane %v7725_v51, 1  ;;  %v19332_v49 = vrot.slane %v7737_v26, 1  ;;  %9759 = vmatpush.bf16.msra.mxu0 %v13134_v36  ;;  %9710 = vmatpush.bf16.msrb.mxu3 %v12902_v52  ;;  %v14260_v36 = vld [vmem:[%s21295_s13 + $0x5d4] sm:$0xf0]  ;;  %v19444_v44 = vsel %vm912_vm0, %v7751_v28, %v19411_v56  ;;  %v13333_v10 = vld [vmem:[%s21295_s13 + $0x660] sm:$0xf] }
 0xa9c   : > { %9728 = vmatpush.bf16.msrb.mxu1 %v12966_v23  ;;  %v13262_v52 = vor.u32 %v14260_v36, %v13261_v31  ;;  %v14242_v23 = vld [vmem:[%s21295_s13 + $0x544] sm:$0xf0]  ;;  %v13237_v36 = vld [vmem:[%s21295_s13 + $0x5a0] sm:$0xf]  ;;  %v7764_v8 = vrot.slane %v19177_v45, 3  ;;  %v19580_v13 = vrot.slane %v7718_v54, 3 }
 0xa9d   : > { %v19342_v7 = vsel %vm727_vm2, %v7723_v19, %v19326_v39  ;;  %v19346_v22 = vsel %vm727_vm2, %v7735_v32, %v19332_v49  ;;  %9742 = vmatpush.bf16.msrb.mxu2 %v13062_v55  ;;  %v7754_v19 = vrot.slane %v19177_v45, 1  ;;  %v13101_v32 = vld [vmem:[%s21295_s13 + $0x490] sm:$0xf]  ;;  %v7741_v55 = vshrl.u32 %v19293_v40, 16  ;;  %v14238_v31 = vld [vmem:[%s21295_s13 + $0x524] sm:$0xf0] }
 0xa9e   : > { %9639 = vmatmul.bf16.vlgmr.msra.gmra.mxu3 %v19342_v7  ;;  %9657 = vmatmul.bf16.vlgmr.msra.gmra.mxu1 %v19346_v22  ;;  %v13190_v12 = vor.u32 %v14242_v23, %v13189_v5  ;;  %v14278_v28 = vld [vmem:[%s21295_s13 + $0x664] sm:$0xf0]  ;;  %v13238_v5 = vor.u32 %v14254_v0, %v13237_v36  ;;  %v19596_v54 = vrot.slane %v7732_v37, 4  ;;  %vm21334_vm2 = vcmask 1044480   ;;  %v13317_v37 = vld [vmem:[%s21295_s13 + $0x640] sm:$0xf] }
 0xa9f   : > { %9760 = vmatpush.bf16.msra.mxu0 %v13126_v1  ;;  %9775 = vmatpush.bf16.msra.mxu3 %v13214_v38  ;;  %v19448_v43 = vsel %vm912_vm0, %v7754_v19, %v19414_v63  ;;  %v7744_v1 = vshrl.u32 %v19296_v27, 16  ;;  %v13102_v38 = vor.u32 %v14220_v62, %v13101_v32  ;;  %v19463_v11 = vor.u32 %v7741_v55, %v19326_v39  ;;  %v13093_v39 = vld [vmem:[%s21295_s13 + $0x480] sm:$0xf]  ;;  %v14294_v32 = vld [vmem:[%s21295_s13 + $0x6e4] sm:$0xf0]  ;;  %vm21335_vm12 = vmmov %vm21334_vm2 }
 0xaa0   : > { %9793 = vmatpush.bf16.msra.mxu1 %v13278_v3  ;;  %v13254_v3 = vor.u32 %v14258_v48, %v13253_v24  ;;  %v13397_v19 = vld [vmem:[%s21295_s13 + $0x6e0] sm:$0xf]  ;;  %v14236_v62 = vld [vmem:[%s21295_s13 + $0x514] sm:$0xf0]  ;;  %v13325_v48 = vld [vmem:[%s21295_s13 + $0x650] sm:$0xf] }
 0xaa1   : > { %9743 = vmatpush.bf16.msrb.mxu2 %v13054_v42  ;;  %v19468_v34 = vor.u32 %v7744_v1, %v19332_v49  ;;  %v14218_v49 = vld [vmem:[%s21295_s13 + $0x484] sm:$0xf0]  ;;  %v13181_v42 = vld [vmem:[%s21295_s13 + $0x530] sm:$0xf]  ;;  %v13398_v23 = vor.u32 %v14294_v32, %v13397_v19  ;;  %v14252_v24 = vld [vmem:[%s21295_s13 + $0x594] sm:$0xf0] }
 0xaa2   : > { %v13094_v20 = vor.u32 %v14218_v49, %v13093_v39  ;;  %v13157_v49 = vld [vmem:[%s21295_s13 + $0x500] sm:$0xf]  ;;  %v14312_v36 = vld [vmem:[%s21295_s13 + $0x774] sm:$0xf0]  ;;  %vm21340_vm1 = vmmov %vm21334_vm2 }
 0xaa3   : > { %9761 = vmatpush.bf16.msra.mxu0 %v13118_v50  ;;  %9776 = vmatpush.bf16.msra.mxu3 %v13206_v47  ;;  %v13182_v50 = vor.u32 %v14240_v2, %v13181_v42  ;;  %v14256_v47 = vld [vmem:[%s21295_s13 + $0x5b4] sm:$0xf0]  ;;  %v14234_v42 = vld [vmem:[%s21295_s13 + $0x504] sm:$0xf0]  ;;  %v19563_v2 = vrot.slane %v19293_v40, 3  ;;  %vm21341_vm3 = vmmov %vm21340_vm1 }
 0xaa4   : > { %9794 = vmatpush.bf16.msra.mxu1 %v13270_v21  ;;  %v13246_v21 = vor.u32 %v14256_v47, %v13245_v58  ;;  %v19566_v58 = vrot.slane %v19296_v27, 3  ;;  %v7761_v47 = vrot.slane %v19173_v4, 3  ;;  %v14274_v27 = vld [vmem:[%s21295_s13 + $0x644] sm:$0xf0]  ;;  %v14328_v19 = vld [vmem:[%s21295_s13 + $0x7f4] sm:$0xf0] }
 0xaa5   : > { %9744 = vmatpush.bf16.msrb.mxu2 %v13046_v46  ;;  %v13406_v46 = vor.u32 %v14296_v33, %v13405_v35  ;;  %v13158_v35 = vor.u32 %v14234_v42, %v13157_v49  ;;  %v7775_v33 = vrot.slane %v7741_v55, 3  ;;  %v14290_v55 = vld [vmem:[%s21295_s13 + $0x6c4] sm:$0xf0]  ;;  %v14272_v32 = vld [vmem:[%s21295_s13 + $0x634] sm:$0xf0] }
 0xaa6   : > { %v19608_v40 = vsel %vm21335_vm12, %v7764_v8, %v19566_v58  ;;  %v13453_v49 = vld [vmem:[%s21295_s13 + $0x750] sm:$0xf] }
 0xaa7   : > { %9762 = vmatpush.bf16.msra.mxu0 %v13110_v29  ;;  %9777 = vmatpush.bf16.msra.mxu3 %v13198_v15  ;;  %v13174_v29 = vor.u32 %v14238_v31, %v13173_v9  ;;  %v13334_v15 = vor.u32 %v14278_v28, %v13333_v10  ;;  %v7776_v9 = vrot.slane %v7725_v51, 4  ;;  %v19604_v31 = vsel %vm21334_vm2, %v7761_v47, %v19563_v2  ;;  %v13381_v51 = vld [vmem:[%s21295_s13 + $0x6c0] sm:$0xf]  ;;  %v13533_v28 = vld [vmem:[%s21295_s13 + $0x7f0] sm:$0xf] }
 0xaa8   : > { %9795 = vmatpush.bf16.msra.mxu1 %v13262_v52  ;;  %v13165_v52 = vld [vmem:[%s21295_s13 + $0x510] sm:$0xf]  ;;  %v13382_v0 = vor.u32 %v14290_v55, %v13381_v51  ;;  %v14308_v47 = vld [vmem:[%s21295_s13 + $0x754] sm:$0xf0]  ;;  %v13445_v55 = vld [vmem:[%s21295_s13 + $0x740] sm:$0xf] }
 0xaa9   : > { %9745 = vmatpush.bf16.msrb.mxu2 %v13038_v14  ;;  %v13229_v14 = vld [vmem:[%s21295_s13 + $0x590] sm:$0xf]  ;;  %v13166_v57 = vor.u32 %v14236_v62, %v13165_v52  ;;  %v14288_v62 = vld [vmem:[%s21295_s13 + $0x6b4] sm:$0xf0]  ;;  %v19675_v42 = vor.u32 %v7776_v9, %v7775_v33 }
 0xaaa   : > { %9675 = vmatmul.bf16.vlgmr.msra.gmra.mxu2 %v19444_v44  ;;  %9693 = vmatmul.bf16.vlgmr.msrb.gmra.mxu0 %v19448_v43  ;;  %v13230_v39 = vor.u32 %v14252_v24, %v13229_v14  ;;  %v13373_v52 = vld [vmem:[%s21295_s13 + $0x6b0] sm:$0xf]  ;;  %v13461_v14 = vld [vmem:[%s21295_s13 + $0x760] sm:$0xf]  ;;  %v14310_v24 = vld [vmem:[%s21295_s13 + $0x764] sm:$0xf0] }
 0xaab   : > { %9763 = vmatpush.bf16.msra.mxu0 %v13102_v38  ;;  %9778 = vmatpush.bf16.msra.mxu3 %v13190_v12  ;;  %v14276_v38 = vld [vmem:[%s21295_s13 + $0x654] sm:$0xf0]  ;;  %v13389_v12 = vld [vmem:[%s21295_s13 + $0x6d0] sm:$0xf] }
 0xaac   : > { %9796 = vmatpush.bf16.msra.mxu1 %v13254_v3  ;;  %v14292_v3 = vld [vmem:[%s21295_s13 + $0x6d4] sm:$0xf0]  ;;  %v13326_v61 = vor.u32 %v14276_v38, %v13325_v48  ;;  %v13525_v48 = vld [vmem:[%s21295_s13 + $0x7e0] sm:$0xf]  ;;  %v13462_v38 = vor.u32 %v14310_v24, %v13461_v14  ;;  %v13517_v8 = vld [vmem:[%s21295_s13 + $0x7d0] sm:$0xf] }
 0xaad   : > { %9746 = vmatpush.bf16.msrb.mxu2 %v13030_v6  ;;  %v13390_v6 = vor.u32 %v14292_v3, %v13389_v12  ;;  %v14326_v12 = vld [vmem:[%s21295_s13 + $0x7e4] sm:$0xf0]  ;;  %v13301_v3 = vld [vmem:[%s21295_s13 + $0x620] sm:$0xf]  ;;  %v13293_v33 = vld [vmem:[%s21295_s13 + $0x610] sm:$0xf] }
 0xaae   : > { %9644 = vmatmul.bf16.gmra.mxu3 %v19463_v11  ;;  %9662 = vmatmul.bf16.gmra.mxu1 %v19468_v34  ;;  %v14268_v9 = vld [vmem:[%s21295_s13 + $0x614] sm:$0xf0]  ;;  %v13501_v24 = vld [vmem:[%s21295_s13 + $0x7b0] sm:$0xf] }
 0xaaf   : > { %9764 = vmatpush.bf16.msra.mxu0 %v13094_v20  ;;  %9779 = vmatpush.bf16.msra.mxu3 %v13182_v50  ;;  %v13221_v20 = vld [vmem:[%s21295_s13 + $0x580] sm:$0xf]  ;;  %v14250_v50 = vld [vmem:[%s21295_s13 + $0x584] sm:$0xf0] }
 0xab0   : > { %9797 = vmatpush.bf16.msra.mxu1 %v13246_v21  ;;  %v19584_v21 = vrot.slane %v7720_v60, 4  ;;  %v13222_v60 = vor.u32 %v14250_v50, %v13221_v20 }
 0xab1   : > { %9811 = vmatpush.bf16.msra.mxu2 %v13342_v18  ;;  %v19588_v18 = vrot.slane %v7730_v25, 3  ;;  %v7782_v25 = vrot.slane %v7744_v1, 3  ;;  %v13469_v1 = vld [vmem:[%s21295_s13 + $0x770] sm:$0xf] }
 0xab2   : > { %v13470_v10 = vor.u32 %v14312_v36, %v13469_v1  ;;  %v13509_v1 = vld [vmem:[%s21295_s13 + $0x7c0] sm:$0xf]  ;;  %v14322_v36 = vld [vmem:[%s21295_s13 + $0x7c4] sm:$0xf0] }
 0xab3   : > { %9829 = vmatpush.bf16.msrb.mxu0 %v13406_v46  ;;  %9780 = vmatpush.bf16.msra.mxu3 %v13174_v29  ;;  %v7783_v46 = vrot.slane %v7737_v26, 4  ;;  %v13318_v26 = vor.u32 %v14274_v27, %v13317_v37  ;;  %v13309_v29 = vld [vmem:[%s21295_s13 + $0x630] sm:$0xf]  ;;  %v13454_v37 = vor.u32 %v14308_v47, %v13453_v49  ;;  %v13429_v47 = vld [vmem:[%s21295_s13 + $0x720] sm:$0xf] }
 0xab4   : > { %9798 = vmatpush.bf16.msra.mxu1 %v13238_v5  ;;  %v13310_v5 = vor.u32 %v14272_v32, %v13309_v29  ;;  %v13357_v27 = vld [vmem:[%s21295_s13 + $0x690] sm:$0xf]  ;;  %v14266_v29 = vld [vmem:[%s21295_s13 + $0x604] sm:$0xf0] }
 0xab5   : > { %9812 = vmatpush.bf16.msra.mxu2 %v13334_v15  ;;  %v13534_v15 = vor.u32 %v14328_v19, %v13533_v28  ;;  %v19677_v20 = vor.u32 %v7783_v46, %v7782_v25  ;;  %v7781_v25 = vor.u32 %v19596_v54, %v19588_v18  ;;  %v13294_v54 = vor.u32 %v14268_v9, %v13293_v33  ;;  %v13285_v19 = vld [vmem:[%s21295_s13 + $0x600] sm:$0xf]  ;;  %v14318_v9 = vld [vmem:[%s21295_s13 + $0x7a4] sm:$0xf0] }
 0xab6   : > { %v13510_v28 = vor.u32 %v14322_v36, %v13509_v1  ;;  %v13286_v32 = vor.u32 %v14266_v29, %v13285_v19  ;;  %v14300_v1 = vld [vmem:[%s21295_s13 + $0x714] sm:$0xf0]  ;;  %v13485_v36 = vld [vmem:[%s21295_s13 + $0x790] sm:$0xf] }
 0xab7   : > { %9830 = vmatpush.bf16.msrb.mxu0 %v13398_v23  ;;  %9781 = vmatpush.bf16.msra.mxu3 %v13166_v57  ;;  %v13374_v23 = vor.u32 %v14288_v62, %v13373_v52  ;;  %v14270_v57 = vld [vmem:[%s21295_s13 + $0x624] sm:$0xf0]  ;;  %v19716_v18 = vsel %vm7771_vm13, %v7781_v25, %v19677_v20  ;;  %v13437_v62 = vld [vmem:[%s21295_s13 + $0x730] sm:$0xf] }
 0xab8   : > { %9799 = vmatpush.bf16.msra.mxu1 %v13230_v39  ;;  %v13365_v39 = vld [vmem:[%s21295_s13 + $0x6a0] sm:$0xf]  ;;  %v13302_v50 = vor.u32 %v14270_v57, %v13301_v3  ;;  %v14282_v52 = vld [vmem:[%s21295_s13 + $0x684] sm:$0xf0]  ;;  %v13645_v19 = vld [vmem:[%s21295_s13 + $0x8d0] sm:$0xf] }
 0xab9   : > { %9813 = vmatpush.bf16.msra.mxu2 %v13326_v61  ;;  %v13526_v61 = vor.u32 %v14326_v12, %v13525_v48  ;;  %v14320_v48 = vld [vmem:[%s21295_s13 + $0x7b4] sm:$0xf0]  ;;  %v14397_v3 = vld [vmem:[#allocation2] sm:$0xff]  ;;  %v14342_v25 = vld [vmem:[%s21295_s13 + $0x864] sm:$0xf0] }
 0xaba   : > { %9680 = vmatmul.bf16.gmra.mxu2 %v19411_v56  ;;  %9698 = vmatmul.bf16.gmra.mxu0 %v19414_v63  ;;  %v13502_v12 = vor.u32 %v14320_v48, %v13501_v24  ;;  %v7694_v57 = vpack.c.bf16 %v14397_v3, %v14397_v3  ;;  %v13477_v48 = vld [vmem:[%s21295_s13 + $0x780] sm:$0xf] }
 0xabb   : > { %9831 = vmatpush.bf16.msrb.mxu0 %v13390_v6  ;;  %9782 = vmatpush.bf16.msra.mxu3 %v13158_v35  ;;  %v14286_v6 = vld [vmem:[%s21295_s13 + $0x6a4] sm:$0xf0]  ;;  %v14324_v35 = vld [vmem:[%s21295_s13 + $0x7d4] sm:$0xf0] }
 0xabc   : > { %9800 = vmatpush.bf16.msra.mxu1 %v13222_v60  ;;  %v7774_v60 = vor.u32 %v19584_v21, %v19580_v13  ;;  %v13366_v46 = vor.u32 %v14286_v6, %v13365_v39  ;;  %v13518_v51 = vor.u32 %v14324_v35, %v13517_v8  ;;  %v14306_v13 = vld [vmem:[%s21295_s13 + $0x744] sm:$0xf0]  ;;  %v13661_v39 = vld [vmem:[%s21295_s13 + $0x8f0] sm:$0xf]  ;;  %v14360_v6 = vld [vmem:[%s21295_s13 + $0x8f4] sm:$0xf0] }
 0xabd   : > { %9814 = vmatpush.bf16.msra.mxu2 %v13318_v26  ;;  %v14284_v26 = vld [vmem:[%s21295_s13 + $0x694] sm:$0xf0]  ;;  %v14302_v8 = vld [vmem:[%s21295_s13 + $0x724] sm:$0xf0]  ;;  %v13493_v35 = vld [vmem:[%s21295_s13 + $0x7a0] sm:$0xf] }
 0xabe   : > { %9711 = vmatmul.bf16.vlgmr.msrb.gmra.mxu3 %v19604_v31  ;;  %9729 = vmatmul.bf16.vlgmr.msrb.gmra.mxu1 %v19608_v40  ;;  %v19712_v21 = vsel %vm7771_vm13, %v7774_v60, %v19675_v42  ;;  %v13430_v33 = vor.u32 %v14302_v8, %v13429_v47  ;;  %v13589_v60 = vld [vmem:[%s21295_s13 + $0x860] sm:$0xf]  ;;  %v14354_v47 = vld [vmem:[%s21295_s13 + $0x8c4] sm:$0xf0]  ;;  %v14087_v8 = vld [vmem:[%s21295_s13 + $0x74] sm:$0xf] }
 0xabf   : > { %9832 = vmatpush.bf16.msrb.mxu0 %v13382_v0  ;;  %9847 = vmatpush.bf16.msrb.mxu3 %v13470_v10  ;;  %v13358_v0 = vor.u32 %v14284_v26, %v13357_v27  ;;  %v13446_v10 = vor.u32 %v14306_v13, %v13445_v55  ;;  %v13653_v27 = vld [vmem:[%s21295_s13 + $0x8e0] sm:$0xf]  ;;  %v13421_v26 = vld [vmem:[%s21295_s13 + $0x710] sm:$0xf]  ;;  %v7799_v55 = vunpack.c.l.b16 %v7694_v57  ;;  %v7800_v13 = vunpack.c.h.b16 %v7694_v57 }
 0xac0   : > { %9865 = vmatpush.bf16.msrb.mxu1 %v13534_v15  ;;  %v13349_v15 = vld [vmem:[%s21295_s13 + $0x680] sm:$0xf]  ;;  %v13422_v29 = vor.u32 %v14300_v1, %v13421_v26  ;;  %v14352_v26 = vld [vmem:[%s21295_s13 + $0x8b4] sm:$0xf0]  ;;  %v12567_v1 = vld [vmem:[%s21295_s13 + $0x68] sm:$0xf0] }
 0xac1   : > { %9815 = vmatpush.bf16.msra.mxu2 %v13310_v5  ;;  %v14304_v5 = vld [vmem:[%s21295_s13 + $0x734] sm:$0xf0]  ;;  %vm10538_vm13 = vcmask 1047559  }
 0xac2   : > { %v13438_v14 = vor.u32 %v14304_v5, %v13437_v62  ;;  %v13413_v62 = vld [vmem:[%s21295_s13 + $0x700] sm:$0xf]  ;;  %v14298_v5 = vld [vmem:[%s21295_s13 + $0x704] sm:$0xf0] }
 0xac3   : > { %9833 = vmatpush.bf16.msrb.mxu0 %v13374_v23  ;;  %9848 = vmatpush.bf16.msrb.mxu3 %v13462_v38  ;;  %v13350_v23 = vor.u32 %v14282_v52, %v13349_v15  ;;  %v13597_v38 = vld [vmem:[%s21295_s13 + $0x870] sm:$0xf]  ;;  %v14356_v15 = vld [vmem:[%s21295_s13 + $0x8d4] sm:$0xf0] }
 0xac4   : > { %9866 = vmatpush.bf16.msrb.mxu1 %v13526_v61  ;;  %v14344_v61 = vld [vmem:[%s21295_s13 + $0x874] sm:$0xf0]  ;;  %v13646_v24 = vor.u32 %v14356_v15, %v13645_v19  ;;  %v14334_v19 = vld [vmem:[%s21295_s13 + $0x824] sm:$0xf0]  ;;  %v13621_v15 = vld [vmem:[%s21295_s13 + $0x8a0] sm:$0xf] }
 0xac5   : > { %9816 = vmatpush.bf16.msra.mxu2 %v13302_v50  ;;  %v13598_v49 = vor.u32 %v14344_v61, %v13597_v38  ;;  %v13662_v50 = vor.u32 %v14360_v6, %v13661_v39  ;;  %v14314_v38 = vld [vmem:[%s21295_s13 + $0x784] sm:$0xf0]  ;;  %v13573_v39 = vld [vmem:[%s21295_s13 + $0x840] sm:$0xf] }
 0xac6   : > { %v13478_v3 = vor.u32 %v14314_v38, %v13477_v48  ;;  %v14338_v6 = vld [vmem:[%s21295_s13 + $0x844] sm:$0xf0]  ;;  %v12623_v48 = vld [vmem:[%s21295_s13 + $0xd8] sm:$0xf0]  ;;  %v7803_v38 = vrot.slane %v19243_v53, 2 }
 0xac7   : > { %9834 = vmatpush.bf16.msrb.mxu0 %v13366_v46  ;;  %9849 = vmatpush.bf16.msrb.mxu3 %v13454_v37  ;;  %v13494_v46 = vor.u32 %v14318_v9, %v13493_v35  ;;  %v13590_v37 = vor.u32 %v14342_v25, %v13589_v60  ;;  %v12575_v35 = vld [vmem:[%s21295_s13 + $0x78] sm:$0xf0]  ;;  %v14103_v60 = vld [vmem:[%s21295_s13 + $0xf4] sm:$0xf] }
 0xac8   : > { %9867 = vmatpush.bf16.msrb.mxu1 %v13518_v51  ;;  %v14358_v51 = vld [vmem:[%s21295_s13 + $0x8e4] sm:$0xf0]  ;;  %v12578_v9 = vor.u32 %v14087_v8, %v12575_v35  ;;  %v12639_v25 = vld [vmem:[%s21295_s13 + $0xf8] sm:$0xf0]  ;;  %v13613_v8 = vld [vmem:[%s21295_s13 + $0x890] sm:$0xf] }
 0xac9   : > { %9817 = vmatpush.bf16.msra.mxu2 %v13294_v54  ;;  %v13654_v54 = vor.u32 %v14358_v51, %v13653_v27  ;;  %v14336_v27 = vld [vmem:[%s21295_s13 + $0x834] sm:$0xf0]  ;;  %v13629_v51 = vld [vmem:[%s21295_s13 + $0x8b0] sm:$0xf] }
 0xaca   : > { %9747 = vmatmul.bf16.vlgmr.msrb.gmra.mxu2 %v19712_v21  ;;  %9765 = vmatmul.bf16.vlgmr.msra.gmra.mxu0 %v19716_v18 }
 0xacb   : > { %9835 = vmatpush.bf16.msrb.mxu0 %v13358_v0  ;;  %9850 = vmatpush.bf16.msrb.mxu3 %v13446_v10  ;;  %v14316_v0 = vld [vmem:[%s21295_s13 + $0x794] sm:$0xf0]  ;;  %v13581_v10 = vld [vmem:[%s21295_s13 + $0x850] sm:$0xf] }
 0xacc   : > { %9868 = vmatpush.bf16.msrb.mxu1 %v13510_v28  ;;  %v14340_v28 = vld [vmem:[%s21295_s13 + $0x854] sm:$0xf0] }
 0xacd   : > { %9818 = vmatpush.bf16.msra.mxu2 %v13286_v32  ;;  %v13486_v32 = vor.u32 %v14316_v0, %v13485_v36  ;;  %v13582_v52 = vor.u32 %v14340_v28, %v13581_v10  ;;  %v14101_v36 = vld [vmem:[%s21295_s13 + $0xe4] sm:$0xf]  ;;  %v12631_v10 = vld [vmem:[%s21295_s13 + $0xe8] sm:$0xf0]  ;;  %v13557_v28 = vld [vmem:[%s21295_s13 + $0x820] sm:$0xf] }
 0xace   : > { %9716 = vmatmul.bf16.gmra.mxu3 %v19563_v2  ;;  %9734 = vmatmul.bf16.gmra.mxu1 %v19566_v58 }
 0xacf   : > { %9836 = vmatpush.bf16.msrb.mxu0 %v13350_v23  ;;  %9851 = vmatpush.bf16.msrb.mxu3 %v13438_v14  ;;  %v19819_v23 = vpack.c.b16 %v7799_v55, %v19270_v41  ;;  %v19822_v14 = vpack.c.b16 %v7800_v13, %v19272_v17  ;;  %v13630_v13 = vor.u32 %v14352_v26, %v13629_v51  ;;  %v14097_v26 = vld [vmem:[%s21295_s13 + $0xc4] sm:$0xf] }
 0xad0   : > { %9869 = vmatpush.bf16.msrb.mxu1 %v13502_v12  ;;  %v13414_v12 = vor.u32 %v14298_v5, %v13413_v62  ;;  %v13558_v62 = vor.u32 %v14334_v19, %v13557_v28  ;;  %v12559_v5 = vld [vmem:[%s21295_s13 + $0x58] sm:$0xf0] }
 0xad1   : > { %9883 = vmatpush.bf16.msrb.mxu2 %v13598_v49  ;;  %v19833_v57 = vrot.slane %v19819_v23, 2  ;;  %v19836_v61 = vrot.slane %v19822_v14, 2  ;;  %v13637_v49 = vld [vmem:[%s21295_s13 + $0x8c0] sm:$0xf] }
 0xad3   : > { %9901 = vmatpush.bf16.msra.mxu0 %v13662_v50  ;;  %9852 = vmatpush.bf16.msrb.mxu3 %v13430_v33  ;;  %v13574_v50 = vor.u32 %v14338_v6, %v13573_v39  ;;  %v13638_v33 = vor.u32 %v14354_v47, %v13637_v49  ;;  %v14332_v39 = vld [vmem:[%s21295_s13 + $0x814] sm:$0xf0]  ;;  %v7814_v6 = vshrl.u32 %v19243_v53, 16  ;;  %v7817_v49 = vshll.u32 %v19243_v53, 16 }
 0xad4   : > { %9870 = vmatpush.bf16.msrb.mxu1 %v13494_v46  ;;  %v13565_v46 = vld [vmem:[%s21295_s13 + $0x830] sm:$0xf]  ;;  %v19927_v35 = vsel %vm21336_vm15, %v7803_v38, %v19833_v57  ;;  %v14079_v38 = vld [vmem:[%s21295_s13 + $0x34] sm:$0xf]  ;;  %vm10391_vm15 = vcmask 1047553  }
 0xad5   : > { %9884 = vmatpush.bf16.msrb.mxu2 %v13590_v37  ;;  %v12642_v37 = vor.u32 %v14103_v60, %v12639_v25  ;;  %v13566_v55 = vor.u32 %v14336_v27, %v13565_v46  ;;  %v14081_v60 = vld [vmem:[%s21295_s13 + $0x44] sm:$0xf]  ;;  %v12551_v25 = vld [vmem:[%s21295_s13 + $0x48] sm:$0xf0]  ;;  %v7825_v27 = vshll.u32 %v19819_v23, 16  ;;  %v19963_v28 = vrot.slane %v7817_v49, 3 }
 0xad6   : > { %v12607_v49 = vld [vmem:[%s21295_s13 + $0xb8] sm:$0xf0] }
 0xad7   : > { %9902 = vmatpush.bf16.msra.mxu0 %v13654_v54  ;;  %9853 = vmatpush.bf16.msrb.mxu3 %v13422_v29  ;;  %v14085_v54 = vld [vmem:[%s21295_s13 + $0x64] sm:$0xf]  ;;  %v12634_v29 = vor.u32 %v14101_v36, %v12631_v10  ;;  %v19961_v10 = vrot.slane %v7814_v6, 2  ;;  %v14095_v6 = vld [vmem:[%s21295_s13 + $0xb4] sm:$0xf] }
 0xad8   : > { %9871 = vmatpush.bf16.msrb.mxu1 %v13486_v32  ;;  %v12570_v0 = vor.u32 %v14085_v54, %v12567_v1  ;;  %v14350_v32 = vld [vmem:[%s21295_s13 + $0x8a4] sm:$0xf0]  ;;  %v19958_v54 = vpack.c.b16 %v19272_v17, %v19272_v17  ;;  %v7831_v1 = vshrl.u32 %v19247_v16, 16  ;;  %v7839_v17 = vshrl.u32 %v19822_v14, 16 }
 0xad9   : > { %9885 = vmatpush.bf16.msrb.mxu2 %v13582_v52  ;;  %v14083_v52 = vld [vmem:[%s21295_s13 + $0x54] sm:$0xf] }
 0xada   : > { %9752 = vmatmul.bf16.gmra.mxu2 %v19675_v42  ;;  %9770 = vmatmul.bf16.gmra.mxu0 %v19677_v20  ;;  %v12562_v47 = vor.u32 %v14083_v52, %v12559_v5  ;;  %v13541_v52 = vld [vmem:[%s21295_s13 + $0x800] sm:$0xf] }
 0xadb   : > { %9903 = vmatpush.bf16.msra.mxu0 %v13646_v24  ;;  %9854 = vmatpush.bf16.msrb.mxu3 %v13414_v12  ;;  %v14099_v24 = vld [vmem:[%s21295_s13 + $0xd4] sm:$0xf]  ;;  %v7806_v12 = vrot.slane %v19247_v16, 2  ;;  %v13605_v5 = vld [vmem:[%s21295_s13 + $0x880] sm:$0xf] }
 0xadc   : > { %9872 = vmatpush.bf16.msrb.mxu1 %v13478_v3  ;;  %v13549_v3 = vld [vmem:[%s21295_s13 + $0x810] sm:$0xf] }
 0xadd   : > { %9886 = vmatpush.bf16.msrb.mxu2 %v13574_v50  ;;  %v13622_v50 = vor.u32 %v14350_v32, %v13621_v15  ;;  %v19940_v46 = vsel %vm21337_vm4, %v7806_v12, %v19836_v61  ;;  %v13550_v51 = vor.u32 %v14332_v39, %v13549_v3  ;;  %v19968_v15 = vrot.slane %v7825_v27, 3  ;;  %v12543_v12 = vld [vmem:[%s21295_s13 + $0x38] sm:$0xf0]  ;;  %v12535_v27 = vld [vmem:[%s21295_s13 + $0x28] sm:$0xf0] }
 0xade   : > { %9783 = vmatmul.bf16.vlgmr.msra.gmra.mxu3 %v19243_v53  ;;  %9801 = vmatmul.bf16.vlgmr.msra.gmra.mxu1 %v19247_v16  ;;  %v7842_v32 = vshll.u32 %v19822_v14, 16  ;;  %v12546_v39 = vor.u32 %v14079_v38, %v12543_v12  ;;  %v14091_v12 = vld [vmem:[%s21295_s13 + $0x94] sm:$0xf]  ;;  %vm10440_vm4 = vcmask 1047554  }
 0xadf   : > { %9904 = vmatpush.bf16.msra.mxu0 %v13638_v33  ;;  %9919 = vmatpush.bf16.msra.mxu3 %v12578_v9  ;;  %v12626_v33 = vor.u32 %v14099_v24, %v12623_v48  ;;  %v14348_v9 = vld [vmem:[%s21295_s13 + $0x894] sm:$0xf0]  ;;  %v14346_v48 = vld [vmem:[%s21295_s13 + $0x884] sm:$0xf0] }
 0xae0   : > { %9937 = vmatpush.bf16.msra.mxu1 %v12642_v37  ;;  %v7822_v37 = vshrl.u32 %v19819_v23, 16  ;;  %v13614_v36 = vor.u32 %v14348_v9, %v13613_v8  ;;  %v13606_v3 = vor.u32 %v14346_v48, %v13605_v5  ;;  %v12703_v8 = vld [vmem:[%s21295_s13 + $0x178] sm:$0xf0]  ;;  %v12759_v48 = vld [vmem:[%s21295_s13 + $0x1e8] sm:$0xf0] }
 0xae1   : > { %9887 = vmatpush.bf16.msrb.mxu2 %v13566_v55  ;;  %v12615_v55 = vld [vmem:[%s21295_s13 + $0xc8] sm:$0xf0]  ;;  %v12767_v9 = vld [vmem:[%s21295_s13 + $0x1f8] sm:$0xf0] }
 0xae2   : > { %v12618_v19 = vor.u32 %v14097_v26, %v12615_v55  ;;  %v7833_v26 = vrot.slane %v7831_v1, 2  ;;  %v12695_v1 = vld [vmem:[%s21295_s13 + $0x168] sm:$0xf0] }
 0xae3   : > { %9905 = vmatpush.bf16.msra.mxu0 %v13630_v13  ;;  %9920 = vmatpush.bf16.msra.mxu3 %v12570_v0  ;;  %v19952_v13 = vpack.c.b16 %v19270_v41, %v19270_v41  ;;  %v12554_v0 = vor.u32 %v14081_v60, %v12551_v25  ;;  %v7834_v41 = vshll.u32 %v19247_v16, 16 }
 0xae4   : > { %9938 = vmatpush.bf16.msra.mxu1 %v12634_v29  ;;  %v19966_v29 = vrot.slane %v7822_v37, 2  ;;  %v14077_v37 = vld [vmem:[%s21295_s13 + $0x24] sm:$0xf] }
 0xae5   : > { %9888 = vmatpush.bf16.msrb.mxu2 %v13558_v62  ;;  %v14330_v62 = vld [vmem:[%s21295_s13 + $0x804] sm:$0xf0]  ;;  %v7836_v55 = vrot.slane %v7834_v41, 3  ;;  %v14133_v41 = vld [vmem:[%s21295_s13 + $0x1e4] sm:$0xf] }
 0xae6   : > { %v13542_v24 = vor.u32 %v14330_v62, %v13541_v52  ;;  %v7841_v52 = vrot.slane %v7839_v17, 2  ;;  %v7844_v62 = vrot.slane %v7842_v32, 3  ;;  %v14075_v17 = vld [vmem:[%s21295_s13 + $0x14] sm:$0xf]  ;;  %v12527_v32 = vld [vmem:[%s21295_s13 + $0x18] sm:$0xf0]  ;;  %v12762_v38 = vor.u32 %v14133_v41, %v12759_v48 }
 0xae7   : > { %9906 = vmatpush.bf16.msra.mxu0 %v13622_v50  ;;  %9921 = vmatpush.bf16.msra.mxu3 %v12562_v47  ;;  %v14119_v50 = vld [vmem:[%s21295_s13 + $0x174] sm:$0xf]  ;;  %v12610_v47 = vor.u32 %v14095_v6, %v12607_v49  ;;  %v12530_v6 = vor.u32 %v14075_v17, %v12527_v32  ;;  %v12687_v49 = vld [vmem:[%s21295_s13 + $0x158] sm:$0xf0] }
 0xae8   : > { %9939 = vmatpush.bf16.msra.mxu1 %v12626_v33  ;;  %v14135_v33 = vld [vmem:[%s21295_s13 + $0x1f4] sm:$0xf]  ;;  %v12706_v60 = vor.u32 %v14119_v50, %v12703_v8  ;;  %v12831_v41 = vld [vmem:[%s21295_s13 + $0x278] sm:$0xf0] }
 0xae9   : > { %9889 = vmatpush.bf16.msrb.mxu2 %v13550_v51  ;;  %v12770_v25 = vor.u32 %v14135_v33, %v12767_v9  ;;  %v14093_v51 = vld [vmem:[%s21295_s13 + $0xa4] sm:$0xf]  ;;  %v14131_v50 = vld [vmem:[%s21295_s13 + $0x1d4] sm:$0xf]  ;;  %v20060_v9 = vor.u32 %v19968_v15, %v19966_v29  ;;  %v12519_v29 = vld [vmem:[%s21295_s13 + $0x8] sm:$0xf0] }
 0xaea   : > { %9819 = vmatmul.bf16.vlgmr.msra.gmra.mxu2 %v19927_v35  ;;  %9837 = vmatmul.bf16.vlgmr.msrb.gmra.mxu0 %v19940_v46  ;;  %v14089_v15 = vld [vmem:[%s21295_s13 + $0x84] sm:$0xf]  ;;  %v14167_v17 = vld [vmem:[%s21295_s13 + $0x2f4] sm:$0xf]  ;;  %v12895_v32 = vld [vmem:[%s21295_s13 + $0x2f8] sm:$0xf0] }
 0xaeb   : > { %9907 = vmatpush.bf16.msra.mxu0 %v13614_v36  ;;  %9922 = vmatpush.bf16.msra.mxu3 %v12554_v0  ;;  %v12538_v36 = vor.u32 %v14077_v37, %v12535_v27  ;;  %v12599_v0 = vld [vmem:[%s21295_s13 + $0xa8] sm:$0xf0]  ;;  %v7820_v37 = vor.u32 %v19963_v28, %v19961_v10  ;;  %v7837_v27 = vor.u32 %v7836_v55, %v7833_v26 }
 0xaec   : > { %9940 = vmatpush.bf16.msra.mxu1 %v12618_v19  ;;  %v14117_v19 = vld [vmem:[%s21295_s13 + $0x164] sm:$0xf]  ;;  %v12602_v5 = vor.u32 %v14093_v51, %v12599_v0  ;;  %v12583_v10 = vld [vmem:[%s21295_s13 + $0x88] sm:$0xf0] }
 0xaed   : > { %9890 = vmatpush.bf16.msrb.mxu2 %v13542_v24  ;;  %v12698_v24 = vor.u32 %v14117_v19, %v12695_v1  ;;  %v14073_v51 = vld [vmem:[%s21295_s13 + $0x4] sm:$0xf]  ;;  %v20082_v28 = vsel %vm21338_vm10, %v7820_v37, %v20060_v9  ;;  %v12586_v55 = vor.u32 %v14089_v15, %v12583_v10  ;;  %v12679_v19 = vld [vmem:[%s21295_s13 + $0x148] sm:$0xf0]  ;;  %v14151_v1 = vld [vmem:[%s21295_s13 + $0x274] sm:$0xf] }
 0xaee   : > { %9788 = vmatmul.bf16.gmra.mxu3 %v19952_v13  ;;  %9806 = vmatmul.bf16.gmra.mxu1 %v19958_v54  ;;  %v14113_v0 = vld [vmem:[%s21295_s13 + $0x144] sm:$0xf]  ;;  %v12834_v48 = vor.u32 %v14151_v1, %v12831_v41  ;;  %v12663_v15 = vld [vmem:[%s21295_s13 + $0x128] sm:$0xf0]  ;;  %v7854_v1 = vrot.slane %v19247_v16, 3  ;;  %vm10490_vm10 = vcmask 1047558  }
 0xaef   : > { %9908 = vmatpush.bf16.msra.mxu0 %v13606_v3  ;;  %9923 = vmatpush.bf16.msra.mxu3 %v12546_v39  ;;  %v12591_v3 = vld [vmem:[%s21295_s13 + $0x98] sm:$0xf0]  ;;  %v14115_v39 = vld [vmem:[%s21295_s13 + $0x154] sm:$0xf]  ;;  %v14165_v37 = vld [vmem:[%s21295_s13 + $0x2e4] sm:$0xf] }
 0xaf0   : > { %9941 = vmatpush.bf16.msra.mxu1 %v12610_v47  ;;  %v12751_v47 = vld [vmem:[%s21295_s13 + $0x1d8] sm:$0xf0]  ;;  %v12594_v8 = vor.u32 %v14091_v12, %v12591_v3  ;;  %v12690_v33 = vor.u32 %v14115_v39, %v12687_v49  ;;  %v20118_v12 = vrot.slane %v19822_v14, 3  ;;  %v12898_v3 = vor.u32 %v14167_v17, %v12895_v32  ;;  %v14111_v39 = vld [vmem:[%s21295_s13 + $0x134] sm:$0xf] }
 0xaf1   : > { %9955 = vmatpush.bf16.msra.mxu2 %v12706_v60  ;;  %v20062_v60 = vor.u32 %v7844_v62, %v7841_v52  ;;  %v14129_v52 = vld [vmem:[%s21295_s13 + $0x1c4] sm:$0xf]  ;;  %v12682_v62 = vor.u32 %v14113_v0, %v12679_v19  ;;  %v12735_v14 = vld [vmem:[%s21295_s13 + $0x1b8] sm:$0xf0]  ;;  %v12727_v10 = vld [vmem:[%s21295_s13 + $0x1a8] sm:$0xf0] }
 0xaf2   : > { %v14147_v0 = vld [vmem:[%s21295_s13 + $0x254] sm:$0xf]  ;;  %v12815_v19 = vld [vmem:[%s21295_s13 + $0x258] sm:$0xf0] }
 0xaf3   : > { %9973 = vmatpush.bf16.msrb.mxu0 %v12770_v25  ;;  %9924 = vmatpush.bf16.msra.mxu3 %v12538_v36  ;;  %v12754_v25 = vor.u32 %v14131_v50, %v12751_v47  ;;  %v12522_v36 = vor.u32 %v14073_v51, %v12519_v29  ;;  %v20086_v26 = vsel %vm21339_vm14, %v7837_v27, %v20062_v60  ;;  %v14149_v50 = vld [vmem:[%s21295_s13 + $0x264] sm:$0xf]  ;;  %v12823_v47 = vld [vmem:[%s21295_s13 + $0x268] sm:$0xf0]  ;;  %vm10613_vm14 = vcmask 1047556  }
 0xaf4   : > { %9942 = vmatpush.bf16.msra.mxu1 %v12602_v5  ;;  %v12743_v5 = vld [vmem:[%s21295_s13 + $0x1c8] sm:$0xf0]  ;;  %v14109_v51 = vld [vmem:[%s21295_s13 + $0x124] sm:$0xf] }
 0xaf5   : > { %9956 = vmatpush.bf16.msra.mxu2 %v12698_v24  ;;  %v12746_v24 = vor.u32 %v14129_v52, %v12743_v5  ;;  %v12887_v27 = vld [vmem:[%s21295_s13 + $0x2e8] sm:$0xf0]  ;;  %v14163_v52 = vld [vmem:[%s21295_s13 + $0x2d4] sm:$0xf]  ;;  %v7851_v5 = vrot.slane %v19243_v53, 3 }
 0xaf6   : > { %v12890_v29 = vor.u32 %v14165_v37, %v12887_v27  ;;  %v14161_v37 = vld [vmem:[%s21295_s13 + $0x2c4] sm:$0xf]  ;;  %v12871_v27 = vld [vmem:[%s21295_s13 + $0x2c8] sm:$0xf0] }
 0xaf7   : > { %9974 = vmatpush.bf16.msrb.mxu0 %v12762_v38  ;;  %9925 = vmatpush.bf16.msra.mxu3 %v12530_v6  ;;  %v20115_v38 = vrot.slane %v19819_v23, 3  ;;  %v12671_v6 = vld [vmem:[%s21295_s13 + $0x138] sm:$0xf0]  ;;  %v14127_v23 = vld [vmem:[%s21295_s13 + $0x1b4] sm:$0xf] }
 0xaf8   : > { %9943 = vmatpush.bf16.msra.mxu1 %v12594_v8  ;;  %v12674_v49 = vor.u32 %v14111_v39, %v12671_v6  ;;  %v8149_v8 = vld [vmem:[%s21296_s14] sm:$0x3]  ;;  %v14107_v6 = vld [vmem:[%s21295_s13 + $0x114] sm:$0xf] }
 0xaf9   : > { %9957 = vmatpush.bf16.msra.mxu2 %v12690_v33  ;;  %v12738_v33 = vor.u32 %v14127_v23, %v12735_v14  ;;  %v20175_v32 = vsel %vm21340_vm1, %v7851_v5, %v20115_v38  ;;  %v20181_v39 = vperm.slane %v8149_v8, 0  ;;  %v12655_v23 = vld [vmem:[%s21295_s13 + $0x118] sm:$0xf0]  ;;  %v12807_v8 = vld [vmem:[%s21295_s13 + $0x248] sm:$0xf0]  ;;  %vm10403_vm1 = vcmask 1040384  }
 0xafa   : > { %9824 = vmatmul.bf16.gmra.mxu2 %v19833_v57  ;;  %9842 = vmatmul.bf16.gmra.mxu0 %v19836_v61  ;;  %v12658_v14 = vor.u32 %v14107_v6, %v12655_v23  ;;  %v14143_v5 = vld [vmem:[%s21295_s13 + $0x234] sm:$0xf]  ;;  %v12863_v6 = vld [vmem:[%s21295_s13 + $0x2b8] sm:$0xf0] }
 0xafb   : > { %9975 = vmatpush.bf16.msrb.mxu0 %v12754_v25  ;;  %9926 = vmatpush.bf16.msra.mxu3 %v12522_v36  ;;  %v12826_v25 = vor.u32 %v14149_v50, %v12823_v47  ;;  %v14125_v36 = vld [vmem:[%s21295_s13 + $0x1a4] sm:$0xf]  ;;  %v12719_v50 = vld [vmem:[%s21295_s13 + $0x198] sm:$0xf0] }
 0xafc   : > { %9944 = vmatpush.bf16.msra.mxu1 %v12586_v55  ;;  %v12666_v55 = vor.u32 %v14109_v51, %v12663_v15  ;;  %v12730_v41 = vor.u32 %v14125_v36, %v12727_v10  ;;  %v14145_v47 = vld [vmem:[%s21295_s13 + $0x244] sm:$0xf]  ;;  %v12647_v10 = vld [vmem:[%s21295_s13 + $0x108] sm:$0xf0] }
 0xafd   : > { %9958 = vmatpush.bf16.msra.mxu2 %v12682_v62  ;;  %v14105_v36 = vld [vmem:[%s21295_s13 + $0x104] sm:$0xf] }
 0xafe   : > { %9855 = vmatmul.bf16.vlgmr.msrb.gmra.mxu3 %v20082_v28  ;;  %9873 = vmatmul.bf16.vlgmr.msrb.gmra.mxu1 %v20086_v26 }
 0xaff   : > { %9976 = vmatpush.bf16.msrb.mxu0 %v12746_v24  ;;  %9991 = vmatpush.bf16.msrb.mxu3 %v12834_v48  ;;  %v12818_v24 = vor.u32 %v14147_v0, %v12815_v19  ;;  %v12879_v48 = vld [vmem:[%s21295_s13 + $0x2d8] sm:$0xf0]  ;;  %v12650_v19 = vor.u32 %v14105_v36, %v12647_v10  ;;  %v12951_v10 = vld [vmem:[%s21295_s13 + $0x368] sm:$0xf0] }
 0xb00   : > { %10009 = vmatpush.bf16.msrb.mxu1 %v12898_v3  ;;  %v12882_v17 = vor.u32 %v14163_v52, %v12879_v48  ;;  %v20179_v3 = vsel %vm21341_vm3, %v7854_v1, %v20118_v12  ;;  %v12711_v52 = vld [vmem:[%s21295_s13 + $0x188] sm:$0xf0]  ;;  %v12799_v1 = vld [vmem:[%s21295_s13 + $0x238] sm:$0xf0]  ;;  %vm10661_vm3 = vcmask 1047557  }
 0xb01   : > { %9959 = vmatpush.bf16.msra.mxu2 %v12674_v49  ;;  %v14123_v49 = vld [vmem:[%s21295_s13 + $0x194] sm:$0xf]  ;;  %v12802_v48 = vor.u32 %v14143_v5, %v12799_v1 }
 0xb02   : > { %v14139_v1 = vld [vmem:[%s21295_s13 + $0x214] sm:$0xf] }
 0xb03   : > { %9977 = vmatpush.bf16.msrb.mxu0 %v12738_v33  ;;  %9992 = vmatpush.bf16.msrb.mxu3 %v12826_v25  ;;  %v12722_v33 = vor.u32 %v14123_v49, %v12719_v50  ;;  %v12810_v25 = vor.u32 %v14145_v47, %v12807_v8  ;;  %v14183_v49 = vld [vmem:[%s21295_s13 + $0x374] sm:$0xf]  ;;  %v13023_v47 = vld [vmem:[%s21295_s13 + $0x3f8] sm:$0xf0]  ;;  %v14141_v8 = vld [vmem:[%s21295_s13 + $0x224] sm:$0xf] }
 0xb04   : > { %10010 = vmatpush.bf16.msrb.mxu1 %v12890_v29  ;;  %v12874_v29 = vor.u32 %v14161_v37, %v12871_v27  ;;  %v14157_v27 = vld [vmem:[%s21295_s13 + $0x2a4] sm:$0xf] }
 0xb05   : > { %9960 = vmatpush.bf16.msra.mxu2 %v12666_v55  ;;  %v14121_v55 = vld [vmem:[%s21295_s13 + $0x184] sm:$0xf] }
 0xb07   : > { %v9622_v62 = vpop.f32.mrf.mxu0  ;;  %9978 = vmatpush.bf16.msrb.mxu0 %v12730_v41  ;;  %9993 = vmatpush.bf16.msrb.mxu3 %v12818_v24  ;;  %v12714_v24 = vor.u32 %v14121_v55, %v12711_v52  ;;  %v14197_v55 = vld [vmem:[%s21295_s13 + $0x3e4] sm:$0xf] }
 0xb08   : > { %10011 = vmatpush.bf16.msrb.mxu1 %v12882_v17  ;;  %v14159_v17 = vld [vmem:[%s21295_s13 + $0x2b4] sm:$0xf] }
 0xb09   : > { %9961 = vmatpush.bf16.msra.mxu2 %v12658_v14  ;;  %v12866_v23 = vor.u32 %v14159_v17, %v12863_v6  ;;  %v14199_v14 = vld [vmem:[%s21295_s13 + $0x3f4] sm:$0xf] }
 0xb0a   : > { %9891 = vmatmul.bf16.vlgmr.msrb.gmra.mxu2 %v20175_v32  ;;  %9909 = vmatmul.bf16.vlgmr.msra.gmra.mxu0 %v20179_v3 }
 0xb0b   : > { %9979 = vmatpush.bf16.msrb.mxu0 %v12722_v33  ;;  %9994 = vmatpush.bf16.msrb.mxu3 %v12810_v25  ;;  %v12791_v33 = vld [vmem:[%s21295_s13 + $0x228] sm:$0xf0]  ;;  %v13026_v25 = vor.u32 %v14199_v14, %v13023_v47  ;;  %v12943_v47 = vld [vmem:[%s21295_s13 + $0x358] sm:$0xf0] }
 0xb0c   : > { %10012 = vmatpush.bf16.msrb.mxu1 %v12874_v29  ;;  %v12794_v37 = vor.u32 %v14141_v8, %v12791_v33  ;;  %v14181_v29 = vld [vmem:[%s21295_s13 + $0x364] sm:$0xf]  ;;  %v14195_v8 = vld [vmem:[%s21295_s13 + $0x3d4] sm:$0xf]  ;;  %v13007_v33 = vld [vmem:[%s21295_s13 + $0x3d8] sm:$0xf0] }
 0xb0d   : > { %v9604_v51 = vpop.f32.mrf.mxu2  ;;  %9962 = vmatpush.bf16.msra.mxu2 %v12650_v19  ;;  %v13015_v19 = vld [vmem:[%s21295_s13 + $0x3e8] sm:$0xf0]  ;;  %v12954_v5 = vor.u32 %v14181_v29, %v12951_v10  ;;  %v14153_v29 = vld [vmem:[%s21295_s13 + $0x284] sm:$0xf] }
 0xb0e   : > { %9860 = vmatmul.bf16.gmra.mxu3 %v20060_v9  ;;  %9878 = vmatmul.bf16.gmra.mxu1 %v20062_v60  ;;  %v9605_v15 = vadd.f32 %v9604_v51, %v20181_v39  ;;  %v12855_v51 = vld [vmem:[%s21295_s13 + $0x2a8] sm:$0xf0]  ;;  %v13018_v6 = vor.u32 %v14197_v55, %v13015_v19 }
 0xb0f   : > { %v9624_v0 = vpop.f32.mrf.mxu0  ;;  %9980 = vmatpush.bf16.msrb.mxu0 %v12714_v24  ;;  %9995 = vmatpush.bf16.msrb.mxu3 %v12802_v48  ;;  %v12858_v36 = vor.u32 %v14157_v27, %v12855_v51  ;;  %v12783_v24 = vld [vmem:[%s21295_s13 + $0x218] sm:$0xf0]  ;;  %v14155_v48 = vld [vmem:[%s21295_s13 + $0x294] sm:$0xf]  ;;  %v14137_v27 = vld [vmem:[%s21295_s13 + $0x204] sm:$0xf] }
 0xb10   : > { %v20230_v41 = vadd.f32 %v9622_v62, %v9605_v15  ;;  %v12959_v62 = vld [vmem:[%s21295_s13 + $0x378] sm:$0xf0]  ;;  %10013 = vmatpush.bf16.msrb.mxu1 %v12866_v23  ;;  %v12786_v23 = vor.u32 %v14139_v1, %v12783_v24  ;;  %v12775_v51 = vld [vmem:[%s21295_s13 + $0x208] sm:$0xf0]  ;;  %v14193_v1 = vld [vmem:[%s21295_s13 + $0x3c4] sm:$0xf] }
 0xb11   : > { %v12962_v50 = vor.u32 %v14183_v49, %v12959_v62  ;;  %v12847_v49 = vld [vmem:[%s21295_s13 + $0x298] sm:$0xf0] }
 0xb12   : > { %v12850_v14 = vor.u32 %v14155_v48, %v12847_v49  ;;  %v13087_v48 = vld [vmem:[%s21295_s13 + $0x478] sm:$0xf0] }
 0xb13   : > { %10027 = vmatpush.bf16.msrb.mxu2 %v12962_v50  ;;  %10045 = vmatpush.bf16.msra.mxu0 %v13026_v25  ;;  %v14179_v50 = vld [vmem:[%s21295_s13 + $0x354] sm:$0xf] }
 0xb14   : > { %9996 = vmatpush.bf16.msrb.mxu3 %v12794_v37  ;;  %10014 = vmatpush.bf16.msrb.mxu1 %v12858_v36  ;;  %v13010_v37 = vor.u32 %v14195_v8, %v13007_v33  ;;  %v12839_v36 = vld [vmem:[%s21295_s13 + $0x288] sm:$0xf0]  ;;  %v12927_v33 = vld [vmem:[%s21295_s13 + $0x338] sm:$0xf0] }
 0xb15   : > { %v9606_v15 = vpop.f32.mrf.mxu2  ;;  %v12842_v55 = vor.u32 %v14153_v29, %v12839_v36  ;;  %v14213_v29 = vld [vmem:[%s21295_s13 + $0x464] sm:$0xf] }
 0xb16   : > { %v9607_v52 = vadd.f32 %v9606_v15, %v20181_v39  ;;  %v12778_v15 = vor.u32 %v14137_v27, %v12775_v51 }
 0xb17   : > { %v9627_v17 = vpop.f32.mrf.mxu0  ;;  %10028 = vmatpush.bf16.msrb.mxu2 %v12954_v5  ;;  %10046 = vmatpush.bf16.msra.mxu0 %v13018_v6  ;;  %v12935_v5 = vld [vmem:[%s21295_s13 + $0x348] sm:$0xf0] }
 0xb18   : > { %v20287_v62 = vadd.f32 %v9624_v0, %v9607_v52  ;;  %v12946_v0 = vor.u32 %v14179_v50, %v12943_v47  ;;  %9997 = vmatpush.bf16.msrb.mxu3 %v12786_v23  ;;  %10015 = vmatpush.bf16.msrb.mxu1 %v12850_v14  ;;  %v14177_v52 = vld [vmem:[%s21295_s13 + $0x344] sm:$0xf]  ;;  %v14231_v14 = vld [vmem:[%s21295_s13 + $0x4f4] sm:$0xf]  ;;  %v13151_v50 = vld [vmem:[%s21295_s13 + $0x4f8] sm:$0xf0] }
 0xb19   : > { %v13154_v8 = vor.u32 %v14231_v14, %v13151_v50 }
 0xb1a   : > { %9896 = vmatmul.bf16.gmra.mxu2 %v20115_v38  ;;  %9914 = vmatmul.bf16.gmra.mxu0 %v20118_v12 }
 0xb1b   : > { %v9658_v25 = vpop.f32.mrf.mxu1  ;;  %10029 = vmatpush.bf16.msrb.mxu2 %v12946_v0  ;;  %10047 = vmatpush.bf16.msra.mxu0 %v13010_v37  ;;  %v14191_v37 = vld [vmem:[%s21295_s13 + $0x3b4] sm:$0xf] }
 0xb1c   : > { %9998 = vmatpush.bf16.msrb.mxu3 %v12778_v15  ;;  %10016 = vmatpush.bf16.msrb.mxu1 %v12842_v55  ;;  %v13079_v15 = vld [vmem:[%s21295_s13 + $0x468] sm:$0xf0] }
 0xb1d   : > { %v9609_v10 = vpop.f32.mrf.mxu2  ;;  %v13082_v55 = vor.u32 %v14213_v29, %v13079_v15  ;;  %v13063_v15 = vld [vmem:[%s21295_s13 + $0x448] sm:$0xf0] }
 0xb1e   : > { %9927 = vmatmul.bf16.vlgmr.msra.gmra.mxu3 %v19173_v4  ;;  %9945 = vmatmul.bf16.vlgmr.msra.gmra.mxu1 %v19177_v45  ;;  %v9610_v19 = vadd.f32 %v9609_v10, %v20181_v39  ;;  %v12938_v4 = vor.u32 %v14177_v52, %v12935_v5  ;;  %v12999_v45 = vld [vmem:[%s21295_s13 + $0x3c8] sm:$0xf0]  ;;  %v14215_v39 = vld [vmem:[%s21295_s13 + $0x474] sm:$0xf]  ;;  %v14173_v5 = vld [vmem:[%s21295_s13 + $0x324] sm:$0xf] }
 0xb1f   : > { %v9629_v24 = vpop.f32.mrf.mxu0  ;;  %v13002_v23 = vor.u32 %v14193_v1, %v12999_v45  ;;  %v13090_v49 = vor.u32 %v14215_v39, %v13087_v48  ;;  %v13143_v52 = vld [vmem:[%s21295_s13 + $0x4e8] sm:$0xf0]  ;;  %v14211_v48 = vld [vmem:[%s21295_s13 + $0x454] sm:$0xf] }
 0xb20   : > { %v20336_v6 = vadd.f32 %v9627_v17, %v9610_v19  ;;  %10030 = vmatpush.bf16.msrb.mxu2 %v12938_v4  ;;  %v14175_v17 = vld [vmem:[%s21295_s13 + $0x334] sm:$0xf]  ;;  %10081 = vmatpush.bf16.msra.mxu1 %v13154_v8  ;;  %v14229_v19 = vld [vmem:[%s21295_s13 + $0x4e4] sm:$0xf]  ;;  %v12983_v45 = vld [vmem:[%s21295_s13 + $0x3a8] sm:$0xf0] }
 0xb21   : > { %v9640_v47 = vpop.f32.mrf.mxu3  ;;  %10063 = vmatpush.bf16.msra.mxu3 %v13090_v49  ;;  %10048 = vmatpush.bf16.msra.mxu0 %v13002_v23  ;;  %v12930_v51 = vor.u32 %v14175_v17, %v12927_v33  ;;  %v13146_v24 = vor.u32 %v14229_v19, %v13143_v52  ;;  %v14189_v4 = vld [vmem:[%s21295_s13 + $0x3a4] sm:$0xf]  ;;  %v13071_v23 = vld [vmem:[%s21295_s13 + $0x458] sm:$0xf0]  ;;  %v14227_v49 = vld [vmem:[%s21295_s13 + $0x4d4] sm:$0xf] }
 0xb22   : > { %v9641_v0 = vadd.f32 %v9640_v47, %v20230_v41  ;;  %v12991_v41 = vld [vmem:[%s21295_s13 + $0x3b8] sm:$0xf0]  ;;  %v12986_v50 = vor.u32 %v14189_v4, %v12983_v45  ;;  %v13074_v47 = vor.u32 %v14211_v48, %v13071_v23  ;;  %v14225_v52 = vld [vmem:[%s21295_s13 + $0x4c4] sm:$0xf]  ;;  %v12903_v4 = vld [vmem:[%s21295_s13 + $0x308] sm:$0xf0] }
 0xb23   : > { %v9660_v27 = vpop.f32.mrf.mxu1  ;;  %v12994_v10 = vor.u32 %v14191_v37, %v12991_v41  ;;  %v13135_v8 = vld [vmem:[%s21295_s13 + $0x4d8] sm:$0xf0]  ;;  %v14171_v37 = vld [vmem:[%s21295_s13 + $0x314] sm:$0xf]  ;;  %v14185_v45 = vld [vmem:[%s21295_s13 + $0x384] sm:$0xf] }
 0xb24   : > { %v9659_v36 = vadd.f32 %v9658_v25, %v9641_v0  ;;  %10031 = vmatpush.bf16.msrb.mxu2 %v12930_v51  ;;  %v12919_v25 = vld [vmem:[%s21295_s13 + $0x328] sm:$0xf0]  ;;  %10082 = vmatpush.bf16.msra.mxu1 %v13146_v24  ;;  %v13138_v0 = vor.u32 %v14227_v49, %v13135_v8  ;;  %v12911_v51 = vld [vmem:[%s21295_s13 + $0x318] sm:$0xf0]  ;;  %v14187_v41 = vld [vmem:[%s21295_s13 + $0x394] sm:$0xf] }
 0xb25   : > { %v9611_v1 = vpop.f32.mrf.mxu2  ;;  %10064 = vmatpush.bf16.msra.mxu3 %v13082_v55  ;;  %v12922_v39 = vor.u32 %v14173_v5, %v12919_v25  ;;  %10049 = vmatpush.bf16.msra.mxu0 %v12994_v10  ;;  %v13127_v5 = vld [vmem:[%s21295_s13 + $0x4c8] sm:$0xf0]  ;;  %v13119_v8 = vld [vmem:[%s21295_s13 + $0x4b8] sm:$0xf0] }
 0xb26   : > { %v13130_v24 = vor.u32 %v14225_v52, %v13127_v5  ;;  %v14221_v52 = vld [vmem:[%s21295_s13 + $0x4a4] sm:$0xf]  ;;  %v13111_v5 = vld [vmem:[%s21295_s13 + $0x4a8] sm:$0xf0] }
 0xb27   : > { %v9694_v14 = vpop.f32.mrf.mxu0 }
 0xb28   : > { %10032 = vmatpush.bf16.msrb.mxu2 %v12922_v39  ;;  %10083 = vmatpush.bf16.msra.mxu1 %v13138_v0 }
 0xb29   : > { %v9642_v17 = vpop.f32.mrf.mxu3  ;;  %10050 = vmatpush.bf16.msra.mxu0 %v12986_v50  ;;  %10065 = vmatpush.bf16.msra.mxu3 %v13074_v47  ;;  %v14223_v47 = vld [vmem:[%s21295_s13 + $0x4b4] sm:$0xf] }
 0xb2a   : > { %v9643_v33 = vadd.f32 %v9642_v17, %v20287_v62  ;;  %9963 = vmatmul.bf16.vlgmr.msra.gmra.mxu2 %v19342_v7  ;;  %9981 = vmatmul.bf16.vlgmr.msrb.gmra.mxu0 %v19346_v22  ;;  %v12914_v62 = vor.u32 %v14171_v37, %v12911_v51  ;;  %v12975_v7 = vld [vmem:[%s21295_s13 + $0x398] sm:$0xf0]  ;;  %v14209_v22 = vld [vmem:[%s21295_s13 + $0x444] sm:$0xf]  ;;  %v13122_v17 = vor.u32 %v14223_v47, %v13119_v8  ;;  %v14263_v51 = vld [vmem:[%s21295_s13 + $0x5f4] sm:$0xf] }
 0xb2b   : > { %v9663_v29 = vpop.f32.mrf.mxu1  ;;  %v12978_v55 = vor.u32 %v14187_v41, %v12975_v7  ;;  %v13066_v19 = vor.u32 %v14209_v22, %v13063_v15  ;;  %v13215_v37 = vld [vmem:[%s21295_s13 + $0x578] sm:$0xf0]  ;;  %v14205_v7 = vld [vmem:[%s21295_s13 + $0x424] sm:$0xf]  ;;  %v13047_v22 = vld [vmem:[%s21295_s13 + $0x428] sm:$0xf0] }
 0xb2c   : > { %v9661_v10 = vadd.f32 %v9660_v27, %v9643_v33  ;;  %10033 = vmatpush.bf16.msrb.mxu2 %v12914_v62  ;;  %v14169_v27 = vld [vmem:[%s21295_s13 + $0x304] sm:$0xf]  ;;  %10084 = vmatpush.bf16.msra.mxu1 %v13130_v24 }
 0xb2d   : > { %v9676_v1 = vpop.f32.mrf.mxu2  ;;  %10051 = vmatpush.bf16.msra.mxu0 %v12978_v55  ;;  %10066 = vmatpush.bf16.msra.mxu3 %v13066_v19  ;;  %v12906_v48 = vor.u32 %v14169_v27, %v12903_v4  ;;  %v13050_v19 = vor.u32 %v14205_v7, %v13047_v22  ;;  %v14261_v27 = vld [vmem:[%s21295_s13 + $0x5e4] sm:$0xf]  ;;  %v13271_v4 = vld [vmem:[%s21295_s13 + $0x5e8] sm:$0xf0] }
 0xb2e   : > { %9932 = vmatmul.bf16.gmra.mxu3 %v19301_v30  ;;  %9950 = vmatmul.bf16.gmra.mxu1 %v19303_v59  ;;  %v9677_v25 = vadd.f32 %v9676_v1, %v9659_v36  ;;  %v12967_v30 = vld [vmem:[%s21295_s13 + $0x388] sm:$0xf0]  ;;  %v14207_v59 = vld [vmem:[%s21295_s13 + $0x434] sm:$0xf]  ;;  %v13055_v36 = vld [vmem:[%s21295_s13 + $0x438] sm:$0xf0] }
 0xb2f   : > { %v9696_v39 = vpop.f32.mrf.mxu0  ;;  %v12970_v49 = vor.u32 %v14185_v45, %v12967_v30  ;;  %v13058_v50 = vor.u32 %v14207_v59, %v13055_v36  ;;  %v14245_v1 = vld [vmem:[%s21295_s13 + $0x564] sm:$0xf]  ;;  %v14203_v30 = vld [vmem:[%s21295_s13 + $0x414] sm:$0xf]  ;;  %v13039_v59 = vld [vmem:[%s21295_s13 + $0x418] sm:$0xf0] }
 0xb30   : > { %v20440_v23 = vadd.f32 %v9694_v14, %v9677_v25  ;;  %10034 = vmatpush.bf16.msrb.mxu2 %v12906_v48  ;;  %v14247_v14 = vld [vmem:[%s21295_s13 + $0x574] sm:$0xf]  ;;  %10085 = vmatpush.bf16.msra.mxu1 %v13122_v17  ;;  %v13114_v25 = vor.u32 %v14221_v52, %v13111_v5  ;;  %v13042_v47 = vor.u32 %v14203_v30, %v13039_v59  ;;  %v13031_v7 = vld [vmem:[%s21295_s13 + $0x408] sm:$0xf0]  ;;  %v14241_v5 = vld [vmem:[%s21295_s13 + $0x544] sm:$0xf] }
 0xb31   : > { %v9645_v0 = vpop.f32.mrf.mxu3  ;;  %10052 = vmatpush.bf16.msra.mxu0 %v12970_v49  ;;  %10067 = vmatpush.bf16.msra.mxu3 %v13058_v50  ;;  %v13218_v62 = vor.u32 %v14247_v14, %v13215_v37  ;;  %v14219_v36 = vld [vmem:[%s21295_s13 + $0x494] sm:$0xf]  ;;  %v13274_v50 = vor.u32 %v14261_v27, %v13271_v4  ;;  %v13199_v14 = vld [vmem:[%s21295_s13 + $0x558] sm:$0xf0]  ;;  %v13095_v22 = vld [vmem:[%s21295_s13 + $0x488] sm:$0xf0] }
 0xb32   : > { %v9646_v33 = vadd.f32 %v9645_v0, %v20336_v6  ;;  %v13279_v6 = vld [vmem:[%s21295_s13 + $0x5f8] sm:$0xf0]  ;;  %v14259_v37 = vld [vmem:[%s21295_s13 + $0x5d4] sm:$0xf] }
 0xb33   : > { %v9665_v41 = vpop.f32.mrf.mxu1  ;;  %v13282_v55 = vor.u32 %v14263_v51, %v13279_v6  ;;  %v13263_v51 = vld [vmem:[%s21295_s13 + $0x5d8] sm:$0xf0]  ;;  %v14201_v6 = vld [vmem:[%s21295_s13 + $0x404] sm:$0xf] }
 0xb34   : > { %v9664_v15 = vadd.f32 %v9663_v29, %v9646_v33  ;;  %10099 = vmatpush.bf16.msra.mxu2 %v13218_v62  ;;  %v13207_v29 = vld [vmem:[%s21295_s13 + $0x568] sm:$0xf0]  ;;  %10086 = vmatpush.bf16.msra.mxu1 %v13114_v25  ;;  %v14243_v33 = vld [vmem:[%s21295_s13 + $0x554] sm:$0xf]  ;;  %v13266_v62 = vor.u32 %v14259_v37, %v13263_v51  ;;  %v13407_v30 = vld [vmem:[%s21295_s13 + $0x6f8] sm:$0xf0] }
 0xb35   : > { %v9678_v24 = vpop.f32.mrf.mxu2  ;;  %10117 = vmatpush.bf16.msrb.mxu0 %v13282_v55  ;;  %v13210_v48 = vor.u32 %v14245_v1, %v13207_v29  ;;  %10068 = vmatpush.bf16.msra.mxu3 %v13050_v19  ;;  %v13191_v1 = vld [vmem:[%s21295_s13 + $0x548] sm:$0xf0] }
 0xb36   : > { %v9679_v45 = vadd.f32 %v9678_v24, %v9661_v10  ;;  %v13103_v10 = vld [vmem:[%s21295_s13 + $0x498] sm:$0xf0]  ;;  %v14257_v24 = vld [vmem:[%s21295_s13 + $0x5c4] sm:$0xf]  ;;  %v13194_v29 = vor.u32 %v14241_v5, %v13191_v1  ;;  %v14291_v1 = vld [vmem:[%s21295_s13 + $0x6d4] sm:$0xf] }
 0xb37   : > { %v9699_v49 = vpop.f32.mrf.mxu0  ;;  %v13106_v0 = vor.u32 %v14219_v36, %v13103_v10  ;;  %v14255_v10 = vld [vmem:[%s21295_s13 + $0x5b4] sm:$0xf]  ;;  %v13327_v5 = vld [vmem:[%s21295_s13 + $0x658] sm:$0xf0] }
 0xb38   : > { %v20497_v8 = vadd.f32 %v9696_v39, %v9679_v45  ;;  %10100 = vmatpush.bf16.msra.mxu2 %v13210_v48  ;;  %v13202_v39 = vor.u32 %v14243_v33, %v13199_v14  ;;  %v14295_v48 = vld [vmem:[%s21295_s13 + $0x6f4] sm:$0xf]  ;;  %v14277_v33 = vld [vmem:[%s21295_s13 + $0x664] sm:$0xf]  ;;  %v13335_v14 = vld [vmem:[%s21295_s13 + $0x668] sm:$0xf0] }
 0xb39   : > { %v9647_v17 = vpop.f32.mrf.mxu3  ;;  %10118 = vmatpush.bf16.msrb.mxu0 %v13274_v50  ;;  %10069 = vmatpush.bf16.msra.mxu3 %v13042_v47  ;;  %v13410_v36 = vor.u32 %v14295_v48, %v13407_v30  ;;  %v13183_v47 = vld [vmem:[%s21295_s13 + $0x538] sm:$0xf0]  ;;  %v13338_v51 = vor.u32 %v14277_v33, %v13335_v14  ;;  %v14251_v30 = vld [vmem:[%s21295_s13 + $0x594] sm:$0xf]  ;;  %v13159_v14 = vld [vmem:[%s21295_s13 + $0x508] sm:$0xf0] }
 0xb3a   : > { %9968 = vmatmul.bf16.gmra.mxu2 %v19463_v11  ;;  %9986 = vmatmul.bf16.gmra.mxu0 %v19468_v34  ;;  %v14217_v11 = vld [vmem:[%s21295_s13 + $0x484] sm:$0xf]  ;;  %v13034_v34 = vor.u32 %v14201_v6, %v13031_v7  ;;  %v13399_v6 = vld [vmem:[%s21295_s13 + $0x6e8] sm:$0xf0]  ;;  %v13167_v48 = vld [vmem:[%s21295_s13 + $0x518] sm:$0xf0] }
 0xb3b   : > { %v9730_v41 = vpop.f32.mrf.mxu1  ;;  %10087 = vmatpush.bf16.msra.mxu1 %v13106_v0  ;;  %v13098_v19 = vor.u32 %v14217_v11, %v13095_v22  ;;  %v14237_v7 = vld [vmem:[%s21295_s13 + $0x524] sm:$0xf] }
 0xb3c   : > { %10101 = vmatpush.bf16.msra.mxu2 %v13202_v39  ;;  %v14253_v22 = vld [vmem:[%s21295_s13 + $0x5a4] sm:$0xf] }
 0xb3d   : > { %v9681_v55 = vpop.f32.mrf.mxu2  ;;  %10119 = vmatpush.bf16.msrb.mxu0 %v13266_v62  ;;  %10070 = vmatpush.bf16.msra.mxu3 %v13034_v34  ;;  %v14293_v62 = vld [vmem:[%s21295_s13 + $0x6e4] sm:$0xf] }
 0xb3e   : > { %9999 = vmatmul.bf16.vlgmr.msrb.gmra.mxu3 %v19444_v44  ;;  %10017 = vmatmul.bf16.vlgmr.msrb.gmra.mxu1 %v19448_v43  ;;  %v9682_v52 = vadd.f32 %v9681_v55, %v9664_v15  ;;  %v13255_v44 = vld [vmem:[%s21295_s13 + $0x5c8] sm:$0xf0]  ;;  %v14279_v43 = vld [vmem:[%s21295_s13 + $0x674] sm:$0xf]  ;;  %v13343_v15 = vld [vmem:[%s21295_s13 + $0x678] sm:$0xf0]  ;;  %v13402_v34 = vor.u32 %v14293_v62, %v13399_v6 }
 0xb3f   : > { %v9701_v25 = vpop.f32.mrf.mxu0  ;;  %10088 = vmatpush.bf16.msra.mxu1 %v13098_v19  ;;  %v13258_v4 = vor.u32 %v14257_v24, %v13255_v44  ;;  %v13346_v45 = vor.u32 %v14279_v43, %v13343_v15  ;;  %v13239_v55 = vld [vmem:[%s21295_s13 + $0x5a8] sm:$0xf0]  ;;  %v13391_v44 = vld [vmem:[%s21295_s13 + $0x6d8] sm:$0xf0] }
 0xb40   : > { %v20545_v27 = vadd.f32 %v9699_v49, %v9682_v52  ;;  %10102 = vmatpush.bf16.msra.mxu2 %v13194_v29  ;;  %v14239_v49 = vld [vmem:[%s21295_s13 + $0x534] sm:$0xf]  ;;  %v13242_v25 = vor.u32 %v14253_v22, %v13239_v55  ;;  %v13394_v43 = vor.u32 %v14291_v1, %v13391_v44  ;;  %v13311_v6 = vld [vmem:[%s21295_s13 + $0x638] sm:$0xf0]  ;;  %v14269_v44 = vld [vmem:[%s21295_s13 + $0x624] sm:$0xf] }
 0xb41   : > { %v9712_v59 = vpop.f32.mrf.mxu3  ;;  %10135 = vmatpush.bf16.msrb.mxu3 %v13346_v45  ;;  %10120 = vmatpush.bf16.msrb.mxu0 %v13258_v4  ;;  %v13186_v17 = vor.u32 %v14239_v49, %v13183_v47  ;;  %v14275_v52 = vld [vmem:[%s21295_s13 + $0x654] sm:$0xf] }
 0xb42   : > { %v9713_v50 = vadd.f32 %v9712_v59, %v20440_v23  ;;  %v13247_v23 = vld [vmem:[%s21295_s13 + $0x5b8] sm:$0xf0]  ;;  %v13330_v29 = vor.u32 %v14275_v52, %v13327_v5  ;;  %v14235_v45 = vld [vmem:[%s21295_s13 + $0x514] sm:$0xf] }
 0xb43   : > { %v9732_v0 = vpop.f32.mrf.mxu1  ;;  %10153 = vmatpush.bf16.msrb.mxu1 %v13410_v36  ;;  %v13250_v39 = vor.u32 %v14255_v10, %v13247_v23  ;;  %v13319_v36 = vld [vmem:[%s21295_s13 + $0x648] sm:$0xf0]  ;;  %v14289_v10 = vld [vmem:[%s21295_s13 + $0x6c4] sm:$0xf]  ;;  %v14311_v52 = vld [vmem:[%s21295_s13 + $0x774] sm:$0xf] }
 0xb44   : > { %v20572_v37 = vadd.f32 %v9730_v41, %v9713_v50  ;;  %10103 = vmatpush.bf16.msra.mxu2 %v13186_v17  ;;  %v13175_v41 = vld [vmem:[%s21295_s13 + $0x528] sm:$0xf0]  ;;  %v13471_v5 = vld [vmem:[%s21295_s13 + $0x778] sm:$0xf0]  ;;  %v14327_v1 = vld [vmem:[%s21295_s13 + $0x7f4] sm:$0xf] }
 0xb45   : > { %v9683_v11 = vpop.f32.mrf.mxu2  ;;  %10136 = vmatpush.bf16.msrb.mxu3 %v13338_v51  ;;  %v13178_v19 = vor.u32 %v14237_v7, %v13175_v41  ;;  %10121 = vmatpush.bf16.msrb.mxu0 %v13250_v39  ;;  %v13383_v17 = vld [vmem:[%s21295_s13 + $0x6c8] sm:$0xf0]  ;;  %v14249_v39 = vld [vmem:[%s21295_s13 + $0x584] sm:$0xf]  ;;  %v13375_v41 = vld [vmem:[%s21295_s13 + $0x6b8] sm:$0xf0] }
 0xb46   : > { %v13386_v33 = vor.u32 %v14289_v10, %v13383_v17  ;;  %v14267_v10 = vld [vmem:[%s21295_s13 + $0x614] sm:$0xf]  ;;  %v13295_v17 = vld [vmem:[%s21295_s13 + $0x618] sm:$0xf0] }
 0xb47   : > { %v20601_v24 = vpop.f32.mrf.mxu0  ;;  %10154 = vmatpush.bf16.msrb.mxu1 %v13402_v34  ;;  %v14287_v34 = vld [vmem:[%s21295_s13 + $0x6b4] sm:$0xf] }
 0xb48   : > { %10104 = vmatpush.bf16.msra.mxu2 %v13178_v19  ;;  %v13378_v55 = vor.u32 %v14287_v34, %v13375_v41  ;;  %v13519_v41 = vld [vmem:[%s21295_s13 + $0x7d8] sm:$0xf0] }
 0xb49   : > { %v9714_v15 = vpop.f32.mrf.mxu3  ;;  %10122 = vmatpush.bf16.msrb.mxu0 %v13242_v25  ;;  %10137 = vmatpush.bf16.msrb.mxu3 %v13330_v29  ;;  %v13474_v29 = vor.u32 %v14311_v52, %v13471_v5  ;;  %v13351_v5 = vld [vmem:[%s21295_s13 + $0x688] sm:$0xf0] }
 0xb4a   : > { %v9715_v4 = vadd.f32 %v9714_v15, %v20497_v8  ;;  %10035 = vmatmul.bf16.vlgmr.msrb.gmra.mxu2 %v19604_v31  ;;  %10053 = vmatmul.bf16.vlgmr.msra.gmra.mxu0 %v19608_v40  ;;  %v13170_v8 = vor.u32 %v14235_v45, %v13167_v48  ;;  %v13231_v31 = vld [vmem:[%s21295_s13 + $0x598] sm:$0xf0]  ;;  %v14273_v40 = vld [vmem:[%s21295_s13 + $0x644] sm:$0xf] }
 0xb4b   : > { %v9735_v59 = vpop.f32.mrf.mxu1  ;;  %10155 = vmatpush.bf16.msrb.mxu1 %v13394_v43  ;;  %v13234_v49 = vor.u32 %v14251_v30, %v13231_v31  ;;  %v13322_v47 = vor.u32 %v14273_v40, %v13319_v36  ;;  %v13303_v43 = vld [vmem:[%s21295_s13 + $0x628] sm:$0xf0]  ;;  %v14285_v48 = vld [vmem:[%s21295_s13 + $0x6a4] sm:$0xf] }
 0xb4c   : > { %v20627_v50 = vadd.f32 %v9732_v0, %v9715_v4  ;;  %10105 = vmatpush.bf16.msra.mxu2 %v13170_v8  ;;  %v14233_v0 = vld [vmem:[%s21295_s13 + $0x504] sm:$0xf]  ;;  %v13306_v45 = vor.u32 %v14269_v44, %v13303_v43  ;;  %v13367_v30 = vld [vmem:[%s21295_s13 + $0x6a8] sm:$0xf0] }
 0xb4d   : > { %v20635_v23 = vpop.f32.mrf.mxu2  ;;  %10123 = vmatpush.bf16.msrb.mxu0 %v13234_v49  ;;  %10138 = vmatpush.bf16.msrb.mxu3 %v13322_v47  ;;  %v13162_v62 = vor.u32 %v14233_v0, %v13159_v14  ;;  %v14309_v8 = vld [vmem:[%s21295_s13 + $0x764] sm:$0xf]  ;;  %v13463_v40 = vld [vmem:[%s21295_s13 + $0x768] sm:$0xf0] }
 0xb4e   : > { %10004 = vmatmul.bf16.gmra.mxu3 %v19411_v56  ;;  %10022 = vmatmul.bf16.gmra.mxu1 %v19414_v63  ;;  %v13223_v56 = vld [vmem:[%s21295_s13 + $0x588] sm:$0xf0]  ;;  %v14271_v63 = vld [vmem:[%s21295_s13 + $0x634] sm:$0xf]  ;;  %v14325_v36 = vld [vmem:[%s21295_s13 + $0x7e4] sm:$0xf]  ;;  %v13466_v47 = vor.u32 %v14309_v8, %v13463_v40 }
 0xb4f   : > { %v20648_v51 = vpop.f32.mrf.mxu0  ;;  %10156 = vmatpush.bf16.msrb.mxu1 %v13386_v33  ;;  %v13226_v7 = vor.u32 %v14249_v39, %v13223_v56  ;;  %v13314_v11 = vor.u32 %v14271_v63, %v13311_v6  ;;  %v13527_v49 = vld [vmem:[%s21295_s13 + $0x7e8] sm:$0xf0]  ;;  %v14283_v33 = vld [vmem:[%s21295_s13 + $0x694] sm:$0xf]  ;;  %v13298_v39 = vor.u32 %v14267_v10, %v13295_v17  ;;  %v14321_v44 = vld [vmem:[%s21295_s13 + $0x7c4] sm:$0xf] }
 0xb50   : > { %10106 = vmatpush.bf16.msra.mxu2 %v13162_v62  ;;  %v13530_v14 = vor.u32 %v14325_v36, %v13527_v49  ;;  %v13359_v62 = vld [vmem:[%s21295_s13 + $0x698] sm:$0xf0]  ;;  %v14307_v6 = vld [vmem:[%s21295_s13 + $0x754] sm:$0xf] }
 0xb51   : > { %v9717_v22 = vpop.f32.mrf.mxu3  ;;  %10124 = vmatpush.bf16.msrb.mxu0 %v13226_v7  ;;  %10139 = vmatpush.bf16.msrb.mxu3 %v13314_v11  ;;  %v13362_v56 = vor.u32 %v14283_v33, %v13359_v62  ;;  %v13455_v7 = vld [vmem:[%s21295_s13 + $0x758] sm:$0xf0]  ;;  %v14323_v11 = vld [vmem:[%s21295_s13 + $0x7d4] sm:$0xf]  ;;  %v13591_v62 = vld [vmem:[%s21295_s13 + $0x868] sm:$0xf0] }
 0xb52   : > { %v9718_v19 = vadd.f32 %v9717_v22, %v20545_v27  ;;  %v13535_v27 = vld [vmem:[%s21295_s13 + $0x7f8] sm:$0xf0]  ;;  %v13458_v34 = vor.u32 %v14307_v6, %v13455_v7  ;;  %v14359_v8 = vld [vmem:[%s21295_s13 + $0x8f4] sm:$0xf]  ;;  %v14357_v6 = vld [vmem:[%s21295_s13 + $0x8e4] sm:$0xf] }
 0xb53   : > { %v9737_v25 = vpop.f32.mrf.mxu1  ;;  %10157 = vmatpush.bf16.msrb.mxu1 %v13378_v55  ;;  %v13538_v4 = vor.u32 %v14327_v1, %v13535_v27  ;;  %v13522_v55 = vor.u32 %v14323_v11, %v13519_v41  ;;  %v13447_v27 = vld [vmem:[%s21295_s13 + $0x748] sm:$0xf0]  ;;  %v14303_v49 = vld [vmem:[%s21295_s13 + $0x734] sm:$0xf]  ;;  %v14301_v11 = vld [vmem:[%s21295_s13 + $0x724] sm:$0xf] }
 0xb54   : > { %v20684_v15 = vadd.f32 %v9735_v59, %v9718_v19  ;;  %10171 = vmatpush.bf16.msrb.mxu2 %v13474_v29  ;;  %v13370_v59 = vor.u32 %v14285_v48, %v13367_v30  ;;  %v14265_v19 = vld [vmem:[%s21295_s13 + $0x604] sm:$0xf]  ;;  %v14319_v10 = vld [vmem:[%s21295_s13 + $0x7b4] sm:$0xf]  ;;  %v13655_v7 = vld [vmem:[%s21295_s13 + $0x8e8] sm:$0xf0] }
 0xb55   : > { %v20695_v31 = vpop.f32.mrf.mxu2  ;;  %10189 = vmatpush.bf16.msra.mxu0 %v13538_v4  ;;  %10140 = vmatpush.bf16.msrb.mxu3 %v13306_v45  ;;  %v14305_v29 = vld [vmem:[%s21295_s13 + $0x744] sm:$0xf]  ;;  %v13599_v45 = vld [vmem:[%s21295_s13 + $0x878] sm:$0xf0]  ;;  %v20810_v41 = vor.u32 %v14357_v6, %v13655_v7 }
 0xb56   : > { %v13450_v4 = vor.u32 %v14305_v29, %v13447_v27 }
 0xb57   : > { %v20715_v0 = vpop.f32.mrf.mxu0  ;;  %10158 = vmatpush.bf16.msrb.mxu1 %v13370_v59  ;;  %v13663_v59 = vld [vmem:[%s21295_s13 + $0x8f8] sm:$0xf0] }
 0xb58   : > { %10172 = vmatpush.bf16.msrb.mxu2 %v13466_v47  ;;  %v20778_v36 = vor.u32 %v14359_v8, %v13663_v59  ;;  %v13439_v47 = vld [vmem:[%s21295_s13 + $0x738] sm:$0xf0]  ;;  %v13575_v59 = vld [vmem:[%s21295_s13 + $0x848] sm:$0xf0] }
 0xb59   : > { %v9719_v63 = vpop.f32.mrf.mxu3  ;;  %10190 = vmatpush.bf16.msra.mxu0 %v13530_v14  ;;  %10141 = vmatpush.bf16.msrb.mxu3 %v13298_v39  ;;  %v13442_v33 = vor.u32 %v14303_v49, %v13439_v47  ;;  %v13503_v14 = vld [vmem:[%s21295_s13 + $0x7b8] sm:$0xf0]  ;;  %v14341_v39 = vld [vmem:[%s21295_s13 + $0x864] sm:$0xf] }
 0xb5a   : > { %10040 = vmatmul.bf16.gmra.mxu2 %v19563_v2  ;;  %10058 = vmatmul.bf16.gmra.mxu0 %v19566_v58  ;;  %v13287_v2 = vld [vmem:[%s21295_s13 + $0x608] sm:$0xf0]  ;;  %v14281_v58 = vld [vmem:[%s21295_s13 + $0x684] sm:$0xf]  ;;  %v13594_v63 = vor.u32 %v14341_v39, %v13591_v62 }
 0xb5b   : > { %v20734_v22 = vpop.f32.mrf.mxu1  ;;  %10159 = vmatpush.bf16.msrb.mxu1 %v13362_v56  ;;  %v13290_v52 = vor.u32 %v14265_v19, %v13287_v2  ;;  %v13354_v25 = vor.u32 %v14281_v58, %v13351_v5  ;;  %v13506_v56 = vor.u32 %v14319_v10, %v13503_v14  ;;  %v14317_v19 = vld [vmem:[%s21295_s13 + $0x7a4] sm:$0xf]  ;;  %v13495_v2 = vld [vmem:[%s21295_s13 + $0x7a8] sm:$0xf0]  ;;  %v13583_v5 = vld [vmem:[%s21295_s13 + $0x858] sm:$0xf0] }
 0xb5c   : > { %10173 = vmatpush.bf16.msrb.mxu2 %v13458_v34  ;;  %v13498_v27 = vor.u32 %v14317_v19, %v13495_v2  ;;  %v14353_v10 = vld [vmem:[%s21295_s13 + $0x8c4] sm:$0xf]  ;;  %v14351_v19 = vld [vmem:[%s21295_s13 + $0x8b4] sm:$0xf]  ;;  %v13631_v2 = vld [vmem:[%s21295_s13 + $0x8b8] sm:$0xf0] }
 0xb5d   : > { %v20748_v1 = vpop.f32.mrf.mxu2  ;;  %10191 = vmatpush.bf16.msra.mxu0 %v13522_v55  ;;  %10142 = vmatpush.bf16.msrb.mxu3 %v13290_v52  ;;  %v13431_v55 = vld [vmem:[%s21295_s13 + $0x728] sm:$0xf0]  ;;  %v14339_v52 = vld [vmem:[%s21295_s13 + $0x854] sm:$0xf]  ;;  %v14297_v62 = vld [vmem:[%s21295_s13 + $0x704] sm:$0xf] }
 0xb5e   : > { %10071 = vmatmul.bf16.vlgmr.msra.gmra.mxu3 %v19712_v21  ;;  %10089 = vmatmul.bf16.vlgmr.msra.gmra.mxu1 %v19716_v18  ;;  %v13511_v21 = vld [vmem:[%s21295_s13 + $0x7c8] sm:$0xf0]  ;;  %v14343_v18 = vld [vmem:[%s21295_s13 + $0x874] sm:$0xf]  ;;  %v13434_v58 = vor.u32 %v14301_v11, %v13431_v55  ;;  %v13567_v11 = vld [vmem:[%s21295_s13 + $0x838] sm:$0xf0] }
 0xb5f   : > { %v9773_v43 = vpop.f32.mrf.mxu0  ;;  %10160 = vmatpush.bf16.msrb.mxu1 %v13354_v25  ;;  %v13514_v48 = vor.u32 %v14321_v44, %v13511_v21  ;;  %v13602_v30 = vor.u32 %v14343_v18, %v13599_v45  ;;  %v14355_v25 = vld [vmem:[%s21295_s13 + $0x8d4] sm:$0xf]  ;;  %v13586_v44 = vor.u32 %v14339_v52, %v13583_v5  ;;  %v13423_v45 = vld [vmem:[%s21295_s13 + $0x718] sm:$0xf0]  ;;  %v13634_v52 = vor.u32 %v14351_v19, %v13631_v2 }
 0xb60   : > { %10174 = vmatpush.bf16.msrb.mxu2 %v13450_v4  ;;  %v13647_v43 = vld [vmem:[%s21295_s13 + $0x8d8] sm:$0xf0]  ;;  %v14299_v18 = vld [vmem:[%s21295_s13 + $0x714] sm:$0xf] }
 0xb61   : > { %v20776_v40 = vpop.f32.mrf.mxu3  ;;  %10207 = vmatpush.bf16.msra.mxu3 %v13602_v30  ;;  %10192 = vmatpush.bf16.msra.mxu0 %v13514_v48  ;;  %v20836_v4 = vor.u32 %v14355_v25, %v13647_v43  ;;  %v14315_v48 = vld [vmem:[%s21295_s13 + $0x794] sm:$0xf]  ;;  %v13426_v8 = vor.u32 %v14299_v18, %v13423_v45  ;;  %v14333_v25 = vld [vmem:[%s21295_s13 + $0x824] sm:$0xf] }
 0xb63   : > { %v20789_v17 = vpop.f32.mrf.mxu1  ;;  %10225 = vmatpush.bf16.msra.mxu1 %v20778_v36 }
 0xb64   : > { %10175 = vmatpush.bf16.msrb.mxu2 %v13442_v33  ;;  %v13639_v33 = vld [vmem:[%s21295_s13 + $0x8c8] sm:$0xf0] }
 0xb65   : > { %v9755_v34 = vpop.f32.mrf.mxu2  ;;  %10208 = vmatpush.bf16.msra.mxu3 %v13594_v63  ;;  %10193 = vmatpush.bf16.msra.mxu0 %v13506_v56  ;;  %v20871_v39 = vor.u32 %v14353_v10, %v13639_v33  ;;  %v13415_v56 = vld [vmem:[%s21295_s13 + $0x708] sm:$0xf0]  ;;  %v14313_v63 = vld [vmem:[%s21295_s13 + $0x784] sm:$0xf] }
 0xb66   : > { %v13418_v7 = vor.u32 %v14297_v62, %v13415_v56  ;;  %v9751_v62 = vadd.f32 %v20695_v31, %v20627_v50  ;;  %v9754_v50 = vadd.f32 %v20748_v1, %v20684_v15 }
 0xb67   : > { %v20830_v29 = vpop.f32.mrf.mxu0  ;;  %10226 = vmatpush.bf16.msra.mxu1 %v20810_v41 }
 0xb68   : > { %10176 = vmatpush.bf16.msrb.mxu2 %v13434_v58 }
 0xb69   : > { %v20838_v21 = vpop.f32.mrf.mxu3  ;;  %10194 = vmatpush.bf16.msra.mxu0 %v13498_v27  ;;  %10209 = vmatpush.bf16.msra.mxu3 %v13586_v44  ;;  %v13559_v27 = vld [vmem:[%s21295_s13 + $0x828] sm:$0xf0]  ;;  %v14349_v44 = vld [vmem:[%s21295_s13 + $0x8a4] sm:$0xf] }
 0xb6a   : > { %10107 = vmatmul.bf16.vlgmr.msra.gmra.mxu2 %v19243_v53  ;;  %10125 = vmatmul.bf16.vlgmr.msrb.gmra.mxu0 %v19247_v16  ;;  %v13487_v53 = vld [vmem:[%s21295_s13 + $0x798] sm:$0xf0]  ;;  %v14337_v16 = vld [vmem:[%s21295_s13 + $0x844] sm:$0xf]  ;;  %v13562_v43 = vor.u32 %v14333_v25, %v13559_v27 }
 0xb6b   : > { %v20851_v30 = vpop.f32.mrf.mxu1  ;;  %10227 = vmatpush.bf16.msra.mxu1 %v20836_v4  ;;  %v13490_v49 = vor.u32 %v14315_v48, %v13487_v53  ;;  %v13578_v47 = vor.u32 %v14337_v16, %v13575_v59  ;;  %v9749_v48 = vadd.f32 %v20635_v23, %v20572_v37  ;;  %v13551_v37 = vld [vmem:[%s21295_s13 + $0x818] sm:$0xf0]  ;;  %v14347_v23 = vld [vmem:[%s21295_s13 + $0x894] sm:$0xf] }
 0xb6c   : > { %10177 = vmatpush.bf16.msrb.mxu2 %v13426_v8 }
 0xb6d   : > { %v20869_v14 = vpop.f32.mrf.mxu2  ;;  %10195 = vmatpush.bf16.msra.mxu0 %v13490_v49  ;;  %10210 = vmatpush.bf16.msra.mxu3 %v13578_v47  ;;  %v9767_v16 = vadd.f32 %v20601_v24, %v9749_v48  ;;  %v14331_v49 = vld [vmem:[%s21295_s13 + $0x814] sm:$0xf]  ;;  %v13543_v47 = vld [vmem:[%s21295_s13 + $0x808] sm:$0xf0] }
 0xb6e   : > { %10076 = vmatmul.bf16.gmra.mxu3 %v19675_v42  ;;  %10094 = vmatmul.bf16.gmra.mxu1 %v19677_v20  ;;  %v13479_v42 = vld [vmem:[%s21295_s13 + $0x788] sm:$0xf0]  ;;  %v14335_v20 = vld [vmem:[%s21295_s13 + $0x834] sm:$0xf] }
 0xb6f   : > { %v20884_v6 = vpop.f32.mrf.mxu0  ;;  %10228 = vmatpush.bf16.msra.mxu1 %v20871_v39  ;;  %v13482_v34 = vor.u32 %v14313_v63, %v13479_v42  ;;  %v13570_v55 = vor.u32 %v14335_v20, %v13567_v11  ;;  %v9785_v24 = vadd.f32 %v20776_v40, %v9767_v16  ;;  %v13607_v40 = vld [vmem:[%s21295_s13 + $0x888] sm:$0xf0]  ;;  %v9769_v11 = vadd.f32 %v20648_v51, %v9751_v62 }
 0xb70   : > { %10178 = vmatpush.bf16.msrb.mxu2 %v13418_v7 }
 0xb71   : > { %v20902_v58 = vpop.f32.mrf.mxu3  ;;  %10196 = vmatpush.bf16.msra.mxu0 %v13482_v34  ;;  %10211 = vmatpush.bf16.msra.mxu3 %v13570_v55  ;;  %v9803_v42 = vadd.f32 %v20734_v22, %v9785_v24 }
 0xb73   : > { %v9809_v5 = vpop.f32.mrf.mxu1  ;;  %10229 = vmatpush.bf16.msra.mxu1 %v13634_v52  ;;  %v9821_v34 = vadd.f32 %v20869_v14, %v9803_v42  ;;  %v9772_v14 = vadd.f32 %v20715_v0, %v9754_v50 }
 0xb74   : > { %14361 = vmatpush.bf16.msra.mxu2 %v20778_v36  ;;  %v13623_v36 = vld [vmem:[%s21295_s13 + $0x8a8] sm:$0xf0] }
 0xb75   : > { %v9822_v18 = vpop.f32.mrf.mxu2  ;;  %v13626_v45 = vor.u32 %v14349_v44, %v13623_v36  ;;  %10212 = vmatpush.bf16.msra.mxu3 %v13562_v43  ;;  %v9839_v31 = vadd.f32 %v20830_v29, %v9821_v34  ;;  %v20989_v34 = vpop.permute.xlu0 %10282 }
 0xb77   : > { %v20920_v8 = vpop.f32.mrf.mxu0  ;;  %10230 = vmatpush.bf16.msra.mxu1 %v13626_v45 }
 0xb78   : > { %14362 = vmatpush.bf16.msra.mxu2 %v20810_v41  ;;  %v14329_v41 = vld [vmem:[%s21295_s13 + $0x804] sm:$0xf] }
 0xb79   : > { %v9791_v53 = vpop.f32.mrf.mxu3  ;;  %v13546_v63 = vor.u32 %v14329_v41, %v13543_v47  ;;  %v20978_v41 = vpop.permute.xlu2 %10277  ;;  %v14398_v47 = vld [vmem:[%s21296_s14] sm:$0x3] }
 0xb7a   : > { %10112 = vmatmul.bf16.gmra.mxu2 %v19952_v13  ;;  %10130 = vmatmul.bf16.gmra.mxu0 %v19958_v54  ;;  %v13554_v13 = vor.u32 %v14331_v49, %v13551_v37  ;;  %v13615_v54 = vld [vmem:[%s21295_s13 + $0x898] sm:$0xf0] }
 0xb7b   : > { %v9874_v59 = vpop.f32.mrf.mxu1  ;;  %v13618_v33 = vor.u32 %v14347_v23, %v13615_v54 }
 0xb7c   : > { %14363 = vmatpush.bf16.msra.mxu2 %v20836_v4  ;;  %v14345_v4 = vld [vmem:[%s21295_s13 + $0x884] sm:$0xf]  ;;  %10213 = vmatpush.bf16.msra.mxu3 %v13554_v13 }
 0xb7d   : > { %v9825_v10 = vpop.f32.mrf.mxu2  ;;  %10231 = vmatpush.bf16.msra.mxu1 %v13618_v33  ;;  %v13610_v7 = vor.u32 %v14345_v4, %v13607_v40 }
 0xb7e   : > { %10143 = vmatmul.bf16.vlgmr.msrb.gmra.mxu3 %v19927_v35  ;;  %10161 = vmatmul.bf16.vlgmr.msrb.gmra.mxu1 %v19940_v46  ;;  %v9787_v35 = vadd.f32 %v20838_v21, %v9769_v11 }
 0xb7f   : > { %v9845_v56 = vpop.f32.mrf.mxu0 }
 0xb80   : > { %14364 = vmatpush.bf16.msra.mxu2 %v20871_v39  ;;  %10214 = vmatpush.bf16.msra.mxu3 %v13546_v63  ;;  %v9805_v39 = vadd.f32 %v20789_v17, %v9787_v35 }
 0xb81   : > { %v9856_v20 = vpop.f32.mrf.mxu3  ;;  %10232 = vmatpush.bf16.msra.mxu1 %v13610_v7 }
 0xb82   : > { %v9857_v19 = vadd.f32 %v9856_v20, %v9839_v31  ;;  %v9823_v2 = vadd.f32 %v9822_v18, %v9805_v39 }
 0xb83   : > { %v9876_v55 = vpop.f32.mrf.mxu1 }
 0xb84   : > { %14365 = vmatpush.bf16.msra.mxu2 %v13634_v52  ;;  %v9790_v52 = vadd.f32 %v20902_v58, %v9772_v14  ;;  %v9875_v5 = vadd.f32 %v9874_v59, %v9857_v19  ;;  %v9841_v1 = vadd.f32 %v20884_v6, %v9823_v2 }
 0xb85   : > { %v9827_v46 = vpop.f32.mrf.mxu2 }
 0xb86   : > { %v9808_v0 = vadd.f32 %v20851_v30, %v9790_v52 }
 0xb87   : > { %v9910_v22 = vpop.f32.mrf.mxu0 }
 0xb88   : > { %14366 = vmatpush.bf16.msra.mxu2 %v13626_v45  ;;  %v9826_v27 = vadd.f32 %v9825_v10, %v9808_v0  ;;  %v20972_v45 = vpop.permute.xlu1 %10272  ;;  %v8152_v10 = vperm.slane %v14398_v47, 1 }
 0xb89   : > { %v9858_v51 = vpop.f32.mrf.mxu3 }
 0xb8a   : > { %10179 = vmatmul.bf16.vlgmr.msrb.gmra.mxu2 %v20082_v28  ;;  %10197 = vmatmul.bf16.vlgmr.msra.gmra.mxu0 %v20086_v26  ;;  %v9859_v25 = vadd.f32 %v9858_v51, %v9841_v1 }
 0xb8b   : > { %v9879_v21 = vpop.f32.mrf.mxu1 }
 0xb8c   : > { %14367 = vmatpush.bf16.msra.mxu2 %v13618_v33  ;;  %v9877_v36 = vadd.f32 %v9876_v55, %v9859_v25 }
 0xb8d   : > { %v9892_v15 = vpop.f32.mrf.mxu2 }
 0xb8e   : > { %10148 = vmatmul.bf16.gmra.mxu3 %v19833_v57  ;;  %10166 = vmatmul.bf16.gmra.mxu1 %v19836_v61  ;;  %v9893_v17 = vadd.f32 %v9892_v15, %v9875_v5  ;;  %v9844_v57 = vadd.f32 %v20920_v8, %v9826_v27 }
 0xb8f   : > { %v9912_v29 = vpop.f32.mrf.mxu0 }
 0xb90   : > { %v9911_v28 = vadd.f32 %v9910_v22, %v9893_v17  ;;  %14368 = vmatpush.bf16.msra.mxu2 %v13610_v7 }
 0xb91   : > { %v9861_v26 = vpop.f32.mrf.mxu3 }
 0xb92   : > { %vm10243_vm5 = vcmp.ge.f32.partialorder %v9911_v28, 0.0  ;;  %v10249_v58 = vmul.f32 0.2, %v9911_v28  ;;  %v9862_v53 = vadd.f32 %v9861_v26, %v9844_v57 }
 0xb93   : > { %v9881_v44 = vpop.f32.mrf.mxu1 }
 0xb94   : > { %v10255_v43 = vsel %vm10243_vm5, %v9911_v28, %v10249_v58  ;;  %v9880_v13 = vadd.f32 %v9879_v21, %v9862_v53  ;;  %vm10452_vm5 = vcmask 1041408  }
 0xb95   : > { %v10261_v18 = vmul.f32 1.4142135, %v10255_v43  ;;  %v9894_v6 = vpop.f32.mrf.mxu2 }
 0xb96   : > { %v9895_v61 = vadd.f32 %v9894_v6, %v9877_v36 }
 0xb97   : > { %v10285_v48 = vmul.f32 %v20972_v45, %v10261_v18  ;;  %v9915_v30 = vpop.f32.mrf.mxu0 }
 0xb98   : > { %v9913_v16 = vadd.f32 %v9912_v29, %v9895_v61 }
 0xb99   : > { %v10305_v59 = vrot.slane %v10285_v48, 1  ;;  %v9863_v49 = vpop.f32.mrf.mxu3 }
 0xb9a   : > { %vm10245_vm6 = vcmp.ge.f32.partialorder %v9913_v16, 0.0  ;;  %v10251_v37 = vmul.f32 0.2, %v9913_v16  ;;  %10184 = vmatmul.bf16.gmra.mxu2 %v20060_v9  ;;  %10202 = vmatmul.bf16.gmra.mxu0 %v20062_v60 }
 0xb9b   : > { %10323 = vst [vmem:[#allocation4 + $0x18] sm:$0x80] %v10305_v59  ;;  %v9946_v23 = vpop.f32.mrf.mxu1 }
 0xb9c   : > { %v10257_v24 = vsel %vm10245_vm6, %v9913_v16, %v10251_v37  ;;  %vm21344_vm6 = vcmask 1044480  }
 0xb9d   : > { %v10263_v54 = vmul.f32 1.4142135, %v10257_v24  ;;  %v9897_v8 = vpop.f32.mrf.mxu2 }
 0xb9e   : > { %10215 = vmatmul.bf16.vlgmr.msra.gmra.mxu3 %v20175_v32  ;;  %10233 = vmatmul.bf16.vlgmr.msra.gmra.mxu1 %v20179_v3  ;;  %v9898_v9 = vadd.f32 %v9897_v8, %v9880_v13 }
 0xb9f   : > { %v10287_v60 = vmul.f32 %v20978_v41, %v10263_v54  ;;  %v9917_v33 = vpop.f32.mrf.mxu0 }
 0xba0   : > { %v9916_v4 = vadd.f32 %v9915_v30, %v9898_v9 }
 0xba1   : > { %v10307_v40 = vrot.slane %v10287_v60, 1  ;;  %v9928_v62 = vpop.f32.mrf.mxu3 }
 0xba2   : > { %v9929_v56 = vadd.f32 %v9928_v62, %v8152_v10  ;;  %vm10247_vm7 = vcmp.ge.f32.partialorder %v9916_v4, 0.0  ;;  %v10253_v63 = vmul.f32 0.2, %v9916_v4 }
 0xba3   : > { %v20987_v7 = vsel %vm912_vm0, %v10305_v59, %v10307_v40  ;;  %v9948_v32 = vpop.f32.mrf.mxu1 }
 0xba4   : > { %v10259_v3 = vsel %vm10247_vm7, %v9916_v4, %v10253_v63  ;;  %v9947_v42 = vadd.f32 %v9946_v23, %v9929_v56  ;;  %vm21345_vm7 = vmmov %vm21344_vm6 }
 0xba5   : > { %v10265_v20 = vmul.f32 1.4142135, %v10259_v3  ;;  %v9899_v11 = vpop.f32.mrf.mxu2 }
 0xba7   : > { %v10289_v55 = vmul.f32 %v20989_v34, %v10265_v20  ;;  %v9982_v35 = vpop.f32.mrf.mxu0 }
 0xba9   : > { %v10311_v46 = vrot.slane %v10289_v55, 1  ;;  %v9930_v50 = vpop.f32.mrf.mxu3 }
 0xbaa   : > { %v9931_v31 = vadd.f32 %v9930_v50, %v8152_v10  ;;  %10238 = vmatmul.bf16.vlgmr.msra.gmra.mxu2 %v20118_v12 }
 0xbab   : > { %v20994_v22 = vsel %vm912_vm0, %v10307_v40, %v10311_v46  ;;  %10329 = vst [vmem:[#allocation4 + $0x20] sm:$0x7f] %v10311_v46  ;;  %v9951_v39 = vpop.f32.mrf.mxu1 }
 0xbac   : > { %v9949_v19 = vadd.f32 %v9948_v32, %v9931_v31 }
 0xbad   : > { %v9964_v51 = vpop.f32.mrf.mxu2 }
 0xbae   : > { %10220 = vmatmul.bf16.gmra.mxu3 %v20115_v38  ;;  %v9965_v14 = vadd.f32 %v9964_v51, %v9947_v42 }
 0xbaf   : > { %v9984_v2 = vpop.f32.mrf.mxu0 }
 0xbb0   : > { %v9983_v21 = vadd.f32 %v9982_v35, %v9965_v14 }
 0xbb1   : > { %v9933_v52 = vpop.f32.mrf.mxu3 }
 0xbb2   : > { %v9934_v5 = vadd.f32 %v9933_v52, %v8152_v10 }
 0xbb3   : > { %v9953_v15 = vpop.f32.mrf.mxu1 }
 0xbb4   : > { %v9952_v1 = vadd.f32 %v9951_v39, %v9934_v5 }
 0xbb5   : > { %v9966_v17 = vpop.f32.mrf.mxu2 }
 0xbb6   : > { %v9967_v29 = vadd.f32 %v9966_v17, %v9949_v19 }
 0xbb7   : > { %v9987_v0 = vpop.f32.mrf.mxu0 }
 0xbb8   : > { %v9985_v12 = vadd.f32 %v9984_v2, %v9967_v29 }
 0xbb9   : > { %v9935_v25 = vpop.f32.mrf.mxu3 }
 0xbbb   : > { %v10018_v28 = vpop.f32.mrf.mxu1 }
 0xbbd   : > { %v9969_v26 = vpop.f32.mrf.mxu2 }
 0xbbe   : > { %v9970_v27 = vadd.f32 %v9969_v26, %v9952_v1 }
 0xbbf   : > { %v9989_v58 = vpop.f32.mrf.mxu0 }
 0xbc0   : > { %v9988_v44 = vadd.f32 %v9987_v0, %v9970_v27 }
 0xbc1   : > { %v10000_v43 = vpop.f32.mrf.mxu3 }
 0xbc2   : > { %v10001_v36 = vadd.f32 %v10000_v43, %v9983_v21 }
 0xbc3   : > { %v10020_v38 = vpop.f32.mrf.mxu1 }
 0xbc4   : > { %v10019_v18 = vadd.f32 %v10018_v28, %v10001_v36 }
 0xbc5   : > { %v9971_v6 = vpop.f32.mrf.mxu2 }
 0xbc7   : > { %v10054_v57 = vpop.f32.mrf.mxu0 }
 0xbc9   : > { %v10002_v61 = vpop.f32.mrf.mxu3 }
 0xbca   : > { %v10003_v48 = vadd.f32 %v10002_v61, %v9985_v12 }
 0xbcb   : > { %v10023_v30 = vpop.f32.mrf.mxu1 }
 0xbcc   : > { %v10021_v53 = vadd.f32 %v10020_v38, %v10003_v48 }
 0xbcd   : > { %v10036_v16 = vpop.f32.mrf.mxu2 }
 0xbce   : > { %v10037_v59 = vadd.f32 %v10036_v16, %v10019_v18 }
 0xbcf   : > { %v10056_v49 = vpop.f32.mrf.mxu0 }
 0xbd0   : > { %v10055_v37 = vadd.f32 %v10054_v57, %v10037_v59 }
 0xbd1   : > { %v10005_v23 = vpop.f32.mrf.mxu3 }
 0xbd2   : > { %v10006_v24 = vadd.f32 %v10005_v23, %v9988_v44 }
 0xbd3   : > { %v10025_v13 = vpop.f32.mrf.mxu1 }
 0xbd4   : > { %v10024_v54 = vadd.f32 %v10023_v30, %v10006_v24  ;;  %v14399_v13 = vld [vmem:[#allocation2] sm:$0xff] }
 0xbd5   : > { %v10038_v8 = vpop.f32.mrf.mxu2 }
 0xbd6   : > { %v10039_v47 = vadd.f32 %v10038_v8, %v10021_v53  ;;  %v10599_v8 = vld [vmem:[%s21297_s15 + $0xc] sm:$0x3] }
 0xbd7   : > { %v10059_v10 = vpop.f32.mrf.mxu0 }
 0xbd8   : > { %v10057_v9 = vadd.f32 %v10056_v49, %v10039_v47 }
 0xbd9   : > { %v10007_v60 = vpop.f32.mrf.mxu3 }
 0xbda   : > { %v21002_v60 = vperm.slane %v10599_v8, 1 }
 0xbdb   : > { %v10090_v33 = vpop.f32.mrf.mxu1 }
 0xbdd   : > { %v10041_v4 = vpop.f32.mrf.mxu2 }
 0xbde   : > { %v10042_v40 = vadd.f32 %v10041_v4, %v10024_v54  ;;  %v10596_v54 = vpack.c.bf16 %v14399_v13, %v14399_v13 }
 0xbdf   : > { %v10061_v62 = vpop.f32.mrf.mxu0 }
 0xbe0   : > { %v10060_v56 = vadd.f32 %v10059_v10, %v10042_v40  ;;  %v21004_v40 = vunpack.c.l.bf16 %v10596_v54  ;;  %v21006_v62 = vunpack.c.h.bf16 %v10596_v54 }
 0xbe1   : > { %v10072_v63 = vpop.f32.mrf.mxu3 }
 0xbe2   : > { %v10073_v17 = vadd.f32 %v10072_v63, %v10055_v37 }
 0xbe3   : > { %v10092_v32 = vpop.f32.mrf.mxu1 }
 0xbe4   : > { %v10091_v12 = vadd.f32 %v10090_v33, %v10073_v17 }
 0xbe5   : > { %v10043_v3 = vpop.f32.mrf.mxu2 }
 0xbe7   : > { %v10126_v42 = vpop.f32.mrf.mxu0 }
 0xbe9   : > { %v10074_v20 = vpop.f32.mrf.mxu3 }
 0xbea   : > { %v10075_v27 = vadd.f32 %v10074_v20, %v10057_v9  ;;  %v21000_v9 = vperm.slane %v10599_v8, 0 }
 0xbeb   : > { %v10095_v11 = vpop.f32.mrf.mxu1 }
 0xbec   : > { %v10093_v36 = vadd.f32 %v10092_v32, %v10075_v27  ;;  %v10611_v3 = vmul.f32 %v21000_v9, %v21004_v40 }
 0xbed   : > { %v10108_v55 = vpop.f32.mrf.mxu2 }
 0xbee   : > { %v10109_v28 = vadd.f32 %v10108_v55, %v10091_v12 }
 0xbef   : > { %v10128_v35 = vpop.f32.mrf.mxu0 }
 0xbf0   : > { %v10127_v44 = vadd.f32 %v10126_v42, %v10109_v28  ;;  %v10612_v42 = vmul.f32 %v21002_v60, %v21006_v62 }
 0xbf1   : > { %v10077_v46 = vpop.f32.mrf.mxu3 }
 0xbf2   : > { %v10078_v57 = vadd.f32 %v10077_v46, %v10060_v56  ;;  %v10626_v46 = vsel %vm21343_vm11, %v10612_v42, 0.0 }
 0xbf3   : > { %v10097_v50 = vpop.f32.mrf.mxu1 }
 0xbf4   : > { %v10096_v16 = vadd.f32 %v10095_v11, %v10078_v57 }
 0xbf5   : > { %v10110_v31 = vpop.f32.mrf.mxu2 }
 0xbf6   : > { %v10111_v6 = vadd.f32 %v10110_v31, %v10093_v36 }
 0xbf7   : > { %v10131_v39 = vpop.f32.mrf.mxu0 }
 0xbf8   : > { %v10129_v30 = vadd.f32 %v10128_v35, %v10111_v6  ;;  %v10625_v35 = vsel %vm21342_vm9, %v10611_v3, 0.0 }
 0xbf9   : > { %v10079_v19 = vpop.f32.mrf.mxu3  ;;  %v10627_v50 = vadd.f32 %v10626_v46, %v10625_v35 }
 0xbfb   : > { %v10162_v51 = vpop.f32.mrf.mxu1  ;;  %10628 = vadd.xlane.f32.xlu1 %v10627_v50 }
 0xbfd   : > { %v10113_v14 = vpop.f32.mrf.mxu2 }
 0xbfe   : > { %v10114_v37 = vadd.f32 %v10113_v14, %v10096_v16 }
 0xbff   : > { %v10133_v2 = vpop.f32.mrf.mxu0 }
 0xc00   : > { %v10132_v56 = vadd.f32 %v10131_v39, %v10114_v37  ;;  %v10476_v37 = vld [vmem:[%s21297_s15 + $0x6] sm:$0x3] }
 0xc01   : > { %v10144_v21 = vpop.f32.mrf.mxu3 }
 0xc02   : > { %v10145_v38 = vadd.f32 %v10144_v21, %v10127_v44 }
 0xc03   : > { %v10164_v52 = vpop.f32.mrf.mxu1 }
 0xc04   : > { %v10163_v48 = vadd.f32 %v10162_v51, %v10145_v38 }
 0xc05   : > { %v10115_v5 = vpop.f32.mrf.mxu2 }
 0xc07   : > { %v10198_v15 = vpop.f32.mrf.mxu0 }
 0xc09   : > { %v10146_v1 = vpop.f32.mrf.mxu3 }
 0xc0a   : > { %v10147_v49 = vadd.f32 %v10146_v1, %v10129_v30 }
 0xc0b   : > { %v10167_v29 = vpop.f32.mrf.mxu1 }
 0xc0c   : > { %v10165_v33 = vadd.f32 %v10164_v52, %v10147_v49 }
 0xc0d   : > { %v10180_v0 = vpop.f32.mrf.mxu2 }
 0xc0e   : > { %v10181_v53 = vadd.f32 %v10180_v0, %v10163_v48 }
 0xc0f   : > { %v10200_v25 = vpop.f32.mrf.mxu0 }
 0xc10   : > { %v10199_v24 = vadd.f32 %v10198_v15, %v10181_v53 }
 0xc11   : > { %v10149_v26 = vpop.f32.mrf.mxu3 }
 0xc12   : > { %v10150_v20 = vadd.f32 %v10149_v26, %v10132_v56  ;;  %v21049_v56 = vperm.slane %v10476_v37, 0 }
 0xc13   : > { %v10169_v58 = vpop.f32.mrf.mxu1 }
 0xc14   : > { %v10168_v14 = vadd.f32 %v10167_v29, %v10150_v20  ;;  %v10350_v29 = vld [vmem:[%s21297_s15] sm:$0x3] }
 0xc15   : > { %v10182_v43 = vpop.f32.mrf.mxu2  ;;  %v21025_v6 = vperm.slane %v10350_v29, 0  ;;  %v21027_v57 = vperm.slane %v10350_v29, 1  ;;  %v10337_v29 = vld [vmem:[#allocation4 + $0x20] sm:$0xff] }
 0xc16   : > { %v10183_v63 = vadd.f32 %v10182_v43, %v10165_v33  ;;  %v10377_v43 = vld [vmem:[%s21297_s15 + $0x2] sm:$0x3] }
 0xc17   : > { %v10203_v18 = vpop.f32.mrf.mxu0  ;;  %v21037_v49 = vperm.slane %v10377_v43, 0  ;;  %v21043_v13 = vperm.slane %v10377_v43, 1 }
 0xc18   : > { %v10201_v19 = vadd.f32 %v10200_v25, %v10183_v63  ;;  %v21051_v63 = vperm.slane %v10476_v37, 1 }
 0xc19   : > { %v10151_v61 = vpop.f32.mrf.mxu3 }
 0xc1b   : > { %v10234_v47 = vpop.f32.mrf.mxu1 }
 0xc1d   : > { %v10185_v59 = vpop.f32.mrf.mxu2 }
 0xc1e   : > { %v10186_v5 = vadd.f32 %v10185_v59, %v10168_v14 }
 0xc1f   : > { %v10205_v23 = vpop.f32.mrf.mxu0 }
 0xc20   : > { %v10204_v28 = vadd.f32 %v10203_v18, %v10186_v5  ;;  %v10331_v18 = vld [vmem:[#allocation4 + $0x18] sm:$0xff] }
 0xc21   : > { %v10216_v10 = vpop.f32.mrf.mxu3 }
 0xc22   : > { %v10217_v4 = vadd.f32 %v10216_v10, %v10199_v24 }
 0xc23   : > { %v10236_v52 = vpop.f32.mrf.mxu1 }
 0xc24   : > { %v10235_v32 = vadd.f32 %v10234_v47, %v10217_v4 }
 0xc25   : > { %v10187_v11 = vpop.f32.mrf.mxu2 }
 0xc26   : > { %vm10244_vm8 = vcmp.ge.f32.partialorder %v10235_v32, 0.0  ;;  %v10250_v55 = vmul.f32 0.2, %v10235_v32 }
 0xc28   : > { %v10256_v31 = vsel %vm10244_vm8, %v10235_v32, %v10250_v55  ;;  %vm21346_vm8 = vcmask 1045504  }
 0xc29   : > { %v10262_v39 = vmul.f32 1.4142135, %v10256_v31  ;;  %v10218_v51 = vpop.f32.mrf.mxu3  ;;  %vm21347_vm9 = vmmov %vm21346_vm8 }
 0xc2a   : > { %v10219_v2 = vadd.f32 %v10218_v51, %v10201_v19  ;;  %vm21348_vm11 = vmmov %vm21346_vm8 }
 0xc2b   : > { %v10286_v21 = vmul.f32 %v20972_v45, %v10262_v39  ;;  %v10524_v45 = vld [vmem:[%s21297_s15 + $0x8] sm:$0x3] }
 0xc2c   : > { %v10237_v15 = vadd.f32 %v10236_v52, %v10219_v2  ;;  %v21032_v30 = vperm.slane %v10524_v45, 0  ;;  %v21034_v53 = vperm.slane %v10524_v45, 1 }
 0xc2d   : > { %v10306_v1 = vrot.slane %v10286_v21, 1  ;;  %v10239_v17 = vpop.f32.mrf.mxu2 }
 0xc2e   : > { %vm10246_vm2 = vcmp.ge.f32.partialorder %v10237_v15, 0.0  ;;  %v10252_v0 = vmul.f32 0.2, %v10237_v15 }
 0xc2f   : > { %10324 = vst [vmem:[#allocation4] sm:$0x80] %v10306_v1 }
 0xc30   : > { %v10258_v12 = vsel %vm10246_vm2, %v10237_v15, %v10252_v0  ;;  %vm21349_vm2 = vmmov %vm21346_vm8 }
 0xc31   : > { %v10264_v26 = vmul.f32 1.4142135, %v10258_v12  ;;  %v10221_v27 = vpop.f32.mrf.mxu3 }
 0xc32   : > { %v10222_v25 = vadd.f32 %v10221_v27, %v10204_v28 }
 0xc33   : > { %v10288_v58 = vmul.f32 %v20978_v41, %v10264_v26  ;;  %v10426_v41 = vld [vmem:[%s21297_s15 + $0x4] sm:$0x3] }
 0xc34   : > { %v10240_v44 = vadd.f32 %v10239_v17, %v10222_v25  ;;  %v21045_v33 = vperm.slane %v10426_v41, 0  ;;  %v21047_v4 = vperm.slane %v10426_v41, 1 }
 0xc35   : > { %v10309_v36 = vrot.slane %v10288_v58, 1  ;;  %v10241_v38 = vpop.f32.mrf.mxu2 }
 0xc36   : > { %vm10248_vm12 = vcmp.ge.f32.partialorder %v10240_v44, 0.0  ;;  %v10254_v61 = vmul.f32 0.2, %v10240_v44  ;;  %v10332_v48 = vld [vmem:[#allocation4] sm:$0xff] }
 0xc37   : > { %v10310_v16 = vsel %vm912_vm0, %v10306_v1, %v10309_v36  ;;  %v10341_v59 = vpack.c.bf16 %v10332_v48, %v10331_v18 }
 0xc38   : > { %v10342_v23 = vpack.c.bf16 %v10310_v16, %v20987_v7  ;;  %v10260_v24 = vsel %vm10248_vm12, %v10240_v44, %v10254_v61  ;;  %vm21350_vm12 = vmmov %vm21349_vm2 }
 0xc39   : > { %v10266_v54 = vmul.f32 1.4142135, %v10260_v24  ;;  %v10223_v8 = vpop.f32.mrf.mxu3  ;;  %v10344_v47 = vunpack.c.l.bf16 %v10341_v59  ;;  %v10345_v10 = vunpack.c.h.bf16 %v10341_v59 }
 0xc3a   : > { %v21060_v35 = vunpack.c.l.bf16 %v10342_v23  ;;  %v21069_v5 = vunpack.c.h.bf16 %v10342_v23 }
 0xc3b   : > { %v10290_v32 = vmul.f32 %v20989_v34, %v10266_v54  ;;  %v10356_v7 = vmul.f32 %v21025_v6, %v10344_v47  ;;  %v10357_v3 = vmul.f32 %v21027_v57, %v10345_v10  ;;  %v10530_v42 = vmul.f32 %v21032_v30, %v10344_v47 }
 0xc3c   : > { %v10531_v20 = vmul.f32 %v21034_v53, %v10345_v10  ;;  %v10383_v11 = vmul.f32 %v21037_v49, %v10344_v47  ;;  %v10384_v55 = vmul.f32 %v21043_v13, %v10345_v10  ;;  %v10432_v34 = vmul.f32 %v21045_v33, %v10344_v47 }
 0xc3d   : > { %v10313_v46 = vrot.slane %v10290_v32, 1  ;;  %v10362_v50 = vadd.f32 %v10357_v3, %v10356_v7  ;;  %v10539_v31 = vsel %vm10538_vm13, %v10530_v42, 0.0  ;;  %v10433_v14 = vmul.f32 %v21047_v4, %v10345_v10  ;;  %v10572_v32 = vld [vmem:[%s21297_s15 + $0xa] sm:$0x3] }
 0xc3e   : > { %v10540_v19 = vsel %vm10538_vm13, %v10531_v20, 0.0  ;;  %v10392_v39 = vsel %vm10391_vm15, %v10383_v11, 0.0  ;;  %v10393_v51 = vsel %vm10391_vm15, %v10384_v55, 0.0  ;;  %v10482_v15 = vmul.f32 %v21049_v56, %v10344_v47  ;;  %vm21351_vm13 = vmmov %vm21349_vm2 }
 0xc3f   : > { %v10314_v2 = vsel %vm912_vm0, %v10309_v36, %v10313_v46  ;;  %10330 = vst [vmem:[#allocation4 + $0x50] sm:$0x7f] %v10313_v46  ;;  %10363 = vadd.xlane.f32.xlu1 %v10362_v50  ;;  %v10541_v21 = vadd.f32 %v10540_v19, %v10539_v31  ;;  %v10394_v52 = vadd.f32 %v10393_v51, %v10392_v39  ;;  %v10441_v17 = vsel %vm10440_vm4, %v10432_v34, 0.0  ;;  %v10647_v19 = vld [vmem:[%s21297_s15 + $0xe] sm:$0x3]  ;;  %vm21352_vm15 = vmmov %vm21349_vm2 }
 0xc40   : > { %v10483_v1 = vmul.f32 %v21051_v63, %v10345_v10  ;;  %v10442_v0 = vsel %vm10440_vm4, %v10433_v14, 0.0  ;;  %v10484_v12 = vmul.f32 %v21049_v56, %v21060_v35  ;;  %v10485_v28 = vmul.f32 %v21051_v63, %v21069_v5  ;;  %v10697_v39 = vld [vmem:[%s21297_s15 + $0x10] sm:$0x3] }
 0xc41   : > { %10542 = vadd.xlane.f32.xlu0 %v10541_v21  ;;  %10395 = vadd.xlane.f32.xlu2 %v10394_v52  ;;  %v10491_v26 = vsel %vm10490_vm10, %v10482_v15, 0.0  ;;  %v10443_v25 = vadd.f32 %v10442_v0, %v10441_v17  ;;  %v10385_v36 = vmul.f32 %v21037_v49, %v21060_v35  ;;  %v10386_v38 = vmul.f32 %v21043_v13, %v21069_v5 }
 0xc42   : > { %v10492_v27 = vsel %vm10490_vm10, %v10483_v1, 0.0  ;;  %v10496_v44 = vadd.f32 %v10485_v28, %v10484_v12  ;;  %v10343_v61 = vpack.c.bf16 %v10314_v2, %v20994_v22  ;;  %v10358_v59 = vmul.f32 %v21025_v6, %v21060_v35 }
 0xc43   : > { %v10493_v45 = vadd.f32 %v10492_v27, %v10491_v26  ;;  %v10359_v37 = vmul.f32 %v21027_v57, %v21069_v5  ;;  %v10397_v23 = vadd.f32 %v10386_v38, %v10385_v36  ;;  %v10532_v22 = vmul.f32 %v21032_v30, %v21060_v35 }
 0xc44   : > { %v21098_v8 = vunpack.c.l.bf16 %v10343_v61  ;;  %v21100_v47 = vunpack.c.h.bf16 %v10343_v61  ;;  %v10533_v10 = vmul.f32 %v21034_v53, %v21069_v5  ;;  %v10434_v42 = vmul.f32 %v21045_v33, %v21060_v35 }
 0xc45   : > { %v10365_v54 = vadd.f32 %v10359_v37, %v10358_v59  ;;  %v10435_v20 = vmul.f32 %v21047_v4, %v21069_v5  ;;  %v10605_v11 = vmul.f32 %v21000_v9, %v21060_v35  ;;  %v10606_v46 = vmul.f32 %v21002_v60, %v21069_v5 }
 0xc46   : > { %v10338_v58 = vld [vmem:[#allocation4 + $0x50] sm:$0xff]  ;;  %v10360_v7 = vmul.f32 %v21025_v6, %v21098_v8  ;;  %v10361_v3 = vmul.f32 %v21027_v57, %v21100_v47  ;;  %v10544_v55 = vadd.f32 %v10533_v10, %v10532_v22  ;;  %v21121_v50 = vperm.slane %v10572_v32, 0 }
 0xc47   : > { %10444 = vadd.xlane.f32.xlu1 %v10443_v25  ;;  %v10374_v43 = vpack.c.bf16 %v10338_v58, %v10337_v29  ;;  %v21123_v31 = vperm.slane %v10572_v32, 1  ;;  %v10446_v57 = vadd.f32 %v10435_v20, %v10434_v42  ;;  %v10534_v14 = vmul.f32 %v21032_v30, %v21098_v8 }
 0xc48   : > { %v10368_v6 = vadd.f32 %v10361_v3, %v10360_v7  ;;  %v10614_v2 = vsel %vm10613_vm14, %v10605_v11, 0.0  ;;  %v10615_v21 = vsel %vm10613_vm14, %v10606_v46, 0.0  ;;  %v10578_v52 = vmul.f32 %v21121_v50, %v21060_v35 }
 0xc49   : > { %10494 = vadd.xlane.f32.xlu2 %v10493_v45  ;;  %10497 = vadd.xlane.f32.xlu0 %v10496_v44  ;;  %v21085_v18 = vunpack.c.l.bf16 %v10374_v43  ;;  %v21087_v41 = vunpack.c.h.bf16 %v10374_v43  ;;  %v10579_v15 = vmul.f32 %v21123_v31, %v21069_v5  ;;  %v21141_v1 = vperm.slane %v10647_v19, 0 }
 0xc4a   : > { %v21143_v17 = vperm.slane %v10697_v39, 0  ;;  %v21145_v0 = vperm.slane %v10697_v39, 1  ;;  %v10535_v12 = vmul.f32 %v21034_v53, %v21100_v47  ;;  %v21150_v26 = vperm.slane %v10647_v19, 1 }
 0xc4b   : > { %v10609_v48 = vmul.f32 %v21000_v9, %v21085_v18  ;;  %v10610_v16 = vmul.f32 %v21002_v60, %v21087_v41  ;;  %v10389_v34 = vmul.f32 %v21037_v49, %v21085_v18  ;;  %v10390_v51 = vmul.f32 %v21043_v13, %v21087_v41 }
 0xc4c   : > { %v10607_v27 = vmul.f32 %v21000_v9, %v21098_v8  ;;  %v10608_v25 = vmul.f32 %v21002_v60, %v21100_v47  ;;  %v21157_v58 = vadd.f32 %v10535_v12, %v10534_v14  ;;  %v10707_v45 = vmul.f32 %v21143_v17, %v21085_v18 }
 0xc4d   : > { %v10622_v24 = vadd.f32 %v10610_v16, %v10609_v48  ;;  %v10404_v28 = vsel %vm10403_vm1, %v10389_v34, 0.0  ;;  %v10405_v29 = vsel %vm10403_vm1, %v10390_v51, 0.0  ;;  %v10708_v44 = vmul.f32 %v21145_v0, %v21087_v41 }
 0xc4e   : > { %v10616_v43 = vadd.f32 %v10615_v21, %v10614_v2  ;;  %v21163_v36 = vadd.f32 %v10608_v25, %v10607_v27  ;;  %v10406_v9 = vadd.f32 %v10405_v29, %v10404_v28  ;;  %v10584_v61 = vadd.f32 %v10579_v15, %v10578_v52 }
 0xc4f   : > { %10398 = vadd.xlane.f32.xlu1 %v10397_v23  ;;  %v21165_v38 = vadd.f32 %v10708_v44, %v10707_v45  ;;  %v10653_v60 = vmul.f32 %v21141_v1, %v21060_v35  ;;  %v10654_v48 = vmul.f32 %v21150_v26, %v21069_v5  ;;  %v10582_v16 = vmul.f32 %v21121_v50, %v21085_v18 }
 0xc50   : > { %v10583_v59 = vmul.f32 %v21123_v31, %v21087_v41  ;;  %v10436_v37 = vmul.f32 %v21045_v33, %v21098_v8  ;;  %v10437_v23 = vmul.f32 %v21047_v4, %v21100_v47  ;;  %v10438_v10 = vmul.f32 %v21045_v33, %v21085_v18 }
 0xc51   : > { %10623 = vadd.xlane.f32.xlu0 %v10622_v24  ;;  %10366 = vadd.xlane.f32.xlu2 %v10365_v54  ;;  %v10662_v24 = vsel %vm10661_vm3, %v10653_v60, 0.0  ;;  %v10663_v54 = vsel %vm10661_vm3, %v10654_v48, 0.0  ;;  %v10439_v32 = vmul.f32 %v21047_v4, %v21087_v41  ;;  %v10703_v42 = vmul.f32 %v21143_v17, %v21060_v35 }
 0xc52   : > { %v10590_v22 = vadd.f32 %v10583_v59, %v10582_v16  ;;  %v10449_v7 = vadd.f32 %v10437_v23, %v10436_v37  ;;  %v10664_v3 = vadd.f32 %v10663_v54, %v10662_v24  ;;  %v10704_v20 = vmul.f32 %v21145_v0, %v21069_v5 }
 0xc53   : > { %v10453_v11 = vsel %vm10452_vm5, %v10438_v10, 0.0  ;;  %v10387_v33 = vmul.f32 %v21037_v49, %v21098_v8  ;;  %v10388_v4 = vmul.f32 %v21043_v13, %v21100_v47  ;;  %v10711_v46 = vsel %vm10490_vm10, %v10703_v42, 0.0 }
 0xc54   : > { %v10659_v5 = vmul.f32 %v21141_v1, %v21004_v40  ;;  %v10536_v49 = vmul.f32 %v21032_v30, %v21085_v18  ;;  %v10537_v13 = vmul.f32 %v21034_v53, %v21087_v41  ;;  %v10486_v39 = vmul.f32 %v21049_v56, %v21098_v8 }
 0xc55   : > { %v10400_v19 = vadd.f32 %v10388_v4, %v10387_v33  ;;  %v10487_v51 = vmul.f32 %v21051_v63, %v21100_v47  ;;  %v10488_v12 = vmul.f32 %v21049_v56, %v21085_v18  ;;  %v10489_v28 = vmul.f32 %v21051_v63, %v21087_v41 }
 0xc56   : > { %v10674_v14 = vsel %vm21344_vm6, %v10659_v5, 0.0  ;;  %v10550_v21 = vsel %vm912_vm0, %v10536_v49, 0.0  ;;  %v10551_v52 = vsel %vm912_vm0, %v10537_v13, 0.0  ;;  %v10657_v27 = vmul.f32 %v21141_v1, %v21085_v18 }
 0xc57   : > { %10545 = vadd.xlane.f32.xlu1 %v10544_v55  ;;  %v10454_v55 = vsel %vm10452_vm5, %v10439_v32, 0.0  ;;  %v10499_v30 = vadd.f32 %v10487_v51, %v10486_v39  ;;  %v10552_v53 = vadd.f32 %v10551_v52, %v10550_v21  ;;  %v10658_v25 = vmul.f32 %v21150_v26, %v21087_v41 }
 0xc58   : > { %v10455_v35 = vadd.f32 %v10454_v55, %v10453_v11  ;;  %v10580_v29 = vmul.f32 %v21121_v50, %v21098_v8  ;;  %v10581_v45 = vmul.f32 %v21123_v31, %v21100_v47  ;;  %v10502_v44 = vsel %vm21346_vm8, %v10488_v12, 0.0 }
 0xc59   : > { %10369 = vadd.xlane.f32.xlu0 %v10368_v6  ;;  %10447 = vadd.xlane.f32.xlu2 %v10446_v57  ;;  %v10712_v6 = vsel %vm10490_vm10, %v10704_v20, 0.0  ;;  %v10660_v57 = vmul.f32 %v21150_v26, %v21006_v62  ;;  %v10503_v56 = vsel %vm21347_vm9, %v10489_v28, 0.0  ;;  %v10705_v18 = vmul.f32 %v21143_v17, %v21098_v8 }
 0xc5a   : > { %v10713_v34 = vadd.f32 %v10712_v6, %v10711_v46  ;;  %v10587_v63 = vadd.f32 %v10581_v45, %v10580_v29  ;;  %v10706_v41 = vmul.f32 %v21145_v0, %v21100_v47  ;;  %v10655_v50 = vmul.f32 %v21141_v1, %v21098_v8 }
 0xc5b   : > { %v10675_v2 = vsel %vm21345_vm7, %v10660_v57, 0.0  ;;  %v10656_v31 = vmul.f32 %v21150_v26, %v21100_v47  ;;  %v10709_v60 = vmul.f32 %v21143_v17, %v21004_v40  ;;  %v10710_v48 = vmul.f32 %v21145_v0, %v21006_v62 }
 0xc5c   : > { %v10676_v15 = vadd.f32 %v10675_v2, %v10674_v14  ;;  %vm10683_vm10 = vcmask 1042432  }
 0xc5d   : > { %v10667_v16 = vadd.f32 %v10656_v31, %v10655_v50  ;;  %v10722_v59 = vsel %vm21348_vm11, %v10709_v60, 0.0  ;;  %v10723_v37 = vsel %vm21349_vm2, %v10710_v48, 0.0 }
 0xc5e   : > { %v10724_v8 = vadd.f32 %v10723_v37, %v10722_v59 }
 0xc5f   : > { %10617 = vadd.xlane.f32.xlu1 %v10616_v43  ;;  %v10670_v43 = vadd.f32 %v10658_v25, %v10657_v27 }
 0xc61   : > { %10407 = vadd.xlane.f32.xlu0 %v10406_v9  ;;  %10585 = vadd.xlane.f32.xlu2 %v10584_v61  ;;  %v10504_v9 = vadd.f32 %v10503_v56, %v10502_v44  ;;  %v10716_v61 = vadd.f32 %v10706_v41, %v10705_v18 }
 0xc67   : > { %10591 = vadd.xlane.f32.xlu1 %v10590_v22 }
 0xc69   : > { %10450 = vadd.xlane.f32.xlu0 %v10449_v7  ;;  %10665 = vadd.xlane.f32.xlu2 %v10664_v3 }
 0xc6e   : > { %v21242_v47 = vpop.xlane.xlu1 %10628 }
 0xc6f   : > { %10456 = vadd.xlane.f32.xlu1 %v10455_v35 }
 0xc71   : > { %10714 = vadd.xlane.f32.xlu0 %v10713_v34  ;;  %10401 = vadd.xlane.f32.xlu2 %v10400_v19 }
 0xc77   : > { %10500 = vadd.xlane.f32.xlu1 %v10499_v30 }
 0xc79   : > { %10553 = vadd.xlane.f32.xlu0 %v10552_v53  ;;  %10677 = vadd.xlane.f32.xlu2 %v10676_v15 }
 0xc7f   : > { %10671 = vadd.xlane.f32.xlu1 %v10670_v43 }
 0xc81   : > { %10588 = vadd.xlane.f32.xlu0 %v10587_v63  ;;  %10505 = vadd.xlane.f32.xlu2 %v10504_v9 }
 0xc87   : > { %10717 = vadd.xlane.f32.xlu1 %v10716_v61 }
 0xc89   : > { %10668 = vadd.xlane.f32.xlu0 %v10667_v16  ;;  %10548 = vadd.xlane.f32.xlu2 %v21157_v58 }
 0xc91   : > { %10620 = vadd.xlane.f32.xlu2 %v21163_v36  ;;  %10725 = vadd.xlane.f32.xlu0 %v10724_v8 }
 0xc99   : > { %10720 = vadd.xlane.f32.xlu2 %v21165_v38 }
 0xcb2   : > { %v10364_v40 = vpop.xlane.xlu1 %10363 }
 0xcb4   : > { %v10543_v1 = vpop.xlane.xlu0 %10542  ;;  %v10396_v62 = vpop.xlane.xlu2 %10395 }
 0xcb5   : > { %v10413_v22 = vrot.slane %v10396_v62, 1  ;;  %v10559_v46 = vrot.slane %v10543_v1, 7 }
 0xcba   : > { %v10445_v17 = vpop.xlane.xlu1 %10444 }
 0xcbb   : > { %v10463_v38 = vrot.slane %v10445_v17, 2 }
 0xcbc   : > { %v10495_v0 = vpop.xlane.xlu2 %10494  ;;  %v10498_v26 = vpop.xlane.xlu0 %10497 }
 0xcbd   : > { %v10511_v3 = vrot.slane %v10495_v0, 6  ;;  %v10512_v42 = vrot.slane %v10498_v26, 6 }
 0xcbf   : > { %v10513_v6 = vsel %vm10452_vm5, %v10511_v3, %v10512_v42 }
 0xcc2   : > { %v10399_v23 = vpop.xlane.xlu1 %10398 }
 0xcc3   : > { %v10414_v54 = vrot.slane %v10399_v23, 1 }
 0xcc4   : > { %v21244_v58 = vpop.xlane.xlu0 %10623  ;;  %v10367_v24 = vpop.xlane.xlu2 %10366 }
 0xcc5   : > { %v10415_v36 = vsel %vm912_vm0, %v10413_v22, %v10414_v54 }
 0xcc6   : > { %v10423_v11 = vadd.f32 %v10415_v36, %v10364_v40 }
 0xcca   : > { %v10546_v10 = vpop.xlane.xlu1 %10545 }
 0xccb   : > { %v10560_v55 = vrot.slane %v10546_v10, 7 }
 0xccc   : > { %v10370_v32 = vpop.xlane.xlu0 %10369  ;;  %v10448_v7 = vpop.xlane.xlu2 %10447 }
 0xccd   : > { %v10464_v20 = vrot.slane %v10448_v7, 2  ;;  %v10561_v57 = vsel %vm10403_vm1, %v10559_v46, %v10560_v55 }
 0xccf   : > { %v10465_v33 = vsel %vm21350_vm12, %v10463_v38, %v10464_v20 }
 0xcd0   : > { %v10473_v4 = vadd.f32 %v10465_v33, %v10423_v11 }
 0xcd2   : > { %v10618_v35 = vpop.xlane.xlu1 %10617  ;;  %v10521_v5 = vadd.f32 %v10513_v6, %v10473_v4 }
 0xcd3   : > { %v10634_v22 = vrot.slane %v10618_v35, 4 }
 0xcd4   : > { %v10408_v34 = vpop.xlane.xlu0 %10407  ;;  %v10569_v19 = vadd.f32 %v10561_v57, %v10521_v5  ;;  %v10586_v49 = vpop.xlane.xlu2 %10585 }
 0xcd5   : > { %v10418_v28 = vrot.slane %v10408_v34, 1  ;;  %v14395_v34 = vld [vmem:[#allocation5] ss:$0 sm:$0xff] }
 0xcd6   : > { %v10593_v7 = vadd.f32 %v10586_v49, %v10569_v19 }
 0xcda   : > { %v10592_v13 = vpop.xlane.xlu1 %10591 }
 0xcdc   : > { %v10451_v39 = vpop.xlane.xlu0 %10450  ;;  %v10666_v51 = vpop.xlane.xlu2 %10665 }
 0xcdd   : > { %v10466_v63 = vrot.slane %v10451_v39, 2  ;;  %v10684_v3 = vrot.slane %v10666_v51, 5 }
 0xcdf   : > { %v10467_v16 = vsel %vm21352_vm15, %v10464_v20, %v10466_v63 }
 0xce2   : > { %v10457_v21 = vpop.xlane.xlu1 %10456 }
 0xce3   : > { %v10468_v29 = vrot.slane %v10457_v21, 2 }
 0xce4   : > { %v21250_v14 = vpop.xlane.xlu0 %10714  ;;  %v10402_v2 = vpop.xlane.xlu2 %10401 }
 0xce5   : > { %v10416_v53 = vrot.slane %v10402_v2, 1  ;;  %v10469_v50 = vsel %vm21351_vm13, %v10466_v63, %v10468_v29  ;;  %v10731_v46 = vrot.slane %v21250_v14, 6 }
 0xce7   : > { %v10419_v25 = vsel %vm912_vm0, %v10416_v53, %v10418_v28  ;;  %v10417_v45 = vsel %vm912_vm0, %v10414_v54, %v10416_v53  ;;  %v10637_v54 = vrot.slane %v21244_v58, 4  ;;  %vm21353_vm0 = vcmask 1043456  }
 0xce8   : > { %v10425_v56 = vadd.f32 %v10419_v25, %v10370_v32  ;;  %v10424_v18 = vadd.f32 %v10417_v45, %v10367_v24  ;;  %v10639_v32 = vrot.slane %v21242_v47, 4  ;;  %vm21354_vm4 = vmmov %vm21353_vm0 }
 0xce9   : > { %vm21355_vm14 = vmmov %vm21353_vm0 }
 0xcea   : > { %v10501_v15 = vpop.xlane.xlu1 %10500  ;;  %v10475_v48 = vadd.f32 %v10469_v50, %v10425_v56  ;;  %v10474_v8 = vadd.f32 %v10467_v16, %v10424_v18  ;;  %v10640_v58 = vsel %vm21355_vm14, %v10637_v54, %v10639_v32 }
 0xceb   : > { %v10514_v9 = vrot.slane %v10501_v15, 6 }
 0xcec   : > { %v10554_v52 = vpop.xlane.xlu0 %10553  ;;  %v21252_v30 = vpop.xlane.xlu2 %10677 }
 0xced   : > { %v10564_v31 = vrot.slane %v10554_v52, 7  ;;  %v10515_v59 = vsel %vm10452_vm5, %v10512_v42, %v10514_v9  ;;  %v10689_v19 = vrot.slane %v21252_v30, 5 }
 0xcee   : > { %v10522_v17 = vadd.f32 %v10515_v59, %v10474_v8 }
 0xcf2   : > { %v10672_v43 = vpop.xlane.xlu1 %10671 }
 0xcf3   : > { %v10687_v6 = vrot.slane %v10672_v43, 5 }
 0xcf4   : > { %v10506_v12 = vpop.xlane.xlu2 %10505  ;;  %v10589_v27 = vpop.xlane.xlu0 %10588 }
 0xcf5   : > { %v10516_v44 = vrot.slane %v10506_v12, 6  ;;  %v10690_v2 = vsel %vm10683_vm10, %v10687_v6, %v10689_v19 }
 0xcf7   : > { %v10517_v61 = vsel %vm10452_vm5, %v10514_v9, %v10516_v44 }
 0xcf8   : > { %v10523_v40 = vadd.f32 %v10517_v61, %v10475_v48 }
 0xcfa   : > { %v10718_v26 = vpop.xlane.xlu1 %10717 }
 0xcfb   : > { %v10732_v42 = vrot.slane %v10718_v26, 6 }
 0xcfc   : > { %v10549_v41 = vpop.xlane.xlu2 %10548  ;;  %v10669_v1 = vpop.xlane.xlu0 %10668 }
 0xcfd   : > { %v10562_v60 = vrot.slane %v10549_v41, 7  ;;  %v10685_v10 = vrot.slane %v10669_v1, 5  ;;  %v10733_v49 = vsel %vm10452_vm5, %v10731_v46, %v10732_v42 }
 0xcff   : > { %v10565_v37 = vsel %vm10403_vm1, %v10562_v60, %v10564_v31  ;;  %v10563_v62 = vsel %vm10403_vm1, %v10560_v55, %v10562_v60  ;;  %v10686_v35 = vsel %vm10683_vm10, %v10684_v3, %v10685_v10  ;;  %v10688_v21 = vsel %vm10683_vm10, %v10685_v10, %v10687_v6 }
 0xd00   : > { %v10571_v0 = vadd.f32 %v10565_v37, %v10523_v40  ;;  %v10570_v23 = vadd.f32 %v10563_v62, %v10522_v17  ;;  %vm10751_vm1 = vcmask 7168  }
 0xd02   : > { %v10595_v38 = vadd.f32 %v10592_v13, %v10571_v0  ;;  %v10594_v55 = vadd.f32 %v10589_v27, %v10570_v23 }
 0xd04   : > { %v10621_v24 = vpop.xlane.xlu2 %10620  ;;  %v10726_v4 = vpop.xlane.xlu0 %10725  ;;  %v10646_v57 = vadd.f32 %v10640_v58, %v10595_v38 }
 0xd05   : > { %v10635_v36 = vrot.slane %v10621_v24, 4  ;;  %v10736_v13 = vrot.slane %v10726_v4, 6 }
 0xd06   : > { %v10696_v15 = vadd.f32 %v10690_v2, %v10646_v57 }
 0xd07   : > { %v10636_v20 = vsel %vm21353_vm0, %v10634_v22, %v10635_v36  ;;  %v10638_v11 = vsel %vm21354_vm4, %v10635_v36, %v10637_v54 }
 0xd08   : > { %v10644_v33 = vadd.f32 %v10636_v20, %v10593_v7  ;;  %v10645_v47 = vadd.f32 %v10638_v11, %v10594_v55 }
 0xd0a   : > { %v10694_v5 = vadd.f32 %v10686_v35, %v10644_v33  ;;  %v10695_v52 = vadd.f32 %v10688_v21, %v10645_v47 }
 0xd0c   : > { %v10741_v39 = vadd.f32 %v10733_v49, %v10694_v5  ;;  %v10721_v51 = vpop.xlane.xlu2 %10720 }
 0xd0d   : > { %v10734_v14 = vrot.slane %v10721_v51, 6 }
 0xd0e   : > { %v10748_v53 = vadd.f32 %v14395_v34, %v10741_v39 }
 0xd0f   : > { %v10735_v30 = vsel %vm10452_vm5, %v10732_v42, %v10734_v14  ;;  %v10737_v12 = vsel %vm10452_vm5, %v10734_v14, %v10736_v13 }
 0xd10   : > { %10752 = vst.msk [vmem:[%s550_s25] sm:$0xff] %vm10751_vm1, %v10748_v53  ;;  %v10742_v28 = vadd.f32 %v10735_v30, %v10695_v52  ;;  %v10743_v27 = vadd.f32 %v10737_v12, %v10696_v15 }
 0xd12   : > { %v10749_v25 = vadd.f32 %v14395_v34, %v10742_v28  ;;  %v10750_v29 = vadd.f32 %v14395_v34, %v10743_v27 }
 0xd14   : > { %10753 = vst.msk [vmem:[%s550_s25 + $0x8] sm:$0xff] %vm10751_vm1, %v10749_v25 }
 0xd15   : > { %10754 = vst.msk [vmem:[%s550_s25 + $0x10] sm:$0xff] %vm10751_vm1, %v10750_v29 }
 0xd16 PF: > { %s29_s26 = sadd.s32 1, %s14406_s26  }
 0xd17   : > { %p26_p4 = scmp.ge.s32.totalorder %s29_s26, 4  }
 0xd19   :  { %28 = sbr.rel (!%p26_p4) target bundleno = 3 (0x3), region = 118 }

</bundles_post_ra>
